<compile_context>
chip_gen: v6e
topology: v6e:2x2x1
jax: 0.10.0
libtpu: 0.0.40
codegen_flags: <defaults>
</compile_context>

<pallas_src>
import functools

import jax
import jax.numpy as jnp
from jax.experimental import pallas as pl
from jax.experimental.pallas import tpu as pltpu


def _round_up(x, m):
    return (x + m - 1) // m * m


def _pick_batch_tile(N, H, W, Cin_p, Cout_p, budget_bytes=4 * 1024 * 1024):
    """Largest divisor of N whose per-step blocks stay well inside VMEM (all gens)."""
    best = 1
    for b in range(1, N + 1):
        if N % b:
            continue
        in_b = b * (H + 2) * (W + 2) * Cin_p * 2     # bf16 input block
        out_b = b * H * W * Cout_p * 4               # f32 output block
        acc_b = b * H * W * Cout_p * 4               # f32 accumulator value
        if in_b + out_b + acc_b <= budget_bytes:
            best = b
    return best


def _build_toeplitz_weights(conv_w, W, Cin_p, Cout_p):
    """Fold the kw window + Cin contraction into block-Toeplitz matmul weights.

    Returns T of shape (3, (W+2)*Cin_p, W*Cout_p), bf16, with
      T[kh, w2*Cin_p + ci, w*Cout_p + co] = conv_w[co, ci, kh, w2 - w]  if 0 <= w2-w <= 2
    so that conv[b,h,w,co] = sum_kh  xpad_row[b, h+kh, :] @ T[kh, :, w*Cout_p + co].
    Built once at trace time; tiny (3 * (W+2)*Cin_p * W*Cout_p bf16) and resident in VMEM.
    """
    Cout, Cin = conv_w.shape[0], conv_w.shape[1]
    w4 = jnp.transpose(conv_w.astype(jnp.float32), (2, 3, 1, 0))        # (kh, kw, ci, co)
    w4 = jnp.pad(w4, ((0, 0), (0, 0), (0, Cin_p - Cin), (0, Cout_p - Cout)))
    T = jnp.zeros((3, (W + 2) * Cin_p, W * Cout_p), jnp.float32)
    for kw in range(3):
        for w in range(W):
            T = T.at[:, (w + kw) * Cin_p:(w + kw + 1) * Cin_p,
                     w * Cout_p:(w + 1) * Cout_p].set(w4[:, kw])
    return T.astype(jnp.bfloat16)


def _conv_rows(xpad_ref, t_ref, B_tile, H, Wp2Cin, WCout):
    """3x3 conv as 3 lane-dense MXU matmuls; rows = (b, h), lanes = (w, cout)."""
    acc = jnp.zeros((B_tile * H, WCout), jnp.float32)
    for kh in range(3):                                   # static unroll (3 taps)
        lhs = xpad_ref[:, kh:kh + H, :].reshape(B_tile * H, Wp2Cin)
        acc = acc + jnp.dot(lhs, t_ref[kh], preferred_element_type=jnp.float32)
    return acc


def conv_stats_kernel(xpad_ref, t_ref, stats_ref, *, B_tile, H, Wp2Cin, WCout):
    """Pass 1: conv (not stored) -> per-(w,cout)-lane partial sum / sum-of-squares.

    xpad_ref : (B_tile, H+2, (W+2)*Cin_p) bf16
    t_ref    : (3, (W+2)*Cin_p, W*Cout_p) bf16   (resident across the grid)
    stats_ref: (1, 2, W*Cout_p)           f32    row 0 = sum, row 1 = sum of squares
    """
    acc = _conv_rows(xpad_ref, t_ref, B_tile, H, Wp2Cin, WCout)
    s = jnp.sum(acc, axis=0, keepdims=True)               # (1, WCout)
    ss = jnp.sum(acc * acc, axis=0, keepdims=True)        # (1, WCout)
    stats_ref[...] = jnp.concatenate([s, ss], axis=0).reshape(1, 2, WCout)


def conv_bn_relu_kernel(xpad_ref, t_ref, scale_ref, shift_ref, out_ref, *,
                        B_tile, H, Wp2Cin, WCout):
    """Pass 2: recompute conv, apply pre-folded BN scale/shift, ReLU, store.

    scale_ref/shift_ref : (1, W*Cout_p) f32  (already tiled to the merged lane layout)
    out_ref             : (B_tile, H, W*Cout_p) f32
    """
    acc = _conv_rows(xpad_ref, t_ref, B_tile, H, Wp2Cin, WCout)
    y = jnp.maximum(acc * scale_ref[...] + shift_ref[...], 0.0)
    out_ref[...] = y.reshape(B_tile, H, WCout)


def unit_forward(x_nchw, conv_w, conv_b, bn_gamma, bn_beta, eps=1e-5):
    """x_nchw: (N, Cin, H, W); conv_w: (Cout, Cin, 3, 3). Returns (N, Cout, H, W) f32.

    conv_b is accepted for API parity but unused: with training-mode BatchNorm the
    per-channel conv bias is exactly cancelled by the batch-mean subtraction.
    """
    del conv_b
    N, Cin, H, W = x_nchw.shape
    Cout = conv_w.shape[0]

    LANE, SUB = 128, 8
    Cin_p = _round_up(Cin, SUB)       # keep small: padding Cin to 128 would blow up HBM traffic
    Cout_p = _round_up(Cout, LANE)
    Wp2Cin = (W + 2) * Cin_p
    WCout = W * Cout_p

    # NCHW -> NHWC bf16, spatial pad (padding=1), channel pad, merge (w, cin) lanes.
    x = jnp.transpose(x_nchw.astype(jnp.bfloat16), (0, 2, 3, 1))
    xpad = jnp.pad(x, ((0, 0), (1, 1), (1, 1), (0, Cin_p - Cin)))
    xpad_m = xpad.reshape(N, H + 2, Wp2Cin)                 # free row-major reshape

    T = _build_toeplitz_weights(conv_w, W, Cin_p, Cout_p)    # (3, Wp2Cin, WCout) bf16

    B_tile = _pick_batch_tile(N, H, W, Cin_p, Cout_p)
    n_blocks = N // B_tile

    cparams = pltpu.CompilerParams(
        dimension_semantics=("parallel",),      # batch-block axis -> megacore / v7x TCs
        vmem_limit_bytes=48 * 1024 * 1024,      # safe on v7x (64 MiB phys); raise for big tiles on v5e/v6e
    )

    # TODO(synk): for large H*W (esp. v7x 64 MiB VMEM), add an H-tile grid axis with a
    # 1-row halo (pl.Element index_map or manual DMA) so one block stays <= ~4-8 MiB.

    # ---- Pass 1: conv + per-lane partial BN statistics (no conv output to HBM). ----
    stats = pl.pallas_call(
        functools.partial(conv_stats_kernel, B_tile=B_tile, H=H,
                          Wp2Cin=Wp2Cin, WCout=WCout),
        grid=(n_blocks,),
        in_specs=[
            pl.BlockSpec((B_tile, H + 2, Wp2Cin), lambda n: (n, 0, 0)),
            pl.BlockSpec((3, Wp2Cin, WCout), lambda n: (0, 0, 0)),
        ],
        out_specs=pl.BlockSpec((1, 2, WCout), lambda n: (n, 0, 0)),
        out_shape=jax.ShapeDtypeStruct((n_blocks, 2, WCout), jnp.float32),
        compiler_params=cparams,
    )(xpad_m, T)

    # ---- Tiny JAX glue: reduce stats, fold BN into per-lane scale/shift vectors. ----
    stats = stats.reshape(n_blocks, 2, W, Cout_p)
    count = float(N * H * W)
    s = jnp.sum(stats[:, 0], axis=(0, 1))                   # (Cout_p,)
    ss = jnp.sum(stats[:, 1], axis=(0, 1))                  # (Cout_p,)
    mean = s / count
    # One-pass biased variance (training-mode BN); clamp guards f32 cancellation.
    var = jnp.maximum(ss / count - mean * mean, 0.0)
    gamma = jnp.pad(bn_gamma.astype(jnp.float32), (0, Cout_p - Cout))
    beta = jnp.pad(bn_beta.astype(jnp.float32), (0, Cout_p - Cout))
    scale = gamma * jax.lax.rsqrt(var + eps)
    shift = beta - mean * scale
    scale_m = jnp.tile(scale, W).reshape(1, WCout)           # broadcast to (w, cout) lanes
    shift_m = jnp.tile(shift, W).reshape(1, WCout)

    # ---- Pass 2: recompute conv, fused scale/shift + ReLU, lane-dense f32 store. ----
    out = pl.pallas_call(
        functools.partial(conv_bn_relu_kernel, B_tile=B_tile, H=H,
                          Wp2Cin=Wp2Cin, WCout=WCout),
        grid=(n_blocks,),
        in_specs=[
            pl.BlockSpec((B_tile, H + 2, Wp2Cin), lambda n: (n, 0, 0)),
            pl.BlockSpec((3, Wp2Cin, WCout), lambda n: (0, 0, 0)),
            pl.BlockSpec((1, WCout), lambda n: (0, 0)),
            pl.BlockSpec((1, WCout), lambda n: (0, 0)),
        ],
        out_specs=pl.BlockSpec((B_tile, H, WCout), lambda n: (n, 0, 0)),
        out_shape=jax.ShapeDtypeStruct((N, H, WCout), jnp.float32),
        compiler_params=cparams,
    )(xpad_m, T, scale_m, shift_m)

    # Free (row-major) reshape, drop channel padding, NHWC -> NCHW to match PyTorch.
    # (In a larger model keep NHWC end-to-end to avoid the transposes.)
    out = out.reshape(N, H, W, Cout_p)[..., :Cout]
    return jnp.transpose(out, (0, 3, 1, 2))


def unit_reference(x, w, b, gamma, beta, eps=1e-5):
    """Pure-JAX f32 reference matching the PyTorch module's forward (training mode)."""
    y = jax.lax.conv_general_dilated(
        x, w, window_strides=(1, 1), padding=((1, 1), (1, 1)),
        dimension_numbers=("NCHW", "OIHW", "NCHW"))
    y = y + b.reshape(1, -1, 1, 1)
    mean = jnp.mean(y, axis=(0, 2, 3), keepdims=True)
    var = jnp.mean((y - mean) ** 2, axis=(0, 2, 3), keepdims=True)     # biased
    y = (y - mean) * jax.lax.rsqrt(var + eps)
    y = y * gamma.reshape(1, -1, 1, 1) + beta.reshape(1, -1, 1, 1)
    return jnp.maximum(y, 0.0)


if __name__ == "__main__":
    # Small shapes consistent with the module: batch=2, in_channels=4,
    # out_channels=8, spatial 16x16.
    N, Cin, Cout, H, W = 2, 4, 8, 16, 16

    key = jax.random.PRNGKey(0)
    kx, kw, kb = jax.random.split(key, 3)

    x = jax.random.normal(kx, (N, Cin, H, W), dtype=jnp.float32)

    # Deterministic parameter init mimicking PyTorch defaults:
    # Conv2d: U(-1/sqrt(fan_in), 1/sqrt(fan_in)) with fan_in = Cin*3*3
    bound = 1.0 / jnp.sqrt(jnp.float32(Cin * 3 * 3))
    conv_w = jax.random.uniform(kw, (Cout, Cin, 3, 3), jnp.float32, -bound, bound)
    conv_b = jax.random.uniform(kb, (Cout,), jnp.float32, -bound, bound)
    # BatchNorm2d affine params: gamma=1, beta=0
    bn_gamma = jnp.ones((Cout,), jnp.float32)
    bn_beta = jnp.zeros((Cout,), jnp.float32)

    out = jax.jit(unit_forward)(x, conv_w, conv_b, bn_gamma, bn_beta)
    out = jax.block_until_ready(out)

    ref = unit_reference(x, conv_w, conv_b, bn_gamma, bn_beta)
    ref = jax.block_until_ready(ref)

    assert out.shape == (N, Cout, H, W)
    assert bool(jnp.all(out >= 0.0))                         # ReLU output non-negative
    # bf16 matmul operands -> loose tolerance vs f32 reference.
    assert bool(jnp.allclose(out, ref, atol=1e-1, rtol=1e-1)), float(
        jnp.max(jnp.abs(out - ref)))
    print("KERNEL_OK")
</pallas_src>

<mosaic_0001>
module attributes {stable_mosaic.version = 11 : i64} {
  func.func @conv_stats_kernel(%arg0: i32, %arg1: memref<2x18x144xbf16, #tpu.memory_space<vmem>>, %arg2: memref<3x144x2048xbf16, #tpu.memory_space<vmem>>, %arg3: memref<1x2x2048xf32, #tpu.memory_space<vmem>>) attributes {dimension_semantics = [#tpu.dimension_semantics<parallel>], iteration_bounds = array<i64: 1>, scalar_prefetch = 0 : i64, scratch_operands = 0 : i64, tpu.core_type = #tpu.core_type<tc>, window_params = [{transform_indices = @transform_0, window_bounds = array<i64: 2, 18, 144>}, {pipeline_mode = #tpu.pipeline_mode<synchronous>, transform_indices = @transform_1, window_bounds = array<i64: 3, 144, 2048>}, {transform_indices = @transform_2, window_bounds = array<i64: 1, 2, 2048>}]} {
    %cst = arith.constant 0.000000e+00 : f32
    %0 = vector.broadcast %cst : f32 to vector<32x2048xf32>
    %c0 = arith.constant 0 : index
    %c0_0 = arith.constant 0 : index
    %c0_1 = arith.constant 0 : index
    %1 = vector.load %arg1[%c0, %c0_0, %c0_1] : memref<2x18x144xbf16, #tpu.memory_space<vmem>>, vector<2x16x144xbf16>
    %2 = vector.shape_cast %1 : vector<2x16x144xbf16> to vector<32x144xbf16>
    %c0_2 = arith.constant 0 : index
    %c0_3 = arith.constant 0 : index
    %c0_4 = arith.constant 0 : index
    %3 = vector.load %arg2[%c0_2, %c0_3, %c0_4] : memref<3x144x2048xbf16, #tpu.memory_space<vmem>>, vector<1x144x2048xbf16>
    %4 = vector.shape_cast %3 : vector<1x144x2048xbf16> to vector<144x2048xbf16>
    %cst_5 = arith.constant dense<0.000000e+00> : vector<32x2048xf32>
    %5 = tpu.matmul %2, %4, %cst_5 {dimension_numbers = #tpu.dot_dimension_numbers<[1], [0], [0], [1], [0, 0, 1, 1], [], []>} : vector<32x144xbf16>, vector<144x2048xbf16>, vector<32x2048xf32> -> vector<32x2048xf32>
    %6 = arith.addf %0, %5 : vector<32x2048xf32>
    %c0_6 = arith.constant 0 : index
    %c1 = arith.constant 1 : index
    %c0_7 = arith.constant 0 : index
    %7 = vector.load %arg1[%c0_6, %c1, %c0_7] : memref<2x18x144xbf16, #tpu.memory_space<vmem>>, vector<2x16x144xbf16>
    %8 = vector.shape_cast %7 : vector<2x16x144xbf16> to vector<32x144xbf16>
    %c1_8 = arith.constant 1 : index
    %c0_9 = arith.constant 0 : index
    %c0_10 = arith.constant 0 : index
    %9 = vector.load %arg2[%c1_8, %c0_9, %c0_10] : memref<3x144x2048xbf16, #tpu.memory_space<vmem>>, vector<1x144x2048xbf16>
    %10 = vector.shape_cast %9 : vector<1x144x2048xbf16> to vector<144x2048xbf16>
    %cst_11 = arith.constant dense<0.000000e+00> : vector<32x2048xf32>
    %11 = tpu.matmul %8, %10, %cst_11 {dimension_numbers = #tpu.dot_dimension_numbers<[1], [0], [0], [1], [0, 0, 1, 1], [], []>} : vector<32x144xbf16>, vector<144x2048xbf16>, vector<32x2048xf32> -> vector<32x2048xf32>
    %12 = arith.addf %6, %11 : vector<32x2048xf32>
    %c0_12 = arith.constant 0 : index
    %c2 = arith.constant 2 : index
    %c0_13 = arith.constant 0 : index
    %13 = vector.load %arg1[%c0_12, %c2, %c0_13] : memref<2x18x144xbf16, #tpu.memory_space<vmem>>, vector<2x16x144xbf16>
    %14 = vector.shape_cast %13 : vector<2x16x144xbf16> to vector<32x144xbf16>
    %c2_14 = arith.constant 2 : index
    %c0_15 = arith.constant 0 : index
    %c0_16 = arith.constant 0 : index
    %15 = vector.load %arg2[%c2_14, %c0_15, %c0_16] : memref<3x144x2048xbf16, #tpu.memory_space<vmem>>, vector<1x144x2048xbf16>
    %16 = vector.shape_cast %15 : vector<1x144x2048xbf16> to vector<144x2048xbf16>
    %cst_17 = arith.constant dense<0.000000e+00> : vector<32x2048xf32>
    %17 = tpu.matmul %14, %16, %cst_17 {dimension_numbers = #tpu.dot_dimension_numbers<[1], [0], [0], [1], [0, 0, 1, 1], [], []>} : vector<32x144xbf16>, vector<144x2048xbf16>, vector<32x2048xf32> -> vector<32x2048xf32>
    %18 = arith.addf %12, %17 : vector<32x2048xf32>
    %cst_18 = arith.constant dense<0.000000e+00> : vector<2048xf32>
    %19 = vector.multi_reduction <add>, %18, %cst_18 [0] : vector<32x2048xf32> to vector<2048xf32>
    %20 = vector.shape_cast %19 : vector<2048xf32> to vector<1x2048xf32>
    %21 = arith.mulf %18, %18 : vector<32x2048xf32>
    %cst_19 = arith.constant dense<0.000000e+00> : vector<2048xf32>
    %22 = vector.multi_reduction <add>, %21, %cst_19 [0] : vector<32x2048xf32> to vector<2048xf32>
    %23 = vector.shape_cast %22 : vector<2048xf32> to vector<1x2048xf32>
    %24 = tpu.concatenate %20, %23 in 0 : vector<1x2048xf32>, vector<1x2048xf32> -> vector<2x2048xf32>
    %25 = vector.shape_cast %24 : vector<2x2048xf32> to vector<1x2x2048xf32>
    %c0_20 = arith.constant 0 : index
    %c0_21 = arith.constant 0 : index
    %c0_22 = arith.constant 0 : index
    %26 = vector.load %arg3[%c0_20, %c0_21, %c0_22] : memref<1x2x2048xf32, #tpu.memory_space<vmem>>, vector<1x2x2048xf32>
    tpu.vector_store %arg3[%c0_20, %c0_21, %c0_22], %25 {strides = array<i32>} : memref<1x2x2048xf32, #tpu.memory_space<vmem>>, vector<1x2x2048xf32>,
    return
  }
  func.func @transform_0(%arg0: i32) -> (i32, i32, i32) {
    %c0_i32 = arith.constant 0 : i32
    %c0_i32_0 = arith.constant 0 : i32
    %c0_i32_1 = arith.constant 0 : i32
    return %arg0, %c0_i32, %c0_i32_0 : i32, i32, i32
  }
  func.func @transform_1(%arg0: i32) -> (i32, i32, i32) {
    %c0_i32 = arith.constant 0 : i32
    %c0_i32_0 = arith.constant 0 : i32
    %c0_i32_1 = arith.constant 0 : i32
    %c0_i32_2 = arith.constant 0 : i32
    return %c0_i32, %c0_i32_0, %c0_i32_1 : i32, i32, i32
  }
  func.func @transform_2(%arg0: i32) -> (i32, i32, i32) {
    %c0_i32 = arith.constant 0 : i32
    %c0_i32_0 = arith.constant 0 : i32
    %c0_i32_1 = arith.constant 0 : i32
    return %arg0, %c0_i32, %c0_i32_0 : i32, i32, i32
  }
}

module attributes {stable_mosaic.version = 11 : i64} {
  func.func @conv_bn_relu_kernel(%arg0: i32, %arg1: memref<2x18x144xbf16, #tpu.memory_space<vmem>>, %arg2: memref<3x144x2048xbf16, #tpu.memory_space<vmem>>, %arg3: memref<1x2048xf32, #tpu.memory_space<vmem>>, %arg4: memref<1x2048xf32, #tpu.memory_space<vmem>>, %arg5: memref<2x16x2048xf32, #tpu.memory_space<vmem>>) attributes {dimension_semantics = [#tpu.dimension_semantics<parallel>], iteration_bounds = array<i64: 1>, scalar_prefetch = 0 : i64, scratch_operands = 0 : i64, tpu.core_type = #tpu.core_type<tc>, window_params = [{transform_indices = @transform_0, window_bounds = array<i64: 2, 18, 144>}, {pipeline_mode = #tpu.pipeline_mode<synchronous>, transform_indices = @transform_1, window_bounds = array<i64: 3, 144, 2048>}, {pipeline_mode = #tpu.pipeline_mode<synchronous>, transform_indices = @transform_2, window_bounds = array<i64: 1, 2048>}, {pipeline_mode = #tpu.pipeline_mode<synchronous>, transform_indices = @transform_3, window_bounds = array<i64: 1, 2048>}, {transform_indices = @transform_4, window_bounds = array<i64: 2, 16, 2048>}]} {
    %cst = arith.constant 0.000000e+00 : f32
    %0 = vector.broadcast %cst : f32 to vector<32x2048xf32>
    %c0 = arith.constant 0 : index
    %c0_0 = arith.constant 0 : index
    %c0_1 = arith.constant 0 : index
    %1 = vector.load %arg1[%c0, %c0_0, %c0_1] : memref<2x18x144xbf16, #tpu.memory_space<vmem>>, vector<2x16x144xbf16>
    %2 = vector.shape_cast %1 : vector<2x16x144xbf16> to vector<32x144xbf16>
    %c0_2 = arith.constant 0 : index
    %c0_3 = arith.constant 0 : index
    %c0_4 = arith.constant 0 : index
    %3 = vector.load %arg2[%c0_2, %c0_3, %c0_4] : memref<3x144x2048xbf16, #tpu.memory_space<vmem>>, vector<1x144x2048xbf16>
    %4 = vector.shape_cast %3 : vector<1x144x2048xbf16> to vector<144x2048xbf16>
    %cst_5 = arith.constant dense<0.000000e+00> : vector<32x2048xf32>
    %5 = tpu.matmul %2, %4, %cst_5 {dimension_numbers = #tpu.dot_dimension_numbers<[1], [0], [0], [1], [0, 0, 1, 1], [], []>} : vector<32x144xbf16>, vector<144x2048xbf16>, vector<32x2048xf32> -> vector<32x2048xf32>
    %6 = arith.addf %0, %5 : vector<32x2048xf32>
    %c0_6 = arith.constant 0 : index
    %c1 = arith.constant 1 : index
    %c0_7 = arith.constant 0 : index
    %7 = vector.load %arg1[%c0_6, %c1, %c0_7] : memref<2x18x144xbf16, #tpu.memory_space<vmem>>, vector<2x16x144xbf16>
    %8 = vector.shape_cast %7 : vector<2x16x144xbf16> to vector<32x144xbf16>
    %c1_8 = arith.constant 1 : index
    %c0_9 = arith.constant 0 : index
    %c0_10 = arith.constant 0 : index
    %9 = vector.load %arg2[%c1_8, %c0_9, %c0_10] : memref<3x144x2048xbf16, #tpu.memory_space<vmem>>, vector<1x144x2048xbf16>
    %10 = vector.shape_cast %9 : vector<1x144x2048xbf16> to vector<144x2048xbf16>
    %cst_11 = arith.constant dense<0.000000e+00> : vector<32x2048xf32>
    %11 = tpu.matmul %8, %10, %cst_11 {dimension_numbers = #tpu.dot_dimension_numbers<[1], [0], [0], [1], [0, 0, 1, 1], [], []>} : vector<32x144xbf16>, vector<144x2048xbf16>, vector<32x2048xf32> -> vector<32x2048xf32>
    %12 = arith.addf %6, %11 : vector<32x2048xf32>
    %c0_12 = arith.constant 0 : index
    %c2 = arith.constant 2 : index
    %c0_13 = arith.constant 0 : index
    %13 = vector.load %arg1[%c0_12, %c2, %c0_13] : memref<2x18x144xbf16, #tpu.memory_space<vmem>>, vector<2x16x144xbf16>
    %14 = vector.shape_cast %13 : vector<2x16x144xbf16> to vector<32x144xbf16>
    %c2_14 = arith.constant 2 : index
    %c0_15 = arith.constant 0 : index
    %c0_16 = arith.constant 0 : index
    %15 = vector.load %arg2[%c2_14, %c0_15, %c0_16] : memref<3x144x2048xbf16, #tpu.memory_space<vmem>>, vector<1x144x2048xbf16>
    %16 = vector.shape_cast %15 : vector<1x144x2048xbf16> to vector<144x2048xbf16>
    %cst_17 = arith.constant dense<0.000000e+00> : vector<32x2048xf32>
    %17 = tpu.matmul %14, %16, %cst_17 {dimension_numbers = #tpu.dot_dimension_numbers<[1], [0], [0], [1], [0, 0, 1, 1], [], []>} : vector<32x144xbf16>, vector<144x2048xbf16>, vector<32x2048xf32> -> vector<32x2048xf32>
    %18 = arith.addf %12, %17 : vector<32x2048xf32>
    %c0_18 = arith.constant 0 : index
    %c0_19 = arith.constant 0 : index
    %19 = vector.load %arg3[%c0_18, %c0_19] : memref<1x2048xf32, #tpu.memory_space<vmem>>, vector<1x2048xf32>
    %20 = vector.broadcast %19 : vector<1x2048xf32> to vector<32x2048xf32>
    %21 = arith.mulf %18, %20 : vector<32x2048xf32>
    %c0_20 = arith.constant 0 : index
    %c0_21 = arith.constant 0 : index
    %22 = vector.load %arg4[%c0_20, %c0_21] : memref<1x2048xf32, #tpu.memory_space<vmem>>, vector<1x2048xf32>
    %23 = vector.broadcast %22 : vector<1x2048xf32> to vector<32x2048xf32>
    %24 = arith.addf %21, %23 : vector<32x2048xf32>
    %cst_22 = arith.constant 0.000000e+00 : f32
    %25 = vector.broadcast %cst_22 : f32 to vector<32x2048xf32>
    %26 = arith.maximumf %24, %25 : vector<32x2048xf32>
    %27 = vector.shape_cast %26 : vector<32x2048xf32> to vector<2x16x2048xf32>
    %c0_23 = arith.constant 0 : index
    %c0_24 = arith.constant 0 : index
    %c0_25 = arith.constant 0 : index
    %28 = vector.load %arg5[%c0_23, %c0_24, %c0_25] : memref<2x16x2048xf32, #tpu.memory_space<vmem>>, vector<2x16x2048xf32>
    tpu.vector_store %arg5[%c0_23, %c0_24, %c0_25], %27 {strides = array<i32>} : memref<2x16x2048xf32, #tpu.memory_space<vmem>>, vector<2x16x2048xf32>,
    return
  }
  func.func @transform_0(%arg0: i32) -> (i32, i32, i32) {
    %c0_i32 = arith.constant 0 : i32
    %c0_i32_0 = arith.constant 0 : i32
    %c0_i32_1 = arith.constant 0 : i32
    return %arg0, %c0_i32, %c0_i32_0 : i32, i32, i32
  }
  func.func @transform_1(%arg0: i32) -> (i32, i32, i32) {
    %c0_i32 = arith.constant 0 : i32
    %c0_i32_0 = arith.constant 0 : i32
    %c0_i32_1 = arith.constant 0 : i32
    %c0_i32_2 = arith.constant 0 : i32
    return %c0_i32, %c0_i32_0, %c0_i32_1 : i32, i32, i32
  }
  func.func @transform_2(%arg0: i32) -> (i32, i32) {
    %c0_i32 = arith.constant 0 : i32
    %c0_i32_0 = arith.constant 0 : i32
    %c0_i32_1 = arith.constant 0 : i32
    return %c0_i32, %c0_i32_0 : i32, i32
  }
  func.func @transform_3(%arg0: i32) -> (i32, i32) {
    %c0_i32 = arith.constant 0 : i32
    %c0_i32_0 = arith.constant 0 : i32
    %c0_i32_1 = arith.constant 0 : i32
    return %c0_i32, %c0_i32_0 : i32, i32
  }
  func.func @transform_4(%arg0: i32) -> (i32, i32, i32) {
    %c0_i32 = arith.constant 0 : i32
    %c0_i32_0 = arith.constant 0 : i32
    %c0_i32_1 = arith.constant 0 : i32
    return %arg0, %c0_i32, %c0_i32_0 : i32, i32, i32
  }
}

</mosaic_0001>

<bundles_post_ra>
// kernel: tile.13
= control target key start
LH: loop header
LB: loop body
LE: loop exit
PB: predicated region body
PF: predicated region fallthrough
CT: control target
= control target key end

     0   :  { %s28_s0 = inlined_call_operand.vmem [shape: f32[128], index: 0, kind: input, shape index: {}]   ;;  %s29_s1 = inlined_call_operand.vmem [shape: f32[16,128], index: 1, kind: output, shape index: {}]  }
   0x1   :  { %v4_v0 = vld [vmem:[%s28_s0] ss:$0 sm:$0xff] }
   0x2   :  { %5 = vst [vmem:[%s29_s1] sm:$0xff] %v4_v0  ;;  %8 = vst [vmem:[%s29_s1 + $0x8] sm:$0xff] %v4_v0 }

// kernel: unit_forward.2
= control target key start
LH: loop header
LB: loop body
LE: loop exit
PB: predicated region body
PF: predicated region fallthrough
CT: control target
= control target key end

     0   :  { %vm162_vm0 = vsmask.f32 3328  ;;  %vm163_vm1 = vsmask.f32 7440  ;;  %vm1092_vm3 = vcmask 130048   ;;  %vm2697_vm4 = vcmask 1042432   ;;  %s7352_s1 = inlined_call_operand.vmem [shape: bf16[3,144,2048], index: 1, kind: input, shape index: {}]   ;;  %s7353_s0 = inlined_call_operand.vmem [shape: bf16[2,18,144], index: 0, kind: input, shape index: {}]   ;;  %s7354_s2 = inlined_call_operand.vmem [shape: f32[1,2,2048], index: 2, kind: output, shape index: {}]  }
   0x1   :  { %v4664_v0 = vld [vmem:[%s7352_s1 + $0x800] sm:$0xff]  ;;  %v4665_v2 = vld [vmem:[%s7352_s1 + $0x808] sm:$0xff]  ;;  %v160_v39 = vld [vmem:[%s7353_s0 + $0x10] sm:$0x11]  ;;  %vm2698_vm5 = vcmask 1046532   ;;  %vm4439_vm7 = vcmask 1040384  }
   0x2   :  { %v4672_v1 = vld [vmem:[%s7352_s1 + $0x840] sm:$0xff]  ;;  %v4673_v4 = vld [vmem:[%s7352_s1 + $0x848] sm:$0xff]  ;;  %v185_v47 = vshll.u32 %v160_v39, 16  ;;  %vm5458_vm2 = vmor %vm162_vm0, %vm163_vm1 }
   0x3   :  { %v4813_v3 = vcombine.high %v4664_v0, %v4672_v1  ;;  %v4812_v5 = vcombine.low %v4664_v0, %v4672_v1  ;;  %v4648_v6 = vld [vmem:[%s7352_s1 + $0x780] sm:$0xff]  ;;  %v4815_v8 = vcombine.high %v4665_v2, %v4673_v4  ;;  %v4814_v9 = vcombine.low %v4665_v2, %v4673_v4  ;;  %v4649_v11 = vld [vmem:[%s7352_s1 + $0x788] sm:$0xff]  ;;  %v4635_v63 = vld [vmem:[%s7352_s1 + $0x718] sm:$0xff] }
   0x4   :  { %v4656_v7 = vld [vmem:[%s7352_s1 + $0x7c0] sm:$0xff]  ;;  %v4657_v12 = vld [vmem:[%s7352_s1 + $0x7c8] sm:$0xff]  ;;  %v187_v59 = vrot.slane %v185_v47, 5  ;;  %vm6449_vm6 = vmor %vm2697_vm4, %vm2698_vm5 }
   0x5   :  { %v4797_v10 = vcombine.high %v4648_v6, %v4656_v7  ;;  %v4632_v13 = vld [vmem:[%s7352_s1 + $0x700] sm:$0xff]  ;;  %1099 = vmatprep.subr.bf16.mxu0 %v4813_v3  ;;  %v4799_v14 = vcombine.high %v4649_v11, %v4657_v12  ;;  %v4633_v16 = vld [vmem:[%s7352_s1 + $0x708] sm:$0xff]  ;;  %1152 = vmatprep.subr.bf16.mxu1 %v4815_v8  ;;  %v4796_v18 = vcombine.low %v4648_v6, %v4656_v7 }
   0x6   :  { %v4640_v15 = vld [vmem:[%s7352_s1 + $0x740] sm:$0xff]  ;;  %v4641_v17 = vld [vmem:[%s7352_s1 + $0x748] sm:$0xff]  ;;  %1100 = vmatpush1.bf16.msra.mxu0 %v4812_v5  ;;  %1153 = vmatpush1.bf16.msra.mxu1 %v4814_v9  ;;  %v4798_v19 = vcombine.low %v4649_v11, %v4657_v12  ;;  %v14_v9 = vld [vmem:[%s7353_s0 + $0x18] sm:$0xff] }
   0x7   :  { %1101 = vmatprep.subr.bf16.mxu0 %v4797_v10  ;;  %v4781_v20 = vcombine.high %v4632_v13, %v4640_v15  ;;  %1154 = vmatprep.subr.bf16.mxu1 %v4799_v14  ;;  %v4783_v21 = vcombine.high %v4633_v16, %v4641_v17  ;;  %v4616_v22 = vld [vmem:[%s7352_s1 + $0x680] sm:$0xff]  ;;  %v4617_v24 = vld [vmem:[%s7352_s1 + $0x688] sm:$0xff]  ;;  %v4780_v26 = vcombine.low %v4632_v13, %v4640_v15 }
   0x8   :  { %v4624_v23 = vld [vmem:[%s7352_s1 + $0x6c0] sm:$0xff]  ;;  %v4625_v25 = vld [vmem:[%s7352_s1 + $0x6c8] sm:$0xff]  ;;  %v4782_v27 = vcombine.low %v4633_v16, %v4641_v17 }
   0x9   :  { %v4765_v28 = vcombine.high %v4616_v22, %v4624_v23  ;;  %v4600_v29 = vld [vmem:[%s7352_s1 + $0x600] sm:$0xff]  ;;  %v4767_v31 = vcombine.high %v4617_v24, %v4625_v25  ;;  %v4601_v32 = vld [vmem:[%s7352_s1 + $0x608] sm:$0xff]  ;;  %v4764_v34 = vcombine.low %v4616_v22, %v4624_v23  ;;  %v4766_v35 = vcombine.low %v4617_v24, %v4625_v25 }
   0xa   :  { %1102 = vmatpush1.bf16.msra.mxu0 %v4796_v18  ;;  %1155 = vmatpush1.bf16.msra.mxu1 %v4798_v19  ;;  %v4608_v30 = vld [vmem:[%s7352_s1 + $0x640] sm:$0xff]  ;;  %v4609_v33 = vld [vmem:[%s7352_s1 + $0x648] sm:$0xff]  ;;  %v190_v19 = vshrl.u32 %v14_v9, 16 }
   0xb   :  { %1103 = vmatprep.subr.bf16.mxu0 %v4781_v20  ;;  %1156 = vmatprep.subr.bf16.mxu1 %v4783_v21  ;;  %v4749_v36 = vcombine.high %v4600_v29, %v4608_v30  ;;  %v5424_v37 = vld [vmem:[%s7353_s0] sm:$0xff]  ;;  %v5429_v38 = vld [vmem:[%s7353_s0 + $0x8] sm:$0xff]  ;;  %v4751_v44 = vcombine.high %v4601_v32, %v4609_v33  ;;  %v4748_v54 = vcombine.low %v4600_v29, %v4608_v30  ;;  %v193_v20 = vshll.u32 %v14_v9, 16 }
   0xc   :  { %v166_v40 = vshrl.u32 %v5424_v37, 16  ;;  %v169_v41 = vshll.u32 %v5424_v37, 16  ;;  %v175_v42 = vshll.u32 %v5429_v38, 16  ;;  %v179_v43 = vshrl.u32 %v5429_v38, 16  ;;  %v4584_v45 = vld [vmem:[%s7352_s1 + $0x580] sm:$0xff]  ;;  %v4585_v48 = vld [vmem:[%s7352_s1 + $0x588] sm:$0xff] }
   0xd   :  { %v4592_v46 = vld [vmem:[%s7352_s1 + $0x5c0] sm:$0xff]  ;;  %v4593_v49 = vld [vmem:[%s7352_s1 + $0x5c8] sm:$0xff]  ;;  %v4750_v55 = vcombine.low %v4601_v32, %v4609_v33  ;;  %v195_v29 = vrot.slane %v193_v20, 5  ;;  %v4602_v20 = vld [vmem:[%s7352_s1 + $0x610] sm:$0xff] }
   0xe   :  { %1104 = vmatpush1.bf16.msra.mxu0 %v4780_v26  ;;  %1157 = vmatpush1.bf16.msra.mxu1 %v4782_v27  ;;  %v168_v50 = vrot.slane %v166_v40, 4  ;;  %v171_v51 = vrot.slane %v169_v41, 5  ;;  %v177_v52 = vrot.slane %v175_v42, 5  ;;  %v181_v53 = vrot.slane %v179_v43, 4  ;;  %v4568_v61 = vld [vmem:[%s7352_s1 + $0x500] sm:$0xff]  ;;  %v4569_v0 = vld [vmem:[%s7352_s1 + $0x508] sm:$0xff] }
   0xf   :  { %1105 = vmatprep.subr.bf16.mxu0 %v4765_v28  ;;  %1158 = vmatprep.subr.bf16.mxu1 %v4767_v31  ;;  %v4733_v56 = vcombine.high %v4584_v45, %v4592_v46  ;;  %v4735_v60 = vcombine.high %v4585_v48, %v4593_v49  ;;  %v4576_v62 = vld [vmem:[%s7352_s1 + $0x540] sm:$0xff]  ;;  %v4577_v1 = vld [vmem:[%s7352_s1 + $0x548] sm:$0xff]  ;;  %v4732_v4 = vcombine.low %v4584_v45, %v4592_v46  ;;  %v192_v28 = vrot.slane %v190_v19, 4  ;;  %v4666_v43 = vld [vmem:[%s7352_s1 + $0x810] sm:$0xff] }
  0x10   :  { %v172_v57 = vor.u32 %v171_v51, %v168_v50  ;;  %v182_v58 = vor.u32 %v181_v53, %v177_v52  ;;  %v4734_v5 = vcombine.low %v4585_v48, %v4593_v49  ;;  %v4717_v6 = vcombine.high %v4568_v61, %v4576_v62  ;;  %v4552_v11 = vld [vmem:[%s7352_s1 + $0x480] sm:$0xff]  ;;  %v4553_v15 = vld [vmem:[%s7352_s1 + $0x488] sm:$0xff]  ;;  %v4667_v45 = vld [vmem:[%s7352_s1 + $0x818] sm:$0xff] }
  0x11   :  { %v4719_v10 = vcombine.high %v4569_v0, %v4577_v1  ;;  %v4560_v12 = vld [vmem:[%s7352_s1 + $0x4c0] sm:$0xff]  ;;  %v4561_v16 = vld [vmem:[%s7352_s1 + $0x4c8] sm:$0xff]  ;;  %v4716_v17 = vcombine.low %v4568_v61, %v4576_v62  ;;  %v4718_v22 = vcombine.low %v4569_v0, %v4577_v1  ;;  %v4675_v46 = vld [vmem:[%s7352_s1 + $0x858] sm:$0xff] }
  0x12   :  { %1106 = vmatpush1.bf16.msra.mxu0 %v4764_v34  ;;  %1159 = vmatpush1.bf16.msra.mxu1 %v4766_v35  ;;  %v173_v2 = vrot.slane %v172_v57, 4  ;;  %v183_v3 = vrot.slane %v182_v58, 4  ;;  %v15_v14 = vld [vmem:[%s7353_s0 + $0x20] sm:$0xff]  ;;  %v161_v18 = vld [vmem:[%s7353_s0 + $0x28] sm:$0x11]  ;;  %v4701_v23 = vcombine.high %v4552_v11, %v4560_v12  ;;  %v4703_v25 = vcombine.high %v4553_v15, %v4561_v16  ;;  %v4651_v57 = vld [vmem:[%s7352_s1 + $0x798] sm:$0xff] }
  0x13   :  { %1107 = vmatprep.subr.bf16.mxu0 %v4749_v36  ;;  %1160 = vmatprep.subr.bf16.mxu1 %v4751_v44  ;;  %v199_v21 = vshll.u32 %v15_v14, 16  ;;  %v203_v24 = vshrl.u32 %v15_v14, 16  ;;  %v4680_v26 = vld [vmem:[%s7352_s1 + $0x880] sm:$0xff]  ;;  %v4681_v31 = vld [vmem:[%s7352_s1 + $0x888] sm:$0xff]  ;;  %v209_v34 = vshll.u32 %v161_v18, 16  ;;  %v4700_v35 = vcombine.low %v4552_v11, %v4560_v12  ;;  %v4674_v44 = vld [vmem:[%s7352_s1 + $0x850] sm:$0xff] }
  0x14   :  { %v5470_v7 = vsel %vm5458_vm2, %v173_v2, %v177_v52  ;;  %v188_v8 = vsel %vm5458_vm2, %v183_v3, %v187_v59  ;;  %v4688_v27 = vld [vmem:[%s7352_s1 + $0x8c0] sm:$0xff]  ;;  %v4689_v32 = vld [vmem:[%s7352_s1 + $0x8c8] sm:$0xff]  ;;  %v196_v36 = vor.u32 %v195_v29, %v192_v28  ;;  %v4702_v39 = vcombine.low %v4553_v15, %v4561_v16  ;;  %v4659_v58 = vld [vmem:[%s7352_s1 + $0x7d8] sm:$0xff] }
  0x15   :  { %v5484_v13 = vcombine.high %v5470_v7, %v188_v8  ;;  %v201_v30 = vrot.slane %v199_v21, 5  ;;  %v205_v33 = vrot.slane %v203_v24, 4  ;;  %v4829_v40 = vcombine.high %v4680_v26, %v4688_v27  ;;  %v4634_v2 = vld [vmem:[%s7352_s1 + $0x710] sm:$0xff]  ;;  %v4619_v12 = vld [vmem:[%s7352_s1 + $0x698] sm:$0xff] }
  0x16   :  { %1108 = vmatpush1.bf16.msra.mxu0 %v4748_v54  ;;  %1161 = vmatpush1.bf16.msra.mxu1 %v4750_v55  ;;  %v4831_v42 = vcombine.high %v4681_v31, %v4689_v32  ;;  %v197_v47 = vrot.slane %v196_v36, 4  ;;  %v211_v49 = vrot.slane %v209_v34, 5  ;;  %v4828_v50 = vcombine.low %v4680_v26, %v4688_v27  ;;  %v4650_v54 = vld [vmem:[%s7352_s1 + $0x790] sm:$0xff]  ;;  %v4627_v14 = vld [vmem:[%s7352_s1 + $0x6d8] sm:$0xff] }
  0x17   :  { %1109 = vmatprep.subr.bf16.mxu0 %v4733_v56  ;;  %1162 = vmatprep.subr.bf16.mxu1 %v4735_v60  ;;  %v206_v41 = vor.u32 %v205_v33, %v201_v30  ;;  %v4830_v51 = vcombine.low %v4681_v31, %v4689_v32  ;;  %v4817_v52 = vcombine.high %v4666_v43, %v4674_v44  ;;  %v4658_v55 = vld [vmem:[%s7352_s1 + $0x7d0] sm:$0xff]  ;;  %v4595_v31 = vld [vmem:[%s7352_s1 + $0x5d8] sm:$0xff] }
  0x18   :  { %4844 = vmatprep.mubr.msk.bf16.mxu0 %vm1092_vm3, %v5484_v13  ;;  %4846 = vmatprep.mubr.msk.bf16.mxu1 %vm1092_vm3, %v5484_v13  ;;  %v4819_v53 = vcombine.high %v4667_v45, %v4675_v46  ;;  %v5533_v56 = vcombine.low %v5470_v7, %v188_v8  ;;  %v202_v59 = vsel %vm5458_vm2, %v197_v47, %v201_v30  ;;  %v4642_v3 = vld [vmem:[%s7352_s1 + $0x750] sm:$0xff]  ;;  %v4587_v30 = vld [vmem:[%s7352_s1 + $0x598] sm:$0xff] }
  0x19   :  { %v207_v48 = vrot.slane %v206_v41, 4  ;;  %v4816_v61 = vcombine.low %v4666_v43, %v4674_v44  ;;  %v4818_v62 = vcombine.low %v4667_v45, %v4675_v46  ;;  %v4801_v0 = vcombine.high %v4650_v54, %v4658_v55  ;;  %v4626_v11 = vld [vmem:[%s7352_s1 + $0x6d0] sm:$0xff]  ;;  %v4579_v41 = vld [vmem:[%s7352_s1 + $0x558] sm:$0xff] }
  0x1a   :  { %1110 = vmatpush1.bf16.msra.mxu0 %v4732_v4  ;;  %1163 = vmatpush1.bf16.msra.mxu1 %v4734_v5  ;;  %v4803_v1 = vcombine.high %v4651_v57, %v4659_v58  ;;  %v4643_v5 = vld [vmem:[%s7352_s1 + $0x758] sm:$0xff]  ;;  %v4802_v7 = vcombine.low %v4651_v57, %v4659_v58  ;;  %v4785_v8 = vcombine.high %v4634_v2, %v4642_v3  ;;  %v4610_v21 = vld [vmem:[%s7352_s1 + $0x650] sm:$0xff] }
  0x1b   :  { %1111 = vmatprep.subr.bf16.mxu0 %v4717_v6  ;;  %1164 = vmatprep.subr.bf16.mxu1 %v4719_v10  ;;  %v212_v60 = vsel %vm5458_vm2, %v207_v48, %v211_v49  ;;  %v4800_v6 = vcombine.low %v4650_v54, %v4658_v55  ;;  %v4787_v9 = vcombine.high %v4635_v63, %v4643_v5  ;;  %v4618_v10 = vld [vmem:[%s7352_s1 + $0x690] sm:$0xff]  ;;  %v4555_v48 = vld [vmem:[%s7352_s1 + $0x498] sm:$0xff] }
  0x1c   :  { %v5551_v4 = vcombine.high %v202_v59, %v212_v60  ;;  %v5577_v15 = vcombine.low %v202_v59, %v212_v60  ;;  %v4784_v16 = vcombine.low %v4634_v2, %v4642_v3  ;;  %v4769_v18 = vcombine.high %v4618_v10, %v4626_v11  ;;  %v4586_v28 = vld [vmem:[%s7352_s1 + $0x590] sm:$0xff]  ;;  %v4563_v49 = vld [vmem:[%s7352_s1 + $0x4d8] sm:$0xff]  ;;  %v4669_v2 = vld [vmem:[%s7352_s1 + $0x828] sm:$0xff] }
  0x1d   :  { %v4771_v19 = vcombine.high %v4619_v12, %v4627_v14  ;;  %v4768_v24 = vcombine.low %v4618_v10, %v4626_v11  ;;  %v4753_v26 = vcombine.high %v4602_v20, %v4610_v21  ;;  %v4594_v29 = vld [vmem:[%s7352_s1 + $0x5d0] sm:$0xff]  ;;  %v4752_v32 = vcombine.low %v4602_v20, %v4610_v21  ;;  %v4683_v57 = vld [vmem:[%s7352_s1 + $0x898] sm:$0xff]  ;;  %v4677_v3 = vld [vmem:[%s7352_s1 + $0x868] sm:$0xff] }
  0x1e   :  { %1112 = vmatpush1.bf16.msra.mxu0 %v4716_v17  ;;  %1165 = vmatpush1.bf16.msra.mxu1 %v4718_v22  ;;  %v4786_v17 = vcombine.low %v4635_v63, %v4643_v5  ;;  %v4603_v22 = vld [vmem:[%s7352_s1 + $0x618] sm:$0xff]  ;;  %v4737_v34 = vcombine.high %v4586_v28, %v4594_v29  ;;  %v4570_v36 = vld [vmem:[%s7352_s1 + $0x510] sm:$0xff]  ;;  %v4738_v43 = vcombine.low %v4587_v30, %v4595_v31  ;;  %v4653_v10 = vld [vmem:[%s7352_s1 + $0x7a8] sm:$0xff] }
  0x1f   :  { %1113 = vmatprep.subr.bf16.mxu0 %v4701_v23  ;;  %1166 = vmatprep.subr.bf16.mxu1 %v4703_v25  ;;  %v4611_v23 = vld [vmem:[%s7352_s1 + $0x658] sm:$0xff]  ;;  %v4770_v25 = vcombine.low %v4619_v12, %v4627_v14  ;;  %v4554_v46 = vld [vmem:[%s7352_s1 + $0x490] sm:$0xff]  ;;  %v4706_v60 = vcombine.low %v4555_v48, %v4563_v49  ;;  %v4661_v11 = vld [vmem:[%s7352_s1 + $0x7e8] sm:$0xff]  ;;  %v4822_v14 = vcombine.low %v4669_v2, %v4677_v3 }
  0x20   :  { %v4755_v27 = vcombine.high %v4603_v22, %v4611_v23  ;;  %v4754_v33 = vcombine.low %v4603_v22, %v4611_v23  ;;  %v4562_v47 = vld [vmem:[%s7352_s1 + $0x4d0] sm:$0xff]  ;;  %v4691_v58 = vld [vmem:[%s7352_s1 + $0x8d8] sm:$0xff]  ;;  %v4637_v20 = vld [vmem:[%s7352_s1 + $0x728] sm:$0xff]  ;;  %v4806_v23 = vcombine.low %v4653_v10, %v4661_v11 }
  0x21   :  { %v4682_v54 = vld [vmem:[%s7352_s1 + $0x890] sm:$0xff]  ;;  %v4704_v59 = vcombine.low %v4554_v46, %v4562_v47  ;;  %v4834_v5 = vcombine.low %v4683_v57, %v4691_v58  ;;  %v4645_v21 = vld [vmem:[%s7352_s1 + $0x768] sm:$0xff] }
  0x22   :  { %1114 = vmatpush1.bf16.msra.mxu0 %v4700_v35  ;;  %1167 = vmatpush1.bf16.msra.mxu1 %v4702_v39  ;;  %v4739_v35 = vcombine.high %v4587_v30, %v4595_v31  ;;  %v4578_v39 = vld [vmem:[%s7352_s1 + $0x550] sm:$0xff]  ;;  %v4790_v31 = vcombine.low %v4637_v20, %v4645_v21 }
  0x23   :  { %1129 = vmatprep.subr.bf16.mxu0 %v4829_v40  ;;  %1182 = vmatprep.subr.bf16.mxu1 %v4831_v42  ;;  %v4571_v40 = vld [vmem:[%s7352_s1 + $0x518] sm:$0xff]  ;;  %v4736_v42 = vcombine.low %v4586_v28, %v4594_v29  ;;  %v4721_v44 = vcombine.high %v4570_v36, %v4578_v39  ;;  %v4690_v55 = vld [vmem:[%s7352_s1 + $0x8d0] sm:$0xff]  ;;  %v4621_v28 = vld [vmem:[%s7352_s1 + $0x6a8] sm:$0xff] }
  0x24   :  { %v4723_v45 = vcombine.high %v4571_v40, %v4579_v41  ;;  %v4832_v63 = vcombine.low %v4682_v54, %v4690_v55  ;;  %v4629_v29 = vld [vmem:[%s7352_s1 + $0x6e8] sm:$0xff] }
  0x26   :  { %1130 = vmatpush2.bf16.msra.mxu0 %v4828_v50  ;;  %1183 = vmatpush2.bf16.msra.mxu1 %v4830_v51  ;;  %v4720_v50 = vcombine.low %v4570_v36, %v4578_v39  ;;  %v4722_v51 = vcombine.low %v4571_v40, %v4579_v41  ;;  %v4605_v36 = vld [vmem:[%s7352_s1 + $0x628] sm:$0xff]  ;;  %v4774_v41 = vcombine.low %v4621_v28, %v4629_v29 }
  0x27   :  { %1205 = vmatprep.subr.bf16.mxu0 %v4817_v52  ;;  %1258 = vmatprep.subr.bf16.mxu1 %v4819_v53  ;;  %v4705_v52 = vcombine.high %v4554_v46, %v4562_v47  ;;  %v4707_v53 = vcombine.high %v4555_v48, %v4563_v49  ;;  %v4613_v39 = vld [vmem:[%s7352_s1 + $0x668] sm:$0xff] }
  0x28   :  { %v4589_v46 = vld [vmem:[%s7352_s1 + $0x5a8] sm:$0xff]  ;;  %v4758_v49 = vcombine.low %v4605_v36, %v4613_v39 }
  0x29   :  { %1132 = vmatmul.mubr.bf16.vlgmr.msra.gmra.mxu0 %v5533_v56  ;;  %1185 = vmatmul.mubr.bf16.vlgmr.msra.gmra.mxu1 %v5533_v56  ;;  %v4597_v47 = vld [vmem:[%s7352_s1 + $0x5e8] sm:$0xff] }
  0x2a   :  { %1206 = vmatpush1.bf16.msra.mxu0 %v4816_v61  ;;  %1259 = vmatpush1.bf16.msra.mxu1 %v4818_v62  ;;  %v4833_v61 = vcombine.high %v4682_v54, %v4690_v55  ;;  %v4835_v62 = vcombine.high %v4683_v57, %v4691_v58  ;;  %v4573_v54 = vld [vmem:[%s7352_s1 + $0x528] sm:$0xff]  ;;  %v4742_v58 = vcombine.low %v4589_v46, %v4597_v47 }
  0x2b   :  { %1207 = vmatprep.subr.bf16.mxu0 %v4801_v0  ;;  %1260 = vmatprep.subr.bf16.mxu1 %v4803_v1  ;;  %v4668_v0 = vld [vmem:[%s7352_s1 + $0x820] sm:$0xff]  ;;  %v4581_v55 = vld [vmem:[%s7352_s1 + $0x568] sm:$0xff] }
  0x2c   :  { %4845 = vmatprep.mubr.msk.bf16.mxu0 %vm1092_vm3, %v5551_v4  ;;  %4847 = vmatprep.mubr.msk.bf16.mxu1 %vm1092_vm3, %v5551_v4  ;;  %v4676_v1 = vld [vmem:[%s7352_s1 + $0x860] sm:$0xff] }
  0x2d   :  { %v4820_v12 = vcombine.low %v4668_v0, %v4676_v1 }
  0x2e   :  { %1208 = vmatpush1.bf16.msra.mxu0 %v4800_v6  ;;  %1261 = vmatpush1.bf16.msra.mxu1 %v4802_v7  ;;  %v4821_v6 = vcombine.high %v4668_v0, %v4676_v1  ;;  %v4823_v7 = vcombine.high %v4669_v2, %v4677_v3  ;;  %v4557_v0 = vld [vmem:[%s7352_s1 + $0x4a8] sm:$0xff]  ;;  %v4726_v3 = vcombine.low %v4573_v54, %v4581_v55 }
  0x2f   :  { %1209 = vmatprep.subr.bf16.mxu0 %v4785_v8  ;;  %1262 = vmatprep.subr.bf16.mxu1 %v4787_v9  ;;  %v4652_v8 = vld [vmem:[%s7352_s1 + $0x7a0] sm:$0xff]  ;;  %v4565_v1 = vld [vmem:[%s7352_s1 + $0x4e8] sm:$0xff] }
  0x30   :  { %v4660_v9 = vld [vmem:[%s7352_s1 + $0x7e0] sm:$0xff] }
  0x31   :  { %1142 = vmatmul.mubr.bf16.gmra.mxu0 %v5577_v15  ;;  %1195 = vmatmul.mubr.bf16.gmra.mxu1 %v5577_v15  ;;  %v4804_v22 = vcombine.low %v4652_v8, %v4660_v9 }
  0x32   :  { %1210 = vmatpush1.bf16.msra.mxu0 %v4784_v16  ;;  %1263 = vmatpush1.bf16.msra.mxu1 %v4786_v17  ;;  %v4805_v16 = vcombine.high %v4652_v8, %v4660_v9  ;;  %v4807_v17 = vcombine.high %v4653_v10, %v4661_v11  ;;  %v4685_v8 = vld [vmem:[%s7352_s1 + $0x8a8] sm:$0xff]  ;;  %v4710_v11 = vcombine.low %v4557_v0, %v4565_v1 }
  0x33   :  { %1211 = vmatprep.subr.bf16.mxu0 %v4769_v18  ;;  %1264 = vmatprep.subr.bf16.mxu1 %v4771_v19  ;;  %v4636_v18 = vld [vmem:[%s7352_s1 + $0x720] sm:$0xff]  ;;  %v4693_v9 = vld [vmem:[%s7352_s1 + $0x8e8] sm:$0xff] }
  0x34   :  { %4848 = vmatprep.mubr.msk.bf16.mxu0 %vm1092_vm3, %v5484_v13  ;;  %4850 = vmatprep.mubr.msk.bf16.mxu1 %vm1092_vm3, %v5484_v13  ;;  %v4644_v19 = vld [vmem:[%s7352_s1 + $0x760] sm:$0xff] }
  0x35   :  { %v4788_v30 = vcombine.low %v4636_v18, %v4644_v19 }
  0x36   :  { %1212 = vmatpush1.bf16.msra.mxu0 %v4768_v24  ;;  %1265 = vmatpush1.bf16.msra.mxu1 %v4770_v25  ;;  %v4789_v24 = vcombine.high %v4636_v18, %v4644_v19  ;;  %v4791_v25 = vcombine.high %v4637_v20, %v4645_v21  ;;  %v4671_v18 = vld [vmem:[%s7352_s1 + $0x838] sm:$0xff]  ;;  %v4838_v21 = vcombine.low %v4685_v8, %v4693_v9 }
  0x37   :  { %1213 = vmatprep.subr.bf16.mxu0 %v4753_v26  ;;  %1266 = vmatprep.subr.bf16.mxu1 %v4755_v27  ;;  %v4620_v26 = vld [vmem:[%s7352_s1 + $0x6a0] sm:$0xff]  ;;  %v4679_v19 = vld [vmem:[%s7352_s1 + $0x878] sm:$0xff] }
  0x38   :  { %v4628_v27 = vld [vmem:[%s7352_s1 + $0x6e0] sm:$0xff] }
  0x39   :  { %v4772_v40 = vcombine.low %v4620_v26, %v4628_v27 }
  0x3a   :  { %1214 = vmatpush1.bf16.msra.mxu0 %v4752_v32  ;;  %1267 = vmatpush1.bf16.msra.mxu1 %v4754_v33  ;;  %v4773_v32 = vcombine.high %v4620_v26, %v4628_v27  ;;  %v4775_v33 = vcombine.high %v4621_v28, %v4629_v29  ;;  %v4655_v26 = vld [vmem:[%s7352_s1 + $0x7b8] sm:$0xff]  ;;  %v4826_v29 = vcombine.low %v4671_v18, %v4679_v19 }
  0x3b   :  { %1215 = vmatprep.subr.bf16.mxu0 %v4737_v34  ;;  %1268 = vmatprep.subr.bf16.mxu1 %v4739_v35  ;;  %v4604_v34 = vld [vmem:[%s7352_s1 + $0x620] sm:$0xff]  ;;  %v4663_v27 = vld [vmem:[%s7352_s1 + $0x7f8] sm:$0xff] }
  0x3c   :  { %v4612_v35 = vld [vmem:[%s7352_s1 + $0x660] sm:$0xff] }
  0x3d   :  { %v4756_v48 = vcombine.low %v4604_v34, %v4612_v35 }
  0x3e   :  { %1216 = vmatpush1.bf16.msra.mxu0 %v4736_v42  ;;  %1269 = vmatpush1.bf16.msra.mxu1 %v4738_v43  ;;  %v4757_v42 = vcombine.high %v4604_v34, %v4612_v35  ;;  %v4759_v43 = vcombine.high %v4605_v36, %v4613_v39  ;;  %v4639_v34 = vld [vmem:[%s7352_s1 + $0x738] sm:$0xff]  ;;  %v4810_v39 = vcombine.low %v4655_v26, %v4663_v27 }
  0x3f   :  { %1217 = vmatprep.subr.bf16.mxu0 %v4721_v44  ;;  %1270 = vmatprep.subr.bf16.mxu1 %v4723_v45  ;;  %v4588_v44 = vld [vmem:[%s7352_s1 + $0x5a0] sm:$0xff]  ;;  %v4647_v35 = vld [vmem:[%s7352_s1 + $0x778] sm:$0xff] }
  0x40   :  { %v4596_v45 = vld [vmem:[%s7352_s1 + $0x5e0] sm:$0xff] }
  0x41   :  { %v4740_v57 = vcombine.low %v4588_v44, %v4596_v45 }
  0x42   :  { %1218 = vmatpush1.bf16.msra.mxu0 %v4720_v50  ;;  %1271 = vmatpush1.bf16.msra.mxu1 %v4722_v51  ;;  %v4741_v50 = vcombine.high %v4588_v44, %v4596_v45  ;;  %v4743_v51 = vcombine.high %v4589_v46, %v4597_v47  ;;  %v4623_v44 = vld [vmem:[%s7352_s1 + $0x6b8] sm:$0xff]  ;;  %v4794_v47 = vcombine.low %v4639_v34, %v4647_v35 }
  0x43   :  { %1219 = vmatprep.subr.bf16.mxu0 %v4705_v52  ;;  %1272 = vmatprep.subr.bf16.mxu1 %v4707_v53  ;;  %v4572_v52 = vld [vmem:[%s7352_s1 + $0x520] sm:$0xff]  ;;  %v4631_v45 = vld [vmem:[%s7352_s1 + $0x6f8] sm:$0xff] }
  0x44   :  { %v4580_v53 = vld [vmem:[%s7352_s1 + $0x560] sm:$0xff] }
  0x45   :  { %v4724_v2 = vcombine.low %v4572_v52, %v4580_v53 }
  0x46   :  { %1220 = vmatpush1.bf16.msra.mxu0 %v4704_v59  ;;  %1273 = vmatpush1.bf16.msra.mxu1 %v4706_v60  ;;  %v4725_v59 = vcombine.high %v4572_v52, %v4580_v53  ;;  %v4727_v60 = vcombine.high %v4573_v54, %v4581_v55  ;;  %v4607_v52 = vld [vmem:[%s7352_s1 + $0x638] sm:$0xff]  ;;  %v4778_v55 = vcombine.low %v4623_v44, %v4631_v45 }
  0x47   :  { %1235 = vmatprep.subr.bf16.mxu0 %v4833_v61  ;;  %1288 = vmatprep.subr.bf16.mxu1 %v4835_v62  ;;  %v4556_v61 = vld [vmem:[%s7352_s1 + $0x4a0] sm:$0xff]  ;;  %v4615_v53 = vld [vmem:[%s7352_s1 + $0x678] sm:$0xff] }
  0x48   :  { %v4564_v62 = vld [vmem:[%s7352_s1 + $0x4e0] sm:$0xff] }
  0x49   :  { %v4708_v10 = vcombine.low %v4556_v61, %v4564_v62 }
  0x4a   :  { %1236 = vmatpush2.bf16.msra.mxu0 %v4832_v63  ;;  %1289 = vmatpush2.bf16.msra.mxu1 %v4834_v5  ;;  %v4709_v63 = vcombine.high %v4556_v61, %v4564_v62  ;;  %v4711_v5 = vcombine.high %v4557_v0, %v4565_v1  ;;  %v4591_v61 = vld [vmem:[%s7352_s1 + $0x5b8] sm:$0xff]  ;;  %v4762_v1 = vcombine.low %v4607_v52, %v4615_v53 }
  0x4b   :  { %1311 = vmatprep.subr.bf16.mxu0 %v4821_v6  ;;  %1364 = vmatprep.subr.bf16.mxu1 %v4823_v7  ;;  %v4684_v6 = vld [vmem:[%s7352_s1 + $0x8a0] sm:$0xff]  ;;  %v4599_v62 = vld [vmem:[%s7352_s1 + $0x5f8] sm:$0xff] }
  0x4c   :  { %v4692_v7 = vld [vmem:[%s7352_s1 + $0x8e0] sm:$0xff] }
  0x4d   :  { %1238 = vmatmul.mubr.bf16.vlgmr.msra.gmra.mxu0 %v5533_v56  ;;  %1291 = vmatmul.mubr.bf16.vlgmr.msra.gmra.mxu1 %v5533_v56  ;;  %v4836_v20 = vcombine.low %v4684_v6, %v4692_v7 }
  0x4e   :  { %1312 = vmatpush1.bf16.msra.mxu0 %v4820_v12  ;;  %1365 = vmatpush1.bf16.msra.mxu1 %v4822_v14  ;;  %v4837_v12 = vcombine.high %v4684_v6, %v4692_v7  ;;  %v4839_v14 = vcombine.high %v4685_v8, %v4693_v9  ;;  %v4583_v6 = vld [vmem:[%s7352_s1 + $0x578] sm:$0xff]  ;;  %v4746_v8 = vcombine.low %v4591_v61, %v4599_v62 }
  0x4f   :  { %1313 = vmatprep.subr.bf16.mxu0 %v4805_v16  ;;  %1366 = vmatprep.subr.bf16.mxu1 %v4807_v17  ;;  %v4670_v16 = vld [vmem:[%s7352_s1 + $0x830] sm:$0xff] }
  0x50   :  { %4849 = vmatprep.mubr.msk.bf16.mxu0 %vm1092_vm3, %v5551_v4  ;;  %4851 = vmatprep.mubr.msk.bf16.mxu1 %vm1092_vm3, %v5551_v4  ;;  %v4678_v17 = vld [vmem:[%s7352_s1 + $0x870] sm:$0xff] }
  0x51   :  { %v4824_v28 = vcombine.low %v4670_v16, %v4678_v17 }
  0x52   :  { %1314 = vmatpush1.bf16.msra.mxu0 %v4804_v22  ;;  %1367 = vmatpush1.bf16.msra.mxu1 %v4806_v23  ;;  %v4825_v22 = vcombine.high %v4670_v16, %v4678_v17  ;;  %v4827_v23 = vcombine.high %v4671_v18, %v4679_v19  ;;  %v4567_v16 = vld [vmem:[%s7352_s1 + $0x4f8] sm:$0xff] }
  0x53   :  { %1315 = vmatprep.subr.bf16.mxu0 %v4789_v24  ;;  %1368 = vmatprep.subr.bf16.mxu1 %v4791_v25  ;;  %v4654_v24 = vld [vmem:[%s7352_s1 + $0x7b0] sm:$0xff] }
  0x54   :  { %v4662_v25 = vld [vmem:[%s7352_s1 + $0x7f0] sm:$0xff] }
  0x55   :  { %1248 = vmatmul.mubr.bf16.gmra.mxu0 %v5577_v15  ;;  %1301 = vmatmul.mubr.bf16.gmra.mxu1 %v5577_v15  ;;  %v4808_v36 = vcombine.low %v4654_v24, %v4662_v25 }
  0x56   :  { %1316 = vmatpush1.bf16.msra.mxu0 %v4788_v30  ;;  %1369 = vmatpush1.bf16.msra.mxu1 %v4790_v31  ;;  %v4809_v30 = vcombine.high %v4654_v24, %v4662_v25  ;;  %v4811_v31 = vcombine.high %v4655_v26, %v4663_v27  ;;  %v4695_v24 = vld [vmem:[%s7352_s1 + $0x8f8] sm:$0xff] }
  0x57   :  { %1317 = vmatprep.subr.bf16.mxu0 %v4773_v32  ;;  %1370 = vmatprep.subr.bf16.mxu1 %v4775_v33  ;;  %v4638_v32 = vld [vmem:[%s7352_s1 + $0x730] sm:$0xff] }
  0x58   :  { %4852 = vmatprep.mubr.msk.bf16.mxu0 %vm1092_vm3, %v5484_v13  ;;  %4854 = vmatprep.mubr.msk.bf16.mxu1 %vm1092_vm3, %v5484_v13  ;;  %v4646_v33 = vld [vmem:[%s7352_s1 + $0x770] sm:$0xff] }
  0x59   :  { %v4792_v46 = vcombine.low %v4638_v32, %v4646_v33 }
  0x5a   :  { %1318 = vmatpush1.bf16.msra.mxu0 %v4772_v40  ;;  %1371 = vmatpush1.bf16.msra.mxu1 %v4774_v41  ;;  %v4793_v40 = vcombine.high %v4638_v32, %v4646_v33  ;;  %v4795_v41 = vcombine.high %v4639_v34, %v4647_v35  ;;  %v137_v32 = vld [vmem:[%s7352_s1 + $0x3c8] sm:$0xff] }
  0x5b   :  { %1319 = vmatprep.subr.bf16.mxu0 %v4757_v42  ;;  %1372 = vmatprep.subr.bf16.mxu1 %v4759_v43  ;;  %v4622_v42 = vld [vmem:[%s7352_s1 + $0x6b0] sm:$0xff] }
  0x5c   :  { %v4630_v43 = vld [vmem:[%s7352_s1 + $0x6f0] sm:$0xff] }
  0x5d   :  { %v4776_v54 = vcombine.low %v4622_v42, %v4630_v43 }
  0x5e   :  { %1320 = vmatpush1.bf16.msra.mxu0 %v4756_v48  ;;  %1373 = vmatpush1.bf16.msra.mxu1 %v4758_v49  ;;  %v4777_v48 = vcombine.high %v4622_v42, %v4630_v43  ;;  %v4779_v49 = vcombine.high %v4623_v44, %v4631_v45  ;;  %v121_v42 = vld [vmem:[%s7352_s1 + $0x348] sm:$0xff] }
  0x5f   :  { %1321 = vmatprep.subr.bf16.mxu0 %v4741_v50  ;;  %1374 = vmatprep.subr.bf16.mxu1 %v4743_v51  ;;  %v4606_v50 = vld [vmem:[%s7352_s1 + $0x630] sm:$0xff] }
  0x60   :  { %v4614_v51 = vld [vmem:[%s7352_s1 + $0x670] sm:$0xff] }
  0x61   :  { %v4760_v0 = vcombine.low %v4606_v50, %v4614_v51 }
  0x62   :  { %1322 = vmatpush1.bf16.msra.mxu0 %v4740_v57  ;;  %1375 = vmatpush1.bf16.msra.mxu1 %v4742_v58  ;;  %v4761_v57 = vcombine.high %v4606_v50, %v4614_v51  ;;  %v4763_v58 = vcombine.high %v4607_v52, %v4615_v53  ;;  %v105_v50 = vld [vmem:[%s7352_s1 + $0x2c8] sm:$0xff] }
  0x63   :  { %1323 = vmatprep.subr.bf16.mxu0 %v4725_v59  ;;  %1376 = vmatprep.subr.bf16.mxu1 %v4727_v60  ;;  %v4590_v59 = vld [vmem:[%s7352_s1 + $0x5b0] sm:$0xff] }
  0x64   :  { %v4598_v60 = vld [vmem:[%s7352_s1 + $0x5f0] sm:$0xff] }
  0x65   :  { %v4744_v7 = vcombine.low %v4590_v59, %v4598_v60 }
  0x66   :  { %1324 = vmatpush1.bf16.msra.mxu0 %v4724_v2  ;;  %1377 = vmatpush1.bf16.msra.mxu1 %v4726_v3  ;;  %v4745_v2 = vcombine.high %v4590_v59, %v4598_v60  ;;  %v4747_v3 = vcombine.high %v4591_v61, %v4599_v62 }
  0x67   :  { %1325 = vmatprep.subr.bf16.mxu0 %v4709_v63  ;;  %1378 = vmatprep.subr.bf16.mxu1 %v4711_v5  ;;  %v4574_v63 = vld [vmem:[%s7352_s1 + $0x530] sm:$0xff] }
  0x68   :  { %v4582_v5 = vld [vmem:[%s7352_s1 + $0x570] sm:$0xff] }
  0x69   :  { %v4729_v9 = vcombine.high %v4574_v63, %v4582_v5  ;;  %v4728_v17 = vcombine.low %v4574_v63, %v4582_v5 }
  0x6a   :  { %1326 = vmatpush1.bf16.msra.mxu0 %v4708_v10  ;;  %1379 = vmatpush1.bf16.msra.mxu1 %v4710_v11  ;;  %v4558_v11 = vld [vmem:[%s7352_s1 + $0x4b0] sm:$0xff] }
  0x6b   :  { %1341 = vmatprep.subr.bf16.mxu0 %v4837_v12  ;;  %1394 = vmatprep.subr.bf16.mxu1 %v4839_v14  ;;  %v4566_v12 = vld [vmem:[%s7352_s1 + $0x4f0] sm:$0xff]  ;;  %v4559_v14 = vld [vmem:[%s7352_s1 + $0x4b8] sm:$0xff] }
  0x6c   :  { %v4713_v19 = vcombine.high %v4558_v11, %v4566_v12  ;;  %v4712_v25 = vcombine.low %v4558_v11, %v4566_v12  ;;  %v4714_v26 = vcombine.low %v4559_v14, %v4567_v16  ;;  %v32_v12 = vld [vmem:[%s7352_s1 + $0x80] sm:$0xff] }
  0x6e   :  { %1342 = vmatpush2.bf16.msra.mxu0 %v4836_v20  ;;  %1395 = vmatpush2.bf16.msra.mxu1 %v4838_v21  ;;  %v4715_v20 = vcombine.high %v4559_v14, %v4567_v16  ;;  %v4686_v21 = vld [vmem:[%s7352_s1 + $0x8b0] sm:$0xff]  ;;  %v40_v14 = vld [vmem:[%s7352_s1 + $0xc0] sm:$0xff]  ;;  %v33_v16 = vld [vmem:[%s7352_s1 + $0x88] sm:$0xff] }
  0x6f   :  { %1417 = vmatprep.subr.bf16.mxu0 %v4825_v22  ;;  %1470 = vmatprep.subr.bf16.mxu1 %v4827_v23  ;;  %v4694_v22 = vld [vmem:[%s7352_s1 + $0x8f0] sm:$0xff]  ;;  %v4687_v23 = vld [vmem:[%s7352_s1 + $0x8b8] sm:$0xff] }
  0x70   :  { %v4841_v27 = vcombine.high %v4686_v21, %v4694_v22  ;;  %v4840_v33 = vcombine.low %v4686_v21, %v4694_v22  ;;  %v4842_v34 = vcombine.low %v4687_v23, %v4695_v24  ;;  %v16_v22 = vld [vmem:[%s7352_s1] sm:$0xff] }
  0x71   :  { %1344 = vmatmul.mubr.bf16.vlgmr.msra.gmra.mxu0 %v5533_v56  ;;  %1397 = vmatmul.mubr.bf16.vlgmr.msra.gmra.mxu1 %v5533_v56 }
  0x72   :  { %1418 = vmatpush1.bf16.msra.mxu0 %v4824_v28  ;;  %1471 = vmatpush1.bf16.msra.mxu1 %v4826_v29  ;;  %v4843_v28 = vcombine.high %v4687_v23, %v4695_v24  ;;  %v128_v29 = vld [vmem:[%s7352_s1 + $0x380] sm:$0xff]  ;;  %v17_v24 = vld [vmem:[%s7352_s1 + $0x8] sm:$0xff] }
  0x73   :  { %1419 = vmatprep.subr.bf16.mxu0 %v4809_v30  ;;  %1472 = vmatprep.subr.bf16.mxu1 %v4811_v31  ;;  %v136_v30 = vld [vmem:[%s7352_s1 + $0x3c0] sm:$0xff]  ;;  %v129_v31 = vld [vmem:[%s7352_s1 + $0x388] sm:$0xff] }
  0x74   :  { %4853 = vmatprep.mubr.msk.bf16.mxu0 %vm1092_vm3, %v5551_v4  ;;  %4855 = vmatprep.mubr.msk.bf16.mxu1 %vm1092_vm3, %v5551_v4  ;;  %v4977_v35 = vcombine.high %v128_v29, %v136_v30  ;;  %v4976_v43 = vcombine.low %v128_v29, %v136_v30  ;;  %v4978_v44 = vcombine.low %v129_v31, %v137_v32  ;;  %v24_v23 = vld [vmem:[%s7352_s1 + $0x40] sm:$0xff] }
  0x75   :  { %v144_v30 = vld [vmem:[%s7352_s1 + $0x400] sm:$0xff] }
  0x76   :  { %1420 = vmatpush1.bf16.msra.mxu0 %v4808_v36  ;;  %1473 = vmatpush1.bf16.msra.mxu1 %v4810_v39  ;;  %v4979_v36 = vcombine.high %v129_v31, %v137_v32  ;;  %v112_v39 = vld [vmem:[%s7352_s1 + $0x300] sm:$0xff]  ;;  %v145_v32 = vld [vmem:[%s7352_s1 + $0x408] sm:$0xff] }
  0x77   :  { %1421 = vmatprep.subr.bf16.mxu0 %v4793_v40  ;;  %1474 = vmatprep.subr.bf16.mxu1 %v4795_v41  ;;  %v120_v40 = vld [vmem:[%s7352_s1 + $0x340] sm:$0xff]  ;;  %v113_v41 = vld [vmem:[%s7352_s1 + $0x308] sm:$0xff] }
  0x78   :  { %v4961_v45 = vcombine.high %v112_v39, %v120_v40  ;;  %v4960_v51 = vcombine.low %v112_v39, %v120_v40  ;;  %v4962_v52 = vcombine.low %v113_v41, %v121_v42  ;;  %v152_v31 = vld [vmem:[%s7352_s1 + $0x440] sm:$0xff]  ;;  %v130_v40 = vld [vmem:[%s7352_s1 + $0x390] sm:$0xff] }
  0x79   :  { %1354 = vmatmul.mubr.bf16.gmra.mxu0 %v5577_v15  ;;  %1407 = vmatmul.mubr.bf16.gmra.mxu1 %v5577_v15 }
  0x7a   :  { %1422 = vmatpush1.bf16.msra.mxu0 %v4792_v46  ;;  %1475 = vmatpush1.bf16.msra.mxu1 %v4794_v47  ;;  %v4963_v46 = vcombine.high %v113_v41, %v121_v42  ;;  %v96_v47 = vld [vmem:[%s7352_s1 + $0x280] sm:$0xff]  ;;  %v138_v41 = vld [vmem:[%s7352_s1 + $0x3d0] sm:$0xff]  ;;  %v131_v42 = vld [vmem:[%s7352_s1 + $0x398] sm:$0xff] }
  0x7b   :  { %1423 = vmatprep.subr.bf16.mxu0 %v4777_v48  ;;  %1476 = vmatprep.subr.bf16.mxu1 %v4779_v49  ;;  %v104_v48 = vld [vmem:[%s7352_s1 + $0x2c0] sm:$0xff]  ;;  %v97_v49 = vld [vmem:[%s7352_s1 + $0x288] sm:$0xff] }
  0x7c   :  { %4856 = vmatprep.mubr.msk.bf16.mxu0 %vm1092_vm3, %v5484_v13  ;;  %4858 = vmatprep.mubr.msk.bf16.mxu1 %vm1092_vm3, %v5484_v13  ;;  %v4575_v13 = vld [vmem:[%s7352_s1 + $0x538] sm:$0xff]  ;;  %v4945_v53 = vcombine.high %v96_v47, %v104_v48  ;;  %v4944_v59 = vcombine.low %v96_v47, %v104_v48  ;;  %v4946_v60 = vcombine.low %v97_v49, %v105_v50  ;;  %v114_v48 = vld [vmem:[%s7352_s1 + $0x310] sm:$0xff] }
  0x7d   :  { %v4731_v10 = vcombine.high %v4575_v13, %v4583_v6  ;;  %v4730_v18 = vcombine.low %v4575_v13, %v4583_v6  ;;  %v56_v6 = vld [vmem:[%s7352_s1 + $0x140] sm:$0xff] }
  0x7e   :  { %1424 = vmatpush1.bf16.msra.mxu0 %v4776_v54  ;;  %1477 = vmatpush1.bf16.msra.mxu1 %v4778_v55  ;;  %v4947_v54 = vcombine.high %v97_v49, %v105_v50  ;;  %v80_v55 = vld [vmem:[%s7352_s1 + $0x200] sm:$0xff]  ;;  %v122_v49 = vld [vmem:[%s7352_s1 + $0x350] sm:$0xff] }
  0x7f   :  { %1425 = vmatprep.subr.bf16.mxu0 %v4761_v57  ;;  %1478 = vmatprep.subr.bf16.mxu1 %v4763_v58  ;;  %v88_v57 = vld [vmem:[%s7352_s1 + $0x240] sm:$0xff]  ;;  %v89_v58 = vld [vmem:[%s7352_s1 + $0x248] sm:$0xff] }
  0x80   :  { %v4929_v61 = vcombine.high %v80_v55, %v88_v57  ;;  %v4928_v63 = vcombine.low %v80_v55, %v88_v57  ;;  %v5339_v50 = vld [vmem:[%s7353_s0] sm:$0xff]  ;;  %v4980_v55 = vcombine.low %v130_v40, %v138_v41 }
  0x82   :  { %1426 = vmatpush1.bf16.msra.mxu0 %v4760_v0  ;;  %1479 = vmatpush1.bf16.msra.mxu1 %v4762_v1  ;;  %v64_v0 = vld [vmem:[%s7352_s1 + $0x180] sm:$0xff] }
  0x83   :  { %1427 = vmatprep.subr.bf16.mxu0 %v4745_v2  ;;  %1480 = vmatprep.subr.bf16.mxu1 %v4747_v3  ;;  %v72_v1 = vld [vmem:[%s7352_s1 + $0x1c0] sm:$0xff]  ;;  %v5947_v2 = vcombine.high %v5424_v37, %v5429_v38  ;;  %v73_v3 = vld [vmem:[%s7352_s1 + $0x1c8] sm:$0xff] }
  0x84   :  { %v4913_v13 = vcombine.high %v64_v0, %v72_v1  ;;  %v48_v38 = vld [vmem:[%s7352_s1 + $0x100] sm:$0xff] }
  0x86   :  { %1428 = vmatpush1.bf16.msra.mxu0 %v4744_v7  ;;  %1481 = vmatpush1.bf16.msra.mxu1 %v4746_v8  ;;  %v57_v7 = vld [vmem:[%s7352_s1 + $0x148] sm:$0xff]  ;;  %v4912_v8 = vcombine.low %v64_v0, %v72_v1  ;;  %v106_v0 = vld [vmem:[%s7352_s1 + $0x2d0] sm:$0xff]  ;;  %v99_v1 = vld [vmem:[%s7352_s1 + $0x298] sm:$0xff] }
  0x87   :  { %1429 = vmatprep.subr.bf16.mxu0 %v4729_v9  ;;  %1482 = vmatprep.subr.bf16.mxu1 %v4731_v10  ;;  %v4897_v10 = vcombine.high %v48_v38, %v56_v6 }
  0x8a   :  { %1430 = vmatpush1.bf16.msra.mxu0 %v4728_v17  ;;  %1483 = vmatpush1.bf16.msra.mxu1 %v4730_v18  ;;  %v41_v17 = vld [vmem:[%s7352_s1 + $0xc8] sm:$0xff]  ;;  %v4896_v18 = vcombine.low %v48_v38, %v56_v6  ;;  %v90_v38 = vld [vmem:[%s7352_s1 + $0x250] sm:$0xff] }
  0x8b   :  { %1431 = vmatprep.subr.bf16.mxu0 %v4713_v19  ;;  %1484 = vmatprep.subr.bf16.mxu1 %v4715_v20  ;;  %v4881_v20 = vcombine.high %v32_v12, %v40_v14  ;;  %v4883_v21 = vcombine.high %v33_v16, %v41_v17 }
  0x8e   :  { %1432 = vmatpush1.bf16.msra.mxu0 %v4712_v25  ;;  %1485 = vmatpush1.bf16.msra.mxu1 %v4714_v26  ;;  %v25_v25 = vld [vmem:[%s7352_s1 + $0x48] sm:$0xff]  ;;  %v4880_v26 = vcombine.low %v32_v12, %v40_v14  ;;  %v66_v12 = vld [vmem:[%s7352_s1 + $0x190] sm:$0xff] }
  0x8f   :  { %1447 = vmatprep.subr.bf16.mxu0 %v4841_v27  ;;  %1500 = vmatprep.subr.bf16.mxu1 %v4843_v28  ;;  %v4882_v27 = vcombine.low %v33_v16, %v41_v17  ;;  %v4865_v28 = vcombine.high %v16_v22, %v24_v23  ;;  %v4867_v29 = vcombine.high %v17_v24, %v25_v25  ;;  %v74_v14 = vld [vmem:[%s7352_s1 + $0x1d0] sm:$0xff]  ;;  %v67_v16 = vld [vmem:[%s7352_s1 + $0x198] sm:$0xff] }
  0x90   :  { %v75_v17 = vld [vmem:[%s7352_s1 + $0x1d8] sm:$0xff] }
  0x92   :  { %1448 = vmatpush2.bf16.msra.mxu0 %v4840_v33  ;;  %1501 = vmatpush2.bf16.msra.mxu1 %v4842_v34  ;;  %v153_v33 = vld [vmem:[%s7352_s1 + $0x448] sm:$0xff]  ;;  %v4864_v34 = vcombine.low %v16_v22, %v24_v23  ;;  %v50_v22 = vld [vmem:[%s7352_s1 + $0x110] sm:$0xff] }
  0x93   :  { %2267 = vmatprep.subr.bf16.mxu0 %v4977_v35  ;;  %2320 = vmatprep.subr.bf16.mxu1 %v4979_v36  ;;  %v4866_v35 = vcombine.low %v17_v24, %v25_v25  ;;  %v4993_v36 = vcombine.high %v144_v30, %v152_v31  ;;  %v4995_v39 = vcombine.high %v145_v32, %v153_v33  ;;  %v58_v23 = vld [vmem:[%s7352_s1 + $0x150] sm:$0xff]  ;;  %v51_v24 = vld [vmem:[%s7352_s1 + $0x118] sm:$0xff] }
  0x94   :  { %v59_v25 = vld [vmem:[%s7352_s1 + $0x158] sm:$0xff] }
  0x95   :  { %1450 = vmatmul.mubr.bf16.vlgmr.msra.gmra.mxu0 %v5533_v56  ;;  %1503 = vmatmul.mubr.bf16.vlgmr.msra.gmra.mxu1 %v5533_v56  ;;  %v81_v56 = vld [vmem:[%s7352_s1 + $0x208] sm:$0xff] }
  0x96   :  { %2268 = vmatpush1.bf16.msra.mxu0 %v4976_v43  ;;  %2321 = vmatpush1.bf16.msra.mxu1 %v4978_v44  ;;  %v4931_v62 = vcombine.high %v81_v56, %v89_v58  ;;  %v4930_v5 = vcombine.low %v81_v56, %v89_v58  ;;  %v139_v43 = vld [vmem:[%s7352_s1 + $0x3d8] sm:$0xff]  ;;  %v4992_v44 = vcombine.low %v144_v30, %v152_v31  ;;  %v34_v30 = vld [vmem:[%s7352_s1 + $0x90] sm:$0xff] }
  0x97   :  { %2269 = vmatprep.subr.bf16.mxu0 %v4961_v45  ;;  %2322 = vmatprep.subr.bf16.mxu1 %v4963_v46  ;;  %v4994_v45 = vcombine.low %v145_v32, %v153_v33  ;;  %v4981_v46 = vcombine.high %v130_v40, %v138_v41  ;;  %v4983_v47 = vcombine.high %v131_v42, %v139_v43  ;;  %v42_v31 = vld [vmem:[%s7352_s1 + $0xd0] sm:$0xff]  ;;  %v35_v32 = vld [vmem:[%s7352_s1 + $0x98] sm:$0xff] }
  0x98   :  { %4857 = vmatprep.mubr.msk.bf16.mxu0 %vm1092_vm3, %v5551_v4  ;;  %4859 = vmatprep.mubr.msk.bf16.mxu1 %vm1092_vm3, %v5551_v4  ;;  %v65_v4 = vld [vmem:[%s7352_s1 + $0x188] sm:$0xff]  ;;  %v4982_v57 = vcombine.low %v131_v42, %v139_v43  ;;  %v4965_v56 = vcombine.high %v114_v48, %v122_v49  ;;  %v43_v33 = vld [vmem:[%s7352_s1 + $0xd8] sm:$0xff]  ;;  %v18_v40 = vld [vmem:[%s7352_s1 + $0x10] sm:$0xff] }
  0x99   :  { %v4915_v37 = vcombine.high %v65_v4, %v73_v3  ;;  %v4914_v9 = vcombine.low %v65_v4, %v73_v3  ;;  %v107_v4 = vld [vmem:[%s7352_s1 + $0x2d8] sm:$0xff]  ;;  %v4964_v3 = vcombine.low %v114_v48, %v122_v49  ;;  %v26_v41 = vld [vmem:[%s7352_s1 + $0x50] sm:$0xff] }
  0x9a   :  { %2270 = vmatpush1.bf16.msra.mxu0 %v4960_v51  ;;  %2323 = vmatpush1.bf16.msra.mxu1 %v4962_v52  ;;  %v6033_v51 = vld [vmem:[%s7353_s0 + $0x8] sm:$0xff]  ;;  %v19_v42 = vld [vmem:[%s7352_s1 + $0x18] sm:$0xff]  ;;  %v146_v48 = vld [vmem:[%s7352_s1 + $0x410] sm:$0xff] }
  0x9b   :  { %2271 = vmatprep.subr.bf16.mxu0 %v4945_v53  ;;  %2324 = vmatprep.subr.bf16.mxu1 %v4947_v54  ;;  %v6036_v52 = vcombine.low %v5339_v50, %v6033_v51  ;;  %v115_v53 = vld [vmem:[%s7352_s1 + $0x318] sm:$0xff]  ;;  %v154_v49 = vld [vmem:[%s7352_s1 + $0x450] sm:$0xff] }
  0x9c   :  { %v123_v54 = vld [vmem:[%s7352_s1 + $0x358] sm:$0xff] }
  0x9d   :  { %1460 = vmatmul.mubr.bf16.gmra.mxu0 %v5577_v15  ;;  %1513 = vmatmul.mubr.bf16.gmra.mxu1 %v5577_v15  ;;  %v49_v15 = vld [vmem:[%s7352_s1 + $0x108] sm:$0xff]  ;;  %v4967_v58 = vcombine.high %v115_v53, %v123_v54  ;;  %v27_v43 = vld [vmem:[%s7352_s1 + $0x58] sm:$0xff] }
  0x9e   :  { %2272 = vmatpush1.bf16.msra.mxu0 %v4944_v59  ;;  %2325 = vmatpush1.bf16.msra.mxu1 %v4946_v60  ;;  %v4899_v11 = vcombine.high %v49_v15, %v57_v7  ;;  %v4898_v19 = vcombine.low %v49_v15, %v57_v7  ;;  %v5341_v59 = vld [vmem:[%s7353_s0 + $0x18] sm:$0xff]  ;;  %v6050_v60 = vld [vmem:[%s7353_s0 + $0x20] sm:$0xff] }
  0x9f   :  { %2273 = vmatprep.subr.bf16.mxu0 %v4929_v61  ;;  %2326 = vmatprep.subr.bf16.mxu1 %v4931_v62  ;;  %v6053_v61 = vcombine.high %v5341_v59, %v6050_v60  ;;  %v98_v62 = vld [vmem:[%s7352_s1 + $0x290] sm:$0xff]  ;;  %v6080_v6 = vcombine.low %v5341_v59, %v6050_v60  ;;  %v83_v15 = vld [vmem:[%s7352_s1 + $0x218] sm:$0xff]  ;;  %v140_v59 = vld [vmem:[%s7352_s1 + $0x3e0] sm:$0xff] }
  0xa0   :  { %5008 = vmatprep.mubr.msk.bf16.mxu0 %vm1092_vm3, %v5947_v2  ;;  %5010 = vmatprep.mubr.msk.bf16.mxu1 %vm1092_vm3, %v5947_v2  ;;  %v91_v7 = vld [vmem:[%s7352_s1 + $0x258] sm:$0xff] }
  0xa1   :  { %v147_v50 = vld [vmem:[%s7352_s1 + $0x418] sm:$0xff] }
  0xa2   :  { %2274 = vmatpush1.bf16.msra.mxu0 %v4928_v63  ;;  %2327 = vmatpush1.bf16.msra.mxu1 %v4930_v5  ;;  %v4966_v63 = vcombine.low %v115_v53, %v123_v54  ;;  %v4949_v5 = vcombine.high %v98_v62, %v106_v0  ;;  %v155_v53 = vld [vmem:[%s7352_s1 + $0x458] sm:$0xff]  ;;  %v4868_v54 = vcombine.low %v18_v40, %v26_v41 }
  0xa3   :  { %2275 = vmatprep.subr.bf16.mxu0 %v4913_v13  ;;  %2328 = vmatprep.subr.bf16.mxu1 %v4915_v37  ;;  %v4951_v13 = vcombine.high %v99_v1, %v107_v4  ;;  %v82_v37 = vld [vmem:[%s7352_s1 + $0x210] sm:$0xff] }
  0xa6   :  { %2276 = vmatpush1.bf16.msra.mxu0 %v4912_v8  ;;  %2329 = vmatpush1.bf16.msra.mxu1 %v4914_v9  ;;  %v4948_v8 = vcombine.low %v98_v62, %v106_v0  ;;  %v4950_v9 = vcombine.low %v99_v1, %v107_v4  ;;  %v133_v62 = vld [vmem:[%s7352_s1 + $0x3a8] sm:$0xff]  ;;  %v4996_v1 = vcombine.low %v146_v48, %v154_v49 }
  0xa7   :  { %2277 = vmatprep.subr.bf16.mxu0 %v4897_v10  ;;  %2330 = vmatprep.subr.bf16.mxu1 %v4899_v11  ;;  %v4933_v10 = vcombine.high %v82_v37, %v90_v38  ;;  %v4935_v11 = vcombine.high %v83_v15, %v91_v7  ;;  %v141_v0 = vld [vmem:[%s7352_s1 + $0x3e8] sm:$0xff]  ;;  %v4998_v4 = vcombine.low %v147_v50, %v155_v53 }
  0xaa   :  { %2278 = vmatpush1.bf16.msra.mxu0 %v4896_v18  ;;  %2331 = vmatpush1.bf16.msra.mxu1 %v4898_v19  ;;  %v4932_v18 = vcombine.low %v82_v37, %v90_v38  ;;  %v4934_v19 = vcombine.low %v83_v15, %v91_v7  ;;  %v117_v37 = vld [vmem:[%s7352_s1 + $0x328] sm:$0xff]  ;;  %v4986_v7 = vcombine.low %v133_v62, %v141_v0 }
  0xab   :  { %2279 = vmatprep.subr.bf16.mxu0 %v4881_v20  ;;  %2332 = vmatprep.subr.bf16.mxu1 %v4883_v21  ;;  %v4917_v20 = vcombine.high %v66_v12, %v74_v14  ;;  %v4919_v21 = vcombine.high %v67_v16, %v75_v17  ;;  %v125_v38 = vld [vmem:[%s7352_s1 + $0x368] sm:$0xff] }
  0xae   :  { %2280 = vmatpush1.bf16.msra.mxu0 %v4880_v26  ;;  %2333 = vmatpush1.bf16.msra.mxu1 %v4882_v27  ;;  %v4916_v26 = vcombine.low %v66_v12, %v74_v14  ;;  %v4918_v27 = vcombine.low %v67_v16, %v75_v17  ;;  %v101_v12 = vld [vmem:[%s7352_s1 + $0x2a8] sm:$0xff]  ;;  %v4970_v17 = vcombine.low %v117_v37, %v125_v38 }
  0xaf   :  { %2281 = vmatprep.subr.bf16.mxu0 %v4865_v28  ;;  %2334 = vmatprep.subr.bf16.mxu1 %v4867_v29  ;;  %v4901_v28 = vcombine.high %v50_v22, %v58_v23  ;;  %v4903_v29 = vcombine.high %v51_v24, %v59_v25  ;;  %v109_v14 = vld [vmem:[%s7352_s1 + $0x2e8] sm:$0xff] }
  0xb2   :  { %2282 = vmatpush1.bf16.msra.mxu0 %v4864_v34  ;;  %2335 = vmatpush1.bf16.msra.mxu1 %v4866_v35  ;;  %v4900_v34 = vcombine.low %v50_v22, %v58_v23  ;;  %v4902_v35 = vcombine.low %v51_v24, %v59_v25  ;;  %v85_v22 = vld [vmem:[%s7352_s1 + $0x228] sm:$0xff]  ;;  %v4954_v25 = vcombine.low %v101_v12, %v109_v14 }
  0xb3   :  { %2297 = vmatprep.subr.bf16.mxu0 %v4993_v36  ;;  %2350 = vmatprep.subr.bf16.mxu1 %v4995_v39  ;;  %v4885_v36 = vcombine.high %v34_v30, %v42_v31  ;;  %v4887_v39 = vcombine.high %v35_v32, %v43_v33  ;;  %v93_v23 = vld [vmem:[%s7352_s1 + $0x268] sm:$0xff] }
  0xb6   :  { %2298 = vmatpush2.bf16.msra.mxu0 %v4992_v44  ;;  %2351 = vmatpush2.bf16.msra.mxu1 %v4994_v45  ;;  %v4884_v44 = vcombine.low %v34_v30, %v42_v31  ;;  %v4886_v45 = vcombine.low %v35_v32, %v43_v33  ;;  %v69_v30 = vld [vmem:[%s7352_s1 + $0x1a8] sm:$0xff]  ;;  %v4938_v33 = vcombine.low %v85_v22, %v93_v23 }
  0xb7   :  { %2373 = vmatprep.subr.bf16.mxu0 %v4981_v46  ;;  %2426 = vmatprep.subr.bf16.mxu1 %v4983_v47  ;;  %v4869_v46 = vcombine.high %v18_v40, %v26_v41  ;;  %v4871_v47 = vcombine.high %v19_v42, %v27_v43  ;;  %v77_v31 = vld [vmem:[%s7352_s1 + $0x1e8] sm:$0xff] }
  0xb8   :  { %v53_v40 = vld [vmem:[%s7352_s1 + $0x128] sm:$0xff] }
  0xb9   :  { %2300 = vmatmul.mubr.bf16.vlgmr.msra.gmra.mxu0 %v6036_v52  ;;  %2353 = vmatmul.mubr.bf16.vlgmr.msra.gmra.mxu1 %v6036_v52  ;;  %v61_v41 = vld [vmem:[%s7352_s1 + $0x168] sm:$0xff] }
  0xba   :  { %2374 = vmatpush1.bf16.msra.mxu0 %v4980_v55  ;;  %2427 = vmatpush1.bf16.msra.mxu1 %v4982_v57  ;;  %v4870_v55 = vcombine.low %v19_v42, %v27_v43  ;;  %v4997_v57 = vcombine.high %v146_v48, %v154_v49  ;;  %v4922_v43 = vcombine.low %v69_v30, %v77_v31  ;;  %v37_v48 = vld [vmem:[%s7352_s1 + $0xa8] sm:$0xff] }
  0xbb   :  { %2375 = vmatprep.subr.bf16.mxu0 %v4965_v56  ;;  %2428 = vmatprep.subr.bf16.mxu1 %v4967_v58  ;;  %v4999_v56 = vcombine.high %v147_v50, %v155_v53  ;;  %v132_v58 = vld [vmem:[%s7352_s1 + $0x3a0] sm:$0xff]  ;;  %v45_v49 = vld [vmem:[%s7352_s1 + $0xe8] sm:$0xff]  ;;  %v4906_v53 = vcombine.low %v53_v40, %v61_v41 }
  0xbc   :  { %5009 = vmatprep.mubr.msk.bf16.mxu0 %vm1092_vm3, %v6053_v61  ;;  %5011 = vmatprep.mubr.msk.bf16.mxu1 %vm1092_vm3, %v6053_v61  ;;  %v4984_v15 = vcombine.low %v132_v58, %v140_v59 }
  0xbe   :  { %2376 = vmatpush1.bf16.msra.mxu0 %v4964_v3  ;;  %2429 = vmatpush1.bf16.msra.mxu1 %v4966_v63  ;;  %v4985_v3 = vcombine.high %v132_v58, %v140_v59  ;;  %v4987_v63 = vcombine.high %v133_v62, %v141_v0  ;;  %v21_v58 = vld [vmem:[%s7352_s1 + $0x28] sm:$0xff]  ;;  %v4890_v0 = vcombine.low %v37_v48, %v45_v49 }
  0xbf   :  { %2377 = vmatprep.subr.bf16.mxu0 %v4949_v5  ;;  %2430 = vmatprep.subr.bf16.mxu1 %v4951_v13  ;;  %v116_v5 = vld [vmem:[%s7352_s1 + $0x320] sm:$0xff]  ;;  %v29_v59 = vld [vmem:[%s7352_s1 + $0x68] sm:$0xff] }
  0xc0   :  { %v124_v13 = vld [vmem:[%s7352_s1 + $0x360] sm:$0xff] }
  0xc1   :  { %2310 = vmatmul.mubr.bf16.gmra.mxu0 %v6080_v6  ;;  %2363 = vmatmul.mubr.bf16.gmra.mxu1 %v6080_v6  ;;  %v4968_v16 = vcombine.low %v116_v5, %v124_v13 }
  0xc2   :  { %2378 = vmatpush1.bf16.msra.mxu0 %v4948_v8  ;;  %2431 = vmatpush1.bf16.msra.mxu1 %v4950_v9  ;;  %v4969_v8 = vcombine.high %v116_v5, %v124_v13  ;;  %v4971_v9 = vcombine.high %v117_v37, %v125_v38  ;;  %v149_v5 = vld [vmem:[%s7352_s1 + $0x428] sm:$0xff]  ;;  %v4874_v38 = vcombine.low %v21_v58, %v29_v59 }
  0xc3   :  { %2379 = vmatprep.subr.bf16.mxu0 %v4933_v10  ;;  %2432 = vmatprep.subr.bf16.mxu1 %v4935_v11  ;;  %v100_v10 = vld [vmem:[%s7352_s1 + $0x2a0] sm:$0xff]  ;;  %v157_v13 = vld [vmem:[%s7352_s1 + $0x468] sm:$0xff] }
  0xc4   :  { %5012 = vmatprep.mubr.msk.bf16.mxu0 %vm1092_vm3, %v5947_v2  ;;  %5014 = vmatprep.mubr.msk.bf16.mxu1 %vm1092_vm3, %v5947_v2  ;;  %v108_v11 = vld [vmem:[%s7352_s1 + $0x2e0] sm:$0xff] }
  0xc5   :  { %v4952_v24 = vcombine.low %v100_v10, %v108_v11 }
  0xc6   :  { %2380 = vmatpush1.bf16.msra.mxu0 %v4932_v18  ;;  %2433 = vmatpush1.bf16.msra.mxu1 %v4934_v19  ;;  %v4953_v18 = vcombine.high %v100_v10, %v108_v11  ;;  %v4955_v19 = vcombine.high %v101_v12, %v109_v14  ;;  %v135_v10 = vld [vmem:[%s7352_s1 + $0x3b8] sm:$0xff]  ;;  %v5002_v14 = vcombine.low %v149_v5, %v157_v13 }
  0xc7   :  { %2381 = vmatprep.subr.bf16.mxu0 %v4917_v20  ;;  %2434 = vmatprep.subr.bf16.mxu1 %v4919_v21  ;;  %v84_v20 = vld [vmem:[%s7352_s1 + $0x220] sm:$0xff]  ;;  %v143_v11 = vld [vmem:[%s7352_s1 + $0x3f8] sm:$0xff] }
  0xc8   :  { %v92_v21 = vld [vmem:[%s7352_s1 + $0x260] sm:$0xff] }
  0xc9   :  { %v4936_v32 = vcombine.low %v84_v20, %v92_v21 }
  0xca   :  { %2382 = vmatpush1.bf16.msra.mxu0 %v4916_v26  ;;  %2435 = vmatpush1.bf16.msra.mxu1 %v4918_v27  ;;  %v4937_v26 = vcombine.high %v84_v20, %v92_v21  ;;  %v4939_v27 = vcombine.high %v85_v22, %v93_v23  ;;  %v119_v20 = vld [vmem:[%s7352_s1 + $0x338] sm:$0xff]  ;;  %v4990_v23 = vcombine.low %v135_v10, %v143_v11 }
  0xcb   :  { %2383 = vmatprep.subr.bf16.mxu0 %v4901_v28  ;;  %2436 = vmatprep.subr.bf16.mxu1 %v4903_v29  ;;  %v68_v28 = vld [vmem:[%s7352_s1 + $0x1a0] sm:$0xff]  ;;  %v127_v21 = vld [vmem:[%s7352_s1 + $0x378] sm:$0xff] }
  0xcc   :  { %v76_v29 = vld [vmem:[%s7352_s1 + $0x1e0] sm:$0xff] }
  0xcd   :  { %v4920_v42 = vcombine.low %v68_v28, %v76_v29 }
  0xce   :  { %2384 = vmatpush1.bf16.msra.mxu0 %v4900_v34  ;;  %2437 = vmatpush1.bf16.msra.mxu1 %v4902_v35  ;;  %v4921_v34 = vcombine.high %v68_v28, %v76_v29  ;;  %v4923_v35 = vcombine.high %v69_v30, %v77_v31  ;;  %v103_v28 = vld [vmem:[%s7352_s1 + $0x2b8] sm:$0xff]  ;;  %v4974_v31 = vcombine.low %v119_v20, %v127_v21 }
  0xcf   :  { %2385 = vmatprep.subr.bf16.mxu0 %v4885_v36  ;;  %2438 = vmatprep.subr.bf16.mxu1 %v4887_v39  ;;  %v52_v36 = vld [vmem:[%s7352_s1 + $0x120] sm:$0xff]  ;;  %v111_v29 = vld [vmem:[%s7352_s1 + $0x2f8] sm:$0xff] }
  0xd0   :  { %v60_v39 = vld [vmem:[%s7352_s1 + $0x160] sm:$0xff] }
  0xd1   :  { %v4904_v50 = vcombine.low %v52_v36, %v60_v39 }
  0xd2   :  { %2386 = vmatpush1.bf16.msra.mxu0 %v4884_v44  ;;  %2439 = vmatpush1.bf16.msra.mxu1 %v4886_v45  ;;  %v4905_v44 = vcombine.high %v52_v36, %v60_v39  ;;  %v4907_v45 = vcombine.high %v53_v40, %v61_v41  ;;  %v87_v36 = vld [vmem:[%s7352_s1 + $0x238] sm:$0xff]  ;;  %v4958_v41 = vcombine.low %v103_v28, %v111_v29 }
  0xd3   :  { %2387 = vmatprep.subr.bf16.mxu0 %v4869_v46  ;;  %2440 = vmatprep.subr.bf16.mxu1 %v4871_v47  ;;  %v36_v46 = vld [vmem:[%s7352_s1 + $0xa0] sm:$0xff]  ;;  %v95_v39 = vld [vmem:[%s7352_s1 + $0x278] sm:$0xff] }
  0xd4   :  { %v44_v47 = vld [vmem:[%s7352_s1 + $0xe0] sm:$0xff] }
  0xd5   :  { %v4888_v62 = vcombine.low %v36_v46, %v44_v47 }
  0xd6   :  { %2388 = vmatpush1.bf16.msra.mxu0 %v4868_v54  ;;  %2441 = vmatpush1.bf16.msra.mxu1 %v4870_v55  ;;  %v4889_v54 = vcombine.high %v36_v46, %v44_v47  ;;  %v4891_v55 = vcombine.high %v37_v48, %v45_v49  ;;  %v71_v46 = vld [vmem:[%s7352_s1 + $0x1b8] sm:$0xff]  ;;  %v4942_v49 = vcombine.low %v87_v36, %v95_v39 }
  0xd7   :  { %2403 = vmatprep.subr.bf16.mxu0 %v4997_v57  ;;  %2456 = vmatprep.subr.bf16.mxu1 %v4999_v56  ;;  %v20_v57 = vld [vmem:[%s7352_s1 + $0x20] sm:$0xff]  ;;  %v79_v47 = vld [vmem:[%s7352_s1 + $0x1f8] sm:$0xff] }
  0xd8   :  { %v28_v56 = vld [vmem:[%s7352_s1 + $0x60] sm:$0xff] }
  0xd9   :  { %v4872_v37 = vcombine.low %v20_v57, %v28_v56 }
  0xda   :  { %2404 = vmatpush2.bf16.msra.mxu0 %v4996_v1  ;;  %2457 = vmatpush2.bf16.msra.mxu1 %v4998_v4  ;;  %v4873_v1 = vcombine.high %v20_v57, %v28_v56  ;;  %v4875_v4 = vcombine.high %v21_v58, %v29_v59  ;;  %v55_v57 = vld [vmem:[%s7352_s1 + $0x138] sm:$0xff]  ;;  %v4926_v59 = vcombine.low %v71_v46, %v79_v47 }
  0xdb   :  { %2479 = vmatprep.subr.bf16.mxu0 %v4985_v3  ;;  %2532 = vmatprep.subr.bf16.mxu1 %v4987_v63  ;;  %v148_v3 = vld [vmem:[%s7352_s1 + $0x420] sm:$0xff]  ;;  %v63_v56 = vld [vmem:[%s7352_s1 + $0x178] sm:$0xff] }
  0xdc   :  { %v156_v63 = vld [vmem:[%s7352_s1 + $0x460] sm:$0xff] }
  0xdd   :  { %2406 = vmatmul.mubr.bf16.vlgmr.msra.gmra.mxu0 %v6036_v52  ;;  %2459 = vmatmul.mubr.bf16.vlgmr.msra.gmra.mxu1 %v6036_v52  ;;  %v5000_v12 = vcombine.low %v148_v3, %v156_v63 }
  0xde   :  { %2480 = vmatpush1.bf16.msra.mxu0 %v4984_v15  ;;  %2533 = vmatpush1.bf16.msra.mxu1 %v4986_v7  ;;  %v5001_v15 = vcombine.high %v148_v3, %v156_v63  ;;  %v5003_v7 = vcombine.high %v149_v5, %v157_v13  ;;  %v47_v3 = vld [vmem:[%s7352_s1 + $0xf8] sm:$0xff]  ;;  %v4910_v5 = vcombine.low %v55_v57, %v63_v56 }
  0xdf   :  { %2481 = vmatprep.subr.bf16.mxu0 %v4969_v8  ;;  %2534 = vmatprep.subr.bf16.mxu1 %v4971_v9  ;;  %v134_v8 = vld [vmem:[%s7352_s1 + $0x3b0] sm:$0xff] }
  0xe0   :  { %5013 = vmatprep.mubr.msk.bf16.mxu0 %vm1092_vm3, %v6053_v61  ;;  %5015 = vmatprep.mubr.msk.bf16.mxu1 %vm1092_vm3, %v6053_v61  ;;  %v142_v9 = vld [vmem:[%s7352_s1 + $0x3f0] sm:$0xff] }
  0xe1   :  { %v4988_v22 = vcombine.low %v134_v8, %v142_v9 }
  0xe2   :  { %2482 = vmatpush1.bf16.msra.mxu0 %v4968_v16  ;;  %2535 = vmatpush1.bf16.msra.mxu1 %v4970_v17  ;;  %v4989_v16 = vcombine.high %v134_v8, %v142_v9  ;;  %v4991_v17 = vcombine.high %v135_v10, %v143_v11  ;;  %v31_v8 = vld [vmem:[%s7352_s1 + $0x78] sm:$0xff] }
  0xe3   :  { %2483 = vmatprep.subr.bf16.mxu0 %v4953_v18  ;;  %2536 = vmatprep.subr.bf16.mxu1 %v4955_v19  ;;  %v118_v18 = vld [vmem:[%s7352_s1 + $0x330] sm:$0xff] }
  0xe4   :  { %v126_v19 = vld [vmem:[%s7352_s1 + $0x370] sm:$0xff] }
  0xe5   :  { %2416 = vmatmul.mubr.bf16.gmra.mxu0 %v6080_v6  ;;  %2469 = vmatmul.mubr.bf16.gmra.mxu1 %v6080_v6  ;;  %v4972_v30 = vcombine.low %v118_v18, %v126_v19 }
  0xe6   :  { %2484 = vmatpush1.bf16.msra.mxu0 %v4952_v24  ;;  %2537 = vmatpush1.bf16.msra.mxu1 %v4954_v25  ;;  %v4973_v24 = vcombine.high %v118_v18, %v126_v19  ;;  %v4975_v25 = vcombine.high %v119_v20, %v127_v21  ;;  %v159_v18 = vld [vmem:[%s7352_s1 + $0x478] sm:$0xff] }
  0xe7   :  { %2485 = vmatprep.subr.bf16.mxu0 %v4937_v26  ;;  %2538 = vmatprep.subr.bf16.mxu1 %v4939_v27  ;;  %v102_v26 = vld [vmem:[%s7352_s1 + $0x2b0] sm:$0xff] }
  0xe8   :  { %5016 = vmatprep.mubr.msk.bf16.mxu0 %vm1092_vm3, %v5947_v2  ;;  %5018 = vmatprep.mubr.msk.bf16.mxu1 %vm1092_vm3, %v5947_v2  ;;  %v110_v27 = vld [vmem:[%s7352_s1 + $0x2f0] sm:$0xff] }
  0xe9   :  { %v4956_v40 = vcombine.low %v102_v26, %v110_v27 }
  0xea   :  { %2486 = vmatpush1.bf16.msra.mxu0 %v4936_v32  ;;  %2539 = vmatpush1.bf16.msra.mxu1 %v4938_v33  ;;  %v4957_v32 = vcombine.high %v102_v26, %v110_v27  ;;  %v4959_v33 = vcombine.high %v103_v28, %v111_v29  ;;  %v5147_v26 = vld [vmem:[%s7352_s1 + $0xcc8] sm:$0xff] }
  0xeb   :  { %2487 = vmatprep.subr.bf16.mxu0 %v4921_v34  ;;  %2540 = vmatprep.subr.bf16.mxu1 %v4923_v35  ;;  %v86_v34 = vld [vmem:[%s7352_s1 + $0x230] sm:$0xff] }
  0xec   :  { %v94_v35 = vld [vmem:[%s7352_s1 + $0x270] sm:$0xff] }
  0xed   :  { %v4940_v48 = vcombine.low %v86_v34, %v94_v35 }
  0xee   :  { %2488 = vmatpush1.bf16.msra.mxu0 %v4920_v42  ;;  %2541 = vmatpush1.bf16.msra.mxu1 %v4922_v43  ;;  %v4941_v42 = vcombine.high %v86_v34, %v94_v35  ;;  %v4943_v43 = vcombine.high %v87_v36, %v95_v39  ;;  %v5123_v34 = vld [vmem:[%s7352_s1 + $0xc08] sm:$0xff]  ;;  %v2702_v36 = vrot.slane %v6033_v51, 5  ;;  %v6421_v39 = vpop.f32.mrf.mxu1  ;;  %v5106_v51 = vld [vmem:[%s7352_s1 + $0xb80] sm:$0xff] }
  0xef   :  { %2489 = vmatprep.subr.bf16.mxu0 %v4905_v44  ;;  %2542 = vmatprep.subr.bf16.mxu1 %v4907_v45  ;;  %v70_v44 = vld [vmem:[%s7352_s1 + $0x1b0] sm:$0xff]  ;;  %v5131_v35 = vld [vmem:[%s7352_s1 + $0xc48] sm:$0xff] }
  0xf0   :  { %v78_v45 = vld [vmem:[%s7352_s1 + $0x1f0] sm:$0xff] }
  0xf1   :  { %v4924_v58 = vcombine.low %v70_v44, %v78_v45 }
  0xf2   :  { %2490 = vmatpush1.bf16.msra.mxu0 %v4904_v50  ;;  %2543 = vmatpush1.bf16.msra.mxu1 %v4906_v53  ;;  %v4925_v50 = vcombine.high %v70_v44, %v78_v45  ;;  %v4927_v53 = vcombine.high %v71_v46, %v79_v47  ;;  %v5273_v44 = vcombine.high %v5123_v34, %v5131_v35  ;;  %v5114_v45 = vld [vmem:[%s7352_s1 + $0xbc0] sm:$0xff]  ;;  %v5107_v47 = vld [vmem:[%s7352_s1 + $0xb88] sm:$0xff] }
  0xf3   :  { %2491 = vmatprep.subr.bf16.mxu0 %v4889_v54  ;;  %2544 = vmatprep.subr.bf16.mxu1 %v4891_v55  ;;  %v54_v54 = vld [vmem:[%s7352_s1 + $0x130] sm:$0xff] }
  0xf4   :  { %v62_v55 = vld [vmem:[%s7352_s1 + $0x170] sm:$0xff] }
  0xf5   :  { %v4908_v63 = vcombine.low %v54_v54, %v62_v55 }
  0xf6   :  { %2492 = vmatpush1.bf16.msra.mxu0 %v4888_v62  ;;  %2545 = vmatpush1.bf16.msra.mxu1 %v4890_v0  ;;  %v4909_v62 = vcombine.high %v54_v54, %v62_v55  ;;  %v4911_v0 = vcombine.high %v55_v57, %v63_v56  ;;  %v6444_v55 = vpop.f32.mrf.mxu1  ;;  %v5116_v56 = vld [vmem:[%s7352_s1 + $0xbd0] sm:$0xff] }
  0xf7   :  { %2493 = vmatprep.subr.bf16.mxu0 %v4873_v1  ;;  %2546 = vmatprep.subr.bf16.mxu1 %v4875_v4  ;;  %v38_v1 = vld [vmem:[%s7352_s1 + $0xb0] sm:$0xff] }
  0xf8   :  { %v46_v4 = vld [vmem:[%s7352_s1 + $0xf0] sm:$0xff] }
  0xf9   :  { %v4893_v13 = vcombine.high %v38_v1, %v46_v4  ;;  %v4892_v9 = vcombine.low %v38_v1, %v46_v4  ;;  %v5091_v4 = vld [vmem:[%s7352_s1 + $0xb08] sm:$0xff] }
  0xfa   :  { %2494 = vmatpush1.bf16.msra.mxu0 %v4872_v37  ;;  %2547 = vmatpush1.bf16.msra.mxu1 %v4874_v38  ;;  %v22_v38 = vld [vmem:[%s7352_s1 + $0x30] sm:$0xff] }
  0xfb   :  { %2509 = vmatprep.subr.bf16.mxu0 %v5001_v15  ;;  %2562 = vmatprep.subr.bf16.mxu1 %v5003_v7  ;;  %v30_v15 = vld [vmem:[%s7352_s1 + $0x70] sm:$0xff]  ;;  %v23_v7 = vld [vmem:[%s7352_s1 + $0x38] sm:$0xff] }
  0xfc   :  { %v4877_v11 = vcombine.high %v22_v38, %v30_v15  ;;  %v4876_v19 = vcombine.low %v22_v38, %v30_v15  ;;  %v4878_v20 = vcombine.low %v23_v7, %v31_v8  ;;  %v5074_v15 = vld [vmem:[%s7352_s1 + $0xa80] sm:$0xff] }
  0xfe   :  { %2510 = vmatpush2.bf16.msra.mxu0 %v5000_v12  ;;  %2563 = vmatpush2.bf16.msra.mxu1 %v5002_v14  ;;  %v4879_v12 = vcombine.high %v23_v7, %v31_v8  ;;  %v150_v14 = vld [vmem:[%s7352_s1 + $0x430] sm:$0xff]  ;;  %v5082_v7 = vld [vmem:[%s7352_s1 + $0xac0] sm:$0xff] }
  0xff   :  { %2585 = vmatprep.subr.bf16.mxu0 %v4989_v16  ;;  %2638 = vmatprep.subr.bf16.mxu1 %v4991_v17  ;;  %v158_v16 = vld [vmem:[%s7352_s1 + $0x470] sm:$0xff]  ;;  %v151_v17 = vld [vmem:[%s7352_s1 + $0x438] sm:$0xff] }
 0x100   :  { %v5005_v21 = vcombine.high %v150_v14, %v158_v16  ;;  %v5004_v27 = vcombine.low %v150_v14, %v158_v16  ;;  %v5006_v28 = vcombine.low %v151_v17, %v159_v18 }
 0x101   :  { %2512 = vmatmul.mubr.bf16.vlgmr.msra.gmra.mxu0 %v6036_v52  ;;  %2565 = vmatmul.mubr.bf16.vlgmr.msra.gmra.mxu1 %v6036_v52 }
 0x102   :  { %2586 = vmatpush1.bf16.msra.mxu0 %v4988_v22  ;;  %2639 = vmatpush1.bf16.msra.mxu1 %v4990_v23  ;;  %v5007_v22 = vcombine.high %v151_v17, %v159_v18  ;;  %v5138_v23 = vld [vmem:[%s7352_s1 + $0xc80] sm:$0xff]  ;;  %v5223_v18 = vcombine.high %v5074_v15, %v5082_v7 }
 0x103   :  { %2587 = vmatprep.subr.bf16.mxu0 %v4973_v24  ;;  %2640 = vmatprep.subr.bf16.mxu1 %v4975_v25  ;;  %v5146_v24 = vld [vmem:[%s7352_s1 + $0xcc0] sm:$0xff]  ;;  %v5139_v25 = vld [vmem:[%s7352_s1 + $0xc88] sm:$0xff] }
 0x104   :  { %5017 = vmatprep.mubr.msk.bf16.mxu0 %vm1092_vm3, %v6053_v61  ;;  %5019 = vmatprep.mubr.msk.bf16.mxu1 %vm1092_vm3, %v6053_v61  ;;  %v5287_v29 = vcombine.high %v5138_v23, %v5146_v24 }
 0x106   :  { %2588 = vmatpush1.bf16.msra.mxu0 %v4972_v30  ;;  %2641 = vmatpush1.bf16.msra.mxu1 %v4974_v31  ;;  %v5289_v30 = vcombine.high %v5139_v25, %v5147_v26  ;;  %v5122_v31 = vld [vmem:[%s7352_s1 + $0xc00] sm:$0xff] }
 0x107   :  { %2589 = vmatprep.subr.bf16.mxu0 %v4957_v32  ;;  %2642 = vmatprep.subr.bf16.mxu1 %v4959_v33  ;;  %v5130_v32 = vld [vmem:[%s7352_s1 + $0xc40] sm:$0xff]  ;;  %v6412_v33 = vpop.f32.mrf.mxu0 }
 0x108   :  { %v5270_v57 = vcombine.low %v5122_v31, %v5130_v32 }
 0x109   :  { %2522 = vmatmul.mubr.bf16.gmra.mxu0 %v6080_v6  ;;  %2575 = vmatmul.mubr.bf16.gmra.mxu1 %v6080_v6  ;;  %v6432_v46 = vpop.f32.mrf.mxu0 }
 0x10a   :  { %2590 = vmatpush1.bf16.msra.mxu0 %v4956_v40  ;;  %2643 = vmatpush1.bf16.msra.mxu1 %v4958_v41  ;;  %v5286_v40 = vcombine.low %v5138_v23, %v5146_v24  ;;  %v2691_v41 = vld [vmem:[%s7353_s0] sm:$0xee]  ;;  %v5067_v23 = vld [vmem:[%s7352_s1 + $0xa48] sm:$0xff]  ;;  %v5222_v24 = vcombine.low %v5074_v15, %v5082_v7  ;;  %v5140_v7 = vld [vmem:[%s7352_s1 + $0xc90] sm:$0xff] }
 0x10b   :  { %2591 = vmatprep.subr.bf16.mxu0 %v4941_v42  ;;  %2644 = vmatprep.subr.bf16.mxu1 %v4943_v43  ;;  %v5288_v42 = vcombine.low %v5139_v25, %v5147_v26  ;;  %v5271_v43 = vcombine.high %v5122_v31, %v5130_v32  ;;  %v6461_v1 = vpop.f32.mrf.mxu0  ;;  %v5050_v31 = vld [vmem:[%s7352_s1 + $0x9c0] sm:$0xff]  ;;  %v5043_v32 = vld [vmem:[%s7352_s1 + $0x988] sm:$0xff] }
 0x10c   :  { %5020 = vmatprep.mubr.msk.bf16.mxu0 %vm1092_vm3, %v5947_v2  ;;  %5022 = vmatprep.mubr.msk.bf16.mxu1 %vm1092_vm3, %v5947_v2  ;;  %v39_v2 = vld [vmem:[%s7352_s1 + $0xb8] sm:$0xff] }
 0x10d   :  { %v4895_v37 = vcombine.high %v39_v2, %v47_v3  ;;  %v4894_v10 = vcombine.low %v39_v2, %v47_v3  ;;  %v5099_v2 = vld [vmem:[%s7352_s1 + $0xb48] sm:$0xff] }
 0x10e   :  { %2592 = vmatpush1.bf16.msra.mxu0 %v4940_v48  ;;  %2645 = vmatpush1.bf16.msra.mxu1 %v4942_v49  ;;  %v5115_v48 = vld [vmem:[%s7352_s1 + $0xbc8] sm:$0xff]  ;;  %v5024_v49 = vrot.slane %v2691_v41, 9  ;;  %v5241_v38 = vcombine.high %v5091_v4, %v5099_v2  ;;  %v5240_v17 = vcombine.low %v5091_v4, %v5099_v2  ;;  %v2709_v4 = vrot.slane %v6050_v60, 5  ;;  %v5148_v60 = vld [vmem:[%s7352_s1 + $0xcd0] sm:$0xff] }
 0x10f   :  { %2593 = vmatprep.subr.bf16.mxu0 %v4925_v50  ;;  %2646 = vmatprep.subr.bf16.mxu1 %v4927_v53  ;;  %v2704_v50 = vrot.slane %v2702_v36, 4  ;;  %v5343_v53 = vld [vmem:[%s7353_s0 + $0x10] sm:$0x11] }
 0x110   :  { %v2705_v54 = vrot.slane %v5343_v53, 5  ;;  %v6473_v3 = vsel %vm6449_vm6, %v5024_v49, %v2702_v36 }
 0x112   :  { %2594 = vmatpush1.bf16.msra.mxu0 %v4924_v58  ;;  %2647 = vmatpush1.bf16.msra.mxu1 %v4926_v59  ;;  %v5272_v58 = vcombine.low %v5123_v34, %v5131_v35  ;;  %v5255_v59 = vcombine.high %v5106_v51, %v5114_v45  ;;  %v5051_v34 = vld [vmem:[%s7352_s1 + $0x9c8] sm:$0xff] }
 0x113   :  { %2595 = vmatprep.subr.bf16.mxu0 %v4909_v62  ;;  %2648 = vmatprep.subr.bf16.mxu1 %v4911_v0  ;;  %v5257_v62 = vcombine.high %v5107_v47, %v5115_v48  ;;  %v5098_v0 = vld [vmem:[%s7352_s1 + $0xb40] sm:$0xff] }
 0x116   :  { %2596 = vmatpush1.bf16.msra.mxu0 %v4908_v63  ;;  %2649 = vmatpush1.bf16.msra.mxu1 %v4910_v5  ;;  %v6477_v63 = vsel %vm6449_vm6, %v2704_v50, %v2705_v54  ;;  %v6479_v5 = vpop.f32.mrf.mxu1  ;;  %v5192_v50 = vcombine.low %v5043_v32, %v5051_v34 }
 0x117   :  { %2597 = vmatprep.subr.bf16.mxu0 %v4893_v13  ;;  %2650 = vmatprep.subr.bf16.mxu1 %v4895_v37  ;;  %v5256_v13 = vcombine.low %v5107_v47, %v5115_v48  ;;  %v6489_v8 = vcombine.high %v6473_v3, %v6477_v63  ;;  %v5035_v47 = vld [vmem:[%s7352_s1 + $0x948] sm:$0xff] }
 0x11a   :  { %2598 = vmatpush1.bf16.msra.mxu0 %v4892_v9  ;;  %2651 = vmatpush1.bf16.msra.mxu1 %v4894_v10  ;;  %v6491_v9 = vpop.f32.mrf.mxu0  ;;  %v5075_v10 = vld [vmem:[%s7352_s1 + $0xa88] sm:$0xff] }
 0x11b   :  { %2599 = vmatprep.subr.bf16.mxu0 %v4877_v11  ;;  %2652 = vmatprep.subr.bf16.mxu1 %v4879_v12  ;;  %v5083_v11 = vld [vmem:[%s7352_s1 + $0xac8] sm:$0xff]  ;;  %v6500_v12 = vpop.f32.mrf.mxu1 }
 0x11c   :  { %v6503_v16 = vpop.f32.mrf.mxu0  ;;  %v5224_v26 = vcombine.low %v5075_v10, %v5083_v11 }
 0x11e   :  { %2600 = vmatpush1.bf16.msra.mxu0 %v4876_v19  ;;  %2653 = vmatpush1.bf16.msra.mxu1 %v4878_v20  ;;  %v6505_v19 = vpop.f32.mrf.mxu1  ;;  %v5225_v20 = vcombine.high %v5075_v10, %v5083_v11  ;;  %v6523_v25 = vpop.f32.mrf.mxu0  ;;  %v5141_v11 = vld [vmem:[%s7352_s1 + $0xc98] sm:$0xff] }
 0x11f   :  { %2615 = vmatprep.subr.bf16.mxu0 %v5005_v21  ;;  %2668 = vmatprep.subr.bf16.mxu1 %v5007_v22  ;;  %v5058_v21 = vld [vmem:[%s7352_s1 + $0xa00] sm:$0xff]  ;;  %v5059_v22 = vld [vmem:[%s7352_s1 + $0xa08] sm:$0xff] }
 0x120   :  { %v6539_v36 = vpop.f32.mrf.mxu0 }
 0x122   :  { %2616 = vmatpush2.bf16.msra.mxu0 %v5004_v27  ;;  %2669 = vmatpush2.bf16.msra.mxu1 %v5006_v28  ;;  %v6525_v28 = vpop.f32.mrf.mxu1  ;;  %v6555_v49 = vpop.f32.mrf.mxu0 }
 0x123   :  { %3599 = vmatprep.subr.bf16.mxu0 %v5287_v29  ;;  %3652 = vmatprep.subr.bf16.mxu1 %v5289_v30  ;;  %v5209_v29 = vcombine.high %v5059_v22, %v5067_v23  ;;  %v5042_v30 = vld [vmem:[%s7352_s1 + $0x980] sm:$0xff] }
 0x124   :  { %v5191_v41 = vcombine.high %v5042_v30, %v5050_v31  ;;  %v5190_v48 = vcombine.low %v5042_v30, %v5050_v31  ;;  %v6608_v31 = vcombine.low %v6473_v3, %v6477_v63 }
 0x125   :  { %2618 = vmatmul.mubr.bf16.vlgmr.msra.gmra.mxu0 %v6036_v52  ;;  %2671 = vmatmul.mubr.bf16.vlgmr.msra.gmra.mxu1 %v6036_v52  ;;  %v5090_v52 = vld [vmem:[%s7352_s1 + $0xb00] sm:$0xff] }
 0x126   :  { %3600 = vmatpush1.bf16.msra.mxu0 %v5286_v40  ;;  %3653 = vmatpush1.bf16.msra.mxu1 %v5288_v42  ;;  %v5239_v37 = vcombine.high %v5090_v52, %v5098_v0  ;;  %v5238_v14 = vcombine.low %v5090_v52, %v5098_v0  ;;  %v5208_v40 = vcombine.low %v5059_v22, %v5067_v23  ;;  %v6541_v42 = vpop.f32.mrf.mxu1  ;;  %v5155_v52 = vld [vmem:[%s7352_s1 + $0xd08] sm:$0xff] }
 0x127   :  { %3601 = vmatprep.subr.bf16.mxu0 %v5271_v43  ;;  %3654 = vmatprep.subr.bf16.mxu1 %v5273_v44  ;;  %v5193_v43 = vcombine.high %v5043_v32, %v5051_v34  ;;  %v5026_v44 = vld [vmem:[%s7352_s1 + $0x900] sm:$0xff]  ;;  %v5163_v0 = vld [vmem:[%s7352_s1 + $0xd48] sm:$0xff]  ;;  %v5125_v32 = vld [vmem:[%s7352_s1 + $0xc18] sm:$0xff] }
 0x128   :  { %5021 = vmatprep.mubr.msk.bf16.mxu0 %vm1092_vm3, %v6053_v61  ;;  %5023 = vmatprep.mubr.msk.bf16.mxu1 %vm1092_vm3, %v6053_v61  ;;  %v5254_v61 = vcombine.low %v5106_v51, %v5114_v45  ;;  %v5034_v51 = vld [vmem:[%s7352_s1 + $0x940] sm:$0xff]  ;;  %v5027_v45 = vld [vmem:[%s7352_s1 + $0x908] sm:$0xff]  ;;  %v6557_v54 = vpop.f32.mrf.mxu1  ;;  %v5305_v15 = vcombine.high %v5155_v52, %v5163_v0  ;;  %v5304_v23 = vcombine.low %v5155_v52, %v5163_v0  ;;  %v5133_v34 = vld [vmem:[%s7352_s1 + $0xc58] sm:$0xff] }
 0x129   :  { %v5175_v53 = vcombine.high %v5026_v44, %v5034_v51 }
 0x12a   :  { %3602 = vmatpush1.bf16.msra.mxu0 %v5270_v57  ;;  %3655 = vmatpush1.bf16.msra.mxu1 %v5272_v58  ;;  %v5177_v57 = vcombine.high %v5027_v45, %v5035_v47  ;;  %v5154_v58 = vld [vmem:[%s7352_s1 + $0xd00] sm:$0xff]  ;;  %v6574_v2 = vpop.f32.mrf.mxu1 }
 0x12b   :  { %3603 = vmatprep.subr.bf16.mxu0 %v5255_v59  ;;  %3656 = vmatprep.subr.bf16.mxu1 %v5257_v62  ;;  %v5162_v59 = vld [vmem:[%s7352_s1 + $0xd40] sm:$0xff]  ;;  %v6565_v62 = vpop.f32.mrf.mxu0 }
 0x12c   :  { %v5302_v22 = vcombine.low %v5154_v58, %v5162_v59 }
 0x12d   :  { %2628 = vmatmul.mubr.bf16.gmra.mxu0 %v6080_v6  ;;  %2681 = vmatmul.mubr.bf16.gmra.mxu1 %v6080_v6  ;;  %v5066_v6 = vld [vmem:[%s7352_s1 + $0xa40] sm:$0xff]  ;;  %v6585_v10 = vpop.f32.mrf.mxu0 }
 0x12e   :  { %3604 = vmatpush1.bf16.msra.mxu0 %v5254_v61  ;;  %3657 = vmatpush1.bf16.msra.mxu1 %v5256_v13  ;;  %v5207_v27 = vcombine.high %v5058_v21, %v5066_v6  ;;  %v5206_v35 = vcombine.low %v5058_v21, %v5066_v6  ;;  %v5174_v61 = vcombine.low %v5026_v44, %v5034_v51  ;;  %v2692_v13 = vld [vmem:[%s7353_s0 + $0x18] sm:$0xee]  ;;  %v6596_v6 = vpop.f32.mrf.mxu1 }
 0x12f   :  { %3605 = vmatprep.subr.bf16.mxu0 %v5239_v37  ;;  %3658 = vmatprep.subr.bf16.mxu1 %v5241_v38  ;;  %v5176_v37 = vcombine.low %v5027_v45, %v5035_v47  ;;  %v5303_v38 = vcombine.high %v5154_v58, %v5162_v59  ;;  %v6604_v30 = vpop.f32.mrf.mxu0  ;;  %v5277_v44 = vcombine.high %v5125_v32, %v5133_v34  ;;  %v5108_v45 = vld [vmem:[%s7352_s1 + $0xb90] sm:$0xff] }
 0x130   :  { %5318 = vmatprep.mubr.msk.bf16.mxu0 %vm1092_vm3, %v6489_v8  ;;  %5320 = vmatprep.mubr.msk.bf16.mxu1 %vm1092_vm3, %v6489_v8  ;;  %v5276_v59 = vcombine.low %v5125_v32, %v5133_v34  ;;  %v5259_v52 = vcombine.high %v5108_v45, %v5116_v56 }
 0x131   :  { %v6630_v47 = vpop.f32.mrf.mxu0 }
 0x132   :  { %3606 = vmatpush1.bf16.msra.mxu0 %v5238_v14  ;;  %3659 = vmatpush1.bf16.msra.mxu1 %v5240_v17  ;;  %v5149_v14 = vld [vmem:[%s7352_s1 + $0xcd8] sm:$0xff]  ;;  %v5025_v17 = vrot.slane %v2692_v13, 9  ;;  %v5100_v13 = vld [vmem:[%s7352_s1 + $0xb50] sm:$0xff] }
 0x133   :  { %3607 = vmatprep.subr.bf16.mxu0 %v5223_v18  ;;  %3660 = vmatprep.subr.bf16.mxu1 %v5225_v20  ;;  %v2711_v18 = vrot.slane %v2709_v4, 4  ;;  %v5344_v20 = vld [vmem:[%s7353_s0 + $0x28] sm:$0x11]  ;;  %v5292_v3 = vcombine.low %v5141_v11, %v5149_v14  ;;  %v6642_v58 = vpop.f32.mrf.mxu0 }
 0x134   :  { %v2712_v21 = vrot.slane %v5344_v20, 5  ;;  %v5076_v20 = vld [vmem:[%s7352_s1 + $0xa90] sm:$0xff] }
 0x136   :  { %3608 = vmatpush1.bf16.msra.mxu0 %v5222_v24  ;;  %3661 = vmatpush1.bf16.msra.mxu1 %v5224_v26  ;;  %v5291_v24 = vcombine.high %v5140_v7, %v5148_v60  ;;  %v5293_v26 = vcombine.high %v5141_v11, %v5149_v14 }
 0x137   :  { %3609 = vmatprep.subr.bf16.mxu0 %v5207_v27  ;;  %3662 = vmatprep.subr.bf16.mxu1 %v5209_v29  ;;  %v5124_v27 = vld [vmem:[%s7352_s1 + $0xc10] sm:$0xff] }
 0x138   :  { %v5132_v29 = vld [vmem:[%s7352_s1 + $0xc50] sm:$0xff] }
 0x139   :  { %v5275_v63 = vcombine.high %v5124_v27, %v5132_v29 }
 0x13a   :  { %3610 = vmatpush1.bf16.msra.mxu0 %v5206_v35  ;;  %3663 = vmatpush1.bf16.msra.mxu1 %v5208_v40  ;;  %v2710_v35 = vsel %vm6449_vm6, %v5025_v17, %v2709_v4  ;;  %v2713_v40 = vsel %vm6449_vm6, %v2711_v18, %v2712_v21  ;;  %v5084_v21 = vld [vmem:[%s7352_s1 + $0xad0] sm:$0xff] }
 0x13b   :  { %3611 = vmatprep.subr.bf16.mxu0 %v5191_v41  ;;  %3664 = vmatprep.subr.bf16.mxu1 %v5193_v43  ;;  %v6620_v41 = vpop.f32.mrf.mxu1  ;;  %v5290_v43 = vcombine.low %v5140_v7, %v5148_v60  ;;  %v6622_v51 = vcombine.high %v2710_v35, %v2713_v40  ;;  %v5258_v7 = vcombine.low %v5108_v45, %v5116_v56  ;;  %v6664_v60 = vpop.f32.mrf.mxu0 }
 0x13c   :  { %7360 = vst [vmem:[#allocation3_spill] sm:$0xff] %v6664_v60 }
 0x13e   :  { %3612 = vmatpush1.bf16.msra.mxu0 %v5190_v48  ;;  %3665 = vmatpush1.bf16.msra.mxu1 %v5192_v50  ;;  %v5109_v48 = vld [vmem:[%s7352_s1 + $0xb98] sm:$0xff] }
 0x13f   :  { %3613 = vmatprep.subr.bf16.mxu0 %v5175_v53  ;;  %3666 = vmatprep.subr.bf16.mxu1 %v5177_v57  ;;  %v5117_v50 = vld [vmem:[%s7352_s1 + $0xbd8] sm:$0xff]  ;;  %v6639_v53 = vpop.f32.mrf.mxu1  ;;  %v5274_v57 = vcombine.low %v5124_v27, %v5132_v29  ;;  %v5227_v29 = vcombine.high %v5076_v20, %v5084_v21 }
 0x140   :  { %v5261_v4 = vcombine.high %v5109_v48, %v5117_v50  ;;  %v5260_v11 = vcombine.low %v5109_v48, %v5117_v50 }
 0x141   :  { %v6644_v0 = vpop.f32.mrf.mxu1 }
 0x142   :  { %3614 = vmatpush1.bf16.msra.mxu0 %v5174_v61  ;;  %3667 = vmatpush1.bf16.msra.mxu1 %v5176_v37  ;;  %7359 = vst [vmem:[#allocation2_spill] sm:$0xff] %v6644_v0  ;;  %v5092_v61 = vld [vmem:[%s7352_s1 + $0xb10] sm:$0xff]  ;;  %v6656_v37 = vcombine.low %v2710_v35, %v2713_v40 }
 0x143   :  { %3629 = vmatprep.subr.bf16.mxu0 %v5303_v38  ;;  %3682 = vmatprep.subr.bf16.mxu1 %v5305_v15  ;;  %v5093_v38 = vld [vmem:[%s7352_s1 + $0xb18] sm:$0xff]  ;;  %v5243_v14 = vcombine.high %v5092_v61, %v5100_v13  ;;  %v6666_v17 = vpop.f32.mrf.mxu1  ;;  %v5060_v35 = vld [vmem:[%s7352_s1 + $0xa10] sm:$0xff] }
 0x144   :  { %v5101_v15 = vld [vmem:[%s7352_s1 + $0xb58] sm:$0xff]  ;;  %7361 = vst [vmem:[#allocation4_spill] sm:$0xff] %v6666_v17  ;;  %v5068_v40 = vld [vmem:[%s7352_s1 + $0xa50] sm:$0xff] }
 0x145   :  { %v5245_v18 = vcombine.high %v5093_v38, %v5101_v15  ;;  %v5244_v27 = vcombine.low %v5093_v38, %v5101_v15  ;;  %v6684_v32 = vpop.f32.mrf.mxu1  ;;  %v5211_v56 = vcombine.high %v5060_v35, %v5068_v40  ;;  %v5210_v38 = vcombine.low %v5060_v35, %v5068_v40  ;;  %v5156_v35 = vld [vmem:[%s7352_s1 + $0xd10] sm:$0xff] }
 0x146   :  { %3630 = vmatpush2.bf16.msra.mxu0 %v5302_v22  ;;  %3683 = vmatpush2.bf16.msra.mxu1 %v5304_v23  ;;  %v5077_v22 = vld [vmem:[%s7352_s1 + $0xa98] sm:$0xff]  ;;  %7363 = vst [vmem:[#allocation6_spill] sm:$0xff] %v6684_v32  ;;  %v5164_v40 = vld [vmem:[%s7352_s1 + $0xd50] sm:$0xff] }
 0x147   :  { %3705 = vmatprep.subr.bf16.mxu0 %v5291_v24  ;;  %3758 = vmatprep.subr.bf16.mxu1 %v5293_v26  ;;  %v5085_v23 = vld [vmem:[%s7352_s1 + $0xad8] sm:$0xff]  ;;  %v5242_v24 = vcombine.low %v5092_v61, %v5100_v13  ;;  %v6682_v26 = vpop.f32.mrf.mxu0  ;;  %v6704_v48 = vpop.f32.mrf.mxu1 }
 0x148   :  { %7362 = vst [vmem:[#allocation5_spill] sm:$0xff] %v6682_v26  ;;  %v5229_v34 = vcombine.high %v5077_v22, %v5085_v23  ;;  %v5228_v45 = vcombine.low %v5077_v22, %v5085_v23  ;;  %7365 = vst [vmem:[#allocation8_spill] sm:$0xff] %v6704_v48  ;;  %v5053_v61 = vld [vmem:[%s7352_s1 + $0x9d8] sm:$0xff]  ;;  %v5168_v48 = vld [vmem:[%s7352_s1 + $0xd70] sm:$0xff] }
 0x149   :  { %3632 = vmatmul.mubr.bf16.vlgmr.msra.gmra.mxu0 %v6608_v31  ;;  %3685 = vmatmul.mubr.bf16.vlgmr.msra.gmra.mxu1 %v6608_v31  ;;  %v6720_v13 = vpop.f32.mrf.mxu1  ;;  %v5037_v22 = vld [vmem:[%s7352_s1 + $0x958] sm:$0xff] }
 0x14a   :  { %3706 = vmatpush1.bf16.msra.mxu0 %v5290_v43  ;;  %3759 = vmatpush1.bf16.msra.mxu1 %v5292_v3  ;;  %v5061_v43 = vld [vmem:[%s7352_s1 + $0xa18] sm:$0xff]  ;;  %7367 = vst [vmem:[#allocation10_spill] sm:$0xff] %v6720_v13 }
 0x14b   :  { %3707 = vmatprep.subr.bf16.mxu0 %v5275_v63  ;;  %3760 = vmatprep.subr.bf16.mxu1 %v5277_v44  ;;  %v5069_v3 = vld [vmem:[%s7352_s1 + $0xa58] sm:$0xff]  ;;  %v5226_v63 = vcombine.low %v5076_v20, %v5084_v21  ;;  %v6702_v44 = vpop.f32.mrf.mxu0  ;;  %v6736_v23 = vpop.f32.mrf.mxu1 }
 0x14c   :  { %5319 = vmatprep.mubr.msk.bf16.mxu0 %vm1092_vm3, %v6622_v51  ;;  %5321 = vmatprep.mubr.msk.bf16.mxu1 %vm1092_vm3, %v6622_v51  ;;  %7364 = vst [vmem:[#allocation7_spill] sm:$0xff] %v6702_v44  ;;  %v5213_v50 = vcombine.high %v5061_v43, %v5069_v3  ;;  %v5212_v15 = vcombine.low %v5061_v43, %v5069_v3  ;;  %v5029_v21 = vld [vmem:[%s7352_s1 + $0x918] sm:$0xff]  ;;  %7369 = vst [vmem:[#allocation12_spill] sm:$0xff] %v6736_v23 }
 0x14d   :  { %v5157_v3 = vld [vmem:[%s7352_s1 + $0xd18] sm:$0xff] }
 0x14e   :  { %3708 = vmatpush1.bf16.msra.mxu0 %v5274_v57  ;;  %3761 = vmatpush1.bf16.msra.mxu1 %v5276_v59  ;;  %v5044_v57 = vld [vmem:[%s7352_s1 + $0x990] sm:$0xff] }
 0x14f   :  { %3709 = vmatprep.subr.bf16.mxu0 %v5259_v52  ;;  %3762 = vmatprep.subr.bf16.mxu1 %v5261_v4  ;;  %v5052_v59 = vld [vmem:[%s7352_s1 + $0x9d0] sm:$0xff]  ;;  %v6712_v52 = vpop.f32.mrf.mxu0  ;;  %v5045_v4 = vld [vmem:[%s7352_s1 + $0x998] sm:$0xff] }
 0x150   :  { %7366 = vst [vmem:[#allocation9_spill] sm:$0xff] %v6712_v52 }
 0x151   :  { %3642 = vmatmul.mubr.bf16.gmra.mxu0 %v6656_v37  ;;  %3695 = vmatmul.mubr.bf16.gmra.mxu1 %v6656_v37  ;;  %v6728_v20 = vpop.f32.mrf.mxu0 }
 0x152   :  { %3710 = vmatpush1.bf16.msra.mxu0 %v5258_v7  ;;  %3763 = vmatpush1.bf16.msra.mxu1 %v5260_v11  ;;  %v5195_v7 = vcombine.high %v5044_v57, %v5052_v59  ;;  %v5197_v11 = vcombine.high %v5045_v4, %v5053_v61  ;;  %7368 = vst [vmem:[#allocation11_spill] sm:$0xff] %v6728_v20  ;;  %v5056_v20 = vld [vmem:[%s7352_s1 + $0x9f0] sm:$0xff] }
 0x153   :  { %3711 = vmatprep.subr.bf16.mxu0 %v5243_v14  ;;  %3764 = vmatprep.subr.bf16.mxu1 %v5245_v18  ;;  %v5028_v14 = vld [vmem:[%s7352_s1 + $0x910] sm:$0xff]  ;;  %v6744_v43 = vpop.f32.mrf.mxu0 }
 0x154   :  { %5322 = vmatprep.mubr.msk.bf16.mxu0 %vm1092_vm3, %v6489_v8  ;;  %5324 = vmatprep.mubr.msk.bf16.mxu1 %vm1092_vm3, %v6489_v8  ;;  %v5036_v18 = vld [vmem:[%s7352_s1 + $0x950] sm:$0xff]  ;;  %7370 = vst [vmem:[#allocation13_spill] sm:$0xff] %v6744_v43 }
 0x155   :  { %v5072_v43 = vld [vmem:[%s7352_s1 + $0xa70] sm:$0xff] }
 0x156   :  { %3712 = vmatpush1.bf16.msra.mxu0 %v5242_v24  ;;  %3765 = vmatpush1.bf16.msra.mxu1 %v5244_v27  ;;  %v5194_v24 = vcombine.low %v5044_v57, %v5052_v59  ;;  %v5196_v27 = vcombine.low %v5045_v4, %v5053_v61  ;;  %v5307_v57 = vcombine.high %v5156_v35, %v5164_v40  ;;  %v5142_v4 = vld [vmem:[%s7352_s1 + $0xca0] sm:$0xff] }
 0x157   :  { %3713 = vmatprep.subr.bf16.mxu0 %v5227_v29  ;;  %3766 = vmatprep.subr.bf16.mxu1 %v5229_v34  ;;  %v5179_v29 = vcombine.high %v5028_v14, %v5036_v18  ;;  %v5181_v34 = vcombine.high %v5029_v21, %v5037_v22  ;;  %v5150_v61 = vld [vmem:[%s7352_s1 + $0xce0] sm:$0xff] }
 0x15a   :  { %3714 = vmatpush1.bf16.msra.mxu0 %v5226_v63  ;;  %3767 = vmatpush1.bf16.msra.mxu1 %v5228_v45  ;;  %v5165_v63 = vld [vmem:[%s7352_s1 + $0xd58] sm:$0xff]  ;;  %v6752_v45 = vpop.f32.mrf.mxu1 }
 0x15b   :  { %3715 = vmatprep.subr.bf16.mxu0 %v5211_v56  ;;  %3768 = vmatprep.subr.bf16.mxu1 %v5213_v50  ;;  %7371 = vst [vmem:[#allocation14_spill] sm:$0xff] %v6752_v45  ;;  %v5178_v56 = vcombine.low %v5028_v14, %v5036_v18  ;;  %v5180_v50 = vcombine.low %v5029_v21, %v5037_v22 }
 0x15c   :  { %v5309_v59 = vcombine.high %v5157_v3, %v5165_v63  ;;  %v5306_v14 = vcombine.low %v5156_v35, %v5164_v40  ;;  %v5308_v21 = vcombine.low %v5157_v3, %v5165_v63  ;;  %v5295_v22 = vcombine.high %v5142_v4, %v5150_v61  ;;  %v5127_v35 = vld [vmem:[%s7352_s1 + $0xc28] sm:$0xff] }
 0x15d   :  { %v5135_v40 = vld [vmem:[%s7352_s1 + $0xc68] sm:$0xff]  ;;  %v5294_v3 = vcombine.low %v5142_v4, %v5150_v61 }
 0x15e   :  { %3716 = vmatpush1.bf16.msra.mxu0 %v5210_v38  ;;  %3769 = vmatpush1.bf16.msra.mxu1 %v5212_v15  ;;  %v6760_v38 = vpop.f32.mrf.mxu0  ;;  %v5143_v15 = vld [vmem:[%s7352_s1 + $0xca8] sm:$0xff] }
 0x15f   :  { %3717 = vmatprep.subr.bf16.mxu0 %v5195_v7  ;;  %3770 = vmatprep.subr.bf16.mxu1 %v5197_v11  ;;  %7372 = vst [vmem:[#allocation15_spill] sm:$0xff] %v6760_v38  ;;  %v5151_v7 = vld [vmem:[%s7352_s1 + $0xce8] sm:$0xff]  ;;  %v6768_v11 = vpop.f32.mrf.mxu1  ;;  %v5088_v38 = vld [vmem:[%s7352_s1 + $0xaf0] sm:$0xff] }
 0x160   :  { %7373 = vst [vmem:[#allocation16_spill] sm:$0xff] %v6768_v11  ;;  %v6770_v18 = vpop.f32.mrf.mxu0  ;;  %v5111_v4 = vld [vmem:[%s7352_s1 + $0xba8] sm:$0xff] }
 0x161   :  { %7374 = vst [vmem:[#allocation17_spill] sm:$0xff] %v6770_v18  ;;  %v5118_v18 = vld [vmem:[%s7352_s1 + $0xbe0] sm:$0xff]  ;;  %v5119_v61 = vld [vmem:[%s7352_s1 + $0xbe8] sm:$0xff] }
 0x162   :  { %3718 = vmatpush1.bf16.msra.mxu0 %v5194_v24  ;;  %3771 = vmatpush1.bf16.msra.mxu1 %v5196_v27  ;;  %v6772_v24 = vpop.f32.mrf.mxu1  ;;  %v5297_v27 = vcombine.high %v5143_v15, %v5151_v7  ;;  %v6786_v63 = vpop.f32.mrf.mxu0 }
 0x163   :  { %3719 = vmatprep.subr.bf16.mxu0 %v5179_v29  ;;  %3772 = vmatprep.subr.bf16.mxu1 %v5181_v34  ;;  %7375 = vst [vmem:[#allocation18_spill] sm:$0xff] %v6772_v24  ;;  %v5126_v29 = vld [vmem:[%s7352_s1 + $0xc20] sm:$0xff]  ;;  %7376 = vst [vmem:[#allocation19_spill] sm:$0xff] %v6786_v63 }
 0x164   :  { %v5134_v34 = vld [vmem:[%s7352_s1 + $0xc60] sm:$0xff] }
 0x165   :  { %v5110_v24 = vld [vmem:[%s7352_s1 + $0xba0] sm:$0xff] }
 0x166   :  { %3720 = vmatpush1.bf16.msra.mxu0 %v5178_v56  ;;  %3773 = vmatpush1.bf16.msra.mxu1 %v5180_v50  ;;  %v5296_v56 = vcombine.low %v5143_v15, %v5151_v7  ;;  %v5279_v50 = vcombine.high %v5126_v29, %v5134_v34  ;;  %v5278_v15 = vcombine.low %v5126_v29, %v5134_v34  ;;  %v6804_v7 = vpop.f32.mrf.mxu0  ;;  %v5102_v29 = vld [vmem:[%s7352_s1 + $0xb60] sm:$0xff]  ;;  %v5095_v34 = vld [vmem:[%s7352_s1 + $0xb28] sm:$0xff] }
 0x167   :  { %3735 = vmatprep.subr.bf16.mxu0 %v5307_v57  ;;  %3788 = vmatprep.subr.bf16.mxu1 %v5309_v59  ;;  %v6788_v57 = vpop.f32.mrf.mxu1  ;;  %v5281_v59 = vcombine.high %v5127_v35, %v5135_v40  ;;  %7378 = vst [vmem:[#allocation21_spill] sm:$0xff] %v6804_v7  ;;  %v5078_v7 = vld [vmem:[%s7352_s1 + $0xaa0] sm:$0xff] }
 0x168   :  { %7377 = vst [vmem:[#allocation20_spill] sm:$0xff] %v6788_v57  ;;  %v5094_v57 = vld [vmem:[%s7352_s1 + $0xb20] sm:$0xff] }
 0x169   :  { %v5086_v63 = vld [vmem:[%s7352_s1 + $0xae0] sm:$0xff] }
 0x16a   :  { %3736 = vmatpush2.bf16.msra.mxu0 %v5306_v14  ;;  %3789 = vmatpush2.bf16.msra.mxu1 %v5308_v21  ;;  %v5280_v14 = vcombine.low %v5127_v35, %v5135_v40  ;;  %v5263_v21 = vcombine.high %v5110_v24, %v5118_v18  ;;  %v5103_v35 = vld [vmem:[%s7352_s1 + $0xb68] sm:$0xff]  ;;  %v5262_v40 = vcombine.low %v5110_v24, %v5118_v18 }
 0x16b   :  { %3811 = vmatprep.subr.bf16.mxu0 %v5295_v22  ;;  %3864 = vmatprep.subr.bf16.mxu1 %v5297_v27  ;;  %v6806_v22 = vpop.f32.mrf.mxu1  ;;  %v5265_v27 = vcombine.high %v5111_v4, %v5119_v61  ;;  %v5079_v18 = vld [vmem:[%s7352_s1 + $0xaa8] sm:$0xff] }
 0x16c   :  { %7379 = vst [vmem:[#allocation22_spill] sm:$0xff] %v6806_v22  ;;  %v5249_v22 = vcombine.high %v5095_v34, %v5103_v35  ;;  %v5087_v24 = vld [vmem:[%s7352_s1 + $0xae8] sm:$0xff] }
 0x16d   :  { %3738 = vmatmul.mubr.bf16.vlgmr.msra.gmra.mxu0 %v6608_v31  ;;  %3791 = vmatmul.mubr.bf16.vlgmr.msra.gmra.mxu1 %v6608_v31 }
 0x16e   :  { %3812 = vmatpush1.bf16.msra.mxu0 %v5294_v3  ;;  %3865 = vmatpush1.bf16.msra.mxu1 %v5296_v56  ;;  %v6824_v3 = vpop.f32.mrf.mxu0  ;;  %v5264_v56 = vcombine.low %v5111_v4, %v5119_v61  ;;  %v5246_v61 = vcombine.low %v5094_v57, %v5102_v29 }
 0x16f   :  { %3813 = vmatprep.subr.bf16.mxu0 %v5279_v50  ;;  %3866 = vmatprep.subr.bf16.mxu1 %v5281_v59  ;;  %7380 = vst [vmem:[#allocation23_spill] sm:$0xff] %v6824_v3  ;;  %v5247_v50 = vcombine.high %v5094_v57, %v5102_v29  ;;  %v6826_v59 = vpop.f32.mrf.mxu1  ;;  %v5063_v57 = vld [vmem:[%s7352_s1 + $0xa28] sm:$0xff] }
 0x170   :  { %5323 = vmatprep.mubr.msk.bf16.mxu0 %vm1092_vm3, %v6622_v51  ;;  %5325 = vmatprep.mubr.msk.bf16.mxu1 %vm1092_vm3, %v6622_v51  ;;  %7381 = vst [vmem:[#allocation24_spill] sm:$0xff] %v6826_v59  ;;  %v5070_v59 = vld [vmem:[%s7352_s1 + $0xa60] sm:$0xff] }
 0x171   :  { %v6843_v4 = vpop.f32.mrf.mxu1 }
 0x172   :  { %3814 = vmatpush1.bf16.msra.mxu0 %v5278_v15  ;;  %3867 = vmatpush1.bf16.msra.mxu1 %v5280_v14  ;;  %v6834_v15 = vpop.f32.mrf.mxu0  ;;  %7383 = vst [vmem:[#allocation26_spill] sm:$0xff] %v6843_v4  ;;  %v5248_v14 = vcombine.low %v5095_v34, %v5103_v35  ;;  %v5230_v34 = vcombine.low %v5078_v7, %v5086_v63 }
 0x173   :  { %3815 = vmatprep.subr.bf16.mxu0 %v5263_v21  ;;  %3868 = vmatprep.subr.bf16.mxu1 %v5265_v27  ;;  %7382 = vst [vmem:[#allocation25_spill] sm:$0xff] %v6834_v15  ;;  %v5231_v21 = vcombine.high %v5078_v7, %v5086_v63  ;;  %v5233_v27 = vcombine.high %v5079_v18, %v5087_v24  ;;  %v5062_v15 = vld [vmem:[%s7352_s1 + $0xa20] sm:$0xff]  ;;  %v6864_v29 = vpop.f32.mrf.mxu1  ;;  %v5047_v63 = vld [vmem:[%s7352_s1 + $0x9a8] sm:$0xff] }
 0x174   :  { %v6854_v4 = vpop.f32.mrf.mxu0  ;;  %7385 = vst [vmem:[#allocation28_spill] sm:$0xff] %v6864_v29  ;;  %v5232_v35 = vcombine.low %v5079_v18, %v5087_v24  ;;  %v5055_v7 = vld [vmem:[%s7352_s1 + $0x9e8] sm:$0xff]  ;;  %v5214_v24 = vcombine.low %v5062_v15, %v5070_v59 }
 0x175   :  { %3748 = vmatmul.mubr.bf16.gmra.mxu0 %v6656_v37  ;;  %3801 = vmatmul.mubr.bf16.gmra.mxu1 %v6656_v37  ;;  %7384 = vst [vmem:[#allocation27_spill] sm:$0xff] %v6854_v4  ;;  %v5054_v4 = vld [vmem:[%s7352_s1 + $0x9e0] sm:$0xff]  ;;  %v6880_v18 = vpop.f32.mrf.mxu1 }
 0x176   :  { %3816 = vmatpush1.bf16.msra.mxu0 %v5262_v40  ;;  %3869 = vmatpush1.bf16.msra.mxu1 %v5264_v56  ;;  %v5215_v40 = vcombine.high %v5062_v15, %v5070_v59  ;;  %v6872_v3 = vpop.f32.mrf.mxu0  ;;  %7387 = vst [vmem:[#allocation30_spill] sm:$0xff] %v6880_v18  ;;  %v5031_v59 = vld [vmem:[%s7352_s1 + $0x928] sm:$0xff]  ;;  %v5158_v18 = vld [vmem:[%s7352_s1 + $0xd20] sm:$0xff] }
 0x177   :  { %3817 = vmatprep.subr.bf16.mxu0 %v5247_v50  ;;  %3870 = vmatprep.subr.bf16.mxu1 %v5249_v22  ;;  %v5071_v22 = vld [vmem:[%s7352_s1 + $0xa68] sm:$0xff]  ;;  %v5046_v50 = vld [vmem:[%s7352_s1 + $0x9a0] sm:$0xff]  ;;  %7386 = vst [vmem:[#allocation29_spill] sm:$0xff] %v6872_v3 }
 0x178   :  { %5326 = vmatprep.mubr.msk.bf16.mxu0 %vm1092_vm3, %v6489_v8  ;;  %5328 = vmatprep.mubr.msk.bf16.mxu1 %vm1092_vm3, %v6489_v8  ;;  %v5217_v56 = vcombine.high %v5063_v57, %v5071_v22  ;;  %v5038_v3 = vld [vmem:[%s7352_s1 + $0x960] sm:$0xff]  ;;  %v6888_v29 = vpop.f32.mrf.mxu0  ;;  %v5039_v15 = vld [vmem:[%s7352_s1 + $0x968] sm:$0xff] }
 0x179   :  { %7388 = vst [vmem:[#allocation31_spill] sm:$0xff] %v6888_v29  ;;  %v5185_v29 = vcombine.high %v5031_v59, %v5039_v15 }
 0x17a   :  { %3818 = vmatpush1.bf16.msra.mxu0 %v5246_v61  ;;  %3871 = vmatpush1.bf16.msra.mxu1 %v5248_v14  ;;  %v5216_v61 = vcombine.low %v5063_v57, %v5071_v22  ;;  %v5199_v14 = vcombine.high %v5046_v50, %v5054_v4  ;;  %v6896_v57 = vpop.f32.mrf.mxu1  ;;  %v5198_v22 = vcombine.low %v5046_v50, %v5054_v4  ;;  %v5159_v4 = vld [vmem:[%s7352_s1 + $0xd28] sm:$0xff] }
 0x17b   :  { %3819 = vmatprep.subr.bf16.mxu0 %v5231_v21  ;;  %3872 = vmatprep.subr.bf16.mxu1 %v5233_v27  ;;  %v5201_v21 = vcombine.high %v5047_v63, %v5055_v7  ;;  %v5030_v27 = vld [vmem:[%s7352_s1 + $0x920] sm:$0xff]  ;;  %7389 = vst [vmem:[#allocation32_spill] sm:$0xff] %v6896_v57  ;;  %v5167_v50 = vld [vmem:[%s7352_s1 + $0xd68] sm:$0xff] }
 0x17c   :  { %v5166_v57 = vld [vmem:[%s7352_s1 + $0xd60] sm:$0xff] }
 0x17e   :  { %3820 = vmatpush1.bf16.msra.mxu0 %v5230_v34  ;;  %3873 = vmatpush1.bf16.msra.mxu1 %v5232_v35  ;;  %v6898_v34 = vpop.f32.mrf.mxu0  ;;  %v5200_v35 = vcombine.low %v5047_v63, %v5055_v7  ;;  %v5182_v63 = vcombine.low %v5030_v27, %v5038_v3 }
 0x17f   :  { %3821 = vmatprep.subr.bf16.mxu0 %v5215_v40  ;;  %3874 = vmatprep.subr.bf16.mxu1 %v5217_v56  ;;  %7390 = vst [vmem:[#allocation33_spill] sm:$0xff] %v6898_v34  ;;  %v5183_v40 = vcombine.high %v5030_v27, %v5038_v3  ;;  %v6900_v56 = vpop.f32.mrf.mxu1  ;;  %v5152_v34 = vld [vmem:[%s7352_s1 + $0xcf0] sm:$0xff]  ;;  %v5145_v3 = vld [vmem:[%s7352_s1 + $0xcb8] sm:$0xff] }
 0x180   :  { %7391 = vst [vmem:[#allocation34_spill] sm:$0xff] %v6900_v56  ;;  %v6914_v7 = vpop.f32.mrf.mxu0  ;;  %v5144_v56 = vld [vmem:[%s7352_s1 + $0xcb0] sm:$0xff]  ;;  %v5153_v27 = vld [vmem:[%s7352_s1 + $0xcf8] sm:$0xff] }
 0x181   :  { %7392 = vst [vmem:[#allocation35_spill] sm:$0xff] %v6914_v7  ;;  %v5136_v7 = vld [vmem:[%s7352_s1 + $0xc70] sm:$0xff] }
 0x182   :  { %3822 = vmatpush1.bf16.msra.mxu0 %v5214_v24  ;;  %3875 = vmatpush1.bf16.msra.mxu1 %v5216_v61  ;;  %v5184_v24 = vcombine.low %v5031_v59, %v5039_v15  ;;  %v5311_v61 = vcombine.high %v5158_v18, %v5166_v57  ;;  %v5310_v59 = vcombine.low %v5158_v18, %v5166_v57  ;;  %v5129_v18 = vld [vmem:[%s7352_s1 + $0xc38] sm:$0xff] }
 0x183   :  { %3823 = vmatprep.subr.bf16.mxu0 %v5199_v14  ;;  %3876 = vmatprep.subr.bf16.mxu1 %v5201_v21  ;;  %v6916_v14 = vpop.f32.mrf.mxu1  ;;  %v5313_v21 = vcombine.high %v5159_v4, %v5167_v50  ;;  %v5312_v15 = vcombine.low %v5159_v4, %v5167_v50  ;;  %v5137_v57 = vld [vmem:[%s7352_s1 + $0xc78] sm:$0xff]  ;;  %v5298_v4 = vcombine.low %v5144_v56, %v5152_v34 }
 0x184   :  { %7393 = vst [vmem:[#allocation36_spill] sm:$0xff] %v6916_v14  ;;  %v5128_v14 = vld [vmem:[%s7352_s1 + $0xc30] sm:$0xff] }
 0x186   :  { %3824 = vmatpush1.bf16.msra.mxu0 %v5198_v22  ;;  %3877 = vmatpush1.bf16.msra.mxu1 %v5200_v35  ;;  %v5299_v22 = vcombine.high %v5144_v56, %v5152_v34  ;;  %v6932_v35 = vpop.f32.mrf.mxu1  ;;  %v5113_v34 = vld [vmem:[%s7352_s1 + $0xbb8] sm:$0xff] }
 0x187   :  { %3825 = vmatprep.subr.bf16.mxu0 %v5183_v40  ;;  %3878 = vmatprep.subr.bf16.mxu1 %v5185_v29  ;;  %v6930_v29 = vpop.f32.mrf.mxu0  ;;  %7395 = vst [vmem:[#allocation38_spill] sm:$0xff] %v6932_v35  ;;  %v5301_v40 = vcombine.high %v5145_v3, %v5153_v27  ;;  %v5112_v35 = vld [vmem:[%s7352_s1 + $0xbb0] sm:$0xff]  ;;  %v5121_v56 = vld [vmem:[%s7352_s1 + $0xbf8] sm:$0xff] }
 0x188   :  { %7394 = vst [vmem:[#allocation37_spill] sm:$0xff] %v6930_v29  ;;  %v5120_v29 = vld [vmem:[%s7352_s1 + $0xbf0] sm:$0xff] }
 0x189   :  { %v6946_v50 = vpop.f32.mrf.mxu0 }
 0x18a   :  { %3826 = vmatpush1.bf16.msra.mxu0 %v5182_v63  ;;  %3879 = vmatpush1.bf16.msra.mxu1 %v5184_v24  ;;  %7396 = vst [vmem:[#allocation39_spill] sm:$0xff] %v6946_v50  ;;  %v5300_v63 = vcombine.low %v5145_v3, %v5153_v27  ;;  %v5283_v24 = vcombine.high %v5128_v14, %v5136_v7  ;;  %v5104_v50 = vld [vmem:[%s7352_s1 + $0xb70] sm:$0xff] }
 0x18b   :  { %3841 = vmatprep.subr.bf16.mxu0 %v5311_v61  ;;  %3894 = vmatprep.subr.bf16.mxu1 %v5313_v21  ;;  %v6948_v61 = vpop.f32.mrf.mxu1  ;;  %v5285_v21 = vcombine.high %v5129_v18, %v5137_v57  ;;  %v5282_v27 = vcombine.low %v5128_v14, %v5136_v7  ;;  %v5097_v7 = vld [vmem:[%s7352_s1 + $0xb38] sm:$0xff] }
 0x18c   :  { %7397 = vst [vmem:[#allocation40_spill] sm:$0xff] %v6948_v61  ;;  %v5096_v61 = vld [vmem:[%s7352_s1 + $0xb30] sm:$0xff]  ;;  %v5105_v14 = vld [vmem:[%s7352_s1 + $0xb78] sm:$0xff] }
 0x18d   :  { %v6965_v3 = vpop.f32.mrf.mxu1 }
 0x18e   :  { %3842 = vmatpush2.bf16.msra.mxu0 %v5310_v59  ;;  %3895 = vmatpush2.bf16.msra.mxu1 %v5312_v15  ;;  %v6956_v59 = vpop.f32.mrf.mxu0  ;;  %v5284_v15 = vcombine.low %v5129_v18, %v5137_v57  ;;  %v5266_v57 = vcombine.low %v5112_v35, %v5120_v29 }
 0x18f   :  { %3917 = vmatprep.subr.bf16.mxu0 %v5299_v22  ;;  %3970 = vmatprep.subr.bf16.mxu1 %v5301_v40  ;;  %v5267_v22 = vcombine.high %v5112_v35, %v5120_v29  ;;  %v5269_v40 = vcombine.high %v5113_v34, %v5121_v56  ;;  %v6986_v18 = vpop.f32.mrf.mxu1  ;;  %v5081_v29 = vld [vmem:[%s7352_s1 + $0xab8] sm:$0xff] }
 0x190   :  { %v6976_v11 = vpop.f32.mrf.mxu0  ;;  %v5089_v35 = vld [vmem:[%s7352_s1 + $0xaf8] sm:$0xff] }
 0x191   :  { %3844 = vmatmul.mubr.bf16.vlgmr.msra.gmra.mxu0 %v6608_v31  ;;  %3897 = vmatmul.mubr.bf16.vlgmr.msra.gmra.mxu1 %v6608_v31 }
 0x192   :  { %3918 = vmatpush1.bf16.msra.mxu0 %v5298_v4  ;;  %3971 = vmatpush1.bf16.msra.mxu1 %v5300_v63  ;;  %v5268_v4 = vcombine.low %v5113_v34, %v5121_v56  ;;  %v5251_v63 = vcombine.high %v5096_v61, %v5104_v50  ;;  %v6994_v45 = vpop.f32.mrf.mxu0  ;;  %v7003_v34 = vpop.f32.mrf.mxu1  ;;  %v5250_v56 = vcombine.low %v5096_v61, %v5104_v50  ;;  %v5065_v50 = vld [vmem:[%s7352_s1 + $0xa38] sm:$0xff] }
 0x193   :  { %3919 = vmatprep.subr.bf16.mxu0 %v5283_v24  ;;  %3972 = vmatprep.subr.bf16.mxu1 %v5285_v21  ;;  %v5253_v24 = vcombine.high %v5097_v7, %v5105_v14  ;;  %v5080_v21 = vld [vmem:[%s7352_s1 + $0xab0] sm:$0xff]  ;;  %v5073_v61 = vld [vmem:[%s7352_s1 + $0xa78] sm:$0xff] }
 0x194   :  { %5327 = vmatprep.mubr.msk.bf16.mxu0 %vm1092_vm3, %v6622_v51  ;;  %5329 = vmatprep.mubr.msk.bf16.mxu1 %vm1092_vm3, %v6622_v51  ;;  %v7014_v23 = vpop.f32.mrf.mxu0 }
 0x196   :  { %3920 = vmatpush1.bf16.msra.mxu0 %v5282_v27  ;;  %3973 = vmatpush1.bf16.msra.mxu1 %v5284_v15  ;;  %v5252_v27 = vcombine.low %v5097_v7, %v5105_v14  ;;  %v5235_v15 = vcombine.high %v5080_v21, %v5088_v38  ;;  %v7024_v7 = vpop.f32.mrf.mxu1  ;;  %v5234_v14 = vcombine.low %v5080_v21, %v5088_v38  ;;  %v7032_v13 = vpop.f32.mrf.mxu0  ;;  %v5057_v38 = vld [vmem:[%s7352_s1 + $0x9f8] sm:$0xff] }
 0x197   :  { %3921 = vmatprep.subr.bf16.mxu0 %v5267_v22  ;;  %3974 = vmatprep.subr.bf16.mxu1 %v5269_v40  ;;  %v5237_v22 = vcombine.high %v5081_v29, %v5089_v35  ;;  %v5064_v40 = vld [vmem:[%s7352_s1 + $0xa30] sm:$0xff] }
 0x198   :  { %v7040_v21 = vpop.f32.mrf.mxu1  ;;  %v7048_v52 = vpop.f32.mrf.mxu0 }
 0x199   :  { %3854 = vmatmul.mubr.bf16.gmra.mxu0 %v6656_v37  ;;  %3907 = vmatmul.mubr.bf16.gmra.mxu1 %v6656_v37 }
 0x19a   :  { %3922 = vmatpush1.bf16.msra.mxu0 %v5266_v57  ;;  %3975 = vmatpush1.bf16.msra.mxu1 %v5268_v4  ;;  %v5236_v57 = vcombine.low %v5081_v29, %v5089_v35  ;;  %v5219_v4 = vcombine.high %v5064_v40, %v5072_v43  ;;  %v5218_v29 = vcombine.low %v5064_v40, %v5072_v43  ;;  %v5033_v43 = vld [vmem:[%s7352_s1 + $0x938] sm:$0xff]  ;;  %v7064_v44 = vpop.f32.mrf.mxu0 }
 0x19b   :  { %3923 = vmatprep.subr.bf16.mxu0 %v5251_v63  ;;  %3976 = vmatprep.subr.bf16.mxu1 %v5253_v24  ;;  %v5221_v63 = vcombine.high %v5065_v50, %v5073_v61  ;;  %v5048_v24 = vld [vmem:[%s7352_s1 + $0x9b0] sm:$0xff]  ;;  %v5220_v35 = vcombine.low %v5065_v50, %v5073_v61  ;;  %v5041_v40 = vld [vmem:[%s7352_s1 + $0x978] sm:$0xff]  ;;  %v7056_v50 = vpop.f32.mrf.mxu1 }
 0x19c   :  { %5330 = vmatprep.mubr.msk.bf16.mxu0 %vm1092_vm3, %v6489_v8  ;;  %5332 = vmatprep.mubr.msk.bf16.mxu1 %vm1092_vm3, %v6489_v8  ;;  %v5049_v8 = vld [vmem:[%s7352_s1 + $0x9b8] sm:$0xff]  ;;  %v5202_v61 = vcombine.low %v5048_v24, %v5056_v20 }
 0x19e   :  { %3924 = vmatpush1.bf16.msra.mxu0 %v5250_v56  ;;  %3977 = vmatpush1.bf16.msra.mxu1 %v5252_v27  ;;  %v5203_v56 = vcombine.high %v5048_v24, %v5056_v20  ;;  %v5205_v27 = vcombine.high %v5049_v8, %v5057_v38  ;;  %v5161_v20 = vld [vmem:[%s7352_s1 + $0xd38] sm:$0xff] }
 0x19f   :  { %3925 = vmatprep.subr.bf16.mxu0 %v5235_v15  ;;  %3978 = vmatprep.subr.bf16.mxu1 %v5237_v22  ;;  %v5032_v15 = vld [vmem:[%s7352_s1 + $0x930] sm:$0xff]  ;;  %v5169_v24 = vld [vmem:[%s7352_s1 + $0xd78] sm:$0xff] }
 0x1a0   :  { %v5040_v22 = vld [vmem:[%s7352_s1 + $0x970] sm:$0xff]  ;;  %v5316_v60 = vcombine.low %v5161_v20, %v5169_v24 }
 0x1a2   :  { %3926 = vmatpush1.bf16.msra.mxu0 %v5234_v14  ;;  %3979 = vmatpush1.bf16.msra.mxu1 %v5236_v57  ;;  %v5204_v14 = vcombine.low %v5049_v8, %v5057_v38  ;;  %v5187_v57 = vcombine.high %v5032_v15, %v5040_v22  ;;  %v7072_v8 = vpop.f32.mrf.mxu1  ;;  %v5186_v38 = vcombine.low %v5032_v15, %v5040_v22 }
 0x1a3   :  { %3927 = vmatprep.subr.bf16.mxu0 %v5219_v4  ;;  %3980 = vmatprep.subr.bf16.mxu1 %v5221_v63  ;;  %v5189_v4 = vcombine.high %v5033_v43, %v5041_v40  ;;  %v5160_v63 = vld [vmem:[%s7352_s1 + $0xd30] sm:$0xff] }
 0x1a4   :  { %v7076_v32 = vpop.f32.mrf.mxu1  ;;  %v5314_v26 = vcombine.low %v5160_v63, %v5168_v48 }
 0x1a6   :  { %3928 = vmatpush1.bf16.msra.mxu0 %v5218_v29  ;;  %3981 = vmatpush1.bf16.msra.mxu1 %v5220_v35  ;;  %v5188_v29 = vcombine.low %v5033_v43, %v5041_v40  ;;  %v5315_v35 = vcombine.high %v5160_v63, %v5168_v48  ;;  %v7080_v0 = vpop.f32.mrf.mxu1 }
 0x1a7   :  { %3929 = vmatprep.subr.bf16.mxu0 %v5203_v56  ;;  %3982 = vmatprep.subr.bf16.mxu1 %v5205_v27  ;;  %v5317_v56 = vcombine.high %v5161_v20, %v5169_v24  ;;  %v7074_v27 = vpop.f32.mrf.mxu0 }
 0x1a8   :  { %v7084_v22 = vpop.f32.mrf.mxu1 }
 0x1a9   :  { %v7078_v17 = vpop.f32.mrf.mxu0 }
 0x1aa   :  { %3930 = vmatpush1.bf16.msra.mxu0 %v5202_v61  ;;  %3983 = vmatpush1.bf16.msra.mxu1 %v5204_v14  ;;  %v7094_v43 = vpop.f32.mrf.mxu1 }
 0x1ab   :  { %3931 = vmatprep.subr.bf16.mxu0 %v5187_v57  ;;  %3984 = vmatprep.subr.bf16.mxu1 %v5189_v4  ;;  %v7082_v15 = vpop.f32.mrf.mxu0 }
 0x1ac   :  { %v7098_v40 = vpop.f32.mrf.mxu1 }
 0x1ad   :  { %v7090_v48 = vpop.f32.mrf.mxu0 }
 0x1ae   :  { %3932 = vmatpush1.bf16.msra.mxu0 %v5186_v38  ;;  %3985 = vmatpush1.bf16.msra.mxu1 %v5188_v29 }
 0x1af   :  { %3947 = vmatprep.subr.bf16.mxu0 %v5315_v35  ;;  %4000 = vmatprep.subr.bf16.mxu1 %v5317_v56 }
 0x1b2   :  { %3948 = vmatpush2.bf16.msra.mxu0 %v5314_v26  ;;  %4001 = vmatpush2.bf16.msra.mxu1 %v5316_v60  ;;  %v7096_v26 = vpop.f32.mrf.mxu0 }
 0x1b4   :  { %v7102_v60 = vpop.f32.mrf.mxu0 }
 0x1b5   :  { %3950 = vmatmul.mubr.bf16.vlgmr.msra.gmra.mxu0 %v6608_v31  ;;  %4003 = vmatmul.mubr.bf16.vlgmr.msra.gmra.mxu1 %v6608_v31  ;;  %v7104_v31 = vpop.f32.mrf.mxu1 }
 0x1b6   :  { %5331 = vmatprep.mubr.msk.bf16.mxu0 %vm1092_vm3, %v6622_v51  ;;  %5333 = vmatprep.mubr.msk.bf16.mxu1 %vm1092_vm3, %v6622_v51  ;;  %v7106_v61 = vpop.f32.mrf.mxu0 }
 0x1b7   :  { %v7108_v14 = vpop.f32.mrf.mxu1 }
 0x1b8   :  { %v7110_v57 = vpop.f32.mrf.mxu0 }
 0x1b9   :  { %7398 = vst [vmem:[#allocation41_spill] sm:$0xff] %v7110_v57  ;;  %v7112_v51 = vpop.f32.mrf.mxu1 }
 0x1ba   :  { %7399 = vst [vmem:[#allocation42_spill] sm:$0xff] %v7112_v51  ;;  %v7114_v4 = vpop.f32.mrf.mxu0 }
 0x1bb   :  { %7400 = vst [vmem:[#allocation43_spill] sm:$0xff] %v7114_v4  ;;  %v7116_v63 = vpop.f32.mrf.mxu1 }
 0x1bc   :  { %7401 = vst [vmem:[#allocation44_spill] sm:$0xff] %v7116_v63 }
 0x1bd   :  { %3960 = vmatmul.mubr.bf16.gmra.mxu0 %v6656_v37  ;;  %4013 = vmatmul.mubr.bf16.gmra.mxu1 %v6656_v37 }
 0x1c1   :  { %v7118_v20 = vpop.f32.mrf.mxu0  ;;  %v7120_v24 = vpop.f32.mrf.mxu1 }
 0x1c2   :  { %7402 = vst [vmem:[#allocation45_spill] sm:$0xff] %v7118_v20  ;;  %7403 = vst [vmem:[#allocation46_spill] sm:$0xff] %v7120_v24 }
 0x1c3   :  { %v7122_v37 = vpop.f32.mrf.mxu0  ;;  %v7124_v38 = vpop.f32.mrf.mxu1 }
 0x1c4   :  { %7404 = vst [vmem:[#allocation47_spill] sm:$0xff] %v7122_v37  ;;  %7405 = vst [vmem:[#allocation48_spill] sm:$0xff] %v7124_v38 }
 0x1c5   :  { %v7126_v29 = vpop.f32.mrf.mxu0  ;;  %v7128_v35 = vpop.f32.mrf.mxu1 }
 0x1c6   :  { %7406 = vst [vmem:[#allocation49_spill] sm:$0xff] %v7126_v29  ;;  %7407 = vst [vmem:[#allocation50_spill] sm:$0xff] %v7128_v35 }
 0x1c7   :  { %v7130_v56 = vpop.f32.mrf.mxu0  ;;  %v7132_v57 = vpop.f32.mrf.mxu1 }
 0x1c8   :  { %7408 = vst [vmem:[#allocation51_spill] sm:$0xff] %v7130_v56  ;;  %7409 = vst [vmem:[#allocation52_spill] sm:$0xff] %v7132_v57 }
 0x1c9   :  { %v7134_v51 = vpop.f32.mrf.mxu0  ;;  %v7136_v4 = vpop.f32.mrf.mxu1 }
 0x1ca   :  { %7410 = vst [vmem:[#allocation53_spill] sm:$0xff] %v7134_v51  ;;  %7411 = vst [vmem:[#allocation54_spill] sm:$0xff] %v7136_v4 }
 0x1cb   :  { %v7138_v63 = vpop.f32.mrf.mxu0  ;;  %v7140_v20 = vpop.f32.mrf.mxu1 }
 0x1cc   :  { %7412 = vst [vmem:[#allocation55_spill] sm:$0xff] %v7138_v63  ;;  %7413 = vst [vmem:[#allocation56_spill] sm:$0xff] %v7140_v20 }
 0x1cd   :  { %v7142_v24 = vpop.f32.mrf.mxu0  ;;  %v7144_v37 = vpop.f32.mrf.mxu1 }
 0x1ce   :  { %7414 = vst [vmem:[#allocation57_spill] sm:$0xff] %v7142_v24  ;;  %7415 = vst [vmem:[#allocation58_spill] sm:$0xff] %v7144_v37 }
 0x1cf   :  { %v7146_v38 = vpop.f32.mrf.mxu0  ;;  %v7148_v29 = vpop.f32.mrf.mxu1 }
 0x1d0   :  { %7416 = vst [vmem:[#allocation59_spill] sm:$0xff] %v7146_v38  ;;  %7417 = vst [vmem:[#allocation60_spill] sm:$0xff] %v7148_v29 }
 0x1e5   :  { %v7150_v35 = vpop.f32.mrf.mxu0  ;;  %v7152_v56 = vpop.f32.mrf.mxu1 }
 0x1e6   :  { %7418 = vst [vmem:[#allocation61_spill] sm:$0xff] %v7150_v35  ;;  %7419 = vst [vmem:[#allocation62_spill] sm:$0xff] %v7152_v56 }
 0x1e7   :  { %v7154_v57 = vpop.f32.mrf.mxu0  ;;  %v7156_v51 = vpop.f32.mrf.mxu1 }
 0x1e8   :  { %7420 = vst [vmem:[#allocation63_spill] sm:$0xff] %v7154_v57  ;;  %7421 = vst [vmem:[#allocation64_spill] sm:$0xff] %v7156_v51 }
 0x1e9   :  { %v7158_v4 = vpop.f32.mrf.mxu0  ;;  %v7160_v63 = vpop.f32.mrf.mxu1 }
 0x1ea   :  { %7422 = vst [vmem:[#allocation65_spill] sm:$0xff] %v7158_v4 }
 0x1eb   :  { %v7162_v20 = vpop.f32.mrf.mxu0  ;;  %v7164_v24 = vpop.f32.mrf.mxu1 }
 0x1ec   :  { %7423 = vst [vmem:[#allocation66_spill] sm:$0xff] %v7162_v20  ;;  %7424 = vst [vmem:[#allocation67_spill] sm:$0xff] %v7164_v24  ;;  %v2302_v20 = vadd.f32 %v6956_v59, %v6412_v33 }
 0x1ed   :  { %v7166_v37 = vpop.f32.mrf.mxu0  ;;  %v7168_v38 = vpop.f32.mrf.mxu1 }
 0x1ee   :  { %7425 = vst [vmem:[#allocation68_spill] sm:$0xff] %v7166_v37  ;;  %7426 = vst [vmem:[#allocation69_spill] sm:$0xff] %v7168_v38  ;;  %v2355_v37 = vadd.f32 %v6965_v3, %v6421_v39  ;;  %v2304_v38 = vadd.f32 %v6976_v11, %v6432_v46  ;;  %v2361_v39 = vadd.f32 %v7024_v7, %v6500_v12 }
 0x1ef   :  { %v7170_v29 = vpop.f32.mrf.mxu0  ;;  %v7172_v35 = vpop.f32.mrf.mxu1  ;;  %v2312_v11 = vadd.f32 %v7032_v13, %v6503_v16  ;;  %v2316_v12 = vadd.f32 %v7064_v44, %v6539_v36  ;;  %v2318_v16 = vadd.f32 %v7074_v27, %v6555_v49  ;;  %v5345_v13 = vmov 1983009808  }
 0x1f0   :  { %7427 = vst [vmem:[#allocation70_spill] sm:$0xff] %v7170_v29  ;;  %7428 = vst [vmem:[#allocation71_spill] sm:$0xff] %v7172_v35  ;;  %v2357_v35 = vadd.f32 %v6986_v18, %v6444_v55  ;;  %v2365_v55 = vadd.f32 %v7040_v21, %v6505_v19  ;;  %v2371_v19 = vadd.f32 %v7076_v32, %v6557_v54  ;;  %v7214_v7 = vunpack.c.l.s4 %v5345_v13 }
 0x1f1   :  { %v7174_v56 = vpop.f32.mrf.mxu0  ;;  %v7176_v57 = vpop.f32.mrf.mxu1 }
 0x1f2   :  { %7429 = vst [vmem:[#allocation72_spill] sm:$0xff] %v7174_v56  ;;  %7430 = vst [vmem:[#allocation73_spill] sm:$0xff] %v7176_v57  ;;  %v2306_v57 = vadd.f32 %v6994_v45, %v6461_v1  ;;  %v2314_v1 = vadd.f32 %v7048_v52, %v6523_v25 }
 0x1f3   :  { %v7178_v51 = vpop.f32.mrf.mxu0  ;;  %v7180_v4 = vpop.f32.mrf.mxu1 }
 0x1f4   :  { %7431 = vst [vmem:[#allocation74_spill] sm:$0xff] %v7178_v51  ;;  %7432 = vst [vmem:[#allocation75_spill] sm:$0xff] %v7180_v4  ;;  %v2359_v51 = vadd.f32 %v7003_v34, %v6479_v5  ;;  %v2308_v4 = vadd.f32 %v7014_v23, %v6491_v9  ;;  %v2367_v9 = vadd.f32 %v7056_v50, %v6525_v28 }
 0x1f5   :  { %v2369_v23 = vadd.f32 %v7072_v8, %v6541_v42 }
 0x209   :  { %v3633_v29 = vpop.f32.mrf.mxu0  ;;  %v3686_v33 = vpop.f32.mrf.mxu1 }
 0x20a   :  { %v4023_v59 = vadd.f32 %v3633_v29, %v2302_v20  ;;  %v4025_v3 = vadd.f32 %v3686_v33, %v2355_v37 }
 0x20b   :  { %v3635_v46 = vpop.f32.mrf.mxu0  ;;  %v3688_v45 = vpop.f32.mrf.mxu1 }
 0x20c   :  { %v4024_v5 = vadd.f32 %v3635_v46, %v2304_v38  ;;  %v4026_v18 = vadd.f32 %v3688_v45, %v2357_v35  ;;  %v4231_v28 = vmul.f32 %v4023_v59, %v4023_v59  ;;  %v4233_v21 = vmul.f32 %v4025_v3, %v4025_v3 }
 0x20d   :  { %v3637_v34 = vpop.f32.mrf.mxu0  ;;  %v3690_v52 = vpop.f32.mrf.mxu1 }
 0x20e   :  { %v4039_v25 = vadd.f32 %v3637_v34, %v2306_v57  ;;  %v4041_v50 = vadd.f32 %v3690_v52, %v2359_v51  ;;  %v4232_v20 = vmul.f32 %v4024_v5, %v4024_v5  ;;  %v4234_v29 = vmul.f32 %v4026_v18, %v4026_v18 }
 0x20f   :  { %v3639_v36 = vpop.f32.mrf.mxu0  ;;  %v3692_v38 = vpop.f32.mrf.mxu1 }
 0x210   :  { %v4087_v42 = vadd.f32 %v4039_v25, %v4023_v59  ;;  %v4247_v8 = vmul.f32 %v4039_v25, %v4039_v25  ;;  %v4040_v37 = vadd.f32 %v3639_v36, %v2308_v4  ;;  %v4105_v49 = vadd.f32 %v4041_v50, %v4025_v3 }
 0x211   :  { %v4249_v27 = vmul.f32 %v4041_v50, %v4041_v50  ;;  %v4042_v35 = vadd.f32 %v3692_v38, %v2361_v39  ;;  %v3643_v54 = vpop.f32.mrf.mxu0  ;;  %v3696_v45 = vpop.f32.mrf.mxu1 }
 0x212   :  { %v4295_v32 = vadd.f32 %v4247_v8, %v4231_v28  ;;  %v4096_v57 = vadd.f32 %v4040_v37, %v4024_v5  ;;  %v4248_v33 = vmul.f32 %v4040_v37, %v4040_v37  ;;  %v4055_v46 = vadd.f32 %v3643_v54, %v2312_v11 }
 0x213   :  { %v4313_v34 = vadd.f32 %v4249_v27, %v4233_v21  ;;  %v4114_v13 = vadd.f32 %v4042_v35, %v4026_v18  ;;  %v4250_v51 = vmul.f32 %v4042_v35, %v4042_v35  ;;  %v4057_v52 = vadd.f32 %v3696_v45, %v2365_v55  ;;  %v3645_v44 = vpop.f32.mrf.mxu0  ;;  %v3698_v36 = vpop.f32.mrf.mxu1 }
 0x214   :  { %v4304_v56 = vadd.f32 %v4248_v33, %v4232_v20  ;;  %v4088_v59 = vadd.f32 %v4087_v42, %v4055_v46  ;;  %v4263_v25 = vmul.f32 %v4055_v46, %v4055_v46  ;;  %v4056_v4 = vadd.f32 %v3645_v44, %v2314_v1 }
 0x215   :  { %v4322_v24 = vadd.f32 %v4250_v51, %v4234_v29  ;;  %v4106_v3 = vadd.f32 %v4105_v49, %v4057_v52  ;;  %v4265_v50 = vmul.f32 %v4057_v52, %v4057_v52  ;;  %v4058_v39 = vadd.f32 %v3698_v36, %v2367_v9  ;;  %v3647_v38 = vpop.f32.mrf.mxu0  ;;  %v3700_v37 = vpop.f32.mrf.mxu1 }
 0x216   :  { %v4296_v28 = vadd.f32 %v4295_v32, %v4263_v25  ;;  %v4097_v5 = vadd.f32 %v4096_v57, %v4056_v4  ;;  %v4264_v8 = vmul.f32 %v4056_v4, %v4056_v4  ;;  %v4071_v11 = vadd.f32 %v3647_v38, %v2316_v12 }
 0x217   :  { %v4314_v21 = vadd.f32 %v4313_v34, %v4265_v50  ;;  %v4115_v18 = vadd.f32 %v4114_v13, %v4058_v39  ;;  %v4266_v27 = vmul.f32 %v4058_v39, %v4058_v39  ;;  %v4073_v55 = vadd.f32 %v3700_v37, %v2369_v23  ;;  %v3649_v35 = vpop.f32.mrf.mxu0  ;;  %v3702_v44 = vpop.f32.mrf.mxu1 }
 0x218   :  { %v4305_v20 = vadd.f32 %v4304_v56, %v4264_v8  ;;  %v4089_v42 = vadd.f32 %v4088_v59, %v4071_v11  ;;  %v4279_v54 = vmul.f32 %v4071_v11, %v4071_v11  ;;  %v4072_v1 = vadd.f32 %v3649_v35, %v2318_v16 }
 0x219   :  { %v4323_v29 = vadd.f32 %v4322_v24, %v4266_v27  ;;  %v4107_v49 = vadd.f32 %v4106_v3, %v4073_v55  ;;  %v4281_v33 = vmul.f32 %v4073_v55, %v4073_v55  ;;  %v4074_v9 = vadd.f32 %v3702_v44, %v2371_v19 }
 0x21a   :  { %v4090_v46 = vrot.slane %v4089_v42, 4  ;;  %v4297_v32 = vadd.f32 %v4296_v28, %v4279_v54  ;;  %v4098_v57 = vadd.f32 %v4097_v5, %v4072_v1  ;;  %v4280_v45 = vmul.f32 %v4072_v1, %v4072_v1 }
 0x21b   :  { %v4108_v12 = vrot.slane %v4107_v49, 4  ;;  %v4315_v51 = vadd.f32 %v4314_v21, %v4281_v33  ;;  %v4116_v34 = vadd.f32 %v4115_v18, %v4074_v9  ;;  %v4282_v13 = vmul.f32 %v4074_v9, %v4074_v9 }
 0x21c   :  { %v4091_v52 = vadd.f32 %v4090_v46, %v4089_v42  ;;  %v4298_v23 = vrot.slane %v4297_v32, 4  ;;  %v4099_v25 = vrot.slane %v4098_v57, 4  ;;  %v4306_v56 = vadd.f32 %v4305_v20, %v4280_v45 }
 0x21d   :  { %v4109_v59 = vadd.f32 %v4108_v12, %v4107_v49  ;;  %v4316_v16 = vrot.slane %v4315_v51, 4  ;;  %v4117_v4 = vrot.slane %v4116_v34, 4  ;;  %v4324_v24 = vadd.f32 %v4323_v29, %v4282_v13 }
 0x21e   :  { %v4092_v36 = vrot.slane %v4091_v52, 2  ;;  %v4299_v3 = vadd.f32 %v4298_v23, %v4297_v32  ;;  %v4100_v19 = vadd.f32 %v4099_v25, %v4098_v57  ;;  %v4307_v50 = vrot.slane %v4306_v56, 4 }
 0x21f   :  { %v4110_v39 = vrot.slane %v4109_v59, 2  ;;  %v4317_v38 = vadd.f32 %v4316_v16, %v4315_v51  ;;  %v4118_v28 = vadd.f32 %v4117_v4, %v4116_v34  ;;  %v4325_v5 = vrot.slane %v4324_v24, 4 }
 0x220   :  { %v4093_v8 = vadd.f32 %v4092_v36, %v4091_v52  ;;  %v4300_v11 = vrot.slane %v4299_v3, 2  ;;  %v4101_v37 = vrot.slane %v4100_v19, 2  ;;  %v4308_v21 = vadd.f32 %v4307_v50, %v4306_v56 }
 0x221   :  { %v4111_v18 = vadd.f32 %v4110_v39, %v4109_v59  ;;  %v4318_v27 = vrot.slane %v4317_v38, 2  ;;  %v4119_v55 = vrot.slane %v4118_v28, 2  ;;  %v4326_v35 = vadd.f32 %v4325_v5, %v4324_v24 }
 0x222   :  { %v4094_v20 = vrot.slane %v4093_v8, 1  ;;  %v4301_v42 = vadd.f32 %v4300_v11, %v4299_v3  ;;  %v4102_v54 = vadd.f32 %v4101_v37, %v4100_v19  ;;  %v4309_v1 = vrot.slane %v4308_v21, 2 }
 0x223   :  { %v4112_v44 = vrot.slane %v4111_v18, 1  ;;  %v4319_v29 = vadd.f32 %v4318_v27, %v4317_v38  ;;  %v4120_v49 = vadd.f32 %v4119_v55, %v4118_v28  ;;  %v4327_v33 = vrot.slane %v4326_v35, 2 }
 0x224   :  { %v4302_v9 = vrot.slane %v4301_v42, 1  ;;  %v4103_v46 = vrot.slane %v4102_v54, 1  ;;  %v4310_v32 = vadd.f32 %v4309_v1, %v4308_v21  ;;  %v4476_v57 = vunpack.c.0.s8 %v7214_v7  ;;  %v7435_v1 = vld [vmem:[#allocation3_spill] sm:$0xff] }
 0x225   :  { %v4320_v45 = vrot.slane %v4319_v29, 1  ;;  %v7433_v12 = vlaneseq  ;;  %v4121_v34 = vrot.slane %v4120_v49, 1  ;;  %v4328_v13 = vadd.f32 %v4327_v33, %v4326_v35  ;;  %v7440_v33 = vld [vmem:[#allocation42_spill] sm:$0xff] }
 0x226   :  { %v4095_v52 = vadd.f32 %v4094_v20, %v4093_v8  ;;  %v4303_v23 = vadd.f32 %v4302_v9, %v4301_v42  ;;  %v4311_v25 = vrot.slane %v4310_v32, 1  ;;  %v4113_v56 = vadd.f32 %v4112_v44, %v4111_v18  ;;  %v7442_v9 = vld [vmem:[#allocation43_spill] sm:$0xff] }
 0x227   :  { %v4478_v51 = vshrl.u32 %v7433_v12, 7  ;;  %v4321_v59 = vadd.f32 %v4320_v45, %v4319_v29  ;;  %v4329_v16 = vrot.slane %v4328_v13, 1  ;;  %v4104_v24 = vadd.f32 %v4103_v46, %v4102_v54  ;;  %v7437_v29 = vld [vmem:[#allocation5_spill] sm:$0xff] }
 0x228   :  { %v4440_v4 = vsel %vm4439_vm7, %v4095_v52, %v4303_v23  ;;  %v4312_v36 = vadd.f32 %v4311_v25, %v4310_v32  ;;  %v4122_v7 = vadd.f32 %v4121_v34, %v4120_v49  ;;  %v2408_v8 = vadd.f32 %v7078_v17, %v6565_v62  ;;  %v7438_v49 = vld [vmem:[#allocation41_spill] sm:$0xff]  ;;  %v7443_v32 = vld [vmem:[#allocation8_spill] sm:$0xff] }
 0x229   :  { %v4442_v3 = vsel %vm4439_vm7, %v4113_v56, %v4321_v59  ;;  %v7220_v19 = vsub.s32 %v4476_v57, %v4478_v51  ;;  %v4330_v50 = vadd.f32 %v4329_v16, %v4328_v13  ;;  %v2461_v11 = vadd.f32 %v7080_v0, %v6574_v2  ;;  %v7444_v57 = vld [vmem:[#allocation44_spill] sm:$0xff] }
 0x22a   :  { %v4441_v39 = vsel %vm4439_vm7, %v4104_v24, %v4312_v36  ;;  %v2410_v18 = vadd.f32 %v7082_v15, %v6585_v10  ;;  %v2463_v27 = vadd.f32 %v7084_v22, %v6596_v6  ;;  %v2412_v55 = vadd.f32 %v7090_v48, %v6604_v30  ;;  %v7434_v48 = vld [vmem:[#allocation2_spill] sm:$0xff] }
 0x22b   :  { %v4472_v38 = vcombine.low %v4440_v4, %v4441_v39  ;;  %v4443_v28 = vsel %vm4439_vm7, %v4122_v7, %v4330_v50  ;;  %v2465_v62 = vadd.f32 %v7094_v43, %v6620_v41  ;;  %v2414_v2 = vadd.f32 %v7096_v26, %v6630_v47  ;;  %v7436_v43 = vld [vmem:[#allocation4_spill] sm:$0xff] }
 0x22c   :  { %v4473_v5 = vcombine.low %v4442_v3, %v4443_v28  ;;  %v2467_v10 = vadd.f32 %v7098_v40, %v6639_v53  ;;  %v2418_v6 = vadd.f32 %v7102_v60, %v6642_v58  ;;  %v2471_v54 = vadd.f32 %v7104_v31, %v7434_v48  ;;  %v7439_v40 = vld [vmem:[#allocation6_spill] sm:$0xff]  ;;  %v7441_v60 = vld [vmem:[#allocation7_spill] sm:$0xff] }
 0x22d   :  { %v4480_v37 = vrot.slane %v4472_v38, %v7220_v19  ;;  %v3739_v21 = vpop.f32.mrf.mxu0  ;;  %v3792_v20 = vpop.f32.mrf.mxu1  ;;  %v2420_v41 = vadd.f32 %v7106_v61, %v7435_v1  ;;  %v2473_v47 = vadd.f32 %v7108_v14, %v7436_v43  ;;  %v2422_v53 = vadd.f32 %v7438_v49, %v7437_v29 }
 0x22e   :  { %v4487_v35 = vrot.slane %v4473_v5, %v7220_v19  ;;  %v4027_v0 = vadd.f32 %v3739_v21, %v2408_v8  ;;  %v4029_v17 = vadd.f32 %v3792_v20, %v2461_v11  ;;  %v2475_v58 = vadd.f32 %v7440_v33, %v7439_v40 }
 0x22f   :  { %v3741_v42 = vpop.f32.mrf.mxu0  ;;  %v3794_v22 = vpop.f32.mrf.mxu1  ;;  %v2424_v46 = vadd.f32 %v7442_v9, %v7441_v60  ;;  %v2477_v14 = vadd.f32 %v7444_v57, %v7443_v32 }
 0x230   :  { %v4488_v15 = vcombine.low %v4480_v37, %v4487_v35  ;;  %v4028_v30 = vadd.f32 %v3741_v42, %v2410_v18  ;;  %v4030_v26 = vadd.f32 %v3794_v22, %v2463_v27  ;;  %v4235_v45 = vmul.f32 %v4027_v0, %v4027_v0 }
 0x231   :  { %v3743_v44 = vpop.f32.mrf.mxu0  ;;  %v3796_v61 = vpop.f32.mrf.mxu1  ;;  %v4237_v12 = vmul.f32 %v4029_v17, %v4029_v17 }
 0x232   :  { %4544 = vst [vmem:[%s7354_s2] sm:$0xff] %v4488_v15  ;;  %v4043_v31 = vadd.f32 %v3743_v44, %v2412_v55  ;;  %v4045_v51 = vadd.f32 %v3796_v61, %v2465_v62  ;;  %v4236_v13 = vmul.f32 %v4028_v30, %v4028_v30  ;;  %v4238_v59 = vmul.f32 %v4030_v26, %v4030_v26 }
 0x233   :  { %v3745_v34 = vpop.f32.mrf.mxu0  ;;  %v3798_v56 = vpop.f32.mrf.mxu1 }
 0x234   :  { %v4123_v52 = vadd.f32 %v4043_v31, %v4027_v0  ;;  %v4251_v23 = vmul.f32 %v4043_v31, %v4043_v31  ;;  %v4044_v25 = vadd.f32 %v3745_v34, %v2414_v2  ;;  %v4141_v16 = vadd.f32 %v4045_v51, %v4029_v17 }
 0x235   :  { %v4253_v4 = vmul.f32 %v4045_v51, %v4045_v51  ;;  %v4046_v24 = vadd.f32 %v3798_v56, %v2467_v10  ;;  %v3749_v36 = vpop.f32.mrf.mxu0  ;;  %v3802_v38 = vpop.f32.mrf.mxu1 }
 0x236   :  { %v4331_v3 = vadd.f32 %v4251_v23, %v4235_v45  ;;  %v4132_v7 = vadd.f32 %v4044_v25, %v4028_v30  ;;  %v4252_v50 = vmul.f32 %v4044_v25, %v4044_v25  ;;  %v4059_v39 = vadd.f32 %v3749_v36, %v2418_v6 }
 0x237   :  { %v4349_v28 = vadd.f32 %v4253_v4, %v4237_v12  ;;  %v4150_v5 = vadd.f32 %v4046_v24, %v4030_v26  ;;  %v4254_v8 = vmul.f32 %v4046_v24, %v4046_v24  ;;  %v4061_v11 = vadd.f32 %v3802_v38, %v2471_v54  ;;  %v3751_v37 = vpop.f32.mrf.mxu0  ;;  %v3804_v35 = vpop.f32.mrf.mxu1 }
 0x238   :  { %v4340_v21 = vadd.f32 %v4252_v50, %v4236_v13  ;;  %v4124_v18 = vadd.f32 %v4123_v52, %v4059_v39  ;;  %v4267_v27 = vmul.f32 %v4059_v39, %v4059_v39  ;;  %v4060_v55 = vadd.f32 %v3751_v37, %v2420_v41 }
 0x239   :  { %v4358_v20 = vadd.f32 %v4254_v8, %v4238_v59  ;;  %v4142_v62 = vadd.f32 %v4141_v16, %v4061_v11  ;;  %v4269_v2 = vmul.f32 %v4061_v11, %v4061_v11  ;;  %v4062_v0 = vadd.f32 %v3804_v35, %v2473_v47  ;;  %v3753_v17 = vpop.f32.mrf.mxu0  ;;  %v3806_v30 = vpop.f32.mrf.mxu1 }
 0x23a   :  { %v4332_v42 = vadd.f32 %v4331_v3, %v4267_v27  ;;  %v4133_v10 = vadd.f32 %v4132_v7, %v4060_v55  ;;  %v4268_v15 = vmul.f32 %v4060_v55, %v4060_v55  ;;  %v4075_v6 = vadd.f32 %v3753_v17, %v2422_v53 }
 0x23b   :  { %v4350_v22 = vadd.f32 %v4349_v28, %v4269_v2  ;;  %v4151_v48 = vadd.f32 %v4150_v5, %v4062_v0  ;;  %v4270_v1 = vmul.f32 %v4062_v0, %v4062_v0  ;;  %v4077_v54 = vadd.f32 %v3806_v30, %v2475_v58  ;;  %v3755_v43 = vpop.f32.mrf.mxu0  ;;  %v3808_v49 = vpop.f32.mrf.mxu1 }
 0x23c   :  { %v4341_v26 = vadd.f32 %v4340_v21, %v4268_v15  ;;  %v4125_v44 = vadd.f32 %v4124_v18, %v4075_v6  ;;  %v4283_v29 = vmul.f32 %v4075_v6, %v4075_v6  ;;  %v4076_v41 = vadd.f32 %v3755_v43, %v2424_v46 }
 0x23d   :  { %v4359_v40 = vadd.f32 %v4358_v20, %v4270_v1  ;;  %v4143_v33 = vadd.f32 %v4142_v62, %v4077_v54  ;;  %v4285_v60 = vmul.f32 %v4077_v54, %v4077_v54  ;;  %v4078_v47 = vadd.f32 %v3808_v49, %v2477_v14 }
 0x23e   :  { %v4126_v9 = vrot.slane %v4125_v44, 4  ;;  %v4333_v31 = vadd.f32 %v4332_v42, %v4283_v29  ;;  %v4134_v61 = vadd.f32 %v4133_v10, %v4076_v41  ;;  %v4284_v32 = vmul.f32 %v4076_v41, %v4076_v41 }
 0x23f   :  { %v4144_v53 = vrot.slane %v4143_v33, 4  ;;  %v4351_v57 = vadd.f32 %v4350_v22, %v4285_v60  ;;  %v4152_v45 = vadd.f32 %v4151_v48, %v4078_v47  ;;  %v4286_v12 = vmul.f32 %v4078_v47, %v4078_v47 }
 0x240   :  { %v4127_v51 = vadd.f32 %v4126_v9, %v4125_v44  ;;  %v4334_v58 = vrot.slane %v4333_v31, 4  ;;  %v4135_v34 = vrot.slane %v4134_v61, 4  ;;  %v4342_v13 = vadd.f32 %v4341_v26, %v4284_v32  ;;  %v7445_v9 = vld [vmem:[#allocation9_spill] sm:$0xff]  ;;  %v7447_v32 = vld [vmem:[#allocation10_spill] sm:$0xff] }
 0x241   :  { %v4145_v52 = vadd.f32 %v4144_v53, %v4143_v33  ;;  %v4352_v23 = vrot.slane %v4351_v57, 4  ;;  %v4153_v46 = vrot.slane %v4152_v45, 4  ;;  %v4360_v25 = vadd.f32 %v4359_v40, %v4286_v12  ;;  %v7448_v53 = vld [vmem:[#allocation46_spill] sm:$0xff] }
 0x242   :  { %v4128_v56 = vrot.slane %v4127_v51, 2  ;;  %v4335_v59 = vadd.f32 %v4334_v58, %v4333_v31  ;;  %v4136_v16 = vadd.f32 %v4135_v34, %v4134_v61  ;;  %v4343_v14 = vrot.slane %v4342_v13, 4  ;;  %v7446_v31 = vld [vmem:[#allocation45_spill] sm:$0xff]  ;;  %v7450_v58 = vld [vmem:[#allocation47_spill] sm:$0xff] }
 0x243   :  { %v4146_v4 = vrot.slane %v4145_v52, 2  ;;  %v4353_v24 = vadd.f32 %v4352_v23, %v4351_v57  ;;  %v4154_v36 = vadd.f32 %v4153_v46, %v4152_v45  ;;  %v4361_v3 = vrot.slane %v4360_v25, 4  ;;  %v7453_v46 = vld [vmem:[#allocation13_spill] sm:$0xff] }
 0x244   :  { %v4129_v7 = vadd.f32 %v4128_v56, %v4127_v51  ;;  %v4336_v50 = vrot.slane %v4335_v59, 2  ;;  %v4137_v39 = vrot.slane %v4136_v16, 2  ;;  %v4344_v38 = vadd.f32 %v4343_v14, %v4342_v13  ;;  %v7449_v51 = vld [vmem:[#allocation11_spill] sm:$0xff]  ;;  %v7451_v13 = vld [vmem:[#allocation12_spill] sm:$0xff]  ;;  %v7455_v14 = vld [vmem:[#allocation14_spill] sm:$0xff] }
 0x245   :  { %v4147_v28 = vadd.f32 %v4146_v4, %v4145_v52  ;;  %v4354_v5 = vrot.slane %v4353_v24, 2  ;;  %v4155_v8 = vrot.slane %v4154_v36, 2  ;;  %v4362_v11 = vadd.f32 %v4361_v3, %v4360_v25  ;;  %v7452_v52 = vld [vmem:[#allocation48_spill] sm:$0xff]  ;;  %v7454_v25 = vld [vmem:[#allocation49_spill] sm:$0xff]  ;;  %v7456_v4 = vld [vmem:[#allocation50_spill] sm:$0xff] }
 0x246   :  { %v4130_v37 = vrot.slane %v4129_v7, 1  ;;  %v4337_v21 = vadd.f32 %v4336_v50, %v4335_v59  ;;  %v4138_v18 = vadd.f32 %v4137_v39, %v4136_v16  ;;  %v4345_v27 = vrot.slane %v4344_v38, 2  ;;  %v7458_v3 = vld [vmem:[#allocation51_spill] sm:$0xff] }
 0x247   :  { %v4148_v55 = vrot.slane %v4147_v28, 1  ;;  %v4355_v35 = vadd.f32 %v4354_v5, %v4353_v24  ;;  %v4156_v20 = vadd.f32 %v4155_v8, %v4154_v36  ;;  %v4363_v62 = vrot.slane %v4362_v11, 2  ;;  %v7457_v36 = vld [vmem:[#allocation15_spill] sm:$0xff]  ;;  %v7460_v5 = vld [vmem:[#allocation52_spill] sm:$0xff] }
 0x248   :  { %v4338_v2 = vrot.slane %v4337_v21, 1  ;;  %v4139_v0 = vrot.slane %v4138_v18, 1  ;;  %v4346_v17 = vadd.f32 %v4345_v27, %v4344_v38  ;;  %v4131_v6 = vadd.f32 %v4130_v37, %v4129_v7  ;;  %v7462_v37 = vld [vmem:[#allocation53_spill] sm:$0xff] }
 0x249   :  { %v4356_v42 = vrot.slane %v4355_v35, 1  ;;  %v4157_v10 = vrot.slane %v4156_v20, 1  ;;  %v4364_v15 = vadd.f32 %v4363_v62, %v4362_v11  ;;  %v4149_v48 = vadd.f32 %v4148_v55, %v4147_v28  ;;  %v7459_v28 = vld [vmem:[#allocation16_spill] sm:$0xff]  ;;  %v7461_v11 = vld [vmem:[#allocation17_spill] sm:$0xff] }
 0x24a   :  { %v4339_v30 = vadd.f32 %v4338_v2, %v4337_v21  ;;  %v4347_v22 = vrot.slane %v4346_v17, 1  ;;  %v4140_v26 = vadd.f32 %v4139_v0, %v4138_v18  ;;  %v2514_v61 = vadd.f32 %v7446_v31, %v7445_v9  ;;  %v7465_v2 = vld [vmem:[#allocation19_spill] sm:$0xff] }
 0x24b   :  { %v4357_v1 = vadd.f32 %v4356_v42, %v4355_v35  ;;  %v4365_v54 = vrot.slane %v4364_v15, 1  ;;  %v4158_v41 = vadd.f32 %v4157_v10, %v4156_v20  ;;  %v2567_v57 = vadd.f32 %v7448_v53, %v7447_v32  ;;  %v7463_v35 = vld [vmem:[#allocation18_spill] sm:$0xff]  ;;  %v7466_v0 = vld [vmem:[#allocation55_spill] sm:$0xff]  ;;  %v7467_v42 = vld [vmem:[#allocation20_spill] sm:$0xff] }
 0x24c   :  { %v4444_v43 = vsel %vm4439_vm7, %v4131_v6, %v4339_v30  ;;  %v4348_v44 = vadd.f32 %v4347_v22, %v4346_v17  ;;  %v2516_v34 = vadd.f32 %v7450_v58, %v7449_v51  ;;  %v2569_v23 = vadd.f32 %v7452_v52, %v7451_v13  ;;  %v7464_v20 = vld [vmem:[#allocation54_spill] sm:$0xff]  ;;  %v7468_v10 = vld [vmem:[#allocation56_spill] sm:$0xff]  ;;  %v7469_v22 = vld [vmem:[#allocation21_spill] sm:$0xff] }
 0x24d   :  { %v4446_v29 = vsel %vm4439_vm7, %v4149_v48, %v4357_v1  ;;  %v4366_v49 = vadd.f32 %v4365_v54, %v4364_v15  ;;  %v2518_v56 = vadd.f32 %v7454_v25, %v7453_v46  ;;  %v2571_v24 = vadd.f32 %v7456_v4, %v7455_v14  ;;  %v7470_v48 = vld [vmem:[#allocation57_spill] sm:$0xff]  ;;  %v7471_v54 = vld [vmem:[#allocation22_spill] sm:$0xff] }
 0x24e   :  { %v4445_v40 = vsel %vm4439_vm7, %v4140_v26, %v4348_v44  ;;  %v2520_v7 = vadd.f32 %v7458_v3, %v7457_v36  ;;  %v2573_v8 = vadd.f32 %v7460_v5, %v7459_v28  ;;  %v2524_v21 = vadd.f32 %v7462_v37, %v7461_v11  ;;  %v7473_v44 = vld [vmem:[#allocation23_spill] sm:$0xff] }
 0x24f   :  { %v4489_v33 = vcombine.low %v4444_v43, %v4445_v40  ;;  %v4447_v60 = vsel %vm4439_vm7, %v4158_v41, %v4366_v49  ;;  %v2577_v62 = vadd.f32 %v7464_v20, %v7463_v35  ;;  %v2526_v17 = vadd.f32 %v7466_v0, %v7465_v2  ;;  %v7472_v43 = vld [vmem:[#allocation58_spill] sm:$0xff] }
 0x250   :  { %v4490_v47 = vcombine.low %v4446_v29, %v4447_v60  ;;  %v2579_v15 = vadd.f32 %v7468_v10, %v7467_v42  ;;  %v2528_v1 = vadd.f32 %v7470_v48, %v7469_v22  ;;  %v2581_v26 = vadd.f32 %v7472_v43, %v7471_v54  ;;  %v7474_v29 = vld [vmem:[#allocation59_spill] sm:$0xff]  ;;  %v7476_v60 = vld [vmem:[#allocation60_spill] sm:$0xff] }
 0x251   :  { %v4497_v45 = vrot.slane %v4489_v33, %v7220_v19  ;;  %v3845_v12 = vpop.f32.mrf.mxu0  ;;  %v3898_v16 = vpop.f32.mrf.mxu1  ;;  %v2530_v41 = vadd.f32 %v7474_v29, %v7473_v44  ;;  %v7475_v33 = vld [vmem:[#allocation24_spill] sm:$0xff] }
 0x252   :  { %v4504_v59 = vrot.slane %v4490_v47, %v7220_v19  ;;  %v4031_v50 = vadd.f32 %v3845_v12, %v2514_v61  ;;  %v4033_v39 = vadd.f32 %v3898_v16, %v2567_v57  ;;  %v2583_v47 = vadd.f32 %v7476_v60, %v7475_v33 }
 0x253   :  { %v3847_v38 = vpop.f32.mrf.mxu0  ;;  %v3900_v55 = vpop.f32.mrf.mxu1 }
 0x254   :  { %v4505_v18 = vcombine.low %v4497_v45, %v4504_v59  ;;  %v4032_v27 = vadd.f32 %v3847_v38, %v2516_v34  ;;  %v4034_v6 = vadd.f32 %v3900_v55, %v2569_v23  ;;  %v4239_v9 = vmul.f32 %v4031_v50, %v4031_v50 }
 0x255   :  { %v3849_v30 = vpop.f32.mrf.mxu0  ;;  %v3902_v40 = vpop.f32.mrf.mxu1  ;;  %v4241_v31 = vmul.f32 %v4033_v39, %v4033_v39 }
 0x256   :  { %4545 = vst [vmem:[%s7354_s2 + $0x8] sm:$0xff] %v4505_v18  ;;  %v4047_v49 = vadd.f32 %v3849_v30, %v2518_v56  ;;  %v4049_v61 = vadd.f32 %v3902_v40, %v2571_v24  ;;  %v4240_v53 = vmul.f32 %v4032_v27, %v4032_v27  ;;  %v4242_v58 = vmul.f32 %v4034_v6, %v4034_v6 }
 0x257   :  { %v3851_v32 = vpop.f32.mrf.mxu0  ;;  %v3904_v51 = vpop.f32.mrf.mxu1 }
 0x258   :  { %v4159_v57 = vadd.f32 %v4047_v49, %v4031_v50  ;;  %v4255_v45 = vmul.f32 %v4047_v49, %v4047_v49  ;;  %v4048_v12 = vadd.f32 %v3851_v32, %v2520_v7  ;;  %v4177_v34 = vadd.f32 %v4049_v61, %v4033_v39 }
 0x259   :  { %v4257_v13 = vmul.f32 %v4049_v61, %v4049_v61  ;;  %v4050_v52 = vadd.f32 %v3904_v51, %v2573_v8  ;;  %v3855_v23 = vpop.f32.mrf.mxu0  ;;  %v3908_v16 = vpop.f32.mrf.mxu1 }
 0x25a   :  { %v4367_v46 = vadd.f32 %v4255_v45, %v4239_v9  ;;  %v4168_v25 = vadd.f32 %v4048_v12, %v4032_v27  ;;  %v4256_v56 = vmul.f32 %v4048_v12, %v4048_v12  ;;  %v4063_v59 = vadd.f32 %v3855_v23, %v2524_v21 }
 0x25b   :  { %v4385_v14 = vadd.f32 %v4257_v13, %v4241_v31  ;;  %v4186_v4 = vadd.f32 %v4050_v52, %v4034_v6  ;;  %v4258_v36 = vmul.f32 %v4050_v52, %v4050_v52  ;;  %v4065_v24 = vadd.f32 %v3908_v16, %v2577_v62  ;;  %v3857_v3 = vpop.f32.mrf.mxu0  ;;  %v3910_v5 = vpop.f32.mrf.mxu1 }
 0x25c   :  { %v4376_v38 = vadd.f32 %v4256_v56, %v4240_v53  ;;  %v4160_v50 = vadd.f32 %v4159_v57, %v4063_v59  ;;  %v4271_v28 = vmul.f32 %v4063_v59, %v4063_v59  ;;  %v4064_v7 = vadd.f32 %v3857_v3, %v2526_v17 }
 0x25d   :  { %v4394_v11 = vadd.f32 %v4258_v36, %v4242_v58  ;;  %v4178_v39 = vadd.f32 %v4177_v34, %v4065_v24  ;;  %v4273_v37 = vmul.f32 %v4065_v24, %v4065_v24  ;;  %v4066_v8 = vadd.f32 %v3910_v5, %v2579_v15  ;;  %v3859_v18 = vpop.f32.mrf.mxu0  ;;  %v3912_v20 = vpop.f32.mrf.mxu1 }
 0x25e   :  { %v4368_v55 = vadd.f32 %v4367_v46, %v4271_v28  ;;  %v4169_v27 = vadd.f32 %v4168_v25, %v4064_v7  ;;  %v4272_v35 = vmul.f32 %v4064_v7, %v4064_v7  ;;  %v4079_v21 = vadd.f32 %v3859_v18, %v2528_v1 }
 0x25f   :  { %v4386_v2 = vadd.f32 %v4385_v14, %v4273_v37  ;;  %v4187_v0 = vadd.f32 %v4186_v4, %v4066_v8  ;;  %v4274_v42 = vmul.f32 %v4066_v8, %v4066_v8  ;;  %v4081_v62 = vadd.f32 %v3912_v20, %v2581_v26  ;;  %v3861_v10 = vpop.f32.mrf.mxu0  ;;  %v3914_v48 = vpop.f32.mrf.mxu1 }
 0x260   :  { %v4377_v6 = vadd.f32 %v4376_v38, %v4272_v35  ;;  %v4161_v30 = vadd.f32 %v4160_v50, %v4079_v21  ;;  %v4287_v22 = vmul.f32 %v4079_v21, %v4079_v21  ;;  %v4080_v17 = vadd.f32 %v3861_v10, %v2530_v41 }
 0x261   :  { %v4395_v54 = vadd.f32 %v4394_v11, %v4274_v42  ;;  %v4179_v43 = vadd.f32 %v4178_v39, %v4081_v62  ;;  %v4289_v44 = vmul.f32 %v4081_v62, %v4081_v62  ;;  %v4082_v15 = vadd.f32 %v3914_v48, %v2583_v47 }
 0x262   :  { %v4162_v29 = vrot.slane %v4161_v30, 4  ;;  %v4369_v49 = vadd.f32 %v4368_v55, %v4287_v22  ;;  %v4170_v40 = vadd.f32 %v4169_v27, %v4080_v17  ;;  %v4288_v33 = vmul.f32 %v4080_v17, %v4080_v17 }
 0x263   :  { %v4180_v1 = vrot.slane %v4179_v43, 4  ;;  %v4387_v60 = vadd.f32 %v4386_v2, %v4289_v44  ;;  %v4188_v9 = vadd.f32 %v4187_v0, %v4082_v15  ;;  %v4290_v31 = vmul.f32 %v4082_v15, %v4082_v15 }
 0x264   :  { %v4163_v61 = vadd.f32 %v4162_v29, %v4161_v30  ;;  %v4370_v26 = vrot.slane %v4369_v49, 4  ;;  %v4171_v32 = vrot.slane %v4170_v40, 4  ;;  %v4378_v53 = vadd.f32 %v4377_v6, %v4288_v33  ;;  %v7477_v29 = vld [vmem:[#allocation25_spill] sm:$0xff]  ;;  %v7479_v33 = vld [vmem:[#allocation26_spill] sm:$0xff] }
 0x265   :  { %v4181_v57 = vadd.f32 %v4180_v1, %v4179_v43  ;;  %v4388_v45 = vrot.slane %v4387_v60, 4  ;;  %v4189_v41 = vrot.slane %v4188_v9, 4  ;;  %v4396_v12 = vadd.f32 %v4395_v54, %v4290_v31  ;;  %v7480_v1 = vld [vmem:[#allocation62_spill] sm:$0xff] }
 0x266   :  { %v4164_v51 = vrot.slane %v4163_v61, 2  ;;  %v4371_v58 = vadd.f32 %v4370_v26, %v4369_v49  ;;  %v4172_v34 = vadd.f32 %v4171_v32, %v4170_v40  ;;  %v4379_v47 = vrot.slane %v4378_v53, 4  ;;  %v7478_v49 = vld [vmem:[#allocation61_spill] sm:$0xff]  ;;  %v7482_v26 = vld [vmem:[#allocation63_spill] sm:$0xff] }
 0x267   :  { %v4182_v13 = vrot.slane %v4181_v57, 2  ;;  %v4389_v52 = vadd.f32 %v4388_v45, %v4387_v60  ;;  %v4190_v23 = vadd.f32 %v4189_v41, %v4188_v9  ;;  %v4397_v46 = vrot.slane %v4396_v12, 4  ;;  %v7485_v41 = vld [vmem:[#allocation29_spill] sm:$0xff] }
 0x268   :  { %v4165_v25 = vadd.f32 %v4164_v51, %v4163_v61  ;;  %v4372_v56 = vrot.slane %v4371_v58, 2  ;;  %v4173_v59 = vrot.slane %v4172_v34, 2  ;;  %v4380_v16 = vadd.f32 %v4379_v47, %v4378_v53  ;;  %v7481_v61 = vld [vmem:[#allocation27_spill] sm:$0xff]  ;;  %v7483_v53 = vld [vmem:[#allocation28_spill] sm:$0xff]  ;;  %v7487_v47 = vld [vmem:[#allocation30_spill] sm:$0xff] }
 0x269   :  { %v4183_v14 = vadd.f32 %v4182_v13, %v4181_v57  ;;  %v4390_v4 = vrot.slane %v4389_v52, 2  ;;  %v4191_v36 = vrot.slane %v4190_v23, 2  ;;  %v4398_v24 = vadd.f32 %v4397_v46, %v4396_v12  ;;  %v7484_v57 = vld [vmem:[#allocation64_spill] sm:$0xff]  ;;  %v7486_v12 = vld [vmem:[#allocation65_spill] sm:$0xff] }
 0x26a   :  { %v4166_v3 = vrot.slane %v4165_v25, 1  ;;  %v4373_v38 = vadd.f32 %v4372_v56, %v4371_v58  ;;  %v4174_v50 = vadd.f32 %v4173_v59, %v4172_v34  ;;  %v4381_v28 = vrot.slane %v4380_v16, 2 }
 0x26b   :  { %v4184_v7 = vrot.slane %v4183_v14, 1  ;;  %v4391_v5 = vadd.f32 %v4390_v4, %v4389_v52  ;;  %v4192_v11 = vadd.f32 %v4191_v36, %v4190_v23  ;;  %v4399_v39 = vrot.slane %v4398_v24, 2  ;;  %v7488_v52 = vld [vmem:[#allocation31_spill] sm:$0xff]  ;;  %v7489_v23 = vld [vmem:[#allocation66_spill] sm:$0xff]  ;;  %v7492_v36 = vld [vmem:[#allocation33_spill] sm:$0xff] }
 0x26c   :  { %v4374_v37 = vrot.slane %v4373_v38, 1  ;;  %v4175_v8 = vrot.slane %v4174_v50, 1  ;;  %v4382_v18 = vadd.f32 %v4381_v28, %v4380_v16  ;;  %v4167_v21 = vadd.f32 %v4166_v3, %v4165_v25  ;;  %v7490_v16 = vld [vmem:[#allocation32_spill] sm:$0xff] }
 0x26d   :  { %v4392_v55 = vrot.slane %v4391_v5, 1  ;;  %v4193_v27 = vrot.slane %v4192_v11, 1  ;;  %v4400_v35 = vadd.f32 %v4399_v39, %v4398_v24  ;;  %v4185_v0 = vadd.f32 %v4184_v7, %v4183_v14  ;;  %v7491_v14 = vld [vmem:[#allocation67_spill] sm:$0xff]  ;;  %v7493_v24 = vld [vmem:[#allocation68_spill] sm:$0xff]  ;;  %v7494_v7 = vld [vmem:[#allocation34_spill] sm:$0xff] }
 0x26e   :  { %v4375_v20 = vadd.f32 %v4374_v37, %v4373_v38  ;;  %v4383_v2 = vrot.slane %v4382_v18, 1  ;;  %v4176_v6 = vadd.f32 %v4175_v8, %v4174_v50  ;;  %v2620_v40 = vadd.f32 %v7478_v49, %v7477_v29  ;;  %v7496_v39 = vld [vmem:[#allocation35_spill] sm:$0xff]  ;;  %v7498_v8 = vld [vmem:[#allocation36_spill] sm:$0xff] }
 0x26f   :  { %v4393_v42 = vadd.f32 %v4392_v55, %v4391_v5  ;;  %v4401_v62 = vrot.slane %v4400_v35, 1  ;;  %v4194_v17 = vadd.f32 %v4193_v27, %v4192_v11  ;;  %v2673_v60 = vadd.f32 %v7480_v1, %v7479_v33  ;;  %v7495_v5 = vld [vmem:[#allocation69_spill] sm:$0xff] }
 0x270   :  { %v4448_v10 = vsel %vm4439_vm7, %v4167_v21, %v4375_v20  ;;  %v4384_v30 = vadd.f32 %v4383_v2, %v4382_v18  ;;  %v2622_v32 = vadd.f32 %v7482_v26, %v7481_v61  ;;  %v2675_v45 = vadd.f32 %v7484_v57, %v7483_v53  ;;  %v7499_v18 = vld [vmem:[#allocation71_spill] sm:$0xff]  ;;  %v7500_v21 = vld [vmem:[#allocation37_spill] sm:$0xff]  ;;  %v7501_v20 = vld [vmem:[#allocation72_spill] sm:$0xff] }
 0x271   :  { %v4450_v22 = vsel %vm4439_vm7, %v4185_v0, %v4393_v42  ;;  %v4402_v48 = vadd.f32 %v4401_v62, %v4400_v35  ;;  %v2624_v51 = vadd.f32 %v7486_v12, %v7485_v41  ;;  %v2677_v13 = vadd.f32 %v7160_v63, %v7487_v47  ;;  %v7497_v63 = vld [vmem:[#allocation70_spill] sm:$0xff]  ;;  %v7503_v42 = vld [vmem:[#allocation73_spill] sm:$0xff] }
 0x272   :  { %v4449_v54 = vsel %vm4439_vm7, %v4176_v6, %v4384_v30  ;;  %v2626_v46 = vadd.f32 %v7489_v23, %v7488_v52  ;;  %v2679_v4 = vadd.f32 %v7491_v14, %v7490_v16  ;;  %v2630_v3 = vadd.f32 %v7493_v24, %v7492_v36  ;;  %v7502_v0 = vld [vmem:[#allocation38_spill] sm:$0xff] }
 0x273   :  { %v4506_v43 = vcombine.low %v4448_v10, %v4449_v54  ;;  %v4451_v44 = vsel %vm4439_vm7, %v4194_v17, %v4402_v48  ;;  %v2683_v11 = vadd.f32 %v7495_v5, %v7494_v7  ;;  %v2632_v37 = vadd.f32 %v7497_v63, %v7496_v39  ;;  %v7504_v10 = vld [vmem:[#allocation39_spill] sm:$0xff]  ;;  %v7505_v6 = vld [vmem:[#allocation74_spill] sm:$0xff]  ;;  %v7506_v48 = vld [vmem:[#allocation40_spill] sm:$0xff] }
 0x274   :  { %v4507_v15 = vcombine.low %v4450_v22, %v4451_v44  ;;  %v2685_v55 = vadd.f32 %v7499_v18, %v7498_v8  ;;  %v2634_v2 = vadd.f32 %v7501_v20, %v7500_v21  ;;  %v2687_v62 = vadd.f32 %v7503_v42, %v7502_v0  ;;  %v7507_v54 = vld [vmem:[#allocation75_spill] sm:$0xff] }
 0x275   :  { %v4514_v9 = vrot.slane %v4506_v43, %v7220_v19  ;;  %v3951_v31 = vpop.f32.mrf.mxu0  ;;  %v4004_v34 = vpop.f32.mrf.mxu1  ;;  %v2636_v30 = vadd.f32 %v7505_v6, %v7504_v10  ;;  %v2689_v43 = vadd.f32 %v7507_v54, %v7506_v48 }
 0x276   :  { %v4521_v58 = vrot.slane %v4507_v15, %v7220_v19  ;;  %v4035_v25 = vadd.f32 %v3951_v31, %v2620_v40  ;;  %v4037_v56 = vadd.f32 %v4004_v34, %v2673_v60 }
 0x277   :  { %v3953_v59 = vpop.f32.mrf.mxu0  ;;  %v4006_v28 = vpop.f32.mrf.mxu1 }
 0x278   :  { %v4522_v38 = vcombine.low %v4514_v9, %v4521_v58  ;;  %v4036_v50 = vadd.f32 %v3953_v59, %v2622_v32  ;;  %v4038_v27 = vadd.f32 %v4006_v28, %v2675_v45  ;;  %v4243_v44 = vmul.f32 %v4035_v25, %v4035_v25 }
 0x279   :  { %v3955_v35 = vpop.f32.mrf.mxu0  ;;  %v4008_v17 = vpop.f32.mrf.mxu1  ;;  %v4245_v15 = vmul.f32 %v4037_v56, %v4037_v56 }
 0x27a   :  { %4546 = vst [vmem:[%s7354_s2 + $0x10] sm:$0xff] %v4522_v38  ;;  %v4051_v22 = vadd.f32 %v3955_v35, %v2624_v51  ;;  %v4053_v29 = vadd.f32 %v4008_v17, %v2677_v13  ;;  %v4244_v40 = vmul.f32 %v4036_v50, %v4036_v50  ;;  %v4246_v31 = vmul.f32 %v4038_v27, %v4038_v27 }
 0x27b   :  { %v3957_v49 = vpop.f32.mrf.mxu0  ;;  %v4010_v9 = vpop.f32.mrf.mxu1 }
 0x27c   :  { %v4195_v33 = vadd.f32 %v4051_v22, %v4035_v25  ;;  %v4259_v1 = vmul.f32 %v4051_v22, %v4051_v22  ;;  %v4052_v60 = vadd.f32 %v3957_v49, %v2626_v46  ;;  %v4213_v61 = vadd.f32 %v4053_v29, %v4037_v56 }
 0x27d   :  { %v4261_v26 = vmul.f32 %v4053_v29, %v4053_v29  ;;  %v4054_v32 = vadd.f32 %v4010_v9, %v2679_v4  ;;  %v3961_v53 = vpop.f32.mrf.mxu0  ;;  %v4014_v51 = vpop.f32.mrf.mxu1 }
 0x27e   :  { %v4403_v57 = vadd.f32 %v4259_v1, %v4243_v44  ;;  %v4204_v45 = vadd.f32 %v4052_v60, %v4036_v50  ;;  %v4260_v41 = vmul.f32 %v4052_v60, %v4052_v60  ;;  %v4067_v12 = vadd.f32 %v3961_v53, %v2630_v3 }
 0x27f   :  { %v4421_v58 = vadd.f32 %v4261_v26, %v4245_v15  ;;  %v4222_v34 = vadd.f32 %v4054_v32, %v4038_v27  ;;  %v4262_v47 = vmul.f32 %v4054_v32, %v4054_v32  ;;  %v4069_v13 = vadd.f32 %v4014_v51, %v2683_v11  ;;  %v3963_v52 = vpop.f32.mrf.mxu0  ;;  %v4016_v16 = vpop.f32.mrf.mxu1 }
 0x280   :  { %v4412_v23 = vadd.f32 %v4260_v41, %v4244_v40  ;;  %v4196_v25 = vadd.f32 %v4195_v33, %v4067_v12  ;;  %v4275_v59 = vmul.f32 %v4067_v12, %v4067_v12  ;;  %v4068_v46 = vadd.f32 %v3963_v52, %v2632_v37 }
 0x281   :  { %v4430_v14 = vadd.f32 %v4262_v47, %v4246_v31  ;;  %v4214_v56 = vadd.f32 %v4213_v61, %v4069_v13  ;;  %v4277_v36 = vmul.f32 %v4069_v13, %v4069_v13  ;;  %v4070_v4 = vadd.f32 %v4016_v16, %v2685_v55  ;;  %v3965_v24 = vpop.f32.mrf.mxu0  ;;  %v4018_v7 = vpop.f32.mrf.mxu1 }
 0x282   :  { %v4404_v38 = vadd.f32 %v4403_v57, %v4275_v59  ;;  %v4205_v50 = vadd.f32 %v4204_v45, %v4068_v46  ;;  %v4276_v28 = vmul.f32 %v4068_v46, %v4068_v46  ;;  %v4083_v3 = vadd.f32 %v3965_v24, %v2634_v2 }
 0x283   :  { %v4422_v5 = vadd.f32 %v4421_v58, %v4277_v36  ;;  %v4223_v39 = vadd.f32 %v4222_v34, %v4070_v4  ;;  %v4278_v63 = vmul.f32 %v4070_v4, %v4070_v4  ;;  %v4085_v11 = vadd.f32 %v4018_v7, %v2687_v62  ;;  %v3967_v8 = vpop.f32.mrf.mxu0  ;;  %v4020_v21 = vpop.f32.mrf.mxu1 }
 0x284   :  { %v4413_v18 = vadd.f32 %v4412_v23, %v4276_v28  ;;  %v4197_v27 = vadd.f32 %v4196_v25, %v4083_v3  ;;  %v4291_v35 = vmul.f32 %v4083_v3, %v4083_v3  ;;  %v4084_v37 = vadd.f32 %v3967_v8, %v2636_v30 }
 0x285   :  { %v4431_v20 = vadd.f32 %v4430_v14, %v4278_v63  ;;  %v4215_v0 = vadd.f32 %v4214_v56, %v4085_v11  ;;  %v4293_v42 = vmul.f32 %v4085_v11, %v4085_v11  ;;  %v4086_v55 = vadd.f32 %v4020_v21, %v2689_v43 }
 0x286   :  { %v4198_v10 = vrot.slane %v4197_v27, 4  ;;  %v4405_v6 = vadd.f32 %v4404_v38, %v4291_v35  ;;  %v4206_v22 = vadd.f32 %v4205_v50, %v4084_v37  ;;  %v4292_v17 = vmul.f32 %v4084_v37, %v4084_v37 }
 0x287   :  { %v4216_v2 = vrot.slane %v4215_v0, 4  ;;  %v4423_v48 = vadd.f32 %v4422_v5, %v4293_v42  ;;  %v4224_v54 = vadd.f32 %v4223_v39, %v4086_v55  ;;  %v4294_v44 = vmul.f32 %v4086_v55, %v4086_v55 }
 0x288   :  { %v4199_v15 = vadd.f32 %v4198_v10, %v4197_v27  ;;  %v4406_v62 = vrot.slane %v4405_v6, 4  ;;  %v4207_v29 = vrot.slane %v4206_v22, 4  ;;  %v4414_v49 = vadd.f32 %v4413_v18, %v4292_v17 }
 0x289   :  { %v4217_v40 = vadd.f32 %v4216_v2, %v4215_v0  ;;  %v4424_v33 = vrot.slane %v4423_v48, 4  ;;  %v4225_v30 = vrot.slane %v4224_v54, 4  ;;  %v4432_v1 = vadd.f32 %v4431_v20, %v4294_v44 }
 0x28a   :  { %v4200_v60 = vrot.slane %v4199_v15, 2  ;;  %v4407_v9 = vadd.f32 %v4406_v62, %v4405_v6  ;;  %v4208_v31 = vadd.f32 %v4207_v29, %v4206_v22  ;;  %v4415_v43 = vrot.slane %v4414_v49, 4 }
 0x28b   :  { %v4218_v61 = vrot.slane %v4217_v40, 2  ;;  %v4425_v26 = vadd.f32 %v4424_v33, %v4423_v48  ;;  %v4226_v32 = vadd.f32 %v4225_v30, %v4224_v54  ;;  %v4433_v53 = vrot.slane %v4432_v1, 4 }
 0x28c   :  { %v4201_v57 = vadd.f32 %v4200_v60, %v4199_v15  ;;  %v4408_v45 = vrot.slane %v4407_v9, 2  ;;  %v4209_v41 = vrot.slane %v4208_v31, 2  ;;  %v4416_v12 = vadd.f32 %v4415_v43, %v4414_v49 }
 0x28d   :  { %v4219_v51 = vadd.f32 %v4218_v61, %v4217_v40  ;;  %v4426_v58 = vrot.slane %v4425_v26, 2  ;;  %v4227_v34 = vrot.slane %v4226_v32, 2  ;;  %v4434_v47 = vadd.f32 %v4433_v53, %v4432_v1 }
 0x28e   :  { %v4202_v13 = vrot.slane %v4201_v57, 1  ;;  %v4409_v52 = vadd.f32 %v4408_v45, %v4407_v9  ;;  %v4210_v23 = vadd.f32 %v4209_v41, %v4208_v31  ;;  %v4417_v25 = vrot.slane %v4416_v12, 2 }
 0x28f   :  { %v4220_v59 = vrot.slane %v4219_v51, 1  ;;  %v4427_v46 = vadd.f32 %v4426_v58, %v4425_v26  ;;  %v4228_v16 = vadd.f32 %v4227_v34, %v4226_v32  ;;  %v4435_v14 = vrot.slane %v4434_v47, 2 }
 0x290   :  { %v4410_v56 = vrot.slane %v4409_v52, 1  ;;  %v4211_v36 = vrot.slane %v4210_v23, 1  ;;  %v4418_v4 = vadd.f32 %v4417_v25, %v4416_v12  ;;  %v4203_v28 = vadd.f32 %v4202_v13, %v4201_v57 }
 0x291   :  { %v4428_v24 = vrot.slane %v4427_v46, 1  ;;  %v4229_v38 = vrot.slane %v4228_v16, 1  ;;  %v4436_v50 = vadd.f32 %v4435_v14, %v4434_v47  ;;  %v4221_v5 = vadd.f32 %v4220_v59, %v4219_v51 }
 0x292   :  { %v4411_v3 = vadd.f32 %v4410_v56, %v4409_v52  ;;  %v4419_v7 = vrot.slane %v4418_v4, 1  ;;  %v4212_v8 = vadd.f32 %v4211_v36, %v4210_v23 }
 0x293   :  { %v4429_v39 = vadd.f32 %v4428_v24, %v4427_v46  ;;  %v4437_v63 = vrot.slane %v4436_v50, 1  ;;  %v4230_v35 = vadd.f32 %v4229_v38, %v4228_v16 }
 0x294   :  { %v4452_v11 = vsel %vm4439_vm7, %v4203_v28, %v4411_v3  ;;  %v4420_v18 = vadd.f32 %v4419_v7, %v4418_v4 }
 0x295   :  { %v4454_v27 = vsel %vm4439_vm7, %v4221_v5, %v4429_v39  ;;  %v4438_v37 = vadd.f32 %v4437_v63, %v4436_v50 }
 0x296   :  { %v4453_v21 = vsel %vm4439_vm7, %v4212_v8, %v4420_v18 }
 0x297   :  { %v4523_v20 = vcombine.low %v4452_v11, %v4453_v21  ;;  %v4455_v0 = vsel %vm4439_vm7, %v4230_v35, %v4438_v37 }
 0x298   :  { %v4524_v42 = vcombine.low %v4454_v27, %v4455_v0 }
 0x299   :  { %v4531_v55 = vrot.slane %v4523_v20, %v7220_v19 }
 0x29a   :  { %v4538_v10 = vrot.slane %v4524_v42, %v7220_v19 }
 0x29c   :  { %v4539_v6 = vcombine.low %v4531_v55, %v4538_v10 }
 0x29e   :  { %4547 = vst [vmem:[%s7354_s2 + $0x18] sm:$0xff] %v4539_v6 }

// kernel: unit_forward.3
= control target key start
LH: loop header
LB: loop body
LE: loop exit
PB: predicated region body
PF: predicated region fallthrough
CT: control target
= control target key end

     0   :  { %vm168_vm0 = vsmask.f32 3328  ;;  %vm169_vm1 = vsmask.f32 7440  ;;  %vm1098_vm3 = vcmask 130048   ;;  %vm2703_vm4 = vcmask 1042432   ;;  %s7781_s1 = inlined_call_operand.vmem [shape: bf16[3,144,2048], index: 1, kind: input, shape index: {}]   ;;  %s7782_s0 = inlined_call_operand.vmem [shape: bf16[2,18,144], index: 0, kind: input, shape index: {}]   ;;  %s7783_s2 = inlined_call_operand.vmem [shape: f32[1,2048], index: 2, kind: input, shape index: {}]   ;;  %s7784_s3 = inlined_call_operand.vmem [shape: f32[1,2048], index: 3, kind: input, shape index: {}]   ;;  %s7785_s4 = inlined_call_operand.vmem [shape: f32[2,16,2048], index: 4, kind: output, shape index: {}]  }
   0x1   :  { %v4633_v0 = vld [vmem:[%s7781_s1 + $0x800] sm:$0xff]  ;;  %v4634_v2 = vld [vmem:[%s7781_s1 + $0x808] sm:$0xff]  ;;  %v166_v39 = vld [vmem:[%s7782_s0 + $0x10] sm:$0x11]  ;;  %vm2704_vm5 = vcmask 1046532  }
   0x2   :  { %v4641_v1 = vld [vmem:[%s7781_s1 + $0x840] sm:$0xff]  ;;  %v4642_v4 = vld [vmem:[%s7781_s1 + $0x848] sm:$0xff]  ;;  %v191_v47 = vshll.u32 %v166_v39, 16  ;;  %vm5435_vm2 = vmor %vm168_vm0, %vm169_vm1 }
   0x3   :  { %v4782_v3 = vcombine.high %v4633_v0, %v4641_v1  ;;  %v4781_v5 = vcombine.low %v4633_v0, %v4641_v1  ;;  %v4617_v6 = vld [vmem:[%s7781_s1 + $0x780] sm:$0xff]  ;;  %v4784_v8 = vcombine.high %v4634_v2, %v4642_v4  ;;  %v4783_v9 = vcombine.low %v4634_v2, %v4642_v4  ;;  %v4618_v11 = vld [vmem:[%s7781_s1 + $0x788] sm:$0xff]  ;;  %v4604_v63 = vld [vmem:[%s7781_s1 + $0x718] sm:$0xff] }
   0x4   :  { %v4625_v7 = vld [vmem:[%s7781_s1 + $0x7c0] sm:$0xff]  ;;  %v4626_v12 = vld [vmem:[%s7781_s1 + $0x7c8] sm:$0xff]  ;;  %v193_v59 = vrot.slane %v191_v47, 5  ;;  %vm6426_vm6 = vmor %vm2703_vm4, %vm2704_vm5 }
   0x5   :  { %v4766_v10 = vcombine.high %v4617_v6, %v4625_v7  ;;  %v4601_v13 = vld [vmem:[%s7781_s1 + $0x700] sm:$0xff]  ;;  %1105 = vmatprep.subr.bf16.mxu0 %v4782_v3  ;;  %v4768_v14 = vcombine.high %v4618_v11, %v4626_v12  ;;  %v4602_v16 = vld [vmem:[%s7781_s1 + $0x708] sm:$0xff]  ;;  %1158 = vmatprep.subr.bf16.mxu1 %v4784_v8  ;;  %v4765_v18 = vcombine.low %v4617_v6, %v4625_v7 }
   0x6   :  { %v4609_v15 = vld [vmem:[%s7781_s1 + $0x740] sm:$0xff]  ;;  %v4610_v17 = vld [vmem:[%s7781_s1 + $0x748] sm:$0xff]  ;;  %1106 = vmatpush1.bf16.msra.mxu0 %v4781_v5  ;;  %1159 = vmatpush1.bf16.msra.mxu1 %v4783_v9  ;;  %v4767_v19 = vcombine.low %v4618_v11, %v4626_v12  ;;  %v20_v9 = vld [vmem:[%s7782_s0 + $0x18] sm:$0xff] }
   0x7   :  { %1107 = vmatprep.subr.bf16.mxu0 %v4766_v10  ;;  %v4750_v20 = vcombine.high %v4601_v13, %v4609_v15  ;;  %1160 = vmatprep.subr.bf16.mxu1 %v4768_v14  ;;  %v4752_v21 = vcombine.high %v4602_v16, %v4610_v17  ;;  %v4585_v22 = vld [vmem:[%s7781_s1 + $0x680] sm:$0xff]  ;;  %v4586_v24 = vld [vmem:[%s7781_s1 + $0x688] sm:$0xff]  ;;  %v4749_v26 = vcombine.low %v4601_v13, %v4609_v15 }
   0x8   :  { %v4593_v23 = vld [vmem:[%s7781_s1 + $0x6c0] sm:$0xff]  ;;  %v4594_v25 = vld [vmem:[%s7781_s1 + $0x6c8] sm:$0xff]  ;;  %v4751_v27 = vcombine.low %v4602_v16, %v4610_v17 }
   0x9   :  { %v4734_v28 = vcombine.high %v4585_v22, %v4593_v23  ;;  %v4569_v29 = vld [vmem:[%s7781_s1 + $0x600] sm:$0xff]  ;;  %v4736_v31 = vcombine.high %v4586_v24, %v4594_v25  ;;  %v4570_v32 = vld [vmem:[%s7781_s1 + $0x608] sm:$0xff]  ;;  %v4733_v34 = vcombine.low %v4585_v22, %v4593_v23  ;;  %v4735_v35 = vcombine.low %v4586_v24, %v4594_v25 }
   0xa   :  { %1108 = vmatpush1.bf16.msra.mxu0 %v4765_v18  ;;  %1161 = vmatpush1.bf16.msra.mxu1 %v4767_v19  ;;  %v4577_v30 = vld [vmem:[%s7781_s1 + $0x640] sm:$0xff]  ;;  %v4578_v33 = vld [vmem:[%s7781_s1 + $0x648] sm:$0xff]  ;;  %v196_v19 = vshrl.u32 %v20_v9, 16 }
   0xb   :  { %1109 = vmatprep.subr.bf16.mxu0 %v4750_v20  ;;  %1162 = vmatprep.subr.bf16.mxu1 %v4752_v21  ;;  %v4718_v36 = vcombine.high %v4569_v29, %v4577_v30  ;;  %v5401_v37 = vld [vmem:[%s7782_s0] sm:$0xff]  ;;  %v5406_v38 = vld [vmem:[%s7782_s0 + $0x8] sm:$0xff]  ;;  %v4720_v44 = vcombine.high %v4570_v32, %v4578_v33  ;;  %v4717_v54 = vcombine.low %v4569_v29, %v4577_v30  ;;  %v199_v20 = vshll.u32 %v20_v9, 16 }
   0xc   :  { %v172_v40 = vshrl.u32 %v5401_v37, 16  ;;  %v175_v41 = vshll.u32 %v5401_v37, 16  ;;  %v181_v42 = vshll.u32 %v5406_v38, 16  ;;  %v185_v43 = vshrl.u32 %v5406_v38, 16  ;;  %v4553_v45 = vld [vmem:[%s7781_s1 + $0x580] sm:$0xff]  ;;  %v4554_v48 = vld [vmem:[%s7781_s1 + $0x588] sm:$0xff] }
   0xd   :  { %v4561_v46 = vld [vmem:[%s7781_s1 + $0x5c0] sm:$0xff]  ;;  %v4562_v49 = vld [vmem:[%s7781_s1 + $0x5c8] sm:$0xff]  ;;  %v4719_v55 = vcombine.low %v4570_v32, %v4578_v33  ;;  %v201_v29 = vrot.slane %v199_v20, 5  ;;  %v4571_v20 = vld [vmem:[%s7781_s1 + $0x610] sm:$0xff] }
   0xe   :  { %1110 = vmatpush1.bf16.msra.mxu0 %v4749_v26  ;;  %1163 = vmatpush1.bf16.msra.mxu1 %v4751_v27  ;;  %v174_v50 = vrot.slane %v172_v40, 4  ;;  %v177_v51 = vrot.slane %v175_v41, 5  ;;  %v183_v52 = vrot.slane %v181_v42, 5  ;;  %v187_v53 = vrot.slane %v185_v43, 4  ;;  %v4537_v61 = vld [vmem:[%s7781_s1 + $0x500] sm:$0xff]  ;;  %v4538_v0 = vld [vmem:[%s7781_s1 + $0x508] sm:$0xff] }
   0xf   :  { %1111 = vmatprep.subr.bf16.mxu0 %v4734_v28  ;;  %1164 = vmatprep.subr.bf16.mxu1 %v4736_v31  ;;  %v4702_v56 = vcombine.high %v4553_v45, %v4561_v46  ;;  %v4704_v60 = vcombine.high %v4554_v48, %v4562_v49  ;;  %v4545_v62 = vld [vmem:[%s7781_s1 + $0x540] sm:$0xff]  ;;  %v4546_v1 = vld [vmem:[%s7781_s1 + $0x548] sm:$0xff]  ;;  %v4701_v4 = vcombine.low %v4553_v45, %v4561_v46  ;;  %v198_v28 = vrot.slane %v196_v19, 4  ;;  %v4635_v43 = vld [vmem:[%s7781_s1 + $0x810] sm:$0xff] }
  0x10   :  { %v178_v57 = vor.u32 %v177_v51, %v174_v50  ;;  %v188_v58 = vor.u32 %v187_v53, %v183_v52  ;;  %v4703_v5 = vcombine.low %v4554_v48, %v4562_v49  ;;  %v4686_v6 = vcombine.high %v4537_v61, %v4545_v62  ;;  %v4521_v11 = vld [vmem:[%s7781_s1 + $0x480] sm:$0xff]  ;;  %v4522_v15 = vld [vmem:[%s7781_s1 + $0x488] sm:$0xff]  ;;  %v4636_v45 = vld [vmem:[%s7781_s1 + $0x818] sm:$0xff] }
  0x11   :  { %v4688_v10 = vcombine.high %v4538_v0, %v4546_v1  ;;  %v4529_v12 = vld [vmem:[%s7781_s1 + $0x4c0] sm:$0xff]  ;;  %v4530_v16 = vld [vmem:[%s7781_s1 + $0x4c8] sm:$0xff]  ;;  %v4685_v17 = vcombine.low %v4537_v61, %v4545_v62  ;;  %v4687_v22 = vcombine.low %v4538_v0, %v4546_v1  ;;  %v4644_v46 = vld [vmem:[%s7781_s1 + $0x858] sm:$0xff] }
  0x12   :  { %1112 = vmatpush1.bf16.msra.mxu0 %v4733_v34  ;;  %1165 = vmatpush1.bf16.msra.mxu1 %v4735_v35  ;;  %v179_v2 = vrot.slane %v178_v57, 4  ;;  %v189_v3 = vrot.slane %v188_v58, 4  ;;  %v21_v14 = vld [vmem:[%s7782_s0 + $0x20] sm:$0xff]  ;;  %v167_v18 = vld [vmem:[%s7782_s0 + $0x28] sm:$0x11]  ;;  %v4670_v23 = vcombine.high %v4521_v11, %v4529_v12  ;;  %v4672_v25 = vcombine.high %v4522_v15, %v4530_v16  ;;  %v4620_v57 = vld [vmem:[%s7781_s1 + $0x798] sm:$0xff] }
  0x13   :  { %1113 = vmatprep.subr.bf16.mxu0 %v4718_v36  ;;  %1166 = vmatprep.subr.bf16.mxu1 %v4720_v44  ;;  %v205_v21 = vshll.u32 %v21_v14, 16  ;;  %v209_v24 = vshrl.u32 %v21_v14, 16  ;;  %v4649_v26 = vld [vmem:[%s7781_s1 + $0x880] sm:$0xff]  ;;  %v4650_v31 = vld [vmem:[%s7781_s1 + $0x888] sm:$0xff]  ;;  %v215_v34 = vshll.u32 %v167_v18, 16  ;;  %v4669_v35 = vcombine.low %v4521_v11, %v4529_v12  ;;  %v4643_v44 = vld [vmem:[%s7781_s1 + $0x850] sm:$0xff] }
  0x14   :  { %v5447_v7 = vsel %vm5435_vm2, %v179_v2, %v183_v52  ;;  %v194_v8 = vsel %vm5435_vm2, %v189_v3, %v193_v59  ;;  %v4657_v27 = vld [vmem:[%s7781_s1 + $0x8c0] sm:$0xff]  ;;  %v4658_v32 = vld [vmem:[%s7781_s1 + $0x8c8] sm:$0xff]  ;;  %v202_v36 = vor.u32 %v201_v29, %v198_v28  ;;  %v4671_v39 = vcombine.low %v4522_v15, %v4530_v16  ;;  %v4628_v58 = vld [vmem:[%s7781_s1 + $0x7d8] sm:$0xff] }
  0x15   :  { %v5461_v13 = vcombine.high %v5447_v7, %v194_v8  ;;  %v207_v30 = vrot.slane %v205_v21, 5  ;;  %v211_v33 = vrot.slane %v209_v24, 4  ;;  %v4798_v40 = vcombine.high %v4649_v26, %v4657_v27  ;;  %v4603_v2 = vld [vmem:[%s7781_s1 + $0x710] sm:$0xff]  ;;  %v4588_v12 = vld [vmem:[%s7781_s1 + $0x698] sm:$0xff] }
  0x16   :  { %1114 = vmatpush1.bf16.msra.mxu0 %v4717_v54  ;;  %1167 = vmatpush1.bf16.msra.mxu1 %v4719_v55  ;;  %v4800_v42 = vcombine.high %v4650_v31, %v4658_v32  ;;  %v203_v47 = vrot.slane %v202_v36, 4  ;;  %v217_v49 = vrot.slane %v215_v34, 5  ;;  %v4797_v50 = vcombine.low %v4649_v26, %v4657_v27  ;;  %v4619_v54 = vld [vmem:[%s7781_s1 + $0x790] sm:$0xff]  ;;  %v4596_v14 = vld [vmem:[%s7781_s1 + $0x6d8] sm:$0xff] }
  0x17   :  { %1115 = vmatprep.subr.bf16.mxu0 %v4702_v56  ;;  %1168 = vmatprep.subr.bf16.mxu1 %v4704_v60  ;;  %v212_v41 = vor.u32 %v211_v33, %v207_v30  ;;  %v4799_v51 = vcombine.low %v4650_v31, %v4658_v32  ;;  %v4786_v52 = vcombine.high %v4635_v43, %v4643_v44  ;;  %v4627_v55 = vld [vmem:[%s7781_s1 + $0x7d0] sm:$0xff]  ;;  %v4564_v31 = vld [vmem:[%s7781_s1 + $0x5d8] sm:$0xff] }
  0x18   :  { %4813 = vmatprep.mubr.msk.bf16.mxu0 %vm1098_vm3, %v5461_v13  ;;  %4815 = vmatprep.mubr.msk.bf16.mxu1 %vm1098_vm3, %v5461_v13  ;;  %v4788_v53 = vcombine.high %v4636_v45, %v4644_v46  ;;  %v5510_v56 = vcombine.low %v5447_v7, %v194_v8  ;;  %v208_v59 = vsel %vm5435_vm2, %v203_v47, %v207_v30  ;;  %v4611_v3 = vld [vmem:[%s7781_s1 + $0x750] sm:$0xff]  ;;  %v4556_v30 = vld [vmem:[%s7781_s1 + $0x598] sm:$0xff] }
  0x19   :  { %v213_v48 = vrot.slane %v212_v41, 4  ;;  %v4785_v61 = vcombine.low %v4635_v43, %v4643_v44  ;;  %v4787_v62 = vcombine.low %v4636_v45, %v4644_v46  ;;  %v4770_v0 = vcombine.high %v4619_v54, %v4627_v55  ;;  %v4595_v11 = vld [vmem:[%s7781_s1 + $0x6d0] sm:$0xff]  ;;  %v4548_v41 = vld [vmem:[%s7781_s1 + $0x558] sm:$0xff] }
  0x1a   :  { %1116 = vmatpush1.bf16.msra.mxu0 %v4701_v4  ;;  %1169 = vmatpush1.bf16.msra.mxu1 %v4703_v5  ;;  %v4772_v1 = vcombine.high %v4620_v57, %v4628_v58  ;;  %v4612_v5 = vld [vmem:[%s7781_s1 + $0x758] sm:$0xff]  ;;  %v4771_v7 = vcombine.low %v4620_v57, %v4628_v58  ;;  %v4754_v8 = vcombine.high %v4603_v2, %v4611_v3  ;;  %v4579_v21 = vld [vmem:[%s7781_s1 + $0x650] sm:$0xff] }
  0x1b   :  { %1117 = vmatprep.subr.bf16.mxu0 %v4686_v6  ;;  %1170 = vmatprep.subr.bf16.mxu1 %v4688_v10  ;;  %v218_v60 = vsel %vm5435_vm2, %v213_v48, %v217_v49  ;;  %v4769_v6 = vcombine.low %v4619_v54, %v4627_v55  ;;  %v4756_v9 = vcombine.high %v4604_v63, %v4612_v5  ;;  %v4587_v10 = vld [vmem:[%s7781_s1 + $0x690] sm:$0xff]  ;;  %v4524_v48 = vld [vmem:[%s7781_s1 + $0x498] sm:$0xff] }
  0x1c   :  { %v5528_v4 = vcombine.high %v208_v59, %v218_v60  ;;  %v5554_v15 = vcombine.low %v208_v59, %v218_v60  ;;  %v4753_v16 = vcombine.low %v4603_v2, %v4611_v3  ;;  %v4738_v18 = vcombine.high %v4587_v10, %v4595_v11  ;;  %v4555_v28 = vld [vmem:[%s7781_s1 + $0x590] sm:$0xff]  ;;  %v4532_v49 = vld [vmem:[%s7781_s1 + $0x4d8] sm:$0xff]  ;;  %v4638_v2 = vld [vmem:[%s7781_s1 + $0x828] sm:$0xff] }
  0x1d   :  { %v4740_v19 = vcombine.high %v4588_v12, %v4596_v14  ;;  %v4737_v24 = vcombine.low %v4587_v10, %v4595_v11  ;;  %v4722_v26 = vcombine.high %v4571_v20, %v4579_v21  ;;  %v4563_v29 = vld [vmem:[%s7781_s1 + $0x5d0] sm:$0xff]  ;;  %v4721_v32 = vcombine.low %v4571_v20, %v4579_v21  ;;  %v4652_v57 = vld [vmem:[%s7781_s1 + $0x898] sm:$0xff]  ;;  %v4646_v3 = vld [vmem:[%s7781_s1 + $0x868] sm:$0xff] }
  0x1e   :  { %1118 = vmatpush1.bf16.msra.mxu0 %v4685_v17  ;;  %1171 = vmatpush1.bf16.msra.mxu1 %v4687_v22  ;;  %v4755_v17 = vcombine.low %v4604_v63, %v4612_v5  ;;  %v4572_v22 = vld [vmem:[%s7781_s1 + $0x618] sm:$0xff]  ;;  %v4706_v34 = vcombine.high %v4555_v28, %v4563_v29  ;;  %v4539_v36 = vld [vmem:[%s7781_s1 + $0x510] sm:$0xff]  ;;  %v4707_v43 = vcombine.low %v4556_v30, %v4564_v31  ;;  %v4622_v10 = vld [vmem:[%s7781_s1 + $0x7a8] sm:$0xff] }
  0x1f   :  { %1119 = vmatprep.subr.bf16.mxu0 %v4670_v23  ;;  %1172 = vmatprep.subr.bf16.mxu1 %v4672_v25  ;;  %v4580_v23 = vld [vmem:[%s7781_s1 + $0x658] sm:$0xff]  ;;  %v4739_v25 = vcombine.low %v4588_v12, %v4596_v14  ;;  %v4523_v46 = vld [vmem:[%s7781_s1 + $0x490] sm:$0xff]  ;;  %v4675_v60 = vcombine.low %v4524_v48, %v4532_v49  ;;  %v4630_v11 = vld [vmem:[%s7781_s1 + $0x7e8] sm:$0xff]  ;;  %v4791_v14 = vcombine.low %v4638_v2, %v4646_v3 }
  0x20   :  { %v4724_v27 = vcombine.high %v4572_v22, %v4580_v23  ;;  %v4723_v33 = vcombine.low %v4572_v22, %v4580_v23  ;;  %v4531_v47 = vld [vmem:[%s7781_s1 + $0x4d0] sm:$0xff]  ;;  %v4660_v58 = vld [vmem:[%s7781_s1 + $0x8d8] sm:$0xff]  ;;  %v4606_v20 = vld [vmem:[%s7781_s1 + $0x728] sm:$0xff]  ;;  %v4775_v23 = vcombine.low %v4622_v10, %v4630_v11 }
  0x21   :  { %v4651_v54 = vld [vmem:[%s7781_s1 + $0x890] sm:$0xff]  ;;  %v4673_v59 = vcombine.low %v4523_v46, %v4531_v47  ;;  %v4803_v5 = vcombine.low %v4652_v57, %v4660_v58  ;;  %v4614_v21 = vld [vmem:[%s7781_s1 + $0x768] sm:$0xff] }
  0x22   :  { %1120 = vmatpush1.bf16.msra.mxu0 %v4669_v35  ;;  %1173 = vmatpush1.bf16.msra.mxu1 %v4671_v39  ;;  %v4708_v35 = vcombine.high %v4556_v30, %v4564_v31  ;;  %v4547_v39 = vld [vmem:[%s7781_s1 + $0x550] sm:$0xff]  ;;  %v4759_v31 = vcombine.low %v4606_v20, %v4614_v21 }
  0x23   :  { %1135 = vmatprep.subr.bf16.mxu0 %v4798_v40  ;;  %1188 = vmatprep.subr.bf16.mxu1 %v4800_v42  ;;  %v4540_v40 = vld [vmem:[%s7781_s1 + $0x518] sm:$0xff]  ;;  %v4705_v42 = vcombine.low %v4555_v28, %v4563_v29  ;;  %v4690_v44 = vcombine.high %v4539_v36, %v4547_v39  ;;  %v4659_v55 = vld [vmem:[%s7781_s1 + $0x8d0] sm:$0xff]  ;;  %v4590_v28 = vld [vmem:[%s7781_s1 + $0x6a8] sm:$0xff] }
  0x24   :  { %v4692_v45 = vcombine.high %v4540_v40, %v4548_v41  ;;  %v4801_v63 = vcombine.low %v4651_v54, %v4659_v55  ;;  %v4598_v29 = vld [vmem:[%s7781_s1 + $0x6e8] sm:$0xff] }
  0x26   :  { %1136 = vmatpush2.bf16.msra.mxu0 %v4797_v50  ;;  %1189 = vmatpush2.bf16.msra.mxu1 %v4799_v51  ;;  %v4689_v50 = vcombine.low %v4539_v36, %v4547_v39  ;;  %v4691_v51 = vcombine.low %v4540_v40, %v4548_v41  ;;  %v4574_v36 = vld [vmem:[%s7781_s1 + $0x628] sm:$0xff]  ;;  %v4743_v41 = vcombine.low %v4590_v28, %v4598_v29 }
  0x27   :  { %1211 = vmatprep.subr.bf16.mxu0 %v4786_v52  ;;  %1264 = vmatprep.subr.bf16.mxu1 %v4788_v53  ;;  %v4674_v52 = vcombine.high %v4523_v46, %v4531_v47  ;;  %v4676_v53 = vcombine.high %v4524_v48, %v4532_v49  ;;  %v4582_v39 = vld [vmem:[%s7781_s1 + $0x668] sm:$0xff] }
  0x28   :  { %v4558_v46 = vld [vmem:[%s7781_s1 + $0x5a8] sm:$0xff]  ;;  %v4727_v49 = vcombine.low %v4574_v36, %v4582_v39 }
  0x29   :  { %1138 = vmatmul.mubr.bf16.vlgmr.msra.gmra.mxu0 %v5510_v56  ;;  %1191 = vmatmul.mubr.bf16.vlgmr.msra.gmra.mxu1 %v5510_v56  ;;  %v4566_v47 = vld [vmem:[%s7781_s1 + $0x5e8] sm:$0xff] }
  0x2a   :  { %1212 = vmatpush1.bf16.msra.mxu0 %v4785_v61  ;;  %1265 = vmatpush1.bf16.msra.mxu1 %v4787_v62  ;;  %v4802_v61 = vcombine.high %v4651_v54, %v4659_v55  ;;  %v4804_v62 = vcombine.high %v4652_v57, %v4660_v58  ;;  %v4542_v54 = vld [vmem:[%s7781_s1 + $0x528] sm:$0xff]  ;;  %v4711_v58 = vcombine.low %v4558_v46, %v4566_v47 }
  0x2b   :  { %1213 = vmatprep.subr.bf16.mxu0 %v4770_v0  ;;  %1266 = vmatprep.subr.bf16.mxu1 %v4772_v1  ;;  %v4637_v0 = vld [vmem:[%s7781_s1 + $0x820] sm:$0xff]  ;;  %v4550_v55 = vld [vmem:[%s7781_s1 + $0x568] sm:$0xff] }
  0x2c   :  { %4814 = vmatprep.mubr.msk.bf16.mxu0 %vm1098_vm3, %v5528_v4  ;;  %4816 = vmatprep.mubr.msk.bf16.mxu1 %vm1098_vm3, %v5528_v4  ;;  %v4645_v1 = vld [vmem:[%s7781_s1 + $0x860] sm:$0xff] }
  0x2d   :  { %v4789_v12 = vcombine.low %v4637_v0, %v4645_v1 }
  0x2e   :  { %1214 = vmatpush1.bf16.msra.mxu0 %v4769_v6  ;;  %1267 = vmatpush1.bf16.msra.mxu1 %v4771_v7  ;;  %v4790_v6 = vcombine.high %v4637_v0, %v4645_v1  ;;  %v4792_v7 = vcombine.high %v4638_v2, %v4646_v3  ;;  %v4526_v0 = vld [vmem:[%s7781_s1 + $0x4a8] sm:$0xff]  ;;  %v4695_v3 = vcombine.low %v4542_v54, %v4550_v55 }
  0x2f   :  { %1215 = vmatprep.subr.bf16.mxu0 %v4754_v8  ;;  %1268 = vmatprep.subr.bf16.mxu1 %v4756_v9  ;;  %v4621_v8 = vld [vmem:[%s7781_s1 + $0x7a0] sm:$0xff]  ;;  %v4534_v1 = vld [vmem:[%s7781_s1 + $0x4e8] sm:$0xff] }
  0x30   :  { %v4629_v9 = vld [vmem:[%s7781_s1 + $0x7e0] sm:$0xff] }
  0x31   :  { %1148 = vmatmul.mubr.bf16.gmra.mxu0 %v5554_v15  ;;  %1201 = vmatmul.mubr.bf16.gmra.mxu1 %v5554_v15  ;;  %v4773_v22 = vcombine.low %v4621_v8, %v4629_v9 }
  0x32   :  { %1216 = vmatpush1.bf16.msra.mxu0 %v4753_v16  ;;  %1269 = vmatpush1.bf16.msra.mxu1 %v4755_v17  ;;  %v4774_v16 = vcombine.high %v4621_v8, %v4629_v9  ;;  %v4776_v17 = vcombine.high %v4622_v10, %v4630_v11  ;;  %v4654_v8 = vld [vmem:[%s7781_s1 + $0x8a8] sm:$0xff]  ;;  %v4679_v11 = vcombine.low %v4526_v0, %v4534_v1 }
  0x33   :  { %1217 = vmatprep.subr.bf16.mxu0 %v4738_v18  ;;  %1270 = vmatprep.subr.bf16.mxu1 %v4740_v19  ;;  %v4605_v18 = vld [vmem:[%s7781_s1 + $0x720] sm:$0xff]  ;;  %v4662_v9 = vld [vmem:[%s7781_s1 + $0x8e8] sm:$0xff] }
  0x34   :  { %4817 = vmatprep.mubr.msk.bf16.mxu0 %vm1098_vm3, %v5461_v13  ;;  %4819 = vmatprep.mubr.msk.bf16.mxu1 %vm1098_vm3, %v5461_v13  ;;  %v4613_v19 = vld [vmem:[%s7781_s1 + $0x760] sm:$0xff] }
  0x35   :  { %v4757_v30 = vcombine.low %v4605_v18, %v4613_v19 }
  0x36   :  { %1218 = vmatpush1.bf16.msra.mxu0 %v4737_v24  ;;  %1271 = vmatpush1.bf16.msra.mxu1 %v4739_v25  ;;  %v4758_v24 = vcombine.high %v4605_v18, %v4613_v19  ;;  %v4760_v25 = vcombine.high %v4606_v20, %v4614_v21  ;;  %v4640_v18 = vld [vmem:[%s7781_s1 + $0x838] sm:$0xff]  ;;  %v4807_v21 = vcombine.low %v4654_v8, %v4662_v9 }
  0x37   :  { %1219 = vmatprep.subr.bf16.mxu0 %v4722_v26  ;;  %1272 = vmatprep.subr.bf16.mxu1 %v4724_v27  ;;  %v4589_v26 = vld [vmem:[%s7781_s1 + $0x6a0] sm:$0xff]  ;;  %v4648_v19 = vld [vmem:[%s7781_s1 + $0x878] sm:$0xff] }
  0x38   :  { %v4597_v27 = vld [vmem:[%s7781_s1 + $0x6e0] sm:$0xff] }
  0x39   :  { %v4741_v40 = vcombine.low %v4589_v26, %v4597_v27 }
  0x3a   :  { %1220 = vmatpush1.bf16.msra.mxu0 %v4721_v32  ;;  %1273 = vmatpush1.bf16.msra.mxu1 %v4723_v33  ;;  %v4742_v32 = vcombine.high %v4589_v26, %v4597_v27  ;;  %v4744_v33 = vcombine.high %v4590_v28, %v4598_v29  ;;  %v4624_v26 = vld [vmem:[%s7781_s1 + $0x7b8] sm:$0xff]  ;;  %v4795_v29 = vcombine.low %v4640_v18, %v4648_v19 }
  0x3b   :  { %1221 = vmatprep.subr.bf16.mxu0 %v4706_v34  ;;  %1274 = vmatprep.subr.bf16.mxu1 %v4708_v35  ;;  %v4573_v34 = vld [vmem:[%s7781_s1 + $0x620] sm:$0xff]  ;;  %v4632_v27 = vld [vmem:[%s7781_s1 + $0x7f8] sm:$0xff] }
  0x3c   :  { %v4581_v35 = vld [vmem:[%s7781_s1 + $0x660] sm:$0xff] }
  0x3d   :  { %v4725_v48 = vcombine.low %v4573_v34, %v4581_v35 }
  0x3e   :  { %1222 = vmatpush1.bf16.msra.mxu0 %v4705_v42  ;;  %1275 = vmatpush1.bf16.msra.mxu1 %v4707_v43  ;;  %v4726_v42 = vcombine.high %v4573_v34, %v4581_v35  ;;  %v4728_v43 = vcombine.high %v4574_v36, %v4582_v39  ;;  %v4608_v34 = vld [vmem:[%s7781_s1 + $0x738] sm:$0xff]  ;;  %v4779_v39 = vcombine.low %v4624_v26, %v4632_v27 }
  0x3f   :  { %1223 = vmatprep.subr.bf16.mxu0 %v4690_v44  ;;  %1276 = vmatprep.subr.bf16.mxu1 %v4692_v45  ;;  %v4557_v44 = vld [vmem:[%s7781_s1 + $0x5a0] sm:$0xff]  ;;  %v4616_v35 = vld [vmem:[%s7781_s1 + $0x778] sm:$0xff] }
  0x40   :  { %v4565_v45 = vld [vmem:[%s7781_s1 + $0x5e0] sm:$0xff] }
  0x41   :  { %v4709_v57 = vcombine.low %v4557_v44, %v4565_v45 }
  0x42   :  { %1224 = vmatpush1.bf16.msra.mxu0 %v4689_v50  ;;  %1277 = vmatpush1.bf16.msra.mxu1 %v4691_v51  ;;  %v4710_v50 = vcombine.high %v4557_v44, %v4565_v45  ;;  %v4712_v51 = vcombine.high %v4558_v46, %v4566_v47  ;;  %v4592_v44 = vld [vmem:[%s7781_s1 + $0x6b8] sm:$0xff]  ;;  %v4763_v47 = vcombine.low %v4608_v34, %v4616_v35 }
  0x43   :  { %1225 = vmatprep.subr.bf16.mxu0 %v4674_v52  ;;  %1278 = vmatprep.subr.bf16.mxu1 %v4676_v53  ;;  %v4541_v52 = vld [vmem:[%s7781_s1 + $0x520] sm:$0xff]  ;;  %v4600_v45 = vld [vmem:[%s7781_s1 + $0x6f8] sm:$0xff] }
  0x44   :  { %v4549_v53 = vld [vmem:[%s7781_s1 + $0x560] sm:$0xff] }
  0x45   :  { %v4693_v2 = vcombine.low %v4541_v52, %v4549_v53 }
  0x46   :  { %1226 = vmatpush1.bf16.msra.mxu0 %v4673_v59  ;;  %1279 = vmatpush1.bf16.msra.mxu1 %v4675_v60  ;;  %v4694_v59 = vcombine.high %v4541_v52, %v4549_v53  ;;  %v4696_v60 = vcombine.high %v4542_v54, %v4550_v55  ;;  %v4576_v52 = vld [vmem:[%s7781_s1 + $0x638] sm:$0xff]  ;;  %v4747_v55 = vcombine.low %v4592_v44, %v4600_v45 }
  0x47   :  { %1241 = vmatprep.subr.bf16.mxu0 %v4802_v61  ;;  %1294 = vmatprep.subr.bf16.mxu1 %v4804_v62  ;;  %v4525_v61 = vld [vmem:[%s7781_s1 + $0x4a0] sm:$0xff]  ;;  %v4584_v53 = vld [vmem:[%s7781_s1 + $0x678] sm:$0xff] }
  0x48   :  { %v4533_v62 = vld [vmem:[%s7781_s1 + $0x4e0] sm:$0xff] }
  0x49   :  { %v4677_v10 = vcombine.low %v4525_v61, %v4533_v62 }
  0x4a   :  { %1242 = vmatpush2.bf16.msra.mxu0 %v4801_v63  ;;  %1295 = vmatpush2.bf16.msra.mxu1 %v4803_v5  ;;  %v4678_v63 = vcombine.high %v4525_v61, %v4533_v62  ;;  %v4680_v5 = vcombine.high %v4526_v0, %v4534_v1  ;;  %v4560_v61 = vld [vmem:[%s7781_s1 + $0x5b8] sm:$0xff]  ;;  %v4731_v1 = vcombine.low %v4576_v52, %v4584_v53 }
  0x4b   :  { %1317 = vmatprep.subr.bf16.mxu0 %v4790_v6  ;;  %1370 = vmatprep.subr.bf16.mxu1 %v4792_v7  ;;  %v4653_v6 = vld [vmem:[%s7781_s1 + $0x8a0] sm:$0xff]  ;;  %v4568_v62 = vld [vmem:[%s7781_s1 + $0x5f8] sm:$0xff] }
  0x4c   :  { %v4661_v7 = vld [vmem:[%s7781_s1 + $0x8e0] sm:$0xff] }
  0x4d   :  { %1244 = vmatmul.mubr.bf16.vlgmr.msra.gmra.mxu0 %v5510_v56  ;;  %1297 = vmatmul.mubr.bf16.vlgmr.msra.gmra.mxu1 %v5510_v56  ;;  %v4805_v20 = vcombine.low %v4653_v6, %v4661_v7 }
  0x4e   :  { %1318 = vmatpush1.bf16.msra.mxu0 %v4789_v12  ;;  %1371 = vmatpush1.bf16.msra.mxu1 %v4791_v14  ;;  %v4806_v12 = vcombine.high %v4653_v6, %v4661_v7  ;;  %v4808_v14 = vcombine.high %v4654_v8, %v4662_v9  ;;  %v4552_v6 = vld [vmem:[%s7781_s1 + $0x578] sm:$0xff]  ;;  %v4715_v8 = vcombine.low %v4560_v61, %v4568_v62 }
  0x4f   :  { %1319 = vmatprep.subr.bf16.mxu0 %v4774_v16  ;;  %1372 = vmatprep.subr.bf16.mxu1 %v4776_v17  ;;  %v4639_v16 = vld [vmem:[%s7781_s1 + $0x830] sm:$0xff] }
  0x50   :  { %4818 = vmatprep.mubr.msk.bf16.mxu0 %vm1098_vm3, %v5528_v4  ;;  %4820 = vmatprep.mubr.msk.bf16.mxu1 %vm1098_vm3, %v5528_v4  ;;  %v4647_v17 = vld [vmem:[%s7781_s1 + $0x870] sm:$0xff] }
  0x51   :  { %v4793_v28 = vcombine.low %v4639_v16, %v4647_v17 }
  0x52   :  { %1320 = vmatpush1.bf16.msra.mxu0 %v4773_v22  ;;  %1373 = vmatpush1.bf16.msra.mxu1 %v4775_v23  ;;  %v4794_v22 = vcombine.high %v4639_v16, %v4647_v17  ;;  %v4796_v23 = vcombine.high %v4640_v18, %v4648_v19  ;;  %v4536_v16 = vld [vmem:[%s7781_s1 + $0x4f8] sm:$0xff] }
  0x53   :  { %1321 = vmatprep.subr.bf16.mxu0 %v4758_v24  ;;  %1374 = vmatprep.subr.bf16.mxu1 %v4760_v25  ;;  %v4623_v24 = vld [vmem:[%s7781_s1 + $0x7b0] sm:$0xff] }
  0x54   :  { %v4631_v25 = vld [vmem:[%s7781_s1 + $0x7f0] sm:$0xff] }
  0x55   :  { %1254 = vmatmul.mubr.bf16.gmra.mxu0 %v5554_v15  ;;  %1307 = vmatmul.mubr.bf16.gmra.mxu1 %v5554_v15  ;;  %v4777_v36 = vcombine.low %v4623_v24, %v4631_v25 }
  0x56   :  { %1322 = vmatpush1.bf16.msra.mxu0 %v4757_v30  ;;  %1375 = vmatpush1.bf16.msra.mxu1 %v4759_v31  ;;  %v4778_v30 = vcombine.high %v4623_v24, %v4631_v25  ;;  %v4780_v31 = vcombine.high %v4624_v26, %v4632_v27  ;;  %v4664_v24 = vld [vmem:[%s7781_s1 + $0x8f8] sm:$0xff] }
  0x57   :  { %1323 = vmatprep.subr.bf16.mxu0 %v4742_v32  ;;  %1376 = vmatprep.subr.bf16.mxu1 %v4744_v33  ;;  %v4607_v32 = vld [vmem:[%s7781_s1 + $0x730] sm:$0xff] }
  0x58   :  { %4821 = vmatprep.mubr.msk.bf16.mxu0 %vm1098_vm3, %v5461_v13  ;;  %4823 = vmatprep.mubr.msk.bf16.mxu1 %vm1098_vm3, %v5461_v13  ;;  %v4615_v33 = vld [vmem:[%s7781_s1 + $0x770] sm:$0xff] }
  0x59   :  { %v4761_v46 = vcombine.low %v4607_v32, %v4615_v33 }
  0x5a   :  { %1324 = vmatpush1.bf16.msra.mxu0 %v4741_v40  ;;  %1377 = vmatpush1.bf16.msra.mxu1 %v4743_v41  ;;  %v4762_v40 = vcombine.high %v4607_v32, %v4615_v33  ;;  %v4764_v41 = vcombine.high %v4608_v34, %v4616_v35  ;;  %v143_v32 = vld [vmem:[%s7781_s1 + $0x3c8] sm:$0xff] }
  0x5b   :  { %1325 = vmatprep.subr.bf16.mxu0 %v4726_v42  ;;  %1378 = vmatprep.subr.bf16.mxu1 %v4728_v43  ;;  %v4591_v42 = vld [vmem:[%s7781_s1 + $0x6b0] sm:$0xff] }
  0x5c   :  { %v4599_v43 = vld [vmem:[%s7781_s1 + $0x6f0] sm:$0xff] }
  0x5d   :  { %v4745_v54 = vcombine.low %v4591_v42, %v4599_v43 }
  0x5e   :  { %1326 = vmatpush1.bf16.msra.mxu0 %v4725_v48  ;;  %1379 = vmatpush1.bf16.msra.mxu1 %v4727_v49  ;;  %v4746_v48 = vcombine.high %v4591_v42, %v4599_v43  ;;  %v4748_v49 = vcombine.high %v4592_v44, %v4600_v45  ;;  %v127_v42 = vld [vmem:[%s7781_s1 + $0x348] sm:$0xff] }
  0x5f   :  { %1327 = vmatprep.subr.bf16.mxu0 %v4710_v50  ;;  %1380 = vmatprep.subr.bf16.mxu1 %v4712_v51  ;;  %v4575_v50 = vld [vmem:[%s7781_s1 + $0x630] sm:$0xff] }
  0x60   :  { %v4583_v51 = vld [vmem:[%s7781_s1 + $0x670] sm:$0xff] }
  0x61   :  { %v4729_v0 = vcombine.low %v4575_v50, %v4583_v51 }
  0x62   :  { %1328 = vmatpush1.bf16.msra.mxu0 %v4709_v57  ;;  %1381 = vmatpush1.bf16.msra.mxu1 %v4711_v58  ;;  %v4730_v57 = vcombine.high %v4575_v50, %v4583_v51  ;;  %v4732_v58 = vcombine.high %v4576_v52, %v4584_v53  ;;  %v111_v50 = vld [vmem:[%s7781_s1 + $0x2c8] sm:$0xff] }
  0x63   :  { %1329 = vmatprep.subr.bf16.mxu0 %v4694_v59  ;;  %1382 = vmatprep.subr.bf16.mxu1 %v4696_v60  ;;  %v4559_v59 = vld [vmem:[%s7781_s1 + $0x5b0] sm:$0xff] }
  0x64   :  { %v4567_v60 = vld [vmem:[%s7781_s1 + $0x5f0] sm:$0xff] }
  0x65   :  { %v4713_v7 = vcombine.low %v4559_v59, %v4567_v60 }
  0x66   :  { %1330 = vmatpush1.bf16.msra.mxu0 %v4693_v2  ;;  %1383 = vmatpush1.bf16.msra.mxu1 %v4695_v3  ;;  %v4714_v2 = vcombine.high %v4559_v59, %v4567_v60  ;;  %v4716_v3 = vcombine.high %v4560_v61, %v4568_v62 }
  0x67   :  { %1331 = vmatprep.subr.bf16.mxu0 %v4678_v63  ;;  %1384 = vmatprep.subr.bf16.mxu1 %v4680_v5  ;;  %v4543_v63 = vld [vmem:[%s7781_s1 + $0x530] sm:$0xff] }
  0x68   :  { %v4551_v5 = vld [vmem:[%s7781_s1 + $0x570] sm:$0xff] }
  0x69   :  { %v4698_v9 = vcombine.high %v4543_v63, %v4551_v5  ;;  %v4697_v17 = vcombine.low %v4543_v63, %v4551_v5 }
  0x6a   :  { %1332 = vmatpush1.bf16.msra.mxu0 %v4677_v10  ;;  %1385 = vmatpush1.bf16.msra.mxu1 %v4679_v11  ;;  %v4527_v11 = vld [vmem:[%s7781_s1 + $0x4b0] sm:$0xff] }
  0x6b   :  { %1347 = vmatprep.subr.bf16.mxu0 %v4806_v12  ;;  %1400 = vmatprep.subr.bf16.mxu1 %v4808_v14  ;;  %v4535_v12 = vld [vmem:[%s7781_s1 + $0x4f0] sm:$0xff]  ;;  %v4528_v14 = vld [vmem:[%s7781_s1 + $0x4b8] sm:$0xff] }
  0x6c   :  { %v4682_v19 = vcombine.high %v4527_v11, %v4535_v12  ;;  %v4681_v25 = vcombine.low %v4527_v11, %v4535_v12  ;;  %v4683_v26 = vcombine.low %v4528_v14, %v4536_v16  ;;  %v38_v12 = vld [vmem:[%s7781_s1 + $0x80] sm:$0xff] }
  0x6e   :  { %1348 = vmatpush2.bf16.msra.mxu0 %v4805_v20  ;;  %1401 = vmatpush2.bf16.msra.mxu1 %v4807_v21  ;;  %v4684_v20 = vcombine.high %v4528_v14, %v4536_v16  ;;  %v4655_v21 = vld [vmem:[%s7781_s1 + $0x8b0] sm:$0xff]  ;;  %v46_v14 = vld [vmem:[%s7781_s1 + $0xc0] sm:$0xff]  ;;  %v39_v16 = vld [vmem:[%s7781_s1 + $0x88] sm:$0xff] }
  0x6f   :  { %1423 = vmatprep.subr.bf16.mxu0 %v4794_v22  ;;  %1476 = vmatprep.subr.bf16.mxu1 %v4796_v23  ;;  %v4663_v22 = vld [vmem:[%s7781_s1 + $0x8f0] sm:$0xff]  ;;  %v4656_v23 = vld [vmem:[%s7781_s1 + $0x8b8] sm:$0xff] }
  0x70   :  { %v4810_v27 = vcombine.high %v4655_v21, %v4663_v22  ;;  %v4809_v33 = vcombine.low %v4655_v21, %v4663_v22  ;;  %v4811_v34 = vcombine.low %v4656_v23, %v4664_v24  ;;  %v22_v22 = vld [vmem:[%s7781_s1] sm:$0xff] }
  0x71   :  { %1350 = vmatmul.mubr.bf16.vlgmr.msra.gmra.mxu0 %v5510_v56  ;;  %1403 = vmatmul.mubr.bf16.vlgmr.msra.gmra.mxu1 %v5510_v56 }
  0x72   :  { %1424 = vmatpush1.bf16.msra.mxu0 %v4793_v28  ;;  %1477 = vmatpush1.bf16.msra.mxu1 %v4795_v29  ;;  %v4812_v28 = vcombine.high %v4656_v23, %v4664_v24  ;;  %v134_v29 = vld [vmem:[%s7781_s1 + $0x380] sm:$0xff]  ;;  %v23_v24 = vld [vmem:[%s7781_s1 + $0x8] sm:$0xff] }
  0x73   :  { %1425 = vmatprep.subr.bf16.mxu0 %v4778_v30  ;;  %1478 = vmatprep.subr.bf16.mxu1 %v4780_v31  ;;  %v142_v30 = vld [vmem:[%s7781_s1 + $0x3c0] sm:$0xff]  ;;  %v135_v31 = vld [vmem:[%s7781_s1 + $0x388] sm:$0xff] }
  0x74   :  { %4822 = vmatprep.mubr.msk.bf16.mxu0 %vm1098_vm3, %v5528_v4  ;;  %4824 = vmatprep.mubr.msk.bf16.mxu1 %vm1098_vm3, %v5528_v4  ;;  %v4946_v35 = vcombine.high %v134_v29, %v142_v30  ;;  %v4945_v43 = vcombine.low %v134_v29, %v142_v30  ;;  %v4947_v44 = vcombine.low %v135_v31, %v143_v32  ;;  %v30_v23 = vld [vmem:[%s7781_s1 + $0x40] sm:$0xff] }
  0x75   :  { %v150_v30 = vld [vmem:[%s7781_s1 + $0x400] sm:$0xff] }
  0x76   :  { %1426 = vmatpush1.bf16.msra.mxu0 %v4777_v36  ;;  %1479 = vmatpush1.bf16.msra.mxu1 %v4779_v39  ;;  %v4948_v36 = vcombine.high %v135_v31, %v143_v32  ;;  %v118_v39 = vld [vmem:[%s7781_s1 + $0x300] sm:$0xff]  ;;  %v151_v32 = vld [vmem:[%s7781_s1 + $0x408] sm:$0xff] }
  0x77   :  { %1427 = vmatprep.subr.bf16.mxu0 %v4762_v40  ;;  %1480 = vmatprep.subr.bf16.mxu1 %v4764_v41  ;;  %v126_v40 = vld [vmem:[%s7781_s1 + $0x340] sm:$0xff]  ;;  %v119_v41 = vld [vmem:[%s7781_s1 + $0x308] sm:$0xff] }
  0x78   :  { %v4930_v45 = vcombine.high %v118_v39, %v126_v40  ;;  %v4929_v51 = vcombine.low %v118_v39, %v126_v40  ;;  %v4931_v52 = vcombine.low %v119_v41, %v127_v42  ;;  %v158_v31 = vld [vmem:[%s7781_s1 + $0x440] sm:$0xff]  ;;  %v136_v40 = vld [vmem:[%s7781_s1 + $0x390] sm:$0xff] }
  0x79   :  { %1360 = vmatmul.mubr.bf16.gmra.mxu0 %v5554_v15  ;;  %1413 = vmatmul.mubr.bf16.gmra.mxu1 %v5554_v15 }
  0x7a   :  { %1428 = vmatpush1.bf16.msra.mxu0 %v4761_v46  ;;  %1481 = vmatpush1.bf16.msra.mxu1 %v4763_v47  ;;  %v4932_v46 = vcombine.high %v119_v41, %v127_v42  ;;  %v102_v47 = vld [vmem:[%s7781_s1 + $0x280] sm:$0xff]  ;;  %v144_v41 = vld [vmem:[%s7781_s1 + $0x3d0] sm:$0xff]  ;;  %v137_v42 = vld [vmem:[%s7781_s1 + $0x398] sm:$0xff] }
  0x7b   :  { %1429 = vmatprep.subr.bf16.mxu0 %v4746_v48  ;;  %1482 = vmatprep.subr.bf16.mxu1 %v4748_v49  ;;  %v110_v48 = vld [vmem:[%s7781_s1 + $0x2c0] sm:$0xff]  ;;  %v103_v49 = vld [vmem:[%s7781_s1 + $0x288] sm:$0xff] }
  0x7c   :  { %4825 = vmatprep.mubr.msk.bf16.mxu0 %vm1098_vm3, %v5461_v13  ;;  %4827 = vmatprep.mubr.msk.bf16.mxu1 %vm1098_vm3, %v5461_v13  ;;  %v4544_v13 = vld [vmem:[%s7781_s1 + $0x538] sm:$0xff]  ;;  %v4914_v53 = vcombine.high %v102_v47, %v110_v48  ;;  %v4913_v59 = vcombine.low %v102_v47, %v110_v48  ;;  %v4915_v60 = vcombine.low %v103_v49, %v111_v50  ;;  %v120_v48 = vld [vmem:[%s7781_s1 + $0x310] sm:$0xff] }
  0x7d   :  { %v4700_v10 = vcombine.high %v4544_v13, %v4552_v6  ;;  %v4699_v18 = vcombine.low %v4544_v13, %v4552_v6  ;;  %v62_v6 = vld [vmem:[%s7781_s1 + $0x140] sm:$0xff] }
  0x7e   :  { %1430 = vmatpush1.bf16.msra.mxu0 %v4745_v54  ;;  %1483 = vmatpush1.bf16.msra.mxu1 %v4747_v55  ;;  %v4916_v54 = vcombine.high %v103_v49, %v111_v50  ;;  %v86_v55 = vld [vmem:[%s7781_s1 + $0x200] sm:$0xff]  ;;  %v128_v49 = vld [vmem:[%s7781_s1 + $0x350] sm:$0xff] }
  0x7f   :  { %1431 = vmatprep.subr.bf16.mxu0 %v4730_v57  ;;  %1484 = vmatprep.subr.bf16.mxu1 %v4732_v58  ;;  %v94_v57 = vld [vmem:[%s7781_s1 + $0x240] sm:$0xff]  ;;  %v95_v58 = vld [vmem:[%s7781_s1 + $0x248] sm:$0xff] }
  0x80   :  { %v4898_v61 = vcombine.high %v86_v55, %v94_v57  ;;  %v4897_v63 = vcombine.low %v86_v55, %v94_v57  ;;  %v5307_v50 = vld [vmem:[%s7782_s0] sm:$0xff]  ;;  %v4949_v55 = vcombine.low %v136_v40, %v144_v41 }
  0x82   :  { %1432 = vmatpush1.bf16.msra.mxu0 %v4729_v0  ;;  %1485 = vmatpush1.bf16.msra.mxu1 %v4731_v1  ;;  %v70_v0 = vld [vmem:[%s7781_s1 + $0x180] sm:$0xff] }
  0x83   :  { %1433 = vmatprep.subr.bf16.mxu0 %v4714_v2  ;;  %1486 = vmatprep.subr.bf16.mxu1 %v4716_v3  ;;  %v78_v1 = vld [vmem:[%s7781_s1 + $0x1c0] sm:$0xff]  ;;  %v5924_v2 = vcombine.high %v5401_v37, %v5406_v38  ;;  %v79_v3 = vld [vmem:[%s7781_s1 + $0x1c8] sm:$0xff] }
  0x84   :  { %v4882_v13 = vcombine.high %v70_v0, %v78_v1  ;;  %v54_v38 = vld [vmem:[%s7781_s1 + $0x100] sm:$0xff] }
  0x86   :  { %1434 = vmatpush1.bf16.msra.mxu0 %v4713_v7  ;;  %1487 = vmatpush1.bf16.msra.mxu1 %v4715_v8  ;;  %v63_v7 = vld [vmem:[%s7781_s1 + $0x148] sm:$0xff]  ;;  %v4881_v8 = vcombine.low %v70_v0, %v78_v1  ;;  %v112_v0 = vld [vmem:[%s7781_s1 + $0x2d0] sm:$0xff]  ;;  %v105_v1 = vld [vmem:[%s7781_s1 + $0x298] sm:$0xff] }
  0x87   :  { %1435 = vmatprep.subr.bf16.mxu0 %v4698_v9  ;;  %1488 = vmatprep.subr.bf16.mxu1 %v4700_v10  ;;  %v4866_v10 = vcombine.high %v54_v38, %v62_v6 }
  0x8a   :  { %1436 = vmatpush1.bf16.msra.mxu0 %v4697_v17  ;;  %1489 = vmatpush1.bf16.msra.mxu1 %v4699_v18  ;;  %v47_v17 = vld [vmem:[%s7781_s1 + $0xc8] sm:$0xff]  ;;  %v4865_v18 = vcombine.low %v54_v38, %v62_v6  ;;  %v96_v38 = vld [vmem:[%s7781_s1 + $0x250] sm:$0xff] }
  0x8b   :  { %1437 = vmatprep.subr.bf16.mxu0 %v4682_v19  ;;  %1490 = vmatprep.subr.bf16.mxu1 %v4684_v20  ;;  %v4850_v20 = vcombine.high %v38_v12, %v46_v14  ;;  %v4852_v21 = vcombine.high %v39_v16, %v47_v17 }
  0x8e   :  { %1438 = vmatpush1.bf16.msra.mxu0 %v4681_v25  ;;  %1491 = vmatpush1.bf16.msra.mxu1 %v4683_v26  ;;  %v31_v25 = vld [vmem:[%s7781_s1 + $0x48] sm:$0xff]  ;;  %v4849_v26 = vcombine.low %v38_v12, %v46_v14  ;;  %v72_v12 = vld [vmem:[%s7781_s1 + $0x190] sm:$0xff] }
  0x8f   :  { %1453 = vmatprep.subr.bf16.mxu0 %v4810_v27  ;;  %1506 = vmatprep.subr.bf16.mxu1 %v4812_v28  ;;  %v4851_v27 = vcombine.low %v39_v16, %v47_v17  ;;  %v4834_v28 = vcombine.high %v22_v22, %v30_v23  ;;  %v4836_v29 = vcombine.high %v23_v24, %v31_v25  ;;  %v80_v14 = vld [vmem:[%s7781_s1 + $0x1d0] sm:$0xff]  ;;  %v73_v16 = vld [vmem:[%s7781_s1 + $0x198] sm:$0xff] }
  0x90   :  { %v81_v17 = vld [vmem:[%s7781_s1 + $0x1d8] sm:$0xff] }
  0x92   :  { %1454 = vmatpush2.bf16.msra.mxu0 %v4809_v33  ;;  %1507 = vmatpush2.bf16.msra.mxu1 %v4811_v34  ;;  %v159_v33 = vld [vmem:[%s7781_s1 + $0x448] sm:$0xff]  ;;  %v4833_v34 = vcombine.low %v22_v22, %v30_v23  ;;  %v56_v22 = vld [vmem:[%s7781_s1 + $0x110] sm:$0xff] }
  0x93   :  { %2273 = vmatprep.subr.bf16.mxu0 %v4946_v35  ;;  %2326 = vmatprep.subr.bf16.mxu1 %v4948_v36  ;;  %v4835_v35 = vcombine.low %v23_v24, %v31_v25  ;;  %v4962_v36 = vcombine.high %v150_v30, %v158_v31  ;;  %v4964_v39 = vcombine.high %v151_v32, %v159_v33  ;;  %v64_v23 = vld [vmem:[%s7781_s1 + $0x150] sm:$0xff]  ;;  %v57_v24 = vld [vmem:[%s7781_s1 + $0x118] sm:$0xff] }
  0x94   :  { %v65_v25 = vld [vmem:[%s7781_s1 + $0x158] sm:$0xff] }
  0x95   :  { %1456 = vmatmul.mubr.bf16.vlgmr.msra.gmra.mxu0 %v5510_v56  ;;  %1509 = vmatmul.mubr.bf16.vlgmr.msra.gmra.mxu1 %v5510_v56  ;;  %v87_v56 = vld [vmem:[%s7781_s1 + $0x208] sm:$0xff] }
  0x96   :  { %2274 = vmatpush1.bf16.msra.mxu0 %v4945_v43  ;;  %2327 = vmatpush1.bf16.msra.mxu1 %v4947_v44  ;;  %v4900_v62 = vcombine.high %v87_v56, %v95_v58  ;;  %v4899_v5 = vcombine.low %v87_v56, %v95_v58  ;;  %v145_v43 = vld [vmem:[%s7781_s1 + $0x3d8] sm:$0xff]  ;;  %v4961_v44 = vcombine.low %v150_v30, %v158_v31  ;;  %v40_v30 = vld [vmem:[%s7781_s1 + $0x90] sm:$0xff] }
  0x97   :  { %2275 = vmatprep.subr.bf16.mxu0 %v4930_v45  ;;  %2328 = vmatprep.subr.bf16.mxu1 %v4932_v46  ;;  %v4963_v45 = vcombine.low %v151_v32, %v159_v33  ;;  %v4950_v46 = vcombine.high %v136_v40, %v144_v41  ;;  %v4952_v47 = vcombine.high %v137_v42, %v145_v43  ;;  %v48_v31 = vld [vmem:[%s7781_s1 + $0xd0] sm:$0xff]  ;;  %v41_v32 = vld [vmem:[%s7781_s1 + $0x98] sm:$0xff] }
  0x98   :  { %4826 = vmatprep.mubr.msk.bf16.mxu0 %vm1098_vm3, %v5528_v4  ;;  %4828 = vmatprep.mubr.msk.bf16.mxu1 %vm1098_vm3, %v5528_v4  ;;  %v71_v4 = vld [vmem:[%s7781_s1 + $0x188] sm:$0xff]  ;;  %v4951_v57 = vcombine.low %v137_v42, %v145_v43  ;;  %v4934_v56 = vcombine.high %v120_v48, %v128_v49  ;;  %v49_v33 = vld [vmem:[%s7781_s1 + $0xd8] sm:$0xff]  ;;  %v24_v40 = vld [vmem:[%s7781_s1 + $0x10] sm:$0xff] }
  0x99   :  { %v4884_v37 = vcombine.high %v71_v4, %v79_v3  ;;  %v4883_v9 = vcombine.low %v71_v4, %v79_v3  ;;  %v113_v4 = vld [vmem:[%s7781_s1 + $0x2d8] sm:$0xff]  ;;  %v4933_v3 = vcombine.low %v120_v48, %v128_v49  ;;  %v32_v41 = vld [vmem:[%s7781_s1 + $0x50] sm:$0xff] }
  0x9a   :  { %2276 = vmatpush1.bf16.msra.mxu0 %v4929_v51  ;;  %2329 = vmatpush1.bf16.msra.mxu1 %v4931_v52  ;;  %v6010_v51 = vld [vmem:[%s7782_s0 + $0x8] sm:$0xff]  ;;  %v25_v42 = vld [vmem:[%s7781_s1 + $0x18] sm:$0xff]  ;;  %v152_v48 = vld [vmem:[%s7781_s1 + $0x410] sm:$0xff] }
  0x9b   :  { %2277 = vmatprep.subr.bf16.mxu0 %v4914_v53  ;;  %2330 = vmatprep.subr.bf16.mxu1 %v4916_v54  ;;  %v6013_v52 = vcombine.low %v5307_v50, %v6010_v51  ;;  %v121_v53 = vld [vmem:[%s7781_s1 + $0x318] sm:$0xff]  ;;  %v160_v49 = vld [vmem:[%s7781_s1 + $0x450] sm:$0xff] }
  0x9c   :  { %v129_v54 = vld [vmem:[%s7781_s1 + $0x358] sm:$0xff] }
  0x9d   :  { %1466 = vmatmul.mubr.bf16.gmra.mxu0 %v5554_v15  ;;  %1519 = vmatmul.mubr.bf16.gmra.mxu1 %v5554_v15  ;;  %v55_v15 = vld [vmem:[%s7781_s1 + $0x108] sm:$0xff]  ;;  %v4936_v58 = vcombine.high %v121_v53, %v129_v54  ;;  %v33_v43 = vld [vmem:[%s7781_s1 + $0x58] sm:$0xff] }
  0x9e   :  { %2278 = vmatpush1.bf16.msra.mxu0 %v4913_v59  ;;  %2331 = vmatpush1.bf16.msra.mxu1 %v4915_v60  ;;  %v4868_v11 = vcombine.high %v55_v15, %v63_v7  ;;  %v4867_v19 = vcombine.low %v55_v15, %v63_v7  ;;  %v5309_v59 = vld [vmem:[%s7782_s0 + $0x18] sm:$0xff]  ;;  %v6027_v60 = vld [vmem:[%s7782_s0 + $0x20] sm:$0xff] }
  0x9f   :  { %2279 = vmatprep.subr.bf16.mxu0 %v4898_v61  ;;  %2332 = vmatprep.subr.bf16.mxu1 %v4900_v62  ;;  %v6030_v61 = vcombine.high %v5309_v59, %v6027_v60  ;;  %v104_v62 = vld [vmem:[%s7781_s1 + $0x290] sm:$0xff]  ;;  %v6057_v6 = vcombine.low %v5309_v59, %v6027_v60  ;;  %v89_v15 = vld [vmem:[%s7781_s1 + $0x218] sm:$0xff]  ;;  %v146_v59 = vld [vmem:[%s7781_s1 + $0x3e0] sm:$0xff] }
  0xa0   :  { %4977 = vmatprep.mubr.msk.bf16.mxu0 %vm1098_vm3, %v5924_v2  ;;  %4979 = vmatprep.mubr.msk.bf16.mxu1 %vm1098_vm3, %v5924_v2  ;;  %v97_v7 = vld [vmem:[%s7781_s1 + $0x258] sm:$0xff] }
  0xa1   :  { %v153_v50 = vld [vmem:[%s7781_s1 + $0x418] sm:$0xff] }
  0xa2   :  { %2280 = vmatpush1.bf16.msra.mxu0 %v4897_v63  ;;  %2333 = vmatpush1.bf16.msra.mxu1 %v4899_v5  ;;  %v4935_v63 = vcombine.low %v121_v53, %v129_v54  ;;  %v4918_v5 = vcombine.high %v104_v62, %v112_v0  ;;  %v161_v53 = vld [vmem:[%s7781_s1 + $0x458] sm:$0xff]  ;;  %v4837_v54 = vcombine.low %v24_v40, %v32_v41 }
  0xa3   :  { %2281 = vmatprep.subr.bf16.mxu0 %v4882_v13  ;;  %2334 = vmatprep.subr.bf16.mxu1 %v4884_v37  ;;  %v4920_v13 = vcombine.high %v105_v1, %v113_v4  ;;  %v88_v37 = vld [vmem:[%s7781_s1 + $0x210] sm:$0xff] }
  0xa6   :  { %2282 = vmatpush1.bf16.msra.mxu0 %v4881_v8  ;;  %2335 = vmatpush1.bf16.msra.mxu1 %v4883_v9  ;;  %v4917_v8 = vcombine.low %v104_v62, %v112_v0  ;;  %v4919_v9 = vcombine.low %v105_v1, %v113_v4  ;;  %v139_v62 = vld [vmem:[%s7781_s1 + $0x3a8] sm:$0xff]  ;;  %v4965_v1 = vcombine.low %v152_v48, %v160_v49 }
  0xa7   :  { %2283 = vmatprep.subr.bf16.mxu0 %v4866_v10  ;;  %2336 = vmatprep.subr.bf16.mxu1 %v4868_v11  ;;  %v4902_v10 = vcombine.high %v88_v37, %v96_v38  ;;  %v4904_v11 = vcombine.high %v89_v15, %v97_v7  ;;  %v147_v0 = vld [vmem:[%s7781_s1 + $0x3e8] sm:$0xff]  ;;  %v4967_v4 = vcombine.low %v153_v50, %v161_v53 }
  0xaa   :  { %2284 = vmatpush1.bf16.msra.mxu0 %v4865_v18  ;;  %2337 = vmatpush1.bf16.msra.mxu1 %v4867_v19  ;;  %v4901_v18 = vcombine.low %v88_v37, %v96_v38  ;;  %v4903_v19 = vcombine.low %v89_v15, %v97_v7  ;;  %v123_v37 = vld [vmem:[%s7781_s1 + $0x328] sm:$0xff]  ;;  %v4955_v7 = vcombine.low %v139_v62, %v147_v0 }
  0xab   :  { %2285 = vmatprep.subr.bf16.mxu0 %v4850_v20  ;;  %2338 = vmatprep.subr.bf16.mxu1 %v4852_v21  ;;  %v4886_v20 = vcombine.high %v72_v12, %v80_v14  ;;  %v4888_v21 = vcombine.high %v73_v16, %v81_v17  ;;  %v131_v38 = vld [vmem:[%s7781_s1 + $0x368] sm:$0xff] }
  0xae   :  { %2286 = vmatpush1.bf16.msra.mxu0 %v4849_v26  ;;  %2339 = vmatpush1.bf16.msra.mxu1 %v4851_v27  ;;  %v4885_v26 = vcombine.low %v72_v12, %v80_v14  ;;  %v4887_v27 = vcombine.low %v73_v16, %v81_v17  ;;  %v107_v12 = vld [vmem:[%s7781_s1 + $0x2a8] sm:$0xff]  ;;  %v4939_v17 = vcombine.low %v123_v37, %v131_v38 }
  0xaf   :  { %2287 = vmatprep.subr.bf16.mxu0 %v4834_v28  ;;  %2340 = vmatprep.subr.bf16.mxu1 %v4836_v29  ;;  %v4870_v28 = vcombine.high %v56_v22, %v64_v23  ;;  %v4872_v29 = vcombine.high %v57_v24, %v65_v25  ;;  %v115_v14 = vld [vmem:[%s7781_s1 + $0x2e8] sm:$0xff] }
  0xb2   :  { %2288 = vmatpush1.bf16.msra.mxu0 %v4833_v34  ;;  %2341 = vmatpush1.bf16.msra.mxu1 %v4835_v35  ;;  %v4869_v34 = vcombine.low %v56_v22, %v64_v23  ;;  %v4871_v35 = vcombine.low %v57_v24, %v65_v25  ;;  %v91_v22 = vld [vmem:[%s7781_s1 + $0x228] sm:$0xff]  ;;  %v4923_v25 = vcombine.low %v107_v12, %v115_v14 }
  0xb3   :  { %2303 = vmatprep.subr.bf16.mxu0 %v4962_v36  ;;  %2356 = vmatprep.subr.bf16.mxu1 %v4964_v39  ;;  %v4854_v36 = vcombine.high %v40_v30, %v48_v31  ;;  %v4856_v39 = vcombine.high %v41_v32, %v49_v33  ;;  %v99_v23 = vld [vmem:[%s7781_s1 + $0x268] sm:$0xff] }
  0xb6   :  { %2304 = vmatpush2.bf16.msra.mxu0 %v4961_v44  ;;  %2357 = vmatpush2.bf16.msra.mxu1 %v4963_v45  ;;  %v4853_v44 = vcombine.low %v40_v30, %v48_v31  ;;  %v4855_v45 = vcombine.low %v41_v32, %v49_v33  ;;  %v75_v30 = vld [vmem:[%s7781_s1 + $0x1a8] sm:$0xff]  ;;  %v4907_v33 = vcombine.low %v91_v22, %v99_v23 }
  0xb7   :  { %2379 = vmatprep.subr.bf16.mxu0 %v4950_v46  ;;  %2432 = vmatprep.subr.bf16.mxu1 %v4952_v47  ;;  %v4838_v46 = vcombine.high %v24_v40, %v32_v41  ;;  %v4840_v47 = vcombine.high %v25_v42, %v33_v43  ;;  %v83_v31 = vld [vmem:[%s7781_s1 + $0x1e8] sm:$0xff] }
  0xb8   :  { %v59_v40 = vld [vmem:[%s7781_s1 + $0x128] sm:$0xff] }
  0xb9   :  { %2306 = vmatmul.mubr.bf16.vlgmr.msra.gmra.mxu0 %v6013_v52  ;;  %2359 = vmatmul.mubr.bf16.vlgmr.msra.gmra.mxu1 %v6013_v52  ;;  %v67_v41 = vld [vmem:[%s7781_s1 + $0x168] sm:$0xff] }
  0xba   :  { %2380 = vmatpush1.bf16.msra.mxu0 %v4949_v55  ;;  %2433 = vmatpush1.bf16.msra.mxu1 %v4951_v57  ;;  %v4839_v55 = vcombine.low %v25_v42, %v33_v43  ;;  %v4966_v57 = vcombine.high %v152_v48, %v160_v49  ;;  %v4891_v43 = vcombine.low %v75_v30, %v83_v31  ;;  %v43_v48 = vld [vmem:[%s7781_s1 + $0xa8] sm:$0xff] }
  0xbb   :  { %2381 = vmatprep.subr.bf16.mxu0 %v4934_v56  ;;  %2434 = vmatprep.subr.bf16.mxu1 %v4936_v58  ;;  %v4968_v56 = vcombine.high %v153_v50, %v161_v53  ;;  %v138_v58 = vld [vmem:[%s7781_s1 + $0x3a0] sm:$0xff]  ;;  %v51_v49 = vld [vmem:[%s7781_s1 + $0xe8] sm:$0xff]  ;;  %v4875_v53 = vcombine.low %v59_v40, %v67_v41 }
  0xbc   :  { %4978 = vmatprep.mubr.msk.bf16.mxu0 %vm1098_vm3, %v6030_v61  ;;  %4980 = vmatprep.mubr.msk.bf16.mxu1 %vm1098_vm3, %v6030_v61  ;;  %v4953_v15 = vcombine.low %v138_v58, %v146_v59 }
  0xbe   :  { %2382 = vmatpush1.bf16.msra.mxu0 %v4933_v3  ;;  %2435 = vmatpush1.bf16.msra.mxu1 %v4935_v63  ;;  %v4954_v3 = vcombine.high %v138_v58, %v146_v59  ;;  %v4956_v63 = vcombine.high %v139_v62, %v147_v0  ;;  %v27_v58 = vld [vmem:[%s7781_s1 + $0x28] sm:$0xff]  ;;  %v4859_v0 = vcombine.low %v43_v48, %v51_v49 }
  0xbf   :  { %2383 = vmatprep.subr.bf16.mxu0 %v4918_v5  ;;  %2436 = vmatprep.subr.bf16.mxu1 %v4920_v13  ;;  %v122_v5 = vld [vmem:[%s7781_s1 + $0x320] sm:$0xff]  ;;  %v35_v59 = vld [vmem:[%s7781_s1 + $0x68] sm:$0xff] }
  0xc0   :  { %v130_v13 = vld [vmem:[%s7781_s1 + $0x360] sm:$0xff] }
  0xc1   :  { %2316 = vmatmul.mubr.bf16.gmra.mxu0 %v6057_v6  ;;  %2369 = vmatmul.mubr.bf16.gmra.mxu1 %v6057_v6  ;;  %v4937_v16 = vcombine.low %v122_v5, %v130_v13 }
  0xc2   :  { %2384 = vmatpush1.bf16.msra.mxu0 %v4917_v8  ;;  %2437 = vmatpush1.bf16.msra.mxu1 %v4919_v9  ;;  %v4938_v8 = vcombine.high %v122_v5, %v130_v13  ;;  %v4940_v9 = vcombine.high %v123_v37, %v131_v38  ;;  %v155_v5 = vld [vmem:[%s7781_s1 + $0x428] sm:$0xff]  ;;  %v4843_v38 = vcombine.low %v27_v58, %v35_v59 }
  0xc3   :  { %2385 = vmatprep.subr.bf16.mxu0 %v4902_v10  ;;  %2438 = vmatprep.subr.bf16.mxu1 %v4904_v11  ;;  %v106_v10 = vld [vmem:[%s7781_s1 + $0x2a0] sm:$0xff]  ;;  %v163_v13 = vld [vmem:[%s7781_s1 + $0x468] sm:$0xff] }
  0xc4   :  { %4981 = vmatprep.mubr.msk.bf16.mxu0 %vm1098_vm3, %v5924_v2  ;;  %4983 = vmatprep.mubr.msk.bf16.mxu1 %vm1098_vm3, %v5924_v2  ;;  %v114_v11 = vld [vmem:[%s7781_s1 + $0x2e0] sm:$0xff] }
  0xc5   :  { %v4921_v24 = vcombine.low %v106_v10, %v114_v11 }
  0xc6   :  { %2386 = vmatpush1.bf16.msra.mxu0 %v4901_v18  ;;  %2439 = vmatpush1.bf16.msra.mxu1 %v4903_v19  ;;  %v4922_v18 = vcombine.high %v106_v10, %v114_v11  ;;  %v4924_v19 = vcombine.high %v107_v12, %v115_v14  ;;  %v141_v10 = vld [vmem:[%s7781_s1 + $0x3b8] sm:$0xff]  ;;  %v4971_v14 = vcombine.low %v155_v5, %v163_v13 }
  0xc7   :  { %2387 = vmatprep.subr.bf16.mxu0 %v4886_v20  ;;  %2440 = vmatprep.subr.bf16.mxu1 %v4888_v21  ;;  %v90_v20 = vld [vmem:[%s7781_s1 + $0x220] sm:$0xff]  ;;  %v149_v11 = vld [vmem:[%s7781_s1 + $0x3f8] sm:$0xff] }
  0xc8   :  { %v98_v21 = vld [vmem:[%s7781_s1 + $0x260] sm:$0xff] }
  0xc9   :  { %v4905_v32 = vcombine.low %v90_v20, %v98_v21 }
  0xca   :  { %2388 = vmatpush1.bf16.msra.mxu0 %v4885_v26  ;;  %2441 = vmatpush1.bf16.msra.mxu1 %v4887_v27  ;;  %v4906_v26 = vcombine.high %v90_v20, %v98_v21  ;;  %v4908_v27 = vcombine.high %v91_v22, %v99_v23  ;;  %v125_v20 = vld [vmem:[%s7781_s1 + $0x338] sm:$0xff]  ;;  %v4959_v23 = vcombine.low %v141_v10, %v149_v11 }
  0xcb   :  { %2389 = vmatprep.subr.bf16.mxu0 %v4870_v28  ;;  %2442 = vmatprep.subr.bf16.mxu1 %v4872_v29  ;;  %v74_v28 = vld [vmem:[%s7781_s1 + $0x1a0] sm:$0xff]  ;;  %v133_v21 = vld [vmem:[%s7781_s1 + $0x378] sm:$0xff] }
  0xcc   :  { %v82_v29 = vld [vmem:[%s7781_s1 + $0x1e0] sm:$0xff] }
  0xcd   :  { %v4889_v42 = vcombine.low %v74_v28, %v82_v29 }
  0xce   :  { %2390 = vmatpush1.bf16.msra.mxu0 %v4869_v34  ;;  %2443 = vmatpush1.bf16.msra.mxu1 %v4871_v35  ;;  %v4890_v34 = vcombine.high %v74_v28, %v82_v29  ;;  %v4892_v35 = vcombine.high %v75_v30, %v83_v31  ;;  %v109_v28 = vld [vmem:[%s7781_s1 + $0x2b8] sm:$0xff]  ;;  %v4943_v31 = vcombine.low %v125_v20, %v133_v21 }
  0xcf   :  { %2391 = vmatprep.subr.bf16.mxu0 %v4854_v36  ;;  %2444 = vmatprep.subr.bf16.mxu1 %v4856_v39  ;;  %v58_v36 = vld [vmem:[%s7781_s1 + $0x120] sm:$0xff]  ;;  %v117_v29 = vld [vmem:[%s7781_s1 + $0x2f8] sm:$0xff] }
  0xd0   :  { %v66_v39 = vld [vmem:[%s7781_s1 + $0x160] sm:$0xff] }
  0xd1   :  { %v4873_v50 = vcombine.low %v58_v36, %v66_v39 }
  0xd2   :  { %2392 = vmatpush1.bf16.msra.mxu0 %v4853_v44  ;;  %2445 = vmatpush1.bf16.msra.mxu1 %v4855_v45  ;;  %v4874_v44 = vcombine.high %v58_v36, %v66_v39  ;;  %v4876_v45 = vcombine.high %v59_v40, %v67_v41  ;;  %v93_v36 = vld [vmem:[%s7781_s1 + $0x238] sm:$0xff]  ;;  %v4927_v41 = vcombine.low %v109_v28, %v117_v29 }
  0xd3   :  { %2393 = vmatprep.subr.bf16.mxu0 %v4838_v46  ;;  %2446 = vmatprep.subr.bf16.mxu1 %v4840_v47  ;;  %v42_v46 = vld [vmem:[%s7781_s1 + $0xa0] sm:$0xff]  ;;  %v101_v39 = vld [vmem:[%s7781_s1 + $0x278] sm:$0xff] }
  0xd4   :  { %v50_v47 = vld [vmem:[%s7781_s1 + $0xe0] sm:$0xff] }
  0xd5   :  { %v4857_v62 = vcombine.low %v42_v46, %v50_v47 }
  0xd6   :  { %2394 = vmatpush1.bf16.msra.mxu0 %v4837_v54  ;;  %2447 = vmatpush1.bf16.msra.mxu1 %v4839_v55  ;;  %v4858_v54 = vcombine.high %v42_v46, %v50_v47  ;;  %v4860_v55 = vcombine.high %v43_v48, %v51_v49  ;;  %v77_v46 = vld [vmem:[%s7781_s1 + $0x1b8] sm:$0xff]  ;;  %v4911_v49 = vcombine.low %v93_v36, %v101_v39 }
  0xd7   :  { %2409 = vmatprep.subr.bf16.mxu0 %v4966_v57  ;;  %2462 = vmatprep.subr.bf16.mxu1 %v4968_v56  ;;  %v26_v57 = vld [vmem:[%s7781_s1 + $0x20] sm:$0xff]  ;;  %v85_v47 = vld [vmem:[%s7781_s1 + $0x1f8] sm:$0xff] }
  0xd8   :  { %v34_v56 = vld [vmem:[%s7781_s1 + $0x60] sm:$0xff] }
  0xd9   :  { %v4841_v37 = vcombine.low %v26_v57, %v34_v56 }
  0xda   :  { %2410 = vmatpush2.bf16.msra.mxu0 %v4965_v1  ;;  %2463 = vmatpush2.bf16.msra.mxu1 %v4967_v4  ;;  %v4842_v1 = vcombine.high %v26_v57, %v34_v56  ;;  %v4844_v4 = vcombine.high %v27_v58, %v35_v59  ;;  %v61_v57 = vld [vmem:[%s7781_s1 + $0x138] sm:$0xff]  ;;  %v4895_v59 = vcombine.low %v77_v46, %v85_v47 }
  0xdb   :  { %2485 = vmatprep.subr.bf16.mxu0 %v4954_v3  ;;  %2538 = vmatprep.subr.bf16.mxu1 %v4956_v63  ;;  %v154_v3 = vld [vmem:[%s7781_s1 + $0x420] sm:$0xff]  ;;  %v69_v56 = vld [vmem:[%s7781_s1 + $0x178] sm:$0xff] }
  0xdc   :  { %v162_v63 = vld [vmem:[%s7781_s1 + $0x460] sm:$0xff] }
  0xdd   :  { %2412 = vmatmul.mubr.bf16.vlgmr.msra.gmra.mxu0 %v6013_v52  ;;  %2465 = vmatmul.mubr.bf16.vlgmr.msra.gmra.mxu1 %v6013_v52  ;;  %v4969_v12 = vcombine.low %v154_v3, %v162_v63 }
  0xde   :  { %2486 = vmatpush1.bf16.msra.mxu0 %v4953_v15  ;;  %2539 = vmatpush1.bf16.msra.mxu1 %v4955_v7  ;;  %v4970_v15 = vcombine.high %v154_v3, %v162_v63  ;;  %v4972_v7 = vcombine.high %v155_v5, %v163_v13  ;;  %v53_v3 = vld [vmem:[%s7781_s1 + $0xf8] sm:$0xff]  ;;  %v4879_v5 = vcombine.low %v61_v57, %v69_v56 }
  0xdf   :  { %2487 = vmatprep.subr.bf16.mxu0 %v4938_v8  ;;  %2540 = vmatprep.subr.bf16.mxu1 %v4940_v9  ;;  %v140_v8 = vld [vmem:[%s7781_s1 + $0x3b0] sm:$0xff] }
  0xe0   :  { %4982 = vmatprep.mubr.msk.bf16.mxu0 %vm1098_vm3, %v6030_v61  ;;  %4984 = vmatprep.mubr.msk.bf16.mxu1 %vm1098_vm3, %v6030_v61  ;;  %v148_v9 = vld [vmem:[%s7781_s1 + $0x3f0] sm:$0xff] }
  0xe1   :  { %v4957_v22 = vcombine.low %v140_v8, %v148_v9 }
  0xe2   :  { %2488 = vmatpush1.bf16.msra.mxu0 %v4937_v16  ;;  %2541 = vmatpush1.bf16.msra.mxu1 %v4939_v17  ;;  %v4958_v16 = vcombine.high %v140_v8, %v148_v9  ;;  %v4960_v17 = vcombine.high %v141_v10, %v149_v11  ;;  %v37_v8 = vld [vmem:[%s7781_s1 + $0x78] sm:$0xff] }
  0xe3   :  { %2489 = vmatprep.subr.bf16.mxu0 %v4922_v18  ;;  %2542 = vmatprep.subr.bf16.mxu1 %v4924_v19  ;;  %v124_v18 = vld [vmem:[%s7781_s1 + $0x330] sm:$0xff] }
  0xe4   :  { %v132_v19 = vld [vmem:[%s7781_s1 + $0x370] sm:$0xff] }
  0xe5   :  { %2422 = vmatmul.mubr.bf16.gmra.mxu0 %v6057_v6  ;;  %2475 = vmatmul.mubr.bf16.gmra.mxu1 %v6057_v6  ;;  %v4941_v30 = vcombine.low %v124_v18, %v132_v19 }
  0xe6   :  { %2490 = vmatpush1.bf16.msra.mxu0 %v4921_v24  ;;  %2543 = vmatpush1.bf16.msra.mxu1 %v4923_v25  ;;  %v4942_v24 = vcombine.high %v124_v18, %v132_v19  ;;  %v4944_v25 = vcombine.high %v125_v20, %v133_v21  ;;  %v165_v18 = vld [vmem:[%s7781_s1 + $0x478] sm:$0xff] }
  0xe7   :  { %2491 = vmatprep.subr.bf16.mxu0 %v4906_v26  ;;  %2544 = vmatprep.subr.bf16.mxu1 %v4908_v27  ;;  %v108_v26 = vld [vmem:[%s7781_s1 + $0x2b0] sm:$0xff] }
  0xe8   :  { %4985 = vmatprep.mubr.msk.bf16.mxu0 %vm1098_vm3, %v5924_v2  ;;  %4987 = vmatprep.mubr.msk.bf16.mxu1 %vm1098_vm3, %v5924_v2  ;;  %v116_v27 = vld [vmem:[%s7781_s1 + $0x2f0] sm:$0xff] }
  0xe9   :  { %v4925_v40 = vcombine.low %v108_v26, %v116_v27 }
  0xea   :  { %2492 = vmatpush1.bf16.msra.mxu0 %v4905_v32  ;;  %2545 = vmatpush1.bf16.msra.mxu1 %v4907_v33  ;;  %v4926_v32 = vcombine.high %v108_v26, %v116_v27  ;;  %v4928_v33 = vcombine.high %v109_v28, %v117_v29  ;;  %v5116_v26 = vld [vmem:[%s7781_s1 + $0xcc8] sm:$0xff] }
  0xeb   :  { %2493 = vmatprep.subr.bf16.mxu0 %v4890_v34  ;;  %2546 = vmatprep.subr.bf16.mxu1 %v4892_v35  ;;  %v92_v34 = vld [vmem:[%s7781_s1 + $0x230] sm:$0xff] }
  0xec   :  { %v100_v35 = vld [vmem:[%s7781_s1 + $0x270] sm:$0xff] }
  0xed   :  { %v4909_v48 = vcombine.low %v92_v34, %v100_v35 }
  0xee   :  { %2494 = vmatpush1.bf16.msra.mxu0 %v4889_v42  ;;  %2547 = vmatpush1.bf16.msra.mxu1 %v4891_v43  ;;  %v4910_v42 = vcombine.high %v92_v34, %v100_v35  ;;  %v4912_v43 = vcombine.high %v93_v36, %v101_v39  ;;  %v5092_v34 = vld [vmem:[%s7781_s1 + $0xc08] sm:$0xff]  ;;  %v2708_v36 = vrot.slane %v6010_v51, 5  ;;  %v6398_v39 = vpop.f32.mrf.mxu1  ;;  %v5075_v51 = vld [vmem:[%s7781_s1 + $0xb80] sm:$0xff] }
  0xef   :  { %2495 = vmatprep.subr.bf16.mxu0 %v4874_v44  ;;  %2548 = vmatprep.subr.bf16.mxu1 %v4876_v45  ;;  %v76_v44 = vld [vmem:[%s7781_s1 + $0x1b0] sm:$0xff]  ;;  %v5100_v35 = vld [vmem:[%s7781_s1 + $0xc48] sm:$0xff] }
  0xf0   :  { %v84_v45 = vld [vmem:[%s7781_s1 + $0x1f0] sm:$0xff] }
  0xf1   :  { %v4893_v58 = vcombine.low %v76_v44, %v84_v45 }
  0xf2   :  { %2496 = vmatpush1.bf16.msra.mxu0 %v4873_v50  ;;  %2549 = vmatpush1.bf16.msra.mxu1 %v4875_v53  ;;  %v4894_v50 = vcombine.high %v76_v44, %v84_v45  ;;  %v4896_v53 = vcombine.high %v77_v46, %v85_v47  ;;  %v5242_v44 = vcombine.high %v5092_v34, %v5100_v35  ;;  %v5083_v45 = vld [vmem:[%s7781_s1 + $0xbc0] sm:$0xff]  ;;  %v5076_v47 = vld [vmem:[%s7781_s1 + $0xb88] sm:$0xff] }
  0xf3   :  { %2497 = vmatprep.subr.bf16.mxu0 %v4858_v54  ;;  %2550 = vmatprep.subr.bf16.mxu1 %v4860_v55  ;;  %v60_v54 = vld [vmem:[%s7781_s1 + $0x130] sm:$0xff] }
  0xf4   :  { %v68_v55 = vld [vmem:[%s7781_s1 + $0x170] sm:$0xff] }
  0xf5   :  { %v4877_v63 = vcombine.low %v60_v54, %v68_v55 }
  0xf6   :  { %2498 = vmatpush1.bf16.msra.mxu0 %v4857_v62  ;;  %2551 = vmatpush1.bf16.msra.mxu1 %v4859_v0  ;;  %v4878_v62 = vcombine.high %v60_v54, %v68_v55  ;;  %v4880_v0 = vcombine.high %v61_v57, %v69_v56  ;;  %v6421_v55 = vpop.f32.mrf.mxu1  ;;  %v5085_v56 = vld [vmem:[%s7781_s1 + $0xbd0] sm:$0xff] }
  0xf7   :  { %2499 = vmatprep.subr.bf16.mxu0 %v4842_v1  ;;  %2552 = vmatprep.subr.bf16.mxu1 %v4844_v4  ;;  %v44_v1 = vld [vmem:[%s7781_s1 + $0xb0] sm:$0xff] }
  0xf8   :  { %v52_v4 = vld [vmem:[%s7781_s1 + $0xf0] sm:$0xff] }
  0xf9   :  { %v4862_v13 = vcombine.high %v44_v1, %v52_v4  ;;  %v4861_v9 = vcombine.low %v44_v1, %v52_v4  ;;  %v5060_v4 = vld [vmem:[%s7781_s1 + $0xb08] sm:$0xff] }
  0xfa   :  { %2500 = vmatpush1.bf16.msra.mxu0 %v4841_v37  ;;  %2553 = vmatpush1.bf16.msra.mxu1 %v4843_v38  ;;  %v28_v38 = vld [vmem:[%s7781_s1 + $0x30] sm:$0xff] }
  0xfb   :  { %2515 = vmatprep.subr.bf16.mxu0 %v4970_v15  ;;  %2568 = vmatprep.subr.bf16.mxu1 %v4972_v7  ;;  %v36_v15 = vld [vmem:[%s7781_s1 + $0x70] sm:$0xff]  ;;  %v29_v7 = vld [vmem:[%s7781_s1 + $0x38] sm:$0xff] }
  0xfc   :  { %v4846_v11 = vcombine.high %v28_v38, %v36_v15  ;;  %v4845_v19 = vcombine.low %v28_v38, %v36_v15  ;;  %v4847_v20 = vcombine.low %v29_v7, %v37_v8  ;;  %v5043_v15 = vld [vmem:[%s7781_s1 + $0xa80] sm:$0xff] }
  0xfe   :  { %2516 = vmatpush2.bf16.msra.mxu0 %v4969_v12  ;;  %2569 = vmatpush2.bf16.msra.mxu1 %v4971_v14  ;;  %v4848_v12 = vcombine.high %v29_v7, %v37_v8  ;;  %v156_v14 = vld [vmem:[%s7781_s1 + $0x430] sm:$0xff]  ;;  %v5051_v7 = vld [vmem:[%s7781_s1 + $0xac0] sm:$0xff] }
  0xff   :  { %2591 = vmatprep.subr.bf16.mxu0 %v4958_v16  ;;  %2644 = vmatprep.subr.bf16.mxu1 %v4960_v17  ;;  %v164_v16 = vld [vmem:[%s7781_s1 + $0x470] sm:$0xff]  ;;  %v157_v17 = vld [vmem:[%s7781_s1 + $0x438] sm:$0xff] }
 0x100   :  { %v4974_v21 = vcombine.high %v156_v14, %v164_v16  ;;  %v4973_v27 = vcombine.low %v156_v14, %v164_v16  ;;  %v4975_v28 = vcombine.low %v157_v17, %v165_v18 }
 0x101   :  { %2518 = vmatmul.mubr.bf16.vlgmr.msra.gmra.mxu0 %v6013_v52  ;;  %2571 = vmatmul.mubr.bf16.vlgmr.msra.gmra.mxu1 %v6013_v52 }
 0x102   :  { %2592 = vmatpush1.bf16.msra.mxu0 %v4957_v22  ;;  %2645 = vmatpush1.bf16.msra.mxu1 %v4959_v23  ;;  %v4976_v22 = vcombine.high %v157_v17, %v165_v18  ;;  %v5107_v23 = vld [vmem:[%s7781_s1 + $0xc80] sm:$0xff]  ;;  %v5192_v18 = vcombine.high %v5043_v15, %v5051_v7 }
 0x103   :  { %2593 = vmatprep.subr.bf16.mxu0 %v4942_v24  ;;  %2646 = vmatprep.subr.bf16.mxu1 %v4944_v25  ;;  %v5115_v24 = vld [vmem:[%s7781_s1 + $0xcc0] sm:$0xff]  ;;  %v5108_v25 = vld [vmem:[%s7781_s1 + $0xc88] sm:$0xff] }
 0x104   :  { %4986 = vmatprep.mubr.msk.bf16.mxu0 %vm1098_vm3, %v6030_v61  ;;  %4988 = vmatprep.mubr.msk.bf16.mxu1 %vm1098_vm3, %v6030_v61  ;;  %v5256_v29 = vcombine.high %v5107_v23, %v5115_v24 }
 0x106   :  { %2594 = vmatpush1.bf16.msra.mxu0 %v4941_v30  ;;  %2647 = vmatpush1.bf16.msra.mxu1 %v4943_v31  ;;  %v5258_v30 = vcombine.high %v5108_v25, %v5116_v26  ;;  %v5091_v31 = vld [vmem:[%s7781_s1 + $0xc00] sm:$0xff] }
 0x107   :  { %2595 = vmatprep.subr.bf16.mxu0 %v4926_v32  ;;  %2648 = vmatprep.subr.bf16.mxu1 %v4928_v33  ;;  %v5099_v32 = vld [vmem:[%s7781_s1 + $0xc40] sm:$0xff]  ;;  %v6389_v33 = vpop.f32.mrf.mxu0 }
 0x108   :  { %v5239_v57 = vcombine.low %v5091_v31, %v5099_v32 }
 0x109   :  { %2528 = vmatmul.mubr.bf16.gmra.mxu0 %v6057_v6  ;;  %2581 = vmatmul.mubr.bf16.gmra.mxu1 %v6057_v6  ;;  %v6409_v46 = vpop.f32.mrf.mxu0 }
 0x10a   :  { %2596 = vmatpush1.bf16.msra.mxu0 %v4925_v40  ;;  %2649 = vmatpush1.bf16.msra.mxu1 %v4927_v41  ;;  %v5255_v40 = vcombine.low %v5107_v23, %v5115_v24  ;;  %v2697_v41 = vld [vmem:[%s7782_s0] sm:$0xee]  ;;  %v5036_v23 = vld [vmem:[%s7781_s1 + $0xa48] sm:$0xff]  ;;  %v5191_v24 = vcombine.low %v5043_v15, %v5051_v7  ;;  %v5109_v7 = vld [vmem:[%s7781_s1 + $0xc90] sm:$0xff] }
 0x10b   :  { %2597 = vmatprep.subr.bf16.mxu0 %v4910_v42  ;;  %2650 = vmatprep.subr.bf16.mxu1 %v4912_v43  ;;  %v5257_v42 = vcombine.low %v5108_v25, %v5116_v26  ;;  %v5240_v43 = vcombine.high %v5091_v31, %v5099_v32  ;;  %v6438_v1 = vpop.f32.mrf.mxu0  ;;  %v5019_v31 = vld [vmem:[%s7781_s1 + $0x9c0] sm:$0xff]  ;;  %v5012_v32 = vld [vmem:[%s7781_s1 + $0x988] sm:$0xff] }
 0x10c   :  { %4989 = vmatprep.mubr.msk.bf16.mxu0 %vm1098_vm3, %v5924_v2  ;;  %4991 = vmatprep.mubr.msk.bf16.mxu1 %vm1098_vm3, %v5924_v2  ;;  %v45_v2 = vld [vmem:[%s7781_s1 + $0xb8] sm:$0xff] }
 0x10d   :  { %v4864_v37 = vcombine.high %v45_v2, %v53_v3  ;;  %v4863_v10 = vcombine.low %v45_v2, %v53_v3  ;;  %v5068_v2 = vld [vmem:[%s7781_s1 + $0xb48] sm:$0xff] }
 0x10e   :  { %2598 = vmatpush1.bf16.msra.mxu0 %v4909_v48  ;;  %2651 = vmatpush1.bf16.msra.mxu1 %v4911_v49  ;;  %v5084_v48 = vld [vmem:[%s7781_s1 + $0xbc8] sm:$0xff]  ;;  %v4993_v49 = vrot.slane %v2697_v41, 9  ;;  %v5210_v38 = vcombine.high %v5060_v4, %v5068_v2  ;;  %v5209_v17 = vcombine.low %v5060_v4, %v5068_v2  ;;  %v2715_v4 = vrot.slane %v6027_v60, 5  ;;  %v5117_v60 = vld [vmem:[%s7781_s1 + $0xcd0] sm:$0xff] }
 0x10f   :  { %2599 = vmatprep.subr.bf16.mxu0 %v4894_v50  ;;  %2652 = vmatprep.subr.bf16.mxu1 %v4896_v53  ;;  %v2710_v50 = vrot.slane %v2708_v36, 4  ;;  %v5311_v53 = vld [vmem:[%s7782_s0 + $0x10] sm:$0x11] }
 0x110   :  { %v2711_v54 = vrot.slane %v5311_v53, 5  ;;  %v6450_v3 = vsel %vm6426_vm6, %v4993_v49, %v2708_v36 }
 0x112   :  { %2600 = vmatpush1.bf16.msra.mxu0 %v4893_v58  ;;  %2653 = vmatpush1.bf16.msra.mxu1 %v4895_v59  ;;  %v5241_v58 = vcombine.low %v5092_v34, %v5100_v35  ;;  %v5224_v59 = vcombine.high %v5075_v51, %v5083_v45  ;;  %v5020_v34 = vld [vmem:[%s7781_s1 + $0x9c8] sm:$0xff] }
 0x113   :  { %2601 = vmatprep.subr.bf16.mxu0 %v4878_v62  ;;  %2654 = vmatprep.subr.bf16.mxu1 %v4880_v0  ;;  %v5226_v62 = vcombine.high %v5076_v47, %v5084_v48  ;;  %v5067_v0 = vld [vmem:[%s7781_s1 + $0xb40] sm:$0xff] }
 0x116   :  { %2602 = vmatpush1.bf16.msra.mxu0 %v4877_v63  ;;  %2655 = vmatpush1.bf16.msra.mxu1 %v4879_v5  ;;  %v6454_v63 = vsel %vm6426_vm6, %v2710_v50, %v2711_v54  ;;  %v6456_v5 = vpop.f32.mrf.mxu1  ;;  %v5161_v50 = vcombine.low %v5012_v32, %v5020_v34 }
 0x117   :  { %2603 = vmatprep.subr.bf16.mxu0 %v4862_v13  ;;  %2656 = vmatprep.subr.bf16.mxu1 %v4864_v37  ;;  %v5225_v13 = vcombine.low %v5076_v47, %v5084_v48  ;;  %v6466_v8 = vcombine.high %v6450_v3, %v6454_v63  ;;  %v5004_v47 = vld [vmem:[%s7781_s1 + $0x948] sm:$0xff] }
 0x11a   :  { %2604 = vmatpush1.bf16.msra.mxu0 %v4861_v9  ;;  %2657 = vmatpush1.bf16.msra.mxu1 %v4863_v10  ;;  %v6468_v9 = vpop.f32.mrf.mxu0  ;;  %v5044_v10 = vld [vmem:[%s7781_s1 + $0xa88] sm:$0xff] }
 0x11b   :  { %2605 = vmatprep.subr.bf16.mxu0 %v4846_v11  ;;  %2658 = vmatprep.subr.bf16.mxu1 %v4848_v12  ;;  %v5052_v11 = vld [vmem:[%s7781_s1 + $0xac8] sm:$0xff]  ;;  %v6477_v12 = vpop.f32.mrf.mxu1 }
 0x11c   :  { %v6480_v16 = vpop.f32.mrf.mxu0  ;;  %v5193_v26 = vcombine.low %v5044_v10, %v5052_v11 }
 0x11e   :  { %2606 = vmatpush1.bf16.msra.mxu0 %v4845_v19  ;;  %2659 = vmatpush1.bf16.msra.mxu1 %v4847_v20  ;;  %v6482_v19 = vpop.f32.mrf.mxu1  ;;  %v5194_v20 = vcombine.high %v5044_v10, %v5052_v11  ;;  %v6500_v25 = vpop.f32.mrf.mxu0  ;;  %v5110_v11 = vld [vmem:[%s7781_s1 + $0xc98] sm:$0xff] }
 0x11f   :  { %2621 = vmatprep.subr.bf16.mxu0 %v4974_v21  ;;  %2674 = vmatprep.subr.bf16.mxu1 %v4976_v22  ;;  %v5027_v21 = vld [vmem:[%s7781_s1 + $0xa00] sm:$0xff]  ;;  %v5028_v22 = vld [vmem:[%s7781_s1 + $0xa08] sm:$0xff] }
 0x120   :  { %v6516_v36 = vpop.f32.mrf.mxu0 }
 0x122   :  { %2622 = vmatpush2.bf16.msra.mxu0 %v4973_v27  ;;  %2675 = vmatpush2.bf16.msra.mxu1 %v4975_v28  ;;  %v6502_v28 = vpop.f32.mrf.mxu1  ;;  %v6532_v49 = vpop.f32.mrf.mxu0 }
 0x123   :  { %3605 = vmatprep.subr.bf16.mxu0 %v5256_v29  ;;  %3658 = vmatprep.subr.bf16.mxu1 %v5258_v30  ;;  %v5178_v29 = vcombine.high %v5028_v22, %v5036_v23  ;;  %v5011_v30 = vld [vmem:[%s7781_s1 + $0x980] sm:$0xff] }
 0x124   :  { %v5160_v41 = vcombine.high %v5011_v30, %v5019_v31  ;;  %v5159_v48 = vcombine.low %v5011_v30, %v5019_v31  ;;  %v6585_v31 = vcombine.low %v6450_v3, %v6454_v63 }
 0x125   :  { %2624 = vmatmul.mubr.bf16.vlgmr.msra.gmra.mxu0 %v6013_v52  ;;  %2677 = vmatmul.mubr.bf16.vlgmr.msra.gmra.mxu1 %v6013_v52  ;;  %v5059_v52 = vld [vmem:[%s7781_s1 + $0xb00] sm:$0xff] }
 0x126   :  { %3606 = vmatpush1.bf16.msra.mxu0 %v5255_v40  ;;  %3659 = vmatpush1.bf16.msra.mxu1 %v5257_v42  ;;  %v5208_v37 = vcombine.high %v5059_v52, %v5067_v0  ;;  %v5207_v14 = vcombine.low %v5059_v52, %v5067_v0  ;;  %v5177_v40 = vcombine.low %v5028_v22, %v5036_v23  ;;  %v6518_v42 = vpop.f32.mrf.mxu1  ;;  %v5124_v52 = vld [vmem:[%s7781_s1 + $0xd08] sm:$0xff] }
 0x127   :  { %3607 = vmatprep.subr.bf16.mxu0 %v5240_v43  ;;  %3660 = vmatprep.subr.bf16.mxu1 %v5242_v44  ;;  %v5162_v43 = vcombine.high %v5012_v32, %v5020_v34  ;;  %v4995_v44 = vld [vmem:[%s7781_s1 + $0x900] sm:$0xff]  ;;  %v5132_v0 = vld [vmem:[%s7781_s1 + $0xd48] sm:$0xff]  ;;  %v5094_v32 = vld [vmem:[%s7781_s1 + $0xc18] sm:$0xff] }
 0x128   :  { %4990 = vmatprep.mubr.msk.bf16.mxu0 %vm1098_vm3, %v6030_v61  ;;  %4992 = vmatprep.mubr.msk.bf16.mxu1 %vm1098_vm3, %v6030_v61  ;;  %v5223_v61 = vcombine.low %v5075_v51, %v5083_v45  ;;  %v5003_v51 = vld [vmem:[%s7781_s1 + $0x940] sm:$0xff]  ;;  %v4996_v45 = vld [vmem:[%s7781_s1 + $0x908] sm:$0xff]  ;;  %v6534_v54 = vpop.f32.mrf.mxu1  ;;  %v5274_v15 = vcombine.high %v5124_v52, %v5132_v0  ;;  %v5273_v23 = vcombine.low %v5124_v52, %v5132_v0  ;;  %v5102_v34 = vld [vmem:[%s7781_s1 + $0xc58] sm:$0xff] }
 0x129   :  { %v5144_v53 = vcombine.high %v4995_v44, %v5003_v51 }
 0x12a   :  { %3608 = vmatpush1.bf16.msra.mxu0 %v5239_v57  ;;  %3661 = vmatpush1.bf16.msra.mxu1 %v5241_v58  ;;  %v5146_v57 = vcombine.high %v4996_v45, %v5004_v47  ;;  %v5123_v58 = vld [vmem:[%s7781_s1 + $0xd00] sm:$0xff]  ;;  %v6551_v2 = vpop.f32.mrf.mxu1 }
 0x12b   :  { %3609 = vmatprep.subr.bf16.mxu0 %v5224_v59  ;;  %3662 = vmatprep.subr.bf16.mxu1 %v5226_v62  ;;  %v5131_v59 = vld [vmem:[%s7781_s1 + $0xd40] sm:$0xff]  ;;  %v6542_v62 = vpop.f32.mrf.mxu0 }
 0x12c   :  { %v5271_v22 = vcombine.low %v5123_v58, %v5131_v59 }
 0x12d   :  { %2634 = vmatmul.mubr.bf16.gmra.mxu0 %v6057_v6  ;;  %2687 = vmatmul.mubr.bf16.gmra.mxu1 %v6057_v6  ;;  %v5035_v6 = vld [vmem:[%s7781_s1 + $0xa40] sm:$0xff]  ;;  %v6562_v10 = vpop.f32.mrf.mxu0 }
 0x12e   :  { %3610 = vmatpush1.bf16.msra.mxu0 %v5223_v61  ;;  %3663 = vmatpush1.bf16.msra.mxu1 %v5225_v13  ;;  %v5176_v27 = vcombine.high %v5027_v21, %v5035_v6  ;;  %v5175_v35 = vcombine.low %v5027_v21, %v5035_v6  ;;  %v5143_v61 = vcombine.low %v4995_v44, %v5003_v51  ;;  %v2698_v13 = vld [vmem:[%s7782_s0 + $0x18] sm:$0xee]  ;;  %v6573_v6 = vpop.f32.mrf.mxu1 }
 0x12f   :  { %3611 = vmatprep.subr.bf16.mxu0 %v5208_v37  ;;  %3664 = vmatprep.subr.bf16.mxu1 %v5210_v38  ;;  %v5145_v37 = vcombine.low %v4996_v45, %v5004_v47  ;;  %v5272_v38 = vcombine.high %v5123_v58, %v5131_v59  ;;  %v6581_v30 = vpop.f32.mrf.mxu0  ;;  %v5246_v44 = vcombine.high %v5094_v32, %v5102_v34  ;;  %v5077_v45 = vld [vmem:[%s7781_s1 + $0xb90] sm:$0xff] }
 0x130   :  { %5287 = vmatprep.mubr.msk.bf16.mxu0 %vm1098_vm3, %v6466_v8  ;;  %5289 = vmatprep.mubr.msk.bf16.mxu1 %vm1098_vm3, %v6466_v8  ;;  %v5245_v59 = vcombine.low %v5094_v32, %v5102_v34  ;;  %v5228_v52 = vcombine.high %v5077_v45, %v5085_v56 }
 0x131   :  { %v6607_v47 = vpop.f32.mrf.mxu0 }
 0x132   :  { %3612 = vmatpush1.bf16.msra.mxu0 %v5207_v14  ;;  %3665 = vmatpush1.bf16.msra.mxu1 %v5209_v17  ;;  %v5118_v14 = vld [vmem:[%s7781_s1 + $0xcd8] sm:$0xff]  ;;  %v4994_v17 = vrot.slane %v2698_v13, 9  ;;  %v5069_v13 = vld [vmem:[%s7781_s1 + $0xb50] sm:$0xff] }
 0x133   :  { %3613 = vmatprep.subr.bf16.mxu0 %v5192_v18  ;;  %3666 = vmatprep.subr.bf16.mxu1 %v5194_v20  ;;  %v2717_v18 = vrot.slane %v2715_v4, 4  ;;  %v5312_v20 = vld [vmem:[%s7782_s0 + $0x28] sm:$0x11]  ;;  %v5261_v3 = vcombine.low %v5110_v11, %v5118_v14  ;;  %v6619_v58 = vpop.f32.mrf.mxu0 }
 0x134   :  { %v2718_v21 = vrot.slane %v5312_v20, 5  ;;  %v5045_v20 = vld [vmem:[%s7781_s1 + $0xa90] sm:$0xff] }
 0x136   :  { %3614 = vmatpush1.bf16.msra.mxu0 %v5191_v24  ;;  %3667 = vmatpush1.bf16.msra.mxu1 %v5193_v26  ;;  %v5260_v24 = vcombine.high %v5109_v7, %v5117_v60  ;;  %v5262_v26 = vcombine.high %v5110_v11, %v5118_v14 }
 0x137   :  { %3615 = vmatprep.subr.bf16.mxu0 %v5176_v27  ;;  %3668 = vmatprep.subr.bf16.mxu1 %v5178_v29  ;;  %v5093_v27 = vld [vmem:[%s7781_s1 + $0xc10] sm:$0xff] }
 0x138   :  { %v5101_v29 = vld [vmem:[%s7781_s1 + $0xc50] sm:$0xff] }
 0x139   :  { %v5244_v63 = vcombine.high %v5093_v27, %v5101_v29 }
 0x13a   :  { %3616 = vmatpush1.bf16.msra.mxu0 %v5175_v35  ;;  %3669 = vmatpush1.bf16.msra.mxu1 %v5177_v40  ;;  %v2716_v35 = vsel %vm6426_vm6, %v4994_v17, %v2715_v4  ;;  %v2719_v40 = vsel %vm6426_vm6, %v2717_v18, %v2718_v21  ;;  %v5053_v21 = vld [vmem:[%s7781_s1 + $0xad0] sm:$0xff] }
 0x13b   :  { %3617 = vmatprep.subr.bf16.mxu0 %v5160_v41  ;;  %3670 = vmatprep.subr.bf16.mxu1 %v5162_v43  ;;  %v6597_v41 = vpop.f32.mrf.mxu1  ;;  %v5259_v43 = vcombine.low %v5109_v7, %v5117_v60  ;;  %v6599_v51 = vcombine.high %v2716_v35, %v2719_v40  ;;  %v5227_v7 = vcombine.low %v5077_v45, %v5085_v56  ;;  %v6641_v60 = vpop.f32.mrf.mxu0 }
 0x13c   :  { %7799 = vst [vmem:[#allocation3_spill] sm:$0xff] %v6641_v60 }
 0x13e   :  { %3618 = vmatpush1.bf16.msra.mxu0 %v5159_v48  ;;  %3671 = vmatpush1.bf16.msra.mxu1 %v5161_v50  ;;  %v5078_v48 = vld [vmem:[%s7781_s1 + $0xb98] sm:$0xff] }
 0x13f   :  { %3619 = vmatprep.subr.bf16.mxu0 %v5144_v53  ;;  %3672 = vmatprep.subr.bf16.mxu1 %v5146_v57  ;;  %v5086_v50 = vld [vmem:[%s7781_s1 + $0xbd8] sm:$0xff]  ;;  %v6616_v53 = vpop.f32.mrf.mxu1  ;;  %v5243_v57 = vcombine.low %v5093_v27, %v5101_v29  ;;  %v5196_v29 = vcombine.high %v5045_v20, %v5053_v21 }
 0x140   :  { %v5230_v4 = vcombine.high %v5078_v48, %v5086_v50  ;;  %v5229_v11 = vcombine.low %v5078_v48, %v5086_v50 }
 0x141   :  { %v6621_v0 = vpop.f32.mrf.mxu1 }
 0x142   :  { %3620 = vmatpush1.bf16.msra.mxu0 %v5143_v61  ;;  %3673 = vmatpush1.bf16.msra.mxu1 %v5145_v37  ;;  %7798 = vst [vmem:[#allocation2_spill] sm:$0xff] %v6621_v0  ;;  %v5061_v61 = vld [vmem:[%s7781_s1 + $0xb10] sm:$0xff]  ;;  %v6633_v37 = vcombine.low %v2716_v35, %v2719_v40 }
 0x143   :  { %3635 = vmatprep.subr.bf16.mxu0 %v5272_v38  ;;  %3688 = vmatprep.subr.bf16.mxu1 %v5274_v15  ;;  %v5062_v38 = vld [vmem:[%s7781_s1 + $0xb18] sm:$0xff]  ;;  %v5212_v14 = vcombine.high %v5061_v61, %v5069_v13  ;;  %v6643_v17 = vpop.f32.mrf.mxu1  ;;  %v5029_v35 = vld [vmem:[%s7781_s1 + $0xa10] sm:$0xff] }
 0x144   :  { %v5070_v15 = vld [vmem:[%s7781_s1 + $0xb58] sm:$0xff]  ;;  %7800 = vst [vmem:[#allocation4_spill] sm:$0xff] %v6643_v17  ;;  %v5037_v40 = vld [vmem:[%s7781_s1 + $0xa50] sm:$0xff] }
 0x145   :  { %v5214_v18 = vcombine.high %v5062_v38, %v5070_v15  ;;  %v5213_v27 = vcombine.low %v5062_v38, %v5070_v15  ;;  %v6661_v32 = vpop.f32.mrf.mxu1  ;;  %v5180_v56 = vcombine.high %v5029_v35, %v5037_v40  ;;  %v5179_v38 = vcombine.low %v5029_v35, %v5037_v40  ;;  %v5125_v35 = vld [vmem:[%s7781_s1 + $0xd10] sm:$0xff] }
 0x146   :  { %3636 = vmatpush2.bf16.msra.mxu0 %v5271_v22  ;;  %3689 = vmatpush2.bf16.msra.mxu1 %v5273_v23  ;;  %v5046_v22 = vld [vmem:[%s7781_s1 + $0xa98] sm:$0xff]  ;;  %7802 = vst [vmem:[#allocation6_spill] sm:$0xff] %v6661_v32  ;;  %v5133_v40 = vld [vmem:[%s7781_s1 + $0xd50] sm:$0xff] }
 0x147   :  { %3711 = vmatprep.subr.bf16.mxu0 %v5260_v24  ;;  %3764 = vmatprep.subr.bf16.mxu1 %v5262_v26  ;;  %v5054_v23 = vld [vmem:[%s7781_s1 + $0xad8] sm:$0xff]  ;;  %v5211_v24 = vcombine.low %v5061_v61, %v5069_v13  ;;  %v6659_v26 = vpop.f32.mrf.mxu0  ;;  %v6681_v48 = vpop.f32.mrf.mxu1 }
 0x148   :  { %7801 = vst [vmem:[#allocation5_spill] sm:$0xff] %v6659_v26  ;;  %v5198_v34 = vcombine.high %v5046_v22, %v5054_v23  ;;  %v5197_v45 = vcombine.low %v5046_v22, %v5054_v23  ;;  %7804 = vst [vmem:[#allocation8_spill] sm:$0xff] %v6681_v48  ;;  %v5022_v61 = vld [vmem:[%s7781_s1 + $0x9d8] sm:$0xff]  ;;  %v5137_v48 = vld [vmem:[%s7781_s1 + $0xd70] sm:$0xff] }
 0x149   :  { %3638 = vmatmul.mubr.bf16.vlgmr.msra.gmra.mxu0 %v6585_v31  ;;  %3691 = vmatmul.mubr.bf16.vlgmr.msra.gmra.mxu1 %v6585_v31  ;;  %v6697_v13 = vpop.f32.mrf.mxu1  ;;  %v5006_v22 = vld [vmem:[%s7781_s1 + $0x958] sm:$0xff] }
 0x14a   :  { %3712 = vmatpush1.bf16.msra.mxu0 %v5259_v43  ;;  %3765 = vmatpush1.bf16.msra.mxu1 %v5261_v3  ;;  %v5030_v43 = vld [vmem:[%s7781_s1 + $0xa18] sm:$0xff]  ;;  %7806 = vst [vmem:[#allocation10_spill] sm:$0xff] %v6697_v13 }
 0x14b   :  { %3713 = vmatprep.subr.bf16.mxu0 %v5244_v63  ;;  %3766 = vmatprep.subr.bf16.mxu1 %v5246_v44  ;;  %v5038_v3 = vld [vmem:[%s7781_s1 + $0xa58] sm:$0xff]  ;;  %v5195_v63 = vcombine.low %v5045_v20, %v5053_v21  ;;  %v6679_v44 = vpop.f32.mrf.mxu0  ;;  %v6713_v23 = vpop.f32.mrf.mxu1 }
 0x14c   :  { %5288 = vmatprep.mubr.msk.bf16.mxu0 %vm1098_vm3, %v6599_v51  ;;  %5290 = vmatprep.mubr.msk.bf16.mxu1 %vm1098_vm3, %v6599_v51  ;;  %7803 = vst [vmem:[#allocation7_spill] sm:$0xff] %v6679_v44  ;;  %v5182_v50 = vcombine.high %v5030_v43, %v5038_v3  ;;  %v5181_v15 = vcombine.low %v5030_v43, %v5038_v3  ;;  %v4998_v21 = vld [vmem:[%s7781_s1 + $0x918] sm:$0xff]  ;;  %7808 = vst [vmem:[#allocation12_spill] sm:$0xff] %v6713_v23 }
 0x14d   :  { %v5126_v3 = vld [vmem:[%s7781_s1 + $0xd18] sm:$0xff] }
 0x14e   :  { %3714 = vmatpush1.bf16.msra.mxu0 %v5243_v57  ;;  %3767 = vmatpush1.bf16.msra.mxu1 %v5245_v59  ;;  %v5013_v57 = vld [vmem:[%s7781_s1 + $0x990] sm:$0xff] }
 0x14f   :  { %3715 = vmatprep.subr.bf16.mxu0 %v5228_v52  ;;  %3768 = vmatprep.subr.bf16.mxu1 %v5230_v4  ;;  %v5021_v59 = vld [vmem:[%s7781_s1 + $0x9d0] sm:$0xff]  ;;  %v6689_v52 = vpop.f32.mrf.mxu0  ;;  %v5014_v4 = vld [vmem:[%s7781_s1 + $0x998] sm:$0xff] }
 0x150   :  { %7805 = vst [vmem:[#allocation9_spill] sm:$0xff] %v6689_v52 }
 0x151   :  { %3648 = vmatmul.mubr.bf16.gmra.mxu0 %v6633_v37  ;;  %3701 = vmatmul.mubr.bf16.gmra.mxu1 %v6633_v37  ;;  %v6705_v20 = vpop.f32.mrf.mxu0 }
 0x152   :  { %3716 = vmatpush1.bf16.msra.mxu0 %v5227_v7  ;;  %3769 = vmatpush1.bf16.msra.mxu1 %v5229_v11  ;;  %v5164_v7 = vcombine.high %v5013_v57, %v5021_v59  ;;  %v5166_v11 = vcombine.high %v5014_v4, %v5022_v61  ;;  %7807 = vst [vmem:[#allocation11_spill] sm:$0xff] %v6705_v20  ;;  %v5025_v20 = vld [vmem:[%s7781_s1 + $0x9f0] sm:$0xff] }
 0x153   :  { %3717 = vmatprep.subr.bf16.mxu0 %v5212_v14  ;;  %3770 = vmatprep.subr.bf16.mxu1 %v5214_v18  ;;  %v4997_v14 = vld [vmem:[%s7781_s1 + $0x910] sm:$0xff]  ;;  %v6721_v43 = vpop.f32.mrf.mxu0 }
 0x154   :  { %5291 = vmatprep.mubr.msk.bf16.mxu0 %vm1098_vm3, %v6466_v8  ;;  %5293 = vmatprep.mubr.msk.bf16.mxu1 %vm1098_vm3, %v6466_v8  ;;  %v5005_v18 = vld [vmem:[%s7781_s1 + $0x950] sm:$0xff]  ;;  %7809 = vst [vmem:[#allocation13_spill] sm:$0xff] %v6721_v43 }
 0x155   :  { %v5041_v43 = vld [vmem:[%s7781_s1 + $0xa70] sm:$0xff] }
 0x156   :  { %3718 = vmatpush1.bf16.msra.mxu0 %v5211_v24  ;;  %3771 = vmatpush1.bf16.msra.mxu1 %v5213_v27  ;;  %v5163_v24 = vcombine.low %v5013_v57, %v5021_v59  ;;  %v5165_v27 = vcombine.low %v5014_v4, %v5022_v61  ;;  %v5276_v57 = vcombine.high %v5125_v35, %v5133_v40  ;;  %v5111_v4 = vld [vmem:[%s7781_s1 + $0xca0] sm:$0xff] }
 0x157   :  { %3719 = vmatprep.subr.bf16.mxu0 %v5196_v29  ;;  %3772 = vmatprep.subr.bf16.mxu1 %v5198_v34  ;;  %v5148_v29 = vcombine.high %v4997_v14, %v5005_v18  ;;  %v5150_v34 = vcombine.high %v4998_v21, %v5006_v22  ;;  %v5119_v61 = vld [vmem:[%s7781_s1 + $0xce0] sm:$0xff] }
 0x15a   :  { %3720 = vmatpush1.bf16.msra.mxu0 %v5195_v63  ;;  %3773 = vmatpush1.bf16.msra.mxu1 %v5197_v45  ;;  %v5134_v63 = vld [vmem:[%s7781_s1 + $0xd58] sm:$0xff]  ;;  %v6729_v45 = vpop.f32.mrf.mxu1 }
 0x15b   :  { %3721 = vmatprep.subr.bf16.mxu0 %v5180_v56  ;;  %3774 = vmatprep.subr.bf16.mxu1 %v5182_v50  ;;  %7810 = vst [vmem:[#allocation14_spill] sm:$0xff] %v6729_v45  ;;  %v5147_v56 = vcombine.low %v4997_v14, %v5005_v18  ;;  %v5149_v50 = vcombine.low %v4998_v21, %v5006_v22 }
 0x15c   :  { %v5278_v59 = vcombine.high %v5126_v3, %v5134_v63  ;;  %v5275_v14 = vcombine.low %v5125_v35, %v5133_v40  ;;  %v5277_v21 = vcombine.low %v5126_v3, %v5134_v63  ;;  %v5264_v22 = vcombine.high %v5111_v4, %v5119_v61  ;;  %v5096_v35 = vld [vmem:[%s7781_s1 + $0xc28] sm:$0xff] }
 0x15d   :  { %v5104_v40 = vld [vmem:[%s7781_s1 + $0xc68] sm:$0xff]  ;;  %v5263_v3 = vcombine.low %v5111_v4, %v5119_v61 }
 0x15e   :  { %3722 = vmatpush1.bf16.msra.mxu0 %v5179_v38  ;;  %3775 = vmatpush1.bf16.msra.mxu1 %v5181_v15  ;;  %v6737_v38 = vpop.f32.mrf.mxu0  ;;  %v5112_v15 = vld [vmem:[%s7781_s1 + $0xca8] sm:$0xff] }
 0x15f   :  { %3723 = vmatprep.subr.bf16.mxu0 %v5164_v7  ;;  %3776 = vmatprep.subr.bf16.mxu1 %v5166_v11  ;;  %7811 = vst [vmem:[#allocation15_spill] sm:$0xff] %v6737_v38  ;;  %v5120_v7 = vld [vmem:[%s7781_s1 + $0xce8] sm:$0xff]  ;;  %v6745_v11 = vpop.f32.mrf.mxu1  ;;  %v5057_v38 = vld [vmem:[%s7781_s1 + $0xaf0] sm:$0xff] }
 0x160   :  { %7812 = vst [vmem:[#allocation16_spill] sm:$0xff] %v6745_v11  ;;  %v6747_v18 = vpop.f32.mrf.mxu0  ;;  %v5080_v4 = vld [vmem:[%s7781_s1 + $0xba8] sm:$0xff] }
 0x161   :  { %7813 = vst [vmem:[#allocation17_spill] sm:$0xff] %v6747_v18  ;;  %v5087_v18 = vld [vmem:[%s7781_s1 + $0xbe0] sm:$0xff]  ;;  %v5088_v61 = vld [vmem:[%s7781_s1 + $0xbe8] sm:$0xff] }
 0x162   :  { %3724 = vmatpush1.bf16.msra.mxu0 %v5163_v24  ;;  %3777 = vmatpush1.bf16.msra.mxu1 %v5165_v27  ;;  %v6749_v24 = vpop.f32.mrf.mxu1  ;;  %v5266_v27 = vcombine.high %v5112_v15, %v5120_v7  ;;  %v6763_v63 = vpop.f32.mrf.mxu0 }
 0x163   :  { %3725 = vmatprep.subr.bf16.mxu0 %v5148_v29  ;;  %3778 = vmatprep.subr.bf16.mxu1 %v5150_v34  ;;  %7814 = vst [vmem:[#allocation18_spill] sm:$0xff] %v6749_v24  ;;  %v5095_v29 = vld [vmem:[%s7781_s1 + $0xc20] sm:$0xff]  ;;  %7815 = vst [vmem:[#allocation19_spill] sm:$0xff] %v6763_v63 }
 0x164   :  { %v5103_v34 = vld [vmem:[%s7781_s1 + $0xc60] sm:$0xff] }
 0x165   :  { %v5079_v24 = vld [vmem:[%s7781_s1 + $0xba0] sm:$0xff] }
 0x166   :  { %3726 = vmatpush1.bf16.msra.mxu0 %v5147_v56  ;;  %3779 = vmatpush1.bf16.msra.mxu1 %v5149_v50  ;;  %v5265_v56 = vcombine.low %v5112_v15, %v5120_v7  ;;  %v5248_v50 = vcombine.high %v5095_v29, %v5103_v34  ;;  %v5247_v15 = vcombine.low %v5095_v29, %v5103_v34  ;;  %v6781_v7 = vpop.f32.mrf.mxu0  ;;  %v5071_v29 = vld [vmem:[%s7781_s1 + $0xb60] sm:$0xff]  ;;  %v5064_v34 = vld [vmem:[%s7781_s1 + $0xb28] sm:$0xff] }
 0x167   :  { %3741 = vmatprep.subr.bf16.mxu0 %v5276_v57  ;;  %3794 = vmatprep.subr.bf16.mxu1 %v5278_v59  ;;  %v6765_v57 = vpop.f32.mrf.mxu1  ;;  %v5250_v59 = vcombine.high %v5096_v35, %v5104_v40  ;;  %7817 = vst [vmem:[#allocation21_spill] sm:$0xff] %v6781_v7  ;;  %v5047_v7 = vld [vmem:[%s7781_s1 + $0xaa0] sm:$0xff] }
 0x168   :  { %7816 = vst [vmem:[#allocation20_spill] sm:$0xff] %v6765_v57  ;;  %v5063_v57 = vld [vmem:[%s7781_s1 + $0xb20] sm:$0xff] }
 0x169   :  { %v5055_v63 = vld [vmem:[%s7781_s1 + $0xae0] sm:$0xff] }
 0x16a   :  { %3742 = vmatpush2.bf16.msra.mxu0 %v5275_v14  ;;  %3795 = vmatpush2.bf16.msra.mxu1 %v5277_v21  ;;  %v5249_v14 = vcombine.low %v5096_v35, %v5104_v40  ;;  %v5232_v21 = vcombine.high %v5079_v24, %v5087_v18  ;;  %v5072_v35 = vld [vmem:[%s7781_s1 + $0xb68] sm:$0xff]  ;;  %v5231_v40 = vcombine.low %v5079_v24, %v5087_v18 }
 0x16b   :  { %3817 = vmatprep.subr.bf16.mxu0 %v5264_v22  ;;  %3870 = vmatprep.subr.bf16.mxu1 %v5266_v27  ;;  %v6783_v22 = vpop.f32.mrf.mxu1  ;;  %v5234_v27 = vcombine.high %v5080_v4, %v5088_v61  ;;  %v5048_v18 = vld [vmem:[%s7781_s1 + $0xaa8] sm:$0xff] }
 0x16c   :  { %7818 = vst [vmem:[#allocation22_spill] sm:$0xff] %v6783_v22  ;;  %v5218_v22 = vcombine.high %v5064_v34, %v5072_v35  ;;  %v5056_v24 = vld [vmem:[%s7781_s1 + $0xae8] sm:$0xff] }
 0x16d   :  { %3744 = vmatmul.mubr.bf16.vlgmr.msra.gmra.mxu0 %v6585_v31  ;;  %3797 = vmatmul.mubr.bf16.vlgmr.msra.gmra.mxu1 %v6585_v31 }
 0x16e   :  { %3818 = vmatpush1.bf16.msra.mxu0 %v5263_v3  ;;  %3871 = vmatpush1.bf16.msra.mxu1 %v5265_v56  ;;  %v6801_v3 = vpop.f32.mrf.mxu0  ;;  %v5233_v56 = vcombine.low %v5080_v4, %v5088_v61  ;;  %v5215_v61 = vcombine.low %v5063_v57, %v5071_v29 }
 0x16f   :  { %3819 = vmatprep.subr.bf16.mxu0 %v5248_v50  ;;  %3872 = vmatprep.subr.bf16.mxu1 %v5250_v59  ;;  %7819 = vst [vmem:[#allocation23_spill] sm:$0xff] %v6801_v3  ;;  %v5216_v50 = vcombine.high %v5063_v57, %v5071_v29  ;;  %v6803_v59 = vpop.f32.mrf.mxu1  ;;  %v5032_v57 = vld [vmem:[%s7781_s1 + $0xa28] sm:$0xff] }
 0x170   :  { %5292 = vmatprep.mubr.msk.bf16.mxu0 %vm1098_vm3, %v6599_v51  ;;  %5294 = vmatprep.mubr.msk.bf16.mxu1 %vm1098_vm3, %v6599_v51  ;;  %7820 = vst [vmem:[#allocation24_spill] sm:$0xff] %v6803_v59  ;;  %v5039_v59 = vld [vmem:[%s7781_s1 + $0xa60] sm:$0xff] }
 0x171   :  { %v6820_v4 = vpop.f32.mrf.mxu1 }
 0x172   :  { %3820 = vmatpush1.bf16.msra.mxu0 %v5247_v15  ;;  %3873 = vmatpush1.bf16.msra.mxu1 %v5249_v14  ;;  %v6811_v15 = vpop.f32.mrf.mxu0  ;;  %7822 = vst [vmem:[#allocation26_spill] sm:$0xff] %v6820_v4  ;;  %v5217_v14 = vcombine.low %v5064_v34, %v5072_v35  ;;  %v5199_v34 = vcombine.low %v5047_v7, %v5055_v63 }
 0x173   :  { %3821 = vmatprep.subr.bf16.mxu0 %v5232_v21  ;;  %3874 = vmatprep.subr.bf16.mxu1 %v5234_v27  ;;  %7821 = vst [vmem:[#allocation25_spill] sm:$0xff] %v6811_v15  ;;  %v5200_v21 = vcombine.high %v5047_v7, %v5055_v63  ;;  %v5202_v27 = vcombine.high %v5048_v18, %v5056_v24  ;;  %v5031_v15 = vld [vmem:[%s7781_s1 + $0xa20] sm:$0xff]  ;;  %v6841_v29 = vpop.f32.mrf.mxu1  ;;  %v5016_v63 = vld [vmem:[%s7781_s1 + $0x9a8] sm:$0xff] }
 0x174   :  { %v6831_v4 = vpop.f32.mrf.mxu0  ;;  %7824 = vst [vmem:[#allocation28_spill] sm:$0xff] %v6841_v29  ;;  %v5201_v35 = vcombine.low %v5048_v18, %v5056_v24  ;;  %v5024_v7 = vld [vmem:[%s7781_s1 + $0x9e8] sm:$0xff]  ;;  %v5183_v24 = vcombine.low %v5031_v15, %v5039_v59 }
 0x175   :  { %3754 = vmatmul.mubr.bf16.gmra.mxu0 %v6633_v37  ;;  %3807 = vmatmul.mubr.bf16.gmra.mxu1 %v6633_v37  ;;  %7823 = vst [vmem:[#allocation27_spill] sm:$0xff] %v6831_v4  ;;  %v5023_v4 = vld [vmem:[%s7781_s1 + $0x9e0] sm:$0xff]  ;;  %v6857_v18 = vpop.f32.mrf.mxu1 }
 0x176   :  { %3822 = vmatpush1.bf16.msra.mxu0 %v5231_v40  ;;  %3875 = vmatpush1.bf16.msra.mxu1 %v5233_v56  ;;  %v5184_v40 = vcombine.high %v5031_v15, %v5039_v59  ;;  %v6849_v3 = vpop.f32.mrf.mxu0  ;;  %7826 = vst [vmem:[#allocation30_spill] sm:$0xff] %v6857_v18  ;;  %v5000_v59 = vld [vmem:[%s7781_s1 + $0x928] sm:$0xff]  ;;  %v5127_v18 = vld [vmem:[%s7781_s1 + $0xd20] sm:$0xff] }
 0x177   :  { %3823 = vmatprep.subr.bf16.mxu0 %v5216_v50  ;;  %3876 = vmatprep.subr.bf16.mxu1 %v5218_v22  ;;  %v5040_v22 = vld [vmem:[%s7781_s1 + $0xa68] sm:$0xff]  ;;  %v5015_v50 = vld [vmem:[%s7781_s1 + $0x9a0] sm:$0xff]  ;;  %7825 = vst [vmem:[#allocation29_spill] sm:$0xff] %v6849_v3 }
 0x178   :  { %5295 = vmatprep.mubr.msk.bf16.mxu0 %vm1098_vm3, %v6466_v8  ;;  %5297 = vmatprep.mubr.msk.bf16.mxu1 %vm1098_vm3, %v6466_v8  ;;  %v5186_v56 = vcombine.high %v5032_v57, %v5040_v22  ;;  %v5007_v3 = vld [vmem:[%s7781_s1 + $0x960] sm:$0xff]  ;;  %v6865_v29 = vpop.f32.mrf.mxu0  ;;  %v5008_v15 = vld [vmem:[%s7781_s1 + $0x968] sm:$0xff] }
 0x179   :  { %7827 = vst [vmem:[#allocation31_spill] sm:$0xff] %v6865_v29  ;;  %v5154_v29 = vcombine.high %v5000_v59, %v5008_v15 }
 0x17a   :  { %3824 = vmatpush1.bf16.msra.mxu0 %v5215_v61  ;;  %3877 = vmatpush1.bf16.msra.mxu1 %v5217_v14  ;;  %v5185_v61 = vcombine.low %v5032_v57, %v5040_v22  ;;  %v5168_v14 = vcombine.high %v5015_v50, %v5023_v4  ;;  %v6873_v57 = vpop.f32.mrf.mxu1  ;;  %v5167_v22 = vcombine.low %v5015_v50, %v5023_v4  ;;  %v5128_v4 = vld [vmem:[%s7781_s1 + $0xd28] sm:$0xff] }
 0x17b   :  { %3825 = vmatprep.subr.bf16.mxu0 %v5200_v21  ;;  %3878 = vmatprep.subr.bf16.mxu1 %v5202_v27  ;;  %v5170_v21 = vcombine.high %v5016_v63, %v5024_v7  ;;  %v4999_v27 = vld [vmem:[%s7781_s1 + $0x920] sm:$0xff]  ;;  %7828 = vst [vmem:[#allocation32_spill] sm:$0xff] %v6873_v57  ;;  %v5136_v50 = vld [vmem:[%s7781_s1 + $0xd68] sm:$0xff] }
 0x17c   :  { %v5135_v57 = vld [vmem:[%s7781_s1 + $0xd60] sm:$0xff] }
 0x17e   :  { %3826 = vmatpush1.bf16.msra.mxu0 %v5199_v34  ;;  %3879 = vmatpush1.bf16.msra.mxu1 %v5201_v35  ;;  %v6875_v34 = vpop.f32.mrf.mxu0  ;;  %v5169_v35 = vcombine.low %v5016_v63, %v5024_v7  ;;  %v5151_v63 = vcombine.low %v4999_v27, %v5007_v3 }
 0x17f   :  { %3827 = vmatprep.subr.bf16.mxu0 %v5184_v40  ;;  %3880 = vmatprep.subr.bf16.mxu1 %v5186_v56  ;;  %7829 = vst [vmem:[#allocation33_spill] sm:$0xff] %v6875_v34  ;;  %v5152_v40 = vcombine.high %v4999_v27, %v5007_v3  ;;  %v6877_v56 = vpop.f32.mrf.mxu1  ;;  %v5121_v34 = vld [vmem:[%s7781_s1 + $0xcf0] sm:$0xff]  ;;  %v5114_v3 = vld [vmem:[%s7781_s1 + $0xcb8] sm:$0xff] }
 0x180   :  { %7830 = vst [vmem:[#allocation34_spill] sm:$0xff] %v6877_v56  ;;  %v6891_v7 = vpop.f32.mrf.mxu0  ;;  %v5113_v56 = vld [vmem:[%s7781_s1 + $0xcb0] sm:$0xff]  ;;  %v5122_v27 = vld [vmem:[%s7781_s1 + $0xcf8] sm:$0xff] }
 0x181   :  { %7831 = vst [vmem:[#allocation35_spill] sm:$0xff] %v6891_v7  ;;  %v5105_v7 = vld [vmem:[%s7781_s1 + $0xc70] sm:$0xff] }
 0x182   :  { %3828 = vmatpush1.bf16.msra.mxu0 %v5183_v24  ;;  %3881 = vmatpush1.bf16.msra.mxu1 %v5185_v61  ;;  %v5153_v24 = vcombine.low %v5000_v59, %v5008_v15  ;;  %v5280_v61 = vcombine.high %v5127_v18, %v5135_v57  ;;  %v5279_v59 = vcombine.low %v5127_v18, %v5135_v57  ;;  %v5098_v18 = vld [vmem:[%s7781_s1 + $0xc38] sm:$0xff] }
 0x183   :  { %3829 = vmatprep.subr.bf16.mxu0 %v5168_v14  ;;  %3882 = vmatprep.subr.bf16.mxu1 %v5170_v21  ;;  %v6893_v14 = vpop.f32.mrf.mxu1  ;;  %v5282_v21 = vcombine.high %v5128_v4, %v5136_v50  ;;  %v5281_v15 = vcombine.low %v5128_v4, %v5136_v50  ;;  %v5106_v57 = vld [vmem:[%s7781_s1 + $0xc78] sm:$0xff]  ;;  %v5267_v4 = vcombine.low %v5113_v56, %v5121_v34 }
 0x184   :  { %7832 = vst [vmem:[#allocation36_spill] sm:$0xff] %v6893_v14  ;;  %v5097_v14 = vld [vmem:[%s7781_s1 + $0xc30] sm:$0xff] }
 0x186   :  { %3830 = vmatpush1.bf16.msra.mxu0 %v5167_v22  ;;  %3883 = vmatpush1.bf16.msra.mxu1 %v5169_v35  ;;  %v5268_v22 = vcombine.high %v5113_v56, %v5121_v34  ;;  %v6909_v35 = vpop.f32.mrf.mxu1  ;;  %v5082_v34 = vld [vmem:[%s7781_s1 + $0xbb8] sm:$0xff] }
 0x187   :  { %3831 = vmatprep.subr.bf16.mxu0 %v5152_v40  ;;  %3884 = vmatprep.subr.bf16.mxu1 %v5154_v29  ;;  %v6907_v29 = vpop.f32.mrf.mxu0  ;;  %7834 = vst [vmem:[#allocation38_spill] sm:$0xff] %v6909_v35  ;;  %v5270_v40 = vcombine.high %v5114_v3, %v5122_v27  ;;  %v5081_v35 = vld [vmem:[%s7781_s1 + $0xbb0] sm:$0xff]  ;;  %v5090_v56 = vld [vmem:[%s7781_s1 + $0xbf8] sm:$0xff] }
 0x188   :  { %7833 = vst [vmem:[#allocation37_spill] sm:$0xff] %v6907_v29  ;;  %v5089_v29 = vld [vmem:[%s7781_s1 + $0xbf0] sm:$0xff] }
 0x189   :  { %v6923_v50 = vpop.f32.mrf.mxu0 }
 0x18a   :  { %3832 = vmatpush1.bf16.msra.mxu0 %v5151_v63  ;;  %3885 = vmatpush1.bf16.msra.mxu1 %v5153_v24  ;;  %7835 = vst [vmem:[#allocation39_spill] sm:$0xff] %v6923_v50  ;;  %v5269_v63 = vcombine.low %v5114_v3, %v5122_v27  ;;  %v5252_v24 = vcombine.high %v5097_v14, %v5105_v7  ;;  %v5073_v50 = vld [vmem:[%s7781_s1 + $0xb70] sm:$0xff] }
 0x18b   :  { %3847 = vmatprep.subr.bf16.mxu0 %v5280_v61  ;;  %3900 = vmatprep.subr.bf16.mxu1 %v5282_v21  ;;  %v6925_v61 = vpop.f32.mrf.mxu1  ;;  %v5254_v21 = vcombine.high %v5098_v18, %v5106_v57  ;;  %v5251_v27 = vcombine.low %v5097_v14, %v5105_v7  ;;  %v5066_v7 = vld [vmem:[%s7781_s1 + $0xb38] sm:$0xff] }
 0x18c   :  { %7836 = vst [vmem:[#allocation40_spill] sm:$0xff] %v6925_v61  ;;  %v5065_v61 = vld [vmem:[%s7781_s1 + $0xb30] sm:$0xff]  ;;  %v5074_v14 = vld [vmem:[%s7781_s1 + $0xb78] sm:$0xff] }
 0x18d   :  { %v6942_v3 = vpop.f32.mrf.mxu1 }
 0x18e   :  { %3848 = vmatpush2.bf16.msra.mxu0 %v5279_v59  ;;  %3901 = vmatpush2.bf16.msra.mxu1 %v5281_v15  ;;  %v6933_v59 = vpop.f32.mrf.mxu0  ;;  %v5253_v15 = vcombine.low %v5098_v18, %v5106_v57  ;;  %v5235_v57 = vcombine.low %v5081_v35, %v5089_v29 }
 0x18f   :  { %3923 = vmatprep.subr.bf16.mxu0 %v5268_v22  ;;  %3976 = vmatprep.subr.bf16.mxu1 %v5270_v40  ;;  %v5236_v22 = vcombine.high %v5081_v35, %v5089_v29  ;;  %v5238_v40 = vcombine.high %v5082_v34, %v5090_v56  ;;  %v6963_v18 = vpop.f32.mrf.mxu1  ;;  %v5050_v29 = vld [vmem:[%s7781_s1 + $0xab8] sm:$0xff] }
 0x190   :  { %v6953_v11 = vpop.f32.mrf.mxu0  ;;  %v5058_v35 = vld [vmem:[%s7781_s1 + $0xaf8] sm:$0xff] }
 0x191   :  { %3850 = vmatmul.mubr.bf16.vlgmr.msra.gmra.mxu0 %v6585_v31  ;;  %3903 = vmatmul.mubr.bf16.vlgmr.msra.gmra.mxu1 %v6585_v31 }
 0x192   :  { %3924 = vmatpush1.bf16.msra.mxu0 %v5267_v4  ;;  %3977 = vmatpush1.bf16.msra.mxu1 %v5269_v63  ;;  %v5237_v4 = vcombine.low %v5082_v34, %v5090_v56  ;;  %v5220_v63 = vcombine.high %v5065_v61, %v5073_v50  ;;  %v6971_v45 = vpop.f32.mrf.mxu0  ;;  %v6980_v34 = vpop.f32.mrf.mxu1  ;;  %v5219_v56 = vcombine.low %v5065_v61, %v5073_v50  ;;  %v5034_v50 = vld [vmem:[%s7781_s1 + $0xa38] sm:$0xff] }
 0x193   :  { %3925 = vmatprep.subr.bf16.mxu0 %v5252_v24  ;;  %3978 = vmatprep.subr.bf16.mxu1 %v5254_v21  ;;  %v5222_v24 = vcombine.high %v5066_v7, %v5074_v14  ;;  %v5049_v21 = vld [vmem:[%s7781_s1 + $0xab0] sm:$0xff]  ;;  %v5042_v61 = vld [vmem:[%s7781_s1 + $0xa78] sm:$0xff] }
 0x194   :  { %5296 = vmatprep.mubr.msk.bf16.mxu0 %vm1098_vm3, %v6599_v51  ;;  %5298 = vmatprep.mubr.msk.bf16.mxu1 %vm1098_vm3, %v6599_v51  ;;  %v6991_v23 = vpop.f32.mrf.mxu0 }
 0x196   :  { %3926 = vmatpush1.bf16.msra.mxu0 %v5251_v27  ;;  %3979 = vmatpush1.bf16.msra.mxu1 %v5253_v15  ;;  %v5221_v27 = vcombine.low %v5066_v7, %v5074_v14  ;;  %v5204_v15 = vcombine.high %v5049_v21, %v5057_v38  ;;  %v7001_v7 = vpop.f32.mrf.mxu1  ;;  %v5203_v14 = vcombine.low %v5049_v21, %v5057_v38  ;;  %v7009_v13 = vpop.f32.mrf.mxu0  ;;  %v5026_v38 = vld [vmem:[%s7781_s1 + $0x9f8] sm:$0xff] }
 0x197   :  { %3927 = vmatprep.subr.bf16.mxu0 %v5236_v22  ;;  %3980 = vmatprep.subr.bf16.mxu1 %v5238_v40  ;;  %v5206_v22 = vcombine.high %v5050_v29, %v5058_v35  ;;  %v5033_v40 = vld [vmem:[%s7781_s1 + $0xa30] sm:$0xff] }
 0x198   :  { %v7017_v21 = vpop.f32.mrf.mxu1  ;;  %v7025_v52 = vpop.f32.mrf.mxu0 }
 0x199   :  { %3860 = vmatmul.mubr.bf16.gmra.mxu0 %v6633_v37  ;;  %3913 = vmatmul.mubr.bf16.gmra.mxu1 %v6633_v37 }
 0x19a   :  { %3928 = vmatpush1.bf16.msra.mxu0 %v5235_v57  ;;  %3981 = vmatpush1.bf16.msra.mxu1 %v5237_v4  ;;  %v5205_v57 = vcombine.low %v5050_v29, %v5058_v35  ;;  %v5188_v4 = vcombine.high %v5033_v40, %v5041_v43  ;;  %v5187_v29 = vcombine.low %v5033_v40, %v5041_v43  ;;  %v5002_v43 = vld [vmem:[%s7781_s1 + $0x938] sm:$0xff]  ;;  %v7041_v44 = vpop.f32.mrf.mxu0 }
 0x19b   :  { %3929 = vmatprep.subr.bf16.mxu0 %v5220_v63  ;;  %3982 = vmatprep.subr.bf16.mxu1 %v5222_v24  ;;  %v5190_v63 = vcombine.high %v5034_v50, %v5042_v61  ;;  %v5017_v24 = vld [vmem:[%s7781_s1 + $0x9b0] sm:$0xff]  ;;  %v5189_v35 = vcombine.low %v5034_v50, %v5042_v61  ;;  %v5010_v40 = vld [vmem:[%s7781_s1 + $0x978] sm:$0xff]  ;;  %v7033_v50 = vpop.f32.mrf.mxu1 }
 0x19c   :  { %5299 = vmatprep.mubr.msk.bf16.mxu0 %vm1098_vm3, %v6466_v8  ;;  %5301 = vmatprep.mubr.msk.bf16.mxu1 %vm1098_vm3, %v6466_v8  ;;  %v5018_v8 = vld [vmem:[%s7781_s1 + $0x9b8] sm:$0xff]  ;;  %v5171_v61 = vcombine.low %v5017_v24, %v5025_v20 }
 0x19e   :  { %3930 = vmatpush1.bf16.msra.mxu0 %v5219_v56  ;;  %3983 = vmatpush1.bf16.msra.mxu1 %v5221_v27  ;;  %v5172_v56 = vcombine.high %v5017_v24, %v5025_v20  ;;  %v5174_v27 = vcombine.high %v5018_v8, %v5026_v38  ;;  %v5130_v20 = vld [vmem:[%s7781_s1 + $0xd38] sm:$0xff] }
 0x19f   :  { %3931 = vmatprep.subr.bf16.mxu0 %v5204_v15  ;;  %3984 = vmatprep.subr.bf16.mxu1 %v5206_v22  ;;  %v5001_v15 = vld [vmem:[%s7781_s1 + $0x930] sm:$0xff]  ;;  %v5138_v24 = vld [vmem:[%s7781_s1 + $0xd78] sm:$0xff] }
 0x1a0   :  { %v5009_v22 = vld [vmem:[%s7781_s1 + $0x970] sm:$0xff]  ;;  %v5285_v60 = vcombine.low %v5130_v20, %v5138_v24 }
 0x1a2   :  { %3932 = vmatpush1.bf16.msra.mxu0 %v5203_v14  ;;  %3985 = vmatpush1.bf16.msra.mxu1 %v5205_v57  ;;  %v5173_v14 = vcombine.low %v5018_v8, %v5026_v38  ;;  %v5156_v57 = vcombine.high %v5001_v15, %v5009_v22  ;;  %v7049_v8 = vpop.f32.mrf.mxu1  ;;  %v5155_v38 = vcombine.low %v5001_v15, %v5009_v22 }
 0x1a3   :  { %3933 = vmatprep.subr.bf16.mxu0 %v5188_v4  ;;  %3986 = vmatprep.subr.bf16.mxu1 %v5190_v63  ;;  %v5158_v4 = vcombine.high %v5002_v43, %v5010_v40  ;;  %v5129_v63 = vld [vmem:[%s7781_s1 + $0xd30] sm:$0xff] }
 0x1a4   :  { %v7053_v32 = vpop.f32.mrf.mxu1  ;;  %v5283_v26 = vcombine.low %v5129_v63, %v5137_v48 }
 0x1a6   :  { %3934 = vmatpush1.bf16.msra.mxu0 %v5187_v29  ;;  %3987 = vmatpush1.bf16.msra.mxu1 %v5189_v35  ;;  %v5157_v29 = vcombine.low %v5002_v43, %v5010_v40  ;;  %v5284_v35 = vcombine.high %v5129_v63, %v5137_v48  ;;  %v7057_v0 = vpop.f32.mrf.mxu1 }
 0x1a7   :  { %3935 = vmatprep.subr.bf16.mxu0 %v5172_v56  ;;  %3988 = vmatprep.subr.bf16.mxu1 %v5174_v27  ;;  %v5286_v56 = vcombine.high %v5130_v20, %v5138_v24  ;;  %v7051_v27 = vpop.f32.mrf.mxu0 }
 0x1a8   :  { %v7061_v22 = vpop.f32.mrf.mxu1 }
 0x1a9   :  { %v7055_v17 = vpop.f32.mrf.mxu0 }
 0x1aa   :  { %3936 = vmatpush1.bf16.msra.mxu0 %v5171_v61  ;;  %3989 = vmatpush1.bf16.msra.mxu1 %v5173_v14  ;;  %v7071_v43 = vpop.f32.mrf.mxu1 }
 0x1ab   :  { %3937 = vmatprep.subr.bf16.mxu0 %v5156_v57  ;;  %3990 = vmatprep.subr.bf16.mxu1 %v5158_v4  ;;  %v7059_v15 = vpop.f32.mrf.mxu0 }
 0x1ac   :  { %v7075_v40 = vpop.f32.mrf.mxu1 }
 0x1ad   :  { %v7067_v48 = vpop.f32.mrf.mxu0 }
 0x1ae   :  { %3938 = vmatpush1.bf16.msra.mxu0 %v5155_v38  ;;  %3991 = vmatpush1.bf16.msra.mxu1 %v5157_v29 }
 0x1af   :  { %3953 = vmatprep.subr.bf16.mxu0 %v5284_v35  ;;  %4006 = vmatprep.subr.bf16.mxu1 %v5286_v56 }
 0x1b2   :  { %3954 = vmatpush2.bf16.msra.mxu0 %v5283_v26  ;;  %4007 = vmatpush2.bf16.msra.mxu1 %v5285_v60  ;;  %v7073_v26 = vpop.f32.mrf.mxu0 }
 0x1b4   :  { %v7079_v60 = vpop.f32.mrf.mxu0 }
 0x1b5   :  { %3956 = vmatmul.mubr.bf16.vlgmr.msra.gmra.mxu0 %v6585_v31  ;;  %4009 = vmatmul.mubr.bf16.vlgmr.msra.gmra.mxu1 %v6585_v31  ;;  %v7081_v31 = vpop.f32.mrf.mxu1 }
 0x1b6   :  { %5300 = vmatprep.mubr.msk.bf16.mxu0 %vm1098_vm3, %v6599_v51  ;;  %5302 = vmatprep.mubr.msk.bf16.mxu1 %vm1098_vm3, %v6599_v51  ;;  %v7083_v61 = vpop.f32.mrf.mxu0 }
 0x1b7   :  { %v7085_v14 = vpop.f32.mrf.mxu1 }
 0x1b8   :  { %v7087_v57 = vpop.f32.mrf.mxu0 }
 0x1b9   :  { %7837 = vst [vmem:[#allocation41_spill] sm:$0xff] %v7087_v57  ;;  %v7089_v51 = vpop.f32.mrf.mxu1 }
 0x1ba   :  { %7838 = vst [vmem:[#allocation42_spill] sm:$0xff] %v7089_v51  ;;  %v7091_v4 = vpop.f32.mrf.mxu0 }
 0x1bb   :  { %7839 = vst [vmem:[#allocation43_spill] sm:$0xff] %v7091_v4  ;;  %v7093_v63 = vpop.f32.mrf.mxu1 }
 0x1bc   :  { %7840 = vst [vmem:[#allocation44_spill] sm:$0xff] %v7093_v63 }
 0x1bd   :  { %3966 = vmatmul.mubr.bf16.gmra.mxu0 %v6633_v37  ;;  %4019 = vmatmul.mubr.bf16.gmra.mxu1 %v6633_v37 }
 0x1c1   :  { %v7095_v20 = vpop.f32.mrf.mxu0  ;;  %v7097_v24 = vpop.f32.mrf.mxu1 }
 0x1c2   :  { %7841 = vst [vmem:[#allocation45_spill] sm:$0xff] %v7095_v20  ;;  %7842 = vst [vmem:[#allocation46_spill] sm:$0xff] %v7097_v24 }
 0x1c3   :  { %v7099_v37 = vpop.f32.mrf.mxu0  ;;  %v7101_v38 = vpop.f32.mrf.mxu1 }
 0x1c4   :  { %7843 = vst [vmem:[#allocation47_spill] sm:$0xff] %v7099_v37  ;;  %7844 = vst [vmem:[#allocation48_spill] sm:$0xff] %v7101_v38 }
 0x1c5   :  { %v7103_v29 = vpop.f32.mrf.mxu0  ;;  %v7105_v35 = vpop.f32.mrf.mxu1 }
 0x1c6   :  { %7845 = vst [vmem:[#allocation49_spill] sm:$0xff] %v7103_v29  ;;  %7846 = vst [vmem:[#allocation50_spill] sm:$0xff] %v7105_v35 }
 0x1c7   :  { %v7107_v56 = vpop.f32.mrf.mxu0  ;;  %v7109_v57 = vpop.f32.mrf.mxu1 }
 0x1c8   :  { %7847 = vst [vmem:[#allocation51_spill] sm:$0xff] %v7107_v56  ;;  %7848 = vst [vmem:[#allocation52_spill] sm:$0xff] %v7109_v57 }
 0x1c9   :  { %v7111_v51 = vpop.f32.mrf.mxu0  ;;  %v7113_v4 = vpop.f32.mrf.mxu1 }
 0x1ca   :  { %7849 = vst [vmem:[#allocation53_spill] sm:$0xff] %v7111_v51  ;;  %7850 = vst [vmem:[#allocation54_spill] sm:$0xff] %v7113_v4 }
 0x1cb   :  { %v7115_v63 = vpop.f32.mrf.mxu0  ;;  %v7117_v20 = vpop.f32.mrf.mxu1 }
 0x1cc   :  { %7851 = vst [vmem:[#allocation55_spill] sm:$0xff] %v7115_v63  ;;  %7852 = vst [vmem:[#allocation56_spill] sm:$0xff] %v7117_v20 }
 0x1cd   :  { %v7119_v24 = vpop.f32.mrf.mxu0  ;;  %v7121_v37 = vpop.f32.mrf.mxu1 }
 0x1ce   :  { %7853 = vst [vmem:[#allocation57_spill] sm:$0xff] %v7119_v24  ;;  %7854 = vst [vmem:[#allocation58_spill] sm:$0xff] %v7121_v37 }
 0x1cf   :  { %v7123_v38 = vpop.f32.mrf.mxu0  ;;  %v7125_v29 = vpop.f32.mrf.mxu1 }
 0x1d0   :  { %7855 = vst [vmem:[#allocation59_spill] sm:$0xff] %v7123_v38  ;;  %7856 = vst [vmem:[#allocation60_spill] sm:$0xff] %v7125_v29  ;;  %v4097_v29 = vlaneseq }
 0x1e5   :  { %v7127_v35 = vpop.f32.mrf.mxu0  ;;  %v7129_v56 = vpop.f32.mrf.mxu1 }
 0x1e6   :  { %7857 = vst [vmem:[#allocation61_spill] sm:$0xff] %v7127_v35  ;;  %7858 = vst [vmem:[#allocation62_spill] sm:$0xff] %v7129_v56 }
 0x1e7   :  { %v7131_v57 = vpop.f32.mrf.mxu0  ;;  %v7133_v51 = vpop.f32.mrf.mxu1 }
 0x1e8   :  { %7859 = vst [vmem:[#allocation63_spill] sm:$0xff] %v7131_v57  ;;  %7860 = vst [vmem:[#allocation64_spill] sm:$0xff] %v7133_v51  ;;  %v7151_v57 = vshrl.u32 %v4097_v29, 7 }
 0x1e9   :  { %v7135_v4 = vpop.f32.mrf.mxu0  ;;  %v7137_v63 = vpop.f32.mrf.mxu1 }
 0x1ea   :  { %7861 = vst [vmem:[#allocation65_spill] sm:$0xff] %v7135_v4  ;;  %7862 = vst [vmem:[#allocation66_spill] sm:$0xff] %v7137_v63  ;;  %v7158_v63 = vsub.s32 0, %v7151_v57  ;;  %v7171_v29 = vsub.s32 1, %v7151_v57 }
 0x1eb   :  { %v7139_v20 = vpop.f32.mrf.mxu0  ;;  %v7141_v24 = vpop.f32.mrf.mxu1 }
 0x1ec   :  { %7863 = vst [vmem:[#allocation67_spill] sm:$0xff] %v7139_v20  ;;  %7864 = vst [vmem:[#allocation68_spill] sm:$0xff] %v7141_v24  ;;  %v7184_v20 = vld [vmem:[%s7784_s3] sm:$0xff] }
 0x1ed   :  { %v7143_v37 = vpop.f32.mrf.mxu0  ;;  %v7145_v38 = vpop.f32.mrf.mxu1  ;;  %7871 = vst [vmem:[#allocation75_spill] sm:$0xff] %v7158_v63  ;;  %7873 = vst [vmem:[#allocation77_spill] sm:$0xff] %v7171_v29 }
 0x1ee   :  { %7865 = vst [vmem:[#allocation69_spill] sm:$0xff] %v7143_v37  ;;  %7866 = vst [vmem:[#allocation70_spill] sm:$0xff] %v7145_v38  ;;  %v7163_v37 = vld [vmem:[%s7783_s2] sm:$0xff]  ;;  %v7166_v38 = vsub.s32 2, %v7151_v57 }
 0x1ef   :  { %v7147_v35 = vpop.f32.mrf.mxu0  ;;  %v7149_v56 = vpop.f32.mrf.mxu1 }
 0x1f0   :  { %7867 = vst [vmem:[#allocation71_spill] sm:$0xff] %v7147_v35  ;;  %7868 = vst [vmem:[#allocation72_spill] sm:$0xff] %v7149_v56  ;;  %v2308_v56 = vadd.f32 %v6933_v59, %v6389_v33  ;;  %v2363_v35 = vadd.f32 %v6963_v18, %v6421_v55  ;;  %v7187_v33 = vsub.s32 3, %v7151_v57  ;;  %v2312_v59 = vadd.f32 %v6971_v45, %v6438_v1 }
 0x1f1   :  { %v7153_v51 = vpop.f32.mrf.mxu0  ;;  %v7155_v4 = vpop.f32.mrf.mxu1  ;;  %7872 = vst [vmem:[#allocation76_spill] sm:$0xff] %v7166_v38  ;;  %v2318_v18 = vadd.f32 %v7009_v13, %v6480_v16  ;;  %v2371_v1 = vadd.f32 %v7017_v21, %v6482_v19  ;;  %v7219_v16 = vrot.slane %v7163_v37, %v7171_v29  ;;  %v2373_v19 = vadd.f32 %v7033_v50, %v6502_v28 }
 0x1f2   :  { %7869 = vst [vmem:[#allocation73_spill] sm:$0xff] %v7153_v51  ;;  %7870 = vst [vmem:[#allocation74_spill] sm:$0xff] %v7155_v4  ;;  %v2361_v4 = vadd.f32 %v6942_v3, %v6398_v39  ;;  %v2310_v51 = vadd.f32 %v6953_v11, %v6409_v46  ;;  %v2365_v39 = vadd.f32 %v6980_v34, %v6456_v5 }
 0x1f3   :  { %v7179_v24 = vpop.f32.mrf.mxu0  ;;  %7875 = vst [vmem:[#allocation79_spill] sm:$0xff] %v7187_v33  ;;  %v2314_v46 = vadd.f32 %v6991_v23, %v6468_v9  ;;  %v7195_v55 = vpop.f32.mrf.mxu1  ;;  %v7199_v11 = vrot.slane %v7163_v37, %v7158_v63  ;;  %v2367_v3 = vadd.f32 %v7001_v7, %v6477_v12  ;;  %v7209_v5 = vrot.slane %v7163_v37, %v7166_v38 }
 0x1f4   :  { %7874 = vst [vmem:[#allocation78_spill] sm:$0xff] %v7179_v24  ;;  %7876 = vst [vmem:[#allocation80_spill] sm:$0xff] %v7195_v55  ;;  %v2320_v9 = vadd.f32 %v7025_v52, %v6500_v25  ;;  %v7215_v34 = vrot.slane %v7184_v20, %v7158_v63  ;;  %v7225_v7 = vrot.slane %v7184_v20, %v7166_v38 }
 0x1f5   :  { %v7229_v25 = vrot.slane %v7163_v37, %v7187_v33  ;;  %v2322_v52 = vadd.f32 %v7041_v44, %v6516_v36  ;;  %v7236_v55 = vrot.slane %v7184_v20, %v7171_v29  ;;  %v2375_v50 = vadd.f32 %v7049_v8, %v6518_v42 }
 0x1f6   :  { %v7243_v24 = vrot.slane %v7184_v20, %v7187_v33  ;;  %v2324_v36 = vadd.f32 %v7051_v27, %v6532_v49  ;;  %v2377_v42 = vadd.f32 %v7053_v32, %v6534_v54 }
 0x209   :  { %v3639_v45 = vpop.f32.mrf.mxu0  ;;  %v3692_v12 = vpop.f32.mrf.mxu1 }
 0x20a   :  { %v4029_v23 = vadd.f32 %v3639_v45, %v2308_v56  ;;  %v4031_v13 = vadd.f32 %v3692_v12, %v2361_v4 }
 0x20b   :  { %v3641_v21 = vpop.f32.mrf.mxu0  ;;  %v3694_v28 = vpop.f32.mrf.mxu1 }
 0x20c   :  { %v4177_v56 = vmul.f32 %v7199_v11, %v4029_v23  ;;  %v4030_v45 = vadd.f32 %v3641_v21, %v2310_v51  ;;  %v4179_v4 = vmul.f32 %v7209_v5, %v4031_v13  ;;  %v4032_v12 = vadd.f32 %v3694_v28, %v2363_v35 }
 0x20d   :  { %v3643_v38 = vpop.f32.mrf.mxu0  ;;  %v3696_v21 = vpop.f32.mrf.mxu1 }
 0x20e   :  { %v4325_v44 = vadd.f32 %v7215_v34, %v4177_v56  ;;  %v4178_v51 = vmul.f32 %v7219_v16, %v4030_v45  ;;  %v4045_v23 = vadd.f32 %v3643_v38, %v2312_v59  ;;  %v4327_v8 = vadd.f32 %v7225_v7, %v4179_v4 }
 0x20f   :  { %v4180_v35 = vmul.f32 %v7229_v25, %v4032_v12  ;;  %v4047_v13 = vadd.f32 %v3696_v21, %v2365_v39  ;;  %v3645_v28 = vpop.f32.mrf.mxu0  ;;  %v3698_v56 = vpop.f32.mrf.mxu1 }
 0x210   :  { %v4389_v33 = vmax.f32 %v4325_v44, 0.0  ;;  %v4326_v29 = vadd.f32 %v7236_v55, %v4178_v51  ;;  %v4193_v49 = vmul.f32 %v7199_v11, %v4045_v23  ;;  %v4046_v27 = vadd.f32 %v3645_v28, %v2314_v46 }
 0x211   :  { %v4391_v63 = vmax.f32 %v4327_v8, 0.0  ;;  %v4328_v38 = vadd.f32 %v7243_v24, %v4180_v35  ;;  %v4195_v59 = vmul.f32 %v7209_v5, %v4047_v13  ;;  %v4048_v45 = vadd.f32 %v3698_v56, %v2367_v3  ;;  %v3649_v54 = vpop.f32.mrf.mxu0  ;;  %v3702_v44 = vpop.f32.mrf.mxu1 }
 0x212   :  { %4453 = vst [vmem:[%s7785_s4] sm:$0xff] %v4389_v33  ;;  %v4390_v32 = vmax.f32 %v4326_v29, 0.0  ;;  %v4341_v39 = vadd.f32 %v7215_v34, %v4193_v49  ;;  %v4194_v4 = vmul.f32 %v7219_v16, %v4046_v27  ;;  %v4061_v12 = vadd.f32 %v3649_v54, %v2318_v18 }
 0x213   :  { %4455 = vst [vmem:[%s7785_s4 + $0x10] sm:$0xff] %v4391_v63  ;;  %v4392_v46 = vmax.f32 %v4328_v38, 0.0  ;;  %v4343_v51 = vadd.f32 %v7225_v7, %v4195_v59  ;;  %v4196_v3 = vmul.f32 %v7229_v25, %v4048_v45  ;;  %v4063_v23 = vadd.f32 %v3702_v44, %v2371_v1  ;;  %v3651_v21 = vpop.f32.mrf.mxu0  ;;  %v3704_v35 = vpop.f32.mrf.mxu1 }
 0x214   :  { %4454 = vst [vmem:[%s7785_s4 + $0x8] sm:$0xff] %v4390_v32  ;;  %v4405_v29 = vmax.f32 %v4341_v39, 0.0  ;;  %v4342_v33 = vadd.f32 %v7236_v55, %v4194_v4  ;;  %v4209_v18 = vmul.f32 %v7199_v11, %v4061_v12  ;;  %v4062_v8 = vadd.f32 %v3651_v21, %v2320_v9 }
 0x215   :  { %4456 = vst [vmem:[%s7785_s4 + $0x18] sm:$0xff] %v4392_v46  ;;  %v4407_v63 = vmax.f32 %v4343_v51, 0.0  ;;  %v4344_v13 = vadd.f32 %v7243_v24, %v4196_v3  ;;  %v4211_v1 = vmul.f32 %v7209_v5, %v4063_v23  ;;  %v4064_v28 = vadd.f32 %v3704_v35, %v2373_v19  ;;  %v3653_v49 = vpop.f32.mrf.mxu0  ;;  %v3706_v59 = vpop.f32.mrf.mxu1 }
 0x216   :  { %4469 = vst [vmem:[%s7785_s4 + $0x80] sm:$0xff] %v4405_v29  ;;  %v4406_v27 = vmax.f32 %v4342_v33, 0.0  ;;  %v4357_v56 = vadd.f32 %v7215_v34, %v4209_v18  ;;  %v4210_v9 = vmul.f32 %v7219_v16, %v4062_v8  ;;  %v4077_v38 = vadd.f32 %v3653_v49, %v2322_v52 }
 0x217   :  { %4471 = vst [vmem:[%s7785_s4 + $0x90] sm:$0xff] %v4407_v63  ;;  %v4408_v45 = vmax.f32 %v4344_v13, 0.0  ;;  %v4359_v54 = vadd.f32 %v7225_v7, %v4211_v1  ;;  %v4212_v19 = vmul.f32 %v7229_v25, %v4064_v28  ;;  %v4079_v32 = vadd.f32 %v3706_v59, %v2375_v50  ;;  %v3655_v39 = vpop.f32.mrf.mxu0  ;;  %v3708_v46 = vpop.f32.mrf.mxu1 }
 0x218   :  { %4470 = vst [vmem:[%s7785_s4 + $0x88] sm:$0xff] %v4406_v27  ;;  %v4421_v4 = vmax.f32 %v4357_v56, 0.0  ;;  %v4358_v12 = vadd.f32 %v7236_v55, %v4210_v9  ;;  %v4225_v52 = vmul.f32 %v7199_v11, %v4077_v38  ;;  %v4078_v44 = vadd.f32 %v3655_v39, %v2324_v36  ;;  %v7880_v27 = vld [vmem:[#allocation5_spill] sm:$0xff] }
 0x219   :  { %4472 = vst [vmem:[%s7785_s4 + $0x98] sm:$0xff] %v4408_v45  ;;  %v4423_v51 = vmax.f32 %v4359_v54, 0.0  ;;  %v4360_v3 = vadd.f32 %v7243_v24, %v4212_v19  ;;  %v4227_v50 = vmul.f32 %v7209_v5, %v4079_v32  ;;  %v4080_v23 = vadd.f32 %v3708_v46, %v2377_v42  ;;  %v7881_v56 = vld [vmem:[#allocation41_spill] sm:$0xff]  ;;  %v7882_v54 = vld [vmem:[#allocation6_spill] sm:$0xff] }
 0x21a   :  { %4485 = vst [vmem:[%s7785_s4 + $0x100] sm:$0xff] %v4421_v4  ;;  %v4422_v21 = vmax.f32 %v4358_v12, 0.0  ;;  %v4373_v29 = vadd.f32 %v7215_v34, %v4225_v52  ;;  %v4226_v11 = vmul.f32 %v7219_v16, %v4078_v44  ;;  %v2414_v8 = vadd.f32 %v7055_v17, %v6542_v62  ;;  %v7883_v19 = vld [vmem:[#allocation42_spill] sm:$0xff]  ;;  %v7884_v52 = vld [vmem:[#allocation7_spill] sm:$0xff] }
 0x21b   :  { %4487 = vst [vmem:[%s7785_s4 + $0x110] sm:$0xff] %v4423_v51  ;;  %v4424_v36 = vmax.f32 %v4360_v3, 0.0  ;;  %v4375_v33 = vadd.f32 %v7225_v7, %v4227_v50  ;;  %v4228_v18 = vmul.f32 %v7229_v25, %v4080_v23  ;;  %v7336_v35 = vsub.s32 5, %v7151_v57  ;;  %v7885_v44 = vld [vmem:[#allocation43_spill] sm:$0xff] }
 0x21c   :  { %4486 = vst [vmem:[%s7785_s4 + $0x108] sm:$0xff] %v4422_v21  ;;  %v4437_v5 = vmax.f32 %v4373_v29, 0.0  ;;  %v4374_v42 = vadd.f32 %v7236_v55, %v4226_v11  ;;  %v7331_v55 = vsub.s32 6, %v7151_v57  ;;  %v2467_v63 = vadd.f32 %v7057_v0, %v6551_v2  ;;  %v7877_v0 = vld [vmem:[#allocation2_spill] sm:$0xff]  ;;  %v7886_v21 = vld [vmem:[#allocation8_spill] sm:$0xff] }
 0x21d   :  { %4488 = vst [vmem:[%s7785_s4 + $0x118] sm:$0xff] %v4424_v36  ;;  %v4439_v34 = vmax.f32 %v4375_v33, 0.0  ;;  %v4376_v16 = vadd.f32 %v7243_v24, %v4228_v18  ;;  %v7328_v24 = vsub.s32 4, %v7151_v57  ;;  %v2416_v13 = vadd.f32 %v7059_v15, %v6562_v10  ;;  %v7887_v29 = vld [vmem:[#allocation44_spill] sm:$0xff] }
 0x21e   :  { %4501 = vst [vmem:[%s7785_s4 + $0x180] sm:$0xff] %v4437_v5  ;;  %v4438_v7 = vmax.f32 %v4374_v42, 0.0  ;;  %v2469_v1 = vadd.f32 %v7061_v22, %v6573_v6  ;;  %v7345_v28 = vsub.s32 7, %v7151_v57  ;;  %v2418_v49 = vadd.f32 %v7067_v48, %v6581_v30  ;;  %v7878_v22 = vld [vmem:[#allocation3_spill] sm:$0xff] }
 0x21f   :  { %4503 = vst [vmem:[%s7785_s4 + $0x190] sm:$0xff] %v4439_v34  ;;  %v4440_v25 = vmax.f32 %v4376_v16, 0.0  ;;  %v2471_v62 = vadd.f32 %v7071_v43, %v6597_v41  ;;  %v2420_v17 = vadd.f32 %v7073_v26, %v6607_v47  ;;  %v7355_v2 = vrot.slane %v7163_v37, %v7328_v24  ;;  %v7879_v26 = vld [vmem:[#allocation4_spill] sm:$0xff] }
 0x220   :  { %4502 = vst [vmem:[%s7785_s4 + $0x188] sm:$0xff] %v4438_v7  ;;  %v2473_v10 = vadd.f32 %v7075_v40, %v6616_v53  ;;  %v2424_v6 = vadd.f32 %v7079_v60, %v6619_v58  ;;  %v2477_v15 = vadd.f32 %v7081_v31, %v7877_v0  ;;  %v7365_v41 = vrot.slane %v7163_v37, %v7331_v55 }
 0x221   :  { %4504 = vst [vmem:[%s7785_s4 + $0x198] sm:$0xff] %v4440_v25  ;;  %v2426_v47 = vadd.f32 %v7083_v61, %v7878_v22  ;;  %v7371_v43 = vrot.slane %v7184_v20, %v7328_v24  ;;  %v7375_v58 = vrot.slane %v7163_v37, %v7336_v35  ;;  %v2479_v40 = vadd.f32 %v7085_v14, %v7879_v26 }
 0x222   :  { %v7381_v31 = vrot.slane %v7184_v20, %v7331_v55  ;;  %v7385_v61 = vrot.slane %v7163_v37, %v7345_v28  ;;  %v2428_v9 = vadd.f32 %v7881_v56, %v7880_v27  ;;  %v7392_v45 = vrot.slane %v7184_v20, %v7336_v35 }
 0x223   :  { %v2481_v32 = vadd.f32 %v7883_v19, %v7882_v54  ;;  %v7399_v37 = vrot.slane %v7184_v20, %v7345_v28  ;;  %v2430_v46 = vadd.f32 %v7885_v44, %v7884_v52  ;;  %v2483_v11 = vadd.f32 %v7887_v29, %v7886_v21 }
 0x22d   :  { %v3745_v30 = vpop.f32.mrf.mxu0  ;;  %v3798_v53 = vpop.f32.mrf.mxu1 }
 0x22e   :  { %v4033_v48 = vadd.f32 %v3745_v30, %v2414_v8  ;;  %v4035_v60 = vadd.f32 %v3798_v53, %v2467_v63 }
 0x22f   :  { %v3747_v57 = vpop.f32.mrf.mxu0  ;;  %v3800_v14 = vpop.f32.mrf.mxu1 }
 0x230   :  { %v4181_v38 = vmul.f32 %v7355_v2, %v4033_v48  ;;  %v4034_v59 = vadd.f32 %v3747_v57, %v2416_v13  ;;  %v4183_v39 = vmul.f32 %v7365_v41, %v4035_v60  ;;  %v4036_v4 = vadd.f32 %v3800_v14, %v2469_v1 }
 0x231   :  { %v3749_v12 = vpop.f32.mrf.mxu0  ;;  %v3802_v23 = vpop.f32.mrf.mxu1 }
 0x232   :  { %v4329_v51 = vadd.f32 %v7371_v43, %v4181_v38  ;;  %v4182_v3 = vmul.f32 %v7375_v58, %v4034_v59  ;;  %v4049_v50 = vadd.f32 %v3749_v12, %v2418_v49  ;;  %v4331_v36 = vadd.f32 %v7381_v31, %v4183_v39 }
 0x233   :  { %v4184_v33 = vmul.f32 %v7385_v61, %v4036_v4  ;;  %v4051_v18 = vadd.f32 %v3802_v23, %v2471_v62  ;;  %v3751_v20 = vpop.f32.mrf.mxu0  ;;  %v3804_v7 = vpop.f32.mrf.mxu1 }
 0x234   :  { %v4393_v5 = vmax.f32 %v4329_v51, 0.0  ;;  %v4330_v42 = vadd.f32 %v7392_v45, %v4182_v3  ;;  %v4197_v34 = vmul.f32 %v7355_v2, %v4049_v50  ;;  %v4050_v16 = vadd.f32 %v3751_v20, %v2420_v17 }
 0x235   :  { %v4395_v25 = vmax.f32 %v4331_v36, 0.0  ;;  %v4332_v8 = vadd.f32 %v7399_v37, %v4184_v33  ;;  %v4199_v63 = vmul.f32 %v7365_v41, %v4051_v18  ;;  %v4052_v13 = vadd.f32 %v3804_v7, %v2473_v10  ;;  %v3755_v1 = vpop.f32.mrf.mxu0  ;;  %v3808_v22 = vpop.f32.mrf.mxu1 }
 0x236   :  { %4457 = vst [vmem:[%s7785_s4 + $0x20] sm:$0xff] %v4393_v5  ;;  %v4394_v49 = vmax.f32 %v4330_v42, 0.0  ;;  %v4345_v62 = vadd.f32 %v7371_v43, %v4197_v34  ;;  %v4198_v0 = vmul.f32 %v7375_v58, %v4050_v16  ;;  %v4065_v30 = vadd.f32 %v3755_v1, %v2424_v6  ;;  %v7889_v16 = vld [vmem:[#allocation45_spill] sm:$0xff]  ;;  %v7893_v1 = vld [vmem:[#allocation47_spill] sm:$0xff] }
 0x237   :  { %4459 = vst [vmem:[%s7785_s4 + $0x30] sm:$0xff] %v4395_v25  ;;  %v4396_v17 = vmax.f32 %v4332_v8, 0.0  ;;  %v4347_v48 = vadd.f32 %v7381_v31, %v4199_v63  ;;  %v4200_v10 = vmul.f32 %v7385_v61, %v4052_v13  ;;  %v4067_v53 = vadd.f32 %v3808_v22, %v2477_v15  ;;  %v3757_v26 = vpop.f32.mrf.mxu0  ;;  %v3810_v56 = vpop.f32.mrf.mxu1  ;;  %v7890_v25 = vld [vmem:[#allocation10_spill] sm:$0xff]  ;;  %v7892_v13 = vld [vmem:[#allocation11_spill] sm:$0xff] }
 0x238   :  { %4458 = vst [vmem:[%s7785_s4 + $0x28] sm:$0xff] %v4394_v49  ;;  %v4409_v60 = vmax.f32 %v4345_v62, 0.0  ;;  %v4346_v57 = vadd.f32 %v7392_v45, %v4198_v0  ;;  %v4213_v6 = vmul.f32 %v7355_v2, %v4065_v30  ;;  %v4066_v27 = vadd.f32 %v3757_v26, %v2426_v47  ;;  %v7891_v8 = vld [vmem:[#allocation46_spill] sm:$0xff]  ;;  %v7894_v62 = vld [vmem:[#allocation12_spill] sm:$0xff]  ;;  %v7499_v22 = vld [vmem:[%s7784_s3 + $0x8] sm:$0xff] }
 0x239   :  { %4460 = vst [vmem:[%s7785_s4 + $0x38] sm:$0xff] %v4396_v17  ;;  %v4411_v38 = vmax.f32 %v4347_v48, 0.0  ;;  %v4348_v59 = vadd.f32 %v7399_v37, %v4200_v10  ;;  %v4215_v15 = vmul.f32 %v7365_v41, %v4067_v53  ;;  %v4068_v14 = vadd.f32 %v3810_v56, %v2479_v40  ;;  %v3759_v54 = vpop.f32.mrf.mxu0  ;;  %v3812_v12 = vpop.f32.mrf.mxu1  ;;  %v7895_v0 = vld [vmem:[#allocation48_spill] sm:$0xff]  ;;  %v7896_v17 = vld [vmem:[#allocation13_spill] sm:$0xff]  ;;  %v7898_v53 = vld [vmem:[#allocation14_spill] sm:$0xff] }
 0x23a   :  { %4473 = vst [vmem:[%s7785_s4 + $0xa0] sm:$0xff] %v4409_v60  ;;  %v4410_v19 = vmax.f32 %v4346_v57, 0.0  ;;  %v4361_v39 = vadd.f32 %v7371_v43, %v4213_v6  ;;  %v4214_v47 = vmul.f32 %v7375_v58, %v4066_v27  ;;  %v4081_v4 = vadd.f32 %v3759_v54, %v2428_v9  ;;  %v7897_v48 = vld [vmem:[#allocation49_spill] sm:$0xff]  ;;  %v7899_v26 = vld [vmem:[#allocation50_spill] sm:$0xff]  ;;  %v7900_v57 = vld [vmem:[#allocation15_spill] sm:$0xff] }
 0x23b   :  { %4475 = vst [vmem:[%s7785_s4 + $0xb0] sm:$0xff] %v4411_v38  ;;  %v4412_v52 = vmax.f32 %v4348_v59, 0.0  ;;  %v4363_v44 = vadd.f32 %v7381_v31, %v4215_v15  ;;  %v4216_v40 = vmul.f32 %v7385_v61, %v4068_v14  ;;  %v4083_v51 = vadd.f32 %v3812_v12, %v2481_v32  ;;  %v3761_v3 = vpop.f32.mrf.mxu0  ;;  %v3814_v29 = vpop.f32.mrf.mxu1  ;;  %v7901_v6 = vld [vmem:[#allocation51_spill] sm:$0xff]  ;;  %v7903_v59 = vld [vmem:[#allocation16_spill] sm:$0xff]  ;;  %v7905_v54 = vld [vmem:[#allocation17_spill] sm:$0xff] }
 0x23c   :  { %4474 = vst [vmem:[%s7785_s4 + $0xa8] sm:$0xff] %v4410_v19  ;;  %v4425_v50 = vmax.f32 %v4361_v39, 0.0  ;;  %v4362_v23 = vadd.f32 %v7392_v45, %v4214_v47  ;;  %v4229_v9 = vmul.f32 %v7355_v2, %v4081_v4  ;;  %v4082_v21 = vadd.f32 %v3761_v3, %v2430_v46  ;;  %v7902_v56 = vld [vmem:[#allocation75_spill] sm:$0xff]  ;;  %v7904_v15 = vld [vmem:[#allocation52_spill] sm:$0xff]  ;;  %v7906_v19 = vld [vmem:[#allocation53_spill] sm:$0xff] }
 0x23d   :  { %4476 = vst [vmem:[%s7785_s4 + $0xb8] sm:$0xff] %v4412_v52  ;;  %v4427_v36 = vmax.f32 %v4363_v44, 0.0  ;;  %v4364_v33 = vadd.f32 %v7399_v37, %v4216_v40  ;;  %v4231_v32 = vmul.f32 %v7365_v41, %v4083_v51  ;;  %v4084_v18 = vadd.f32 %v3814_v29, %v2483_v11  ;;  %v7907_v47 = vld [vmem:[#allocation18_spill] sm:$0xff]  ;;  %v7909_v44 = vld [vmem:[#allocation76_spill] sm:$0xff]  ;;  %v7910_v51 = vld [vmem:[#allocation19_spill] sm:$0xff] }
 0x23e   :  { %4489 = vst [vmem:[%s7785_s4 + $0x120] sm:$0xff] %v4425_v50  ;;  %v4426_v20 = vmax.f32 %v4362_v23, 0.0  ;;  %v4377_v5 = vadd.f32 %v7371_v43, %v4229_v9  ;;  %v4230_v2 = vmul.f32 %v7375_v58, %v4082_v21  ;;  %v2573_v63 = vadd.f32 %v7891_v8, %v7890_v25  ;;  %v7908_v4 = vld [vmem:[#allocation54_spill] sm:$0xff]  ;;  %v7911_v3 = vld [vmem:[#allocation55_spill] sm:$0xff]  ;;  %v7912_v29 = vld [vmem:[#allocation77_spill] sm:$0xff] }
 0x23f   :  { %4491 = vst [vmem:[%s7785_s4 + $0x130] sm:$0xff] %v4427_v36  ;;  %v4428_v46 = vmax.f32 %v4364_v33, 0.0  ;;  %v4379_v42 = vadd.f32 %v7381_v31, %v4231_v32  ;;  %v4232_v34 = vmul.f32 %v7385_v61, %v4084_v18  ;;  %v2522_v49 = vadd.f32 %v7893_v1, %v7892_v13  ;;  %v7913_v33 = vld [vmem:[#allocation20_spill] sm:$0xff]  ;;  %v7920_v1 = vld [vmem:[#allocation23_spill] sm:$0xff] }
 0x240   :  { %4490 = vst [vmem:[%s7785_s4 + $0x128] sm:$0xff] %v4426_v20  ;;  %v4441_v41 = vmax.f32 %v4377_v5, 0.0  ;;  %v4378_v11 = vadd.f32 %v7392_v45, %v4230_v2  ;;  %v7486_v45 = vld [vmem:[%s7783_s2 + $0x8] sm:$0xff]  ;;  %v2575_v30 = vadd.f32 %v7895_v0, %v7894_v62  ;;  %v2524_v10 = vadd.f32 %v7897_v48, %v7896_v17  ;;  %v7914_v32 = vld [vmem:[#allocation56_spill] sm:$0xff] }
 0x241   :  { %4492 = vst [vmem:[%s7785_s4 + $0x138] sm:$0xff] %v4428_v46  ;;  %v4443_v43 = vmax.f32 %v4379_v42, 0.0  ;;  %v4380_v58 = vadd.f32 %v7399_v37, %v4232_v34  ;;  %v7888_v37 = vld [vmem:[#allocation9_spill] sm:$0xff]  ;;  %v2577_v60 = vadd.f32 %v7899_v26, %v7898_v53  ;;  %v2526_v27 = vadd.f32 %v7901_v6, %v7900_v57  ;;  %v7915_v46 = vld [vmem:[#allocation79_spill] sm:$0xff]  ;;  %v7922_v26 = vld [vmem:[#allocation24_spill] sm:$0xff] }
 0x242   :  { %4505 = vst [vmem:[%s7785_s4 + $0x1a0] sm:$0xff] %v4441_v41  ;;  %v4442_v31 = vmax.f32 %v4378_v11, 0.0  ;;  %v2520_v7 = vadd.f32 %v7889_v16, %v7888_v37  ;;  %v7509_v38 = vrot.slane %v7486_v45, %v7902_v56  ;;  %v2579_v14 = vadd.f32 %v7904_v15, %v7903_v59  ;;  %v7916_v34 = vld [vmem:[#allocation21_spill] sm:$0xff]  ;;  %v7918_v37 = vld [vmem:[#allocation22_spill] sm:$0xff]  ;;  %v7921_v62 = vld [vmem:[#allocation59_spill] sm:$0xff] }
 0x243   :  { %4507 = vst [vmem:[%s7785_s4 + $0x1b0] sm:$0xff] %v4443_v43  ;;  %v4444_v61 = vmax.f32 %v4380_v58, 0.0  ;;  %v2530_v39 = vadd.f32 %v7906_v19, %v7905_v54  ;;  %v2583_v12 = vadd.f32 %v7908_v4, %v7907_v47  ;;  %v7519_v40 = vrot.slane %v7486_v45, %v7909_v44  ;;  %v7917_v41 = vld [vmem:[#allocation57_spill] sm:$0xff]  ;;  %v7919_v16 = vld [vmem:[#allocation58_spill] sm:$0xff]  ;;  %v7923_v57 = vld [vmem:[#allocation60_spill] sm:$0xff] }
 0x244   :  { %4506 = vst [vmem:[%s7785_s4 + $0x1a8] sm:$0xff] %v4442_v31  ;;  %v2532_v50 = vadd.f32 %v7911_v3, %v7910_v51  ;;  %v7525_v9 = vrot.slane %v7499_v22, %v7902_v56  ;;  %v7529_v36 = vrot.slane %v7486_v45, %v7912_v29  ;;  %v2585_v18 = vadd.f32 %v7914_v32, %v7913_v33 }
 0x245   :  { %4508 = vst [vmem:[%s7785_s4 + $0x1b8] sm:$0xff] %v4444_v61  ;;  %v7535_v5 = vrot.slane %v7499_v22, %v7909_v44  ;;  %v7539_v42 = vrot.slane %v7486_v45, %v7915_v46  ;;  %v2534_v11 = vadd.f32 %v7917_v41, %v7916_v34  ;;  %v7546_v31 = vrot.slane %v7499_v22, %v7912_v29 }
 0x246   :  { %v2536_v0 = vadd.f32 %v7921_v62, %v7920_v1  ;;  %v2589_v6 = vadd.f32 %v7923_v57, %v7922_v26 }
 0x251   :  { %v3851_v52 = vpop.f32.mrf.mxu0  ;;  %v3904_v21 = vpop.f32.mrf.mxu1 }
 0x252   :  { %v4037_v23 = vadd.f32 %v3851_v52, %v2520_v7  ;;  %v4039_v20 = vadd.f32 %v3904_v21, %v2573_v63  ;;  %v2587_v7 = vadd.f32 %v7919_v16, %v7918_v37  ;;  %v7553_v63 = vrot.slane %v7499_v22, %v7915_v46 }
 0x253   :  { %v3853_v2 = vpop.f32.mrf.mxu0  ;;  %v3906_v61 = vpop.f32.mrf.mxu1 }
 0x254   :  { %v4185_v43 = vmul.f32 %v7509_v38, %v4037_v23  ;;  %v4038_v58 = vadd.f32 %v3853_v2, %v2522_v49  ;;  %v4187_v25 = vmul.f32 %v7519_v40, %v4039_v20  ;;  %v4040_v8 = vadd.f32 %v3906_v61, %v2575_v30 }
 0x255   :  { %v3855_v13 = vpop.f32.mrf.mxu0  ;;  %v3908_v53 = vpop.f32.mrf.mxu1 }
 0x256   :  { %v4333_v49 = vadd.f32 %v7525_v9, %v4185_v43  ;;  %v4186_v17 = vmul.f32 %v7529_v36, %v4038_v58  ;;  %v4053_v48 = vadd.f32 %v3855_v13, %v2524_v10  ;;  %v4335_v56 = vadd.f32 %v7535_v5, %v4187_v25 }
 0x257   :  { %v4188_v30 = vmul.f32 %v7539_v42, %v4040_v8  ;;  %v4055_v59 = vadd.f32 %v3908_v53, %v2577_v60  ;;  %v3857_v15 = vpop.f32.mrf.mxu0  ;;  %v3910_v52 = vpop.f32.mrf.mxu1 }
 0x258   :  { %v4397_v54 = vmax.f32 %v4333_v49, 0.0  ;;  %v4334_v19 = vadd.f32 %v7546_v31, %v4186_v17  ;;  %v4201_v47 = vmul.f32 %v7509_v38, %v4053_v48  ;;  %v4054_v4 = vadd.f32 %v3857_v15, %v2526_v27 }
 0x259   :  { %v4399_v44 = vmax.f32 %v4335_v56, 0.0  ;;  %v4336_v10 = vadd.f32 %v7553_v63, %v4188_v30  ;;  %v4203_v51 = vmul.f32 %v7519_v40, %v4055_v59  ;;  %v4056_v3 = vadd.f32 %v3910_v52, %v2579_v14  ;;  %v3861_v23 = vpop.f32.mrf.mxu0  ;;  %v3914_v32 = vpop.f32.mrf.mxu1 }
 0x25a   :  { %4461 = vst [vmem:[%s7785_s4 + $0x40] sm:$0xff] %v4397_v54  ;;  %v4398_v60 = vmax.f32 %v4334_v19, 0.0  ;;  %v4349_v21 = vadd.f32 %v7525_v9, %v4201_v47  ;;  %v4202_v29 = vmul.f32 %v7529_v36, %v4054_v4  ;;  %v4069_v33 = vadd.f32 %v3861_v23, %v2530_v39  ;;  %v7928_v23 = vld [vmem:[#allocation27_spill] sm:$0xff] }
 0x25b   :  { %4463 = vst [vmem:[%s7785_s4 + $0x50] sm:$0xff] %v4399_v44  ;;  %v4400_v27 = vmax.f32 %v4336_v10, 0.0  ;;  %v4351_v20 = vadd.f32 %v7535_v5, %v4203_v51  ;;  %v4204_v14 = vmul.f32 %v7539_v42, %v4056_v3  ;;  %v4071_v2 = vadd.f32 %v3914_v32, %v2583_v12  ;;  %v3863_v46 = vpop.f32.mrf.mxu0  ;;  %v3916_v58 = vpop.f32.mrf.mxu1  ;;  %v7926_v10 = vld [vmem:[#allocation26_spill] sm:$0xff] }
 0x25c   :  { %4462 = vst [vmem:[%s7785_s4 + $0x48] sm:$0xff] %v4398_v60  ;;  %v4413_v34 = vmax.f32 %v4349_v21, 0.0  ;;  %v4350_v41 = vadd.f32 %v7546_v31, %v4202_v29  ;;  %v4217_v39 = vmul.f32 %v7509_v38, %v4069_v33  ;;  %v4070_v43 = vadd.f32 %v3863_v46, %v2532_v50  ;;  %v7927_v51 = vld [vmem:[#allocation62_spill] sm:$0xff]  ;;  %v7929_v60 = vld [vmem:[#allocation63_spill] sm:$0xff]  ;;  %v7930_v29 = vld [vmem:[#allocation28_spill] sm:$0xff] }
 0x25d   :  { %4464 = vst [vmem:[%s7785_s4 + $0x58] sm:$0xff] %v4400_v27  ;;  %v4415_v61 = vmax.f32 %v4351_v20, 0.0  ;;  %v4352_v37 = vadd.f32 %v7553_v63, %v4204_v14  ;;  %v4219_v12 = vmul.f32 %v7519_v40, %v4071_v2  ;;  %v4072_v16 = vadd.f32 %v3916_v58, %v2585_v18  ;;  %v3865_v25 = vpop.f32.mrf.mxu0  ;;  %v3918_v62 = vpop.f32.mrf.mxu1  ;;  %v7931_v33 = vld [vmem:[#allocation64_spill] sm:$0xff]  ;;  %v7932_v27 = vld [vmem:[#allocation29_spill] sm:$0xff]  ;;  %v7934_v2 = vld [vmem:[#allocation30_spill] sm:$0xff] }
 0x25e   :  { %4477 = vst [vmem:[%s7785_s4 + $0xc0] sm:$0xff] %v4413_v34  ;;  %v4414_v8 = vmax.f32 %v4350_v41, 0.0  ;;  %v4365_v13 = vadd.f32 %v7525_v9, %v4217_v39  ;;  %v4218_v50 = vmul.f32 %v7529_v36, %v4070_v43  ;;  %v4085_v1 = vadd.f32 %v3865_v25, %v2534_v11  ;;  %v7933_v20 = vld [vmem:[#allocation65_spill] sm:$0xff]  ;;  %v7935_v46 = vld [vmem:[#allocation66_spill] sm:$0xff]  ;;  %v7936_v41 = vld [vmem:[#allocation31_spill] sm:$0xff] }
 0x25f   :  { %4479 = vst [vmem:[%s7785_s4 + $0xd0] sm:$0xff] %v4415_v61  ;;  %v4416_v49 = vmax.f32 %v4352_v37, 0.0  ;;  %v4367_v17 = vadd.f32 %v7535_v5, %v4219_v12  ;;  %v4220_v18 = vmul.f32 %v7539_v42, %v4072_v16  ;;  %v4087_v48 = vadd.f32 %v3918_v62, %v2587_v7  ;;  %v3867_v53 = vpop.f32.mrf.mxu0  ;;  %v3920_v30 = vpop.f32.mrf.mxu1  ;;  %v7937_v39 = vld [vmem:[#allocation67_spill] sm:$0xff]  ;;  %v7938_v61 = vld [vmem:[#allocation32_spill] sm:$0xff]  ;;  %v7940_v16 = vld [vmem:[#allocation33_spill] sm:$0xff] }
 0x260   :  { %4478 = vst [vmem:[%s7785_s4 + $0xc8] sm:$0xff] %v4414_v8  ;;  %v4429_v26 = vmax.f32 %v4365_v13, 0.0  ;;  %v4366_v57 = vadd.f32 %v7546_v31, %v4218_v50  ;;  %v4233_v11 = vmul.f32 %v7509_v38, %v4085_v1  ;;  %v4086_v56 = vadd.f32 %v3867_v53, %v2536_v0  ;;  %v7939_v37 = vld [vmem:[#allocation68_spill] sm:$0xff]  ;;  %v7941_v25 = vld [vmem:[#allocation69_spill] sm:$0xff]  ;;  %v7942_v13 = vld [vmem:[#allocation34_spill] sm:$0xff] }
 0x261   :  { %4480 = vst [vmem:[%s7785_s4 + $0xd8] sm:$0xff] %v4416_v49  ;;  %v4431_v59 = vmax.f32 %v4367_v17, 0.0  ;;  %v4368_v15 = vadd.f32 %v7553_v63, %v4220_v18  ;;  %v4235_v7 = vmul.f32 %v7519_v40, %v4087_v48  ;;  %v4088_v54 = vadd.f32 %v3920_v30, %v2589_v6  ;;  %v7943_v50 = vld [vmem:[#allocation70_spill] sm:$0xff]  ;;  %v7944_v17 = vld [vmem:[#allocation35_spill] sm:$0xff]  ;;  %v7947_v30 = vld [vmem:[#allocation72_spill] sm:$0xff] }
 0x262   :  { %4493 = vst [vmem:[%s7785_s4 + $0x140] sm:$0xff] %v4429_v26  ;;  %v4430_v19 = vmax.f32 %v4366_v57, 0.0  ;;  %v4381_v47 = vadd.f32 %v7525_v9, %v4233_v11  ;;  %v4234_v38 = vmul.f32 %v7529_v36, %v4086_v56  ;;  %v2679_v3 = vadd.f32 %v7927_v51, %v7926_v10  ;;  %v7945_v18 = vld [vmem:[#allocation71_spill] sm:$0xff]  ;;  %v7946_v56 = vld [vmem:[#allocation36_spill] sm:$0xff] }
 0x263   :  { %4495 = vst [vmem:[%s7785_s4 + $0x150] sm:$0xff] %v4431_v59  ;;  %v4432_v0 = vmax.f32 %v4368_v15, 0.0  ;;  %v4383_v4 = vadd.f32 %v7535_v5, %v4235_v7  ;;  %v4236_v52 = vmul.f32 %v7539_v42, %v4088_v54  ;;  %v2628_v21 = vadd.f32 %v7929_v60, %v7928_v23  ;;  %v7954_v23 = vld [vmem:[#allocation40_spill] sm:$0xff] }
 0x264   :  { %4494 = vst [vmem:[%s7785_s4 + $0x148] sm:$0xff] %v4430_v19  ;;  %v4445_v40 = vmax.f32 %v4381_v47, 0.0  ;;  %v4382_v6 = vadd.f32 %v7546_v31, %v4234_v38  ;;  %v7924_v31 = vld [vmem:[#allocation25_spill] sm:$0xff]  ;;  %v2681_v32 = vadd.f32 %v7931_v33, %v7930_v29  ;;  %v2630_v14 = vadd.f32 %v7933_v20, %v7932_v27  ;;  %v7955_v60 = vld [vmem:[#allocation80_spill] sm:$0xff] }
 0x265   :  { %4496 = vst [vmem:[%s7785_s4 + $0x158] sm:$0xff] %v4432_v0  ;;  %v4447_v9 = vmax.f32 %v4383_v4, 0.0  ;;  %v4384_v36 = vadd.f32 %v7553_v63, %v4236_v52  ;;  %v7925_v63 = vld [vmem:[#allocation61_spill] sm:$0xff]  ;;  %v2683_v34 = vadd.f32 %v7935_v46, %v7934_v2  ;;  %v2632_v43 = vadd.f32 %v7937_v39, %v7936_v41 }
 0x266   :  { %4509 = vst [vmem:[%s7785_s4 + $0x1c0] sm:$0xff] %v4445_v40  ;;  %v4446_v5 = vmax.f32 %v4382_v6, 0.0  ;;  %v2626_v44 = vadd.f32 %v7925_v63, %v7924_v31  ;;  %v7653_v58 = vrot.slane %v7486_v45, %v7328_v24  ;;  %v2685_v12 = vadd.f32 %v7939_v37, %v7938_v61  ;;  %v7949_v47 = vld [vmem:[#allocation73_spill] sm:$0xff]  ;;  %v7950_v6 = vld [vmem:[#allocation38_spill] sm:$0xff]  ;;  %v7952_v31 = vld [vmem:[#allocation39_spill] sm:$0xff] }
 0x267   :  { %4511 = vst [vmem:[%s7785_s4 + $0x1d0] sm:$0xff] %v4447_v9  ;;  %v4448_v42 = vmax.f32 %v4384_v36, 0.0  ;;  %v2636_v8 = vadd.f32 %v7941_v25, %v7940_v16  ;;  %v2689_v1 = vadd.f32 %v7943_v50, %v7942_v13  ;;  %v7663_v49 = vrot.slane %v7486_v45, %v7331_v55  ;;  %v7951_v9 = vld [vmem:[#allocation74_spill] sm:$0xff] }
 0x268   :  { %4510 = vst [vmem:[%s7785_s4 + $0x1c8] sm:$0xff] %v4446_v5  ;;  %v2638_v48 = vadd.f32 %v7945_v18, %v7944_v17  ;;  %v7669_v26 = vrot.slane %v7499_v22, %v7328_v24  ;;  %v7673_v11 = vrot.slane %v7486_v45, %v7336_v35  ;;  %v2691_v59 = vadd.f32 %v7947_v30, %v7946_v56  ;;  %v7948_v24 = vld [vmem:[#allocation37_spill] sm:$0xff]  ;;  %v7953_v63 = vld [vmem:[#allocation78_spill] sm:$0xff] }
 0x269   :  { %4512 = vst [vmem:[%s7785_s4 + $0x1d8] sm:$0xff] %v4448_v42  ;;  %v7679_v7 = vrot.slane %v7499_v22, %v7331_v55  ;;  %v7683_v19 = vrot.slane %v7486_v45, %v7345_v28  ;;  %v2640_v38 = vadd.f32 %v7949_v47, %v7948_v24  ;;  %v7690_v52 = vrot.slane %v7499_v22, %v7336_v35 }
 0x26a   :  { %v2693_v55 = vadd.f32 %v7951_v9, %v7950_v6  ;;  %v7697_v45 = vrot.slane %v7499_v22, %v7345_v28 }
 0x275   :  { %v3957_v62 = vpop.f32.mrf.mxu0  ;;  %v4010_v57 = vpop.f32.mrf.mxu1 }
 0x276   :  { %v4041_v53 = vadd.f32 %v3957_v62, %v2626_v44  ;;  %v4043_v15 = vadd.f32 %v4010_v57, %v2679_v3  ;;  %v2642_v44 = vadd.f32 %v7953_v63, %v7952_v31 }
 0x277   :  { %v3959_v54 = vpop.f32.mrf.mxu0  ;;  %v4012_v40 = vpop.f32.mrf.mxu1 }
 0x278   :  { %v4189_v0 = vmul.f32 %v7653_v58, %v4041_v53  ;;  %v4042_v4 = vadd.f32 %v3959_v54, %v2628_v21  ;;  %v4191_v36 = vmul.f32 %v7663_v49, %v4043_v15  ;;  %v4044_v5 = vadd.f32 %v4012_v40, %v2681_v32 }
 0x279   :  { %v3961_v42 = vpop.f32.mrf.mxu0  ;;  %v4014_v3 = vpop.f32.mrf.mxu1  ;;  %v2695_v21 = vadd.f32 %v7955_v60, %v7954_v23 }
 0x27a   :  { %v4337_v10 = vadd.f32 %v7669_v26, %v4189_v0  ;;  %v4190_v35 = vmul.f32 %v7673_v11, %v4042_v4  ;;  %v4057_v51 = vadd.f32 %v3961_v42, %v2630_v14  ;;  %v4339_v29 = vadd.f32 %v7679_v7, %v4191_v36 }
 0x27b   :  { %v4192_v33 = vmul.f32 %v7683_v19, %v4044_v5  ;;  %v4059_v32 = vadd.f32 %v4014_v3, %v2683_v34  ;;  %v3963_v28 = vpop.f32.mrf.mxu0  ;;  %v4016_v46 = vpop.f32.mrf.mxu1 }
 0x27c   :  { %v4401_v22 = vmax.f32 %v4337_v10, 0.0  ;;  %v4338_v27 = vadd.f32 %v7690_v52, %v4190_v35  ;;  %v4205_v20 = vmul.f32 %v7653_v58, %v4057_v51  ;;  %v4058_v2 = vadd.f32 %v3963_v28, %v2632_v43 }
 0x27d   :  { %v4403_v41 = vmax.f32 %v4339_v29, 0.0  ;;  %v4340_v14 = vadd.f32 %v7697_v45, %v4192_v33  ;;  %v4207_v39 = vmul.f32 %v7663_v49, %v4059_v32  ;;  %v4060_v61 = vadd.f32 %v4016_v46, %v2685_v12  ;;  %v3967_v37 = vpop.f32.mrf.mxu0  ;;  %v4020_v50 = vpop.f32.mrf.mxu1 }
 0x27e   :  { %4465 = vst [vmem:[%s7785_s4 + $0x60] sm:$0xff] %v4401_v22  ;;  %v4402_v34 = vmax.f32 %v4338_v27, 0.0  ;;  %v4353_v16 = vadd.f32 %v7669_v26, %v4205_v20  ;;  %v4206_v25 = vmul.f32 %v7673_v11, %v4058_v2  ;;  %v4073_v13 = vadd.f32 %v3967_v37, %v2636_v8 }
 0x27f   :  { %4467 = vst [vmem:[%s7785_s4 + $0x70] sm:$0xff] %v4403_v41  ;;  %v4404_v43 = vmax.f32 %v4340_v14, 0.0  ;;  %v4355_v62 = vadd.f32 %v7679_v7, %v4207_v39  ;;  %v4208_v12 = vmul.f32 %v7683_v19, %v4060_v61  ;;  %v4075_v17 = vadd.f32 %v4020_v50, %v2689_v1  ;;  %v3969_v18 = vpop.f32.mrf.mxu0  ;;  %v4022_v30 = vpop.f32.mrf.mxu1 }
 0x280   :  { %4466 = vst [vmem:[%s7785_s4 + $0x68] sm:$0xff] %v4402_v34  ;;  %v4417_v53 = vmax.f32 %v4353_v16, 0.0  ;;  %v4354_v57 = vadd.f32 %v7690_v52, %v4206_v25  ;;  %v4221_v8 = vmul.f32 %v7653_v58, %v4073_v13  ;;  %v4074_v56 = vadd.f32 %v3969_v18, %v2638_v48 }
 0x281   :  { %4468 = vst [vmem:[%s7785_s4 + $0x78] sm:$0xff] %v4404_v43  ;;  %v4419_v15 = vmax.f32 %v4355_v62, 0.0  ;;  %v4356_v54 = vadd.f32 %v7697_v45, %v4208_v12  ;;  %v4223_v1 = vmul.f32 %v7663_v49, %v4075_v17  ;;  %v4076_v24 = vadd.f32 %v4022_v30, %v2691_v59  ;;  %v3971_v47 = vpop.f32.mrf.mxu0  ;;  %v4024_v6 = vpop.f32.mrf.mxu1 }
 0x282   :  { %4481 = vst [vmem:[%s7785_s4 + $0xe0] sm:$0xff] %v4417_v53  ;;  %v4418_v0 = vmax.f32 %v4354_v57, 0.0  ;;  %v4369_v4 = vadd.f32 %v7669_v26, %v4221_v8  ;;  %v4222_v48 = vmul.f32 %v7673_v11, %v4074_v56  ;;  %v4089_v40 = vadd.f32 %v3971_v47, %v2640_v38 }
 0x283   :  { %4483 = vst [vmem:[%s7785_s4 + $0xf0] sm:$0xff] %v4419_v15  ;;  %v4420_v9 = vmax.f32 %v4356_v54, 0.0  ;;  %v4371_v36 = vadd.f32 %v7679_v7, %v4223_v1  ;;  %v4224_v59 = vmul.f32 %v7683_v19, %v4076_v24  ;;  %v4091_v5 = vadd.f32 %v4024_v6, %v2693_v55  ;;  %v3973_v42 = vpop.f32.mrf.mxu0  ;;  %v4026_v35 = vpop.f32.mrf.mxu1 }
 0x284   :  { %4482 = vst [vmem:[%s7785_s4 + $0xe8] sm:$0xff] %v4418_v0  ;;  %v4433_v31 = vmax.f32 %v4369_v4, 0.0  ;;  %v4370_v63 = vadd.f32 %v7690_v52, %v4222_v48  ;;  %v4237_v38 = vmul.f32 %v7653_v58, %v4089_v40  ;;  %v4090_v10 = vadd.f32 %v3973_v42, %v2642_v44 }
 0x285   :  { %4484 = vst [vmem:[%s7785_s4 + $0xf8] sm:$0xff] %v4420_v9  ;;  %v4435_v51 = vmax.f32 %v4371_v36, 0.0  ;;  %v4372_v3 = vadd.f32 %v7697_v45, %v4224_v59  ;;  %v4239_v55 = vmul.f32 %v7663_v49, %v4091_v5  ;;  %v4092_v23 = vadd.f32 %v4026_v35, %v2695_v21 }
 0x286   :  { %4497 = vst [vmem:[%s7785_s4 + $0x160] sm:$0xff] %v4433_v31  ;;  %v4434_v60 = vmax.f32 %v4370_v63, 0.0  ;;  %v4385_v29 = vadd.f32 %v7669_v26, %v4237_v38  ;;  %v4238_v58 = vmul.f32 %v7673_v11, %v4090_v10 }
 0x287   :  { %4499 = vst [vmem:[%s7785_s4 + $0x170] sm:$0xff] %v4435_v51  ;;  %v4436_v44 = vmax.f32 %v4372_v3, 0.0  ;;  %v4387_v33 = vadd.f32 %v7679_v7, %v4239_v55  ;;  %v4240_v32 = vmul.f32 %v7683_v19, %v4092_v23 }
 0x288   :  { %4498 = vst [vmem:[%s7785_s4 + $0x168] sm:$0xff] %v4434_v60  ;;  %v4449_v49 = vmax.f32 %v4385_v29, 0.0  ;;  %v4386_v21 = vadd.f32 %v7690_v52, %v4238_v58 }
 0x289   :  { %4500 = vst [vmem:[%s7785_s4 + $0x178] sm:$0xff] %v4436_v44  ;;  %v4451_v26 = vmax.f32 %v4387_v33, 0.0  ;;  %v4388_v11 = vadd.f32 %v7697_v45, %v4240_v32 }
 0x28a   :  { %4513 = vst [vmem:[%s7785_s4 + $0x1e0] sm:$0xff] %v4449_v49  ;;  %v4450_v7 = vmax.f32 %v4386_v21, 0.0 }
 0x28b   :  { %4515 = vst [vmem:[%s7785_s4 + $0x1f0] sm:$0xff] %v4451_v26  ;;  %v4452_v19 = vmax.f32 %v4388_v11, 0.0 }
 0x28c   :  { %4514 = vst [vmem:[%s7785_s4 + $0x1e8] sm:$0xff] %v4450_v7 }
 0x28d   :  { %4516 = vst [vmem:[%s7785_s4 + $0x1f8] sm:$0xff] %v4452_v19 }

</bundles_post_ra>
